<compile_context>
chip_gen: v7x
topology: tpu7x:2x2x1
jax: 0.10.0
libtpu: 0.0.40
codegen_flags: <defaults>
</compile_context>

<pallas_src>
import functools

import jax
import jax.numpy as jnp
from jax.experimental import pallas as pl
from jax.experimental.pallas import tpu as pltpu


# (Cin, Cout) per layer and the conv strides, from FeatureExtractor.__init__.
_LAYER_CFG = [(3, 32), (32, 32), (32, 64), (64, 64), (64, 96), (96, 96)]
_STRIDES = (1, 1, 2, 1, 2, 1)


def _round_up(x, m):
    return (x + m - 1) // m * m


def _vmem_capacity_bytes():
    """Per-TensorCore VMEM capacity (generation-aware), with a safe fallback."""
    try:
        return int(pltpu.get_tpu_info().vmem_capacity_bytes)
    except Exception:
        return 64 * 1024 * 1024  # conservative: v7x per-TensorCore VMEM


def _vmem_footprint(th, Wo, Wp, Cin, Cout, s):
    """Hardware-padded VMEM footprint of one grid step.

    Accounts for 128-lane padding of the channel axes, sublane rounding,
    double-buffering of every BlockSpec operand, the stitched scratch strip
    and the large in-kernel temporaries (K-folded patch, bf16 LHS, f32 acc).
    Returns (total_bytes, biggest_single_block_bytes).
    """
    S = s * th
    lane_in = _round_up(Cin, 128)
    lane_k = _round_up(3 * Cin, 128)
    lane_out = _round_up(Cout, 128)
    sub_wp = _round_up(Wp, 8)
    sub_wo = _round_up(Wo, 8)

    in_blk = S * sub_wp * lane_in * 4                 # main-rows input block (f32)
    halo_blk = 2 * sub_wp * lane_in * 4               # 2-row halo block (f32)
    out_blk = th * sub_wo * lane_out * 4              # output block (f32)
    w_blk = 3 * _round_up(3 * Cin, 16) * lane_out * 2  # folded bf16 weights
    scratch = (S + 2) * sub_wp * lane_in * 4          # stitched strip scratch
    cat_tmp = (S + 2) * sub_wo * lane_k * 4           # K-folded patch (f32 value)
    lhs_tmp = _round_up(th * Wo, 16) * lane_k * 2     # bf16 matmul LHS
    acc_tmp = _round_up(th * Wo, 8) * lane_out * 4    # f32 accumulator

    total = (2 * (in_blk + halo_blk + out_blk + w_blk)
             + scratch + cat_tmp + lhs_tmp + acc_tmp)
    return total, max(in_blk, out_blk, scratch)


def _pick_tile_rows(B, Ho, Wo, Wp, Cin, Cout, s, cap):
    """Largest even row tile fitting a generation-aware VMEM budget.

    Returns (th, Ho_pad) with Ho_pad = ceil(Ho/th)*th (output rows beyond Ho
    are computed from zero padding and sliced off in the wrapper).
    """
    budget = int(cap * 0.55)     # leave headroom for Mosaic internals
    per_block = cap // 16        # ~4 MiB on v7x, ~8 MiB on v5e/v6e

    def fits(t):
        total, biggest = _vmem_footprint(t, Wo, Wp, Cin, Cout, s)
        return total <= budget and biggest <= per_block

    th = 2
    for cand in range(2, _round_up(max(Ho, 2), 2) + 1, 2):
        if fits(cand):
            th = cand
        else:
            break

    # Prefer an even divisor of Ho (no padded output rows) unless that would
    # shrink the tile by more than 2x (don't degrade to tiny strips).
    if Ho % th != 0:
        for d in range(th, 1, -2):
            if Ho % d == 0:
                if d >= max(2, th // 2):
                    th = d
                break

    # v7x megacore: keep the parallel grid (B * num_strips) even so both
    # TensorCores get work (irrelevant on single-core v5e/v6e).
    if B % 2 == 1 and (-(-Ho // th)) % 2 == 1:
        for cand in range(th, 1, -2):
            if (-(-Ho // cand)) % 2 == 0:
                th = cand
                break

    return th, _round_up(Ho, th)


def _conv3x3_prelu_kernel(x_ref, halo_ref, w_ref, b_ref, a_ref, o_ref, xs_ref,
                          *, th, Wo, stride, compute_dtype):
    """One (batch, row-strip) tile of Conv2d(3x3, pad=1, stride=s) + PReLU.

    x_ref   : (1, s*th, Wp, Cin)   main padded rows of the strip (VMEM, f32)
    halo_ref: (1, 2, Wp, Cin)      2-row bottom halo (VMEM, f32)
    w_ref   : (3, 3*Cin, Cout)     K-folded taps, row index = kx*Cin + cin
    b_ref   : (1, Cout)            bias (VMEM, f32)
    a_ref   : (1,)                 shared PReLU alpha (SMEM scalar)
    o_ref   : (1, th, Wo, Cout)    output tile (VMEM, f32)
    xs_ref  : (s*th + 2, Wp, Cin)  scratch strip = main rows + halo (VMEM, f32)
    """
    s = stride
    S = s * th
    cin = x_ref.shape[-1]
    cout = w_ref.shape[-1]

    # Stitch main rows + 2-row bottom halo into one contiguous VMEM strip so
    # all taps read from a single ref.
    xs_ref[0:S] = x_ref[0]
    xs_ref[S:S + 2] = halo_ref[0]

    # Build the three kx column views once (strided for stride-2 layers) and
    # K-fold them along the contraction axis: K = 3*Cin instead of Cin.
    if s == 1:
        cols = [xs_ref[:, kx:kx + Wo, :] for kx in range(3)]
    else:
        cols = [xs_ref[:, pl.ds(kx, Wo, s), :] for kx in range(3)]
    cat = jnp.concatenate(cols, axis=-1)              # (S+2, Wo, 3*Cin), f32

    # f32 accumulator seeded with the bias (no separate bias pass).
    acc = jnp.broadcast_to(b_ref[...].astype(jnp.float32), (th * Wo, cout))

    for ky in range(3):
        v = jax.lax.slice(cat, (ky, 0, 0), (ky + S, Wo, 3 * cin))
        if s != 1:
            # Keep rows ky, ky+s, ...: free leading-dim reshape + select.
            v = v.reshape(th, s, Wo, 3 * cin)[:, 0]
        lhs = v.reshape(th * Wo, 3 * cin)
        if compute_dtype is not None:
            lhs = lhs.astype(compute_dtype)           # bf16 MXU inputs
        acc = acc + jnp.dot(lhs, w_ref[ky],
                            preferred_element_type=jnp.float32)

    alpha = a_ref[0]
    y = jnp.where(acc > 0, acc, alpha * acc)          # PReLU (shared alpha)
    # TODO(synk): lane-dense (th, Wo*Cout) store would avoid masked vst for
    # Cout < 128 but needs an in-kernel relayout reshape; measure before use.
    o_ref[0] = y.reshape(th, Wo, cout).astype(o_ref.dtype)


def conv3x3_prelu(x, w, b, alpha, *, stride=1, compute_dtype=jnp.bfloat16):
    """Fused Conv2d(3x3, padding=1, stride) + PReLU (single shared alpha).

    x: (B, H, W, Cin) f32 NHWC; w: (3, 3, Cin, Cout) HWIO f32; b: (1, Cout);
    alpha: (1,).  compute_dtype=None uses pure-f32 MXU inputs (reference
    numerics); the default bf16 path keeps an f32 accumulator.
    """
    B, H, W, Cin = x.shape
    Cout = w.shape[-1]
    s = stride
    Ho = (H - 1) // s + 1
    Wo = (W - 1) // s + 1
    Wp = s * Wo + 2

    cap = _vmem_capacity_bytes()
    th, Ho_pad = _pick_tile_rows(B, Ho, Wo, Wp, Cin, Cout, s, cap)
    nH = Ho_pad // th
    S = s * th
    assert S % 2 == 0, (S, th, s)
    Hp = s * Ho_pad + 2

    # 1-pixel zero halo + bottom/right padding up to the strip grid.
    # TODO(synk): drop this extra HBM pass (zero-fill scratch borders in-kernel
    # with clamped row index_maps); biggest remaining win on HBM-bound v5e.
    xp = jnp.pad(x, ((0, 0), (1, Hp - 1 - H), (1, Wp - 1 - W), (0, 0)))

    # K-folded weights: row index = kx*Cin + cin; bf16 for full MXU throughput.
    w3 = w.reshape(3, 3 * Cin, Cout)
    if compute_dtype is not None:
        w3 = w3.astype(compute_dtype)

    kern = functools.partial(_conv3x3_prelu_kernel, th=th, Wo=Wo, stride=s,
                             compute_dtype=compute_dtype)

    flops = 2 * B * Ho * Wo * 9 * Cin * Cout
    bytes_accessed = (4 * xp.size + w3.size * w3.dtype.itemsize
                      + 4 * b.size + 4 * B * Ho_pad * Wo * Cout)

    out = pl.pallas_call(
        kern,
        out_shape=jax.ShapeDtypeStruct((B, Ho_pad, Wo, Cout), jnp.float32),
        grid=(B, nH),
        in_specs=[
            # Main rows of the strip.
            pl.BlockSpec((1, S, Wp, Cin), lambda bb, i: (bb, i, 0, 0)),
            # 2-row bottom halo in a single block (S is kept even).
            pl.BlockSpec((1, 2, Wp, Cin),
                         lambda bb, i: (bb, (i + 1) * (S // 2), 0, 0)),
            pl.BlockSpec((3, 3 * Cin, Cout), lambda bb, i: (0, 0, 0)),
            pl.BlockSpec((1, Cout), lambda bb, i: (0, 0)),
            pl.BlockSpec(memory_space=pltpu.MemorySpace.SMEM),
        ],
        out_specs=pl.BlockSpec((1, th, Wo, Cout), lambda bb, i: (bb, i, 0, 0)),
        scratch_shapes=[pltpu.VMEM((S + 2, Wp, Cin), jnp.float32)],
        compiler_params=pltpu.CompilerParams(
            dimension_semantics=("parallel", "parallel"),
            vmem_limit_bytes=int(cap * 0.75),
        ),
        cost_estimate=pl.CostEstimate(flops=flops, transcendentals=0,
                                      bytes_accessed=bytes_accessed),
    )(xp, xp, w3, b, alpha)

    if Ho_pad != Ho:
        out = out[:, :Ho]
    return out


@jax.jit
def feature_extractor(x_nchw, params):
    """Reproduces FeatureExtractor.forward; returns (x1, x2, x3) in NCHW."""
    x = jnp.transpose(x_nchw, (0, 2, 3, 1))                  # NCHW -> NHWC
    # TODO(synk): fuse adjacent stride-1 pairs (conv1+conv2, conv3+conv4) into
    # one pallas_call to save an activation round-trip through HBM.
    x = conv3x3_prelu(x, *params[0], stride=_STRIDES[0])     # conv1 + prelu1
    x1 = conv3x3_prelu(x, *params[1], stride=_STRIDES[1])    # conv2 + prelu2
    x = conv3x3_prelu(x1, *params[2], stride=_STRIDES[2])    # conv3(s2)+prelu3
    x2 = conv3x3_prelu(x, *params[3], stride=_STRIDES[3])    # conv4 + prelu4
    x = conv3x3_prelu(x2, *params[4], stride=_STRIDES[4])    # conv5(s2)+prelu5
    x3 = conv3x3_prelu(x, *params[5], stride=_STRIDES[5])    # conv6 + prelu6
    to_nchw = lambda t: jnp.transpose(t, (0, 3, 1, 2))
    return to_nchw(x1), to_nchw(x2), to_nchw(x3)


def _init_params(key):
    """Deterministic synthetic params matching nn.Conv2d/nn.PReLU shapes."""
    keys = jax.random.split(key, 2 * len(_LAYER_CFG))
    params = []
    for i, (cin, cout) in enumerate(_LAYER_CFG):
        scale = (9 * cin) ** -0.5
        w = jax.random.uniform(keys[2 * i], (3, 3, cin, cout),
                               jnp.float32, -scale, scale)       # HWIO
        b = jax.random.uniform(keys[2 * i + 1], (1, cout),
                               jnp.float32, -scale, scale)
        alpha = jnp.full((1,), 0.25, jnp.float32)  # nn.PReLU() default
        params.append((w, b, alpha))
    return params


def _reference_layer_nhwc(x, w, b, alpha, stride):
    """Pure-XLA reference for one conv3x3+PReLU layer (NHWC, HWIO weights)."""
    cout = w.shape[-1]
    y = jax.lax.conv_general_dilated(
        x, w, window_strides=(stride, stride), padding=((1, 1), (1, 1)),
        dimension_numbers=("NHWC", "HWIO", "NHWC"),
        precision=jax.lax.Precision.HIGHEST)
    y = y + b.reshape(1, 1, 1, cout)
    return jnp.where(y > 0, y, alpha[0] * y)


if __name__ == "__main__":
    root = jax.random.PRNGKey(0)
    k_x, k_p = jax.random.split(root)

    # Small NCHW input consistent with the module (3 input channels).
    x_nchw = jax.random.normal(k_x, (2, 3, 16, 16), jnp.float32)
    params = _init_params(k_p)

    x1, x2, x3 = feature_extractor(x_nchw, params)
    jax.block_until_ready((x1, x2, x3))

    assert x1.shape == (2, 32, 16, 16), x1.shape
    assert x2.shape == (2, 64, 8, 8), x2.shape
    assert x3.shape == (2, 96, 4, 4), x3.shape
    assert x1.dtype == x2.dtype == x3.dtype == jnp.float32

    # Layer-local numerical checks against an XLA conv reference (no
    # cross-layer error compounding; covers stride-1 and stride-2 paths).
    x_in = jnp.transpose(x_nchw, (0, 2, 3, 1))  # NHWC
    for li, (w, b, alpha) in enumerate(params):
        s = _STRIDES[li]
        ref = _reference_layer_nhwc(x_in, w, b, alpha, s)
        scale = float(jnp.max(jnp.abs(ref)))

        # Default bf16-MXU path (f32 accumulation): loose tolerance.
        got = conv3x3_prelu(x_in, w, b, alpha, stride=s)
        err = float(jnp.max(jnp.abs(got - ref)))
        assert err <= 0.03 * scale + 1e-2, ("bf16", li, err, scale)

        # Pure-f32 path (reference numerics) on the layers covering both
        # strides and the tiny-Cin case: tight tolerance.
        if li in (0, 2):
            got32 = conv3x3_prelu(x_in, w, b, alpha, stride=s,
                                  compute_dtype=None)
            err32 = float(jnp.max(jnp.abs(got32 - ref)))
            assert err32 <= 2e-3 * scale + 1e-5, ("f32", li, err32, scale)

        x_in = ref  # feed reference activations into the next layer's check

    print("KERNEL_OK")
</pallas_src>

<mosaic_0001>
module attributes {stable_mosaic.version = 11 : i64} {
  func.func @_conv3x3_prelu_kernel(%arg0: i32, %arg1: i32, %arg2: memref<1x16x18x3xf32, #tpu.memory_space<vmem>>, %arg3: memref<1x2x18x3xf32, #tpu.memory_space<vmem>>, %arg4: memref<3x9x32xbf16, #tpu.memory_space<vmem>>, %arg5: memref<1x32xf32, #tpu.memory_space<vmem>>, %arg6: memref<1xf32, #tpu.memory_space<smem>>, %arg7: memref<1x16x16x32xf32, #tpu.memory_space<vmem>>, %arg8: memref<18x18x3xf32, #tpu.memory_space<vmem>>) attributes {dimension_semantics = [#tpu.dimension_semantics<parallel>, #tpu.dimension_semantics<parallel>], iteration_bounds = array<i64: 2, 1>, scalar_prefetch = 0 : i64, scratch_operands = 1 : i64, tpu.core_type = #tpu.core_type<tc>, window_params = [{transform_indices = @transform_0, window_bounds = array<i64: 1, 16, 18, 3>}, {transform_indices = @transform_1, window_bounds = array<i64: 1, 2, 18, 3>}, {pipeline_mode = #tpu.pipeline_mode<synchronous>, transform_indices = @transform_2, window_bounds = array<i64: 3, 9, 32>}, {pipeline_mode = #tpu.pipeline_mode<synchronous>, transform_indices = @transform_3, window_bounds = array<i64: 1, 32>}, {transform_indices = @transform_4, window_bounds = array<i64: 1>}, {transform_indices = @transform_5, window_bounds = array<i64: 1, 16, 16, 32>}]} {
    %c0 = arith.constant 0 : index
    %c0_0 = arith.constant 0 : index
    %c0_1 = arith.constant 0 : index
    %c0_2 = arith.constant 0 : index
    %0 = vector.load %arg2[%c0, %c0_0, %c0_1, %c0_2] : memref<1x16x18x3xf32, #tpu.memory_space<vmem>>, vector<1x16x18x3xf32>
    %1 = vector.shape_cast %0 : vector<1x16x18x3xf32> to vector<16x18x3xf32>
    %c0_3 = arith.constant 0 : index
    %c0_4 = arith.constant 0 : index
    %c0_5 = arith.constant 0 : index
    %2 = vector.load %arg8[%c0_3, %c0_4, %c0_5] : memref<18x18x3xf32, #tpu.memory_space<vmem>>, vector<16x18x3xf32>
    tpu.vector_store %arg8[%c0_3, %c0_4, %c0_5], %1 {strides = array<i32>} : memref<18x18x3xf32, #tpu.memory_space<vmem>>, vector<16x18x3xf32>,
    %c0_6 = arith.constant 0 : index
    %c0_7 = arith.constant 0 : index
    %c0_8 = arith.constant 0 : index
    %c0_9 = arith.constant 0 : index
    %3 = vector.load %arg3[%c0_6, %c0_7, %c0_8, %c0_9] : memref<1x2x18x3xf32, #tpu.memory_space<vmem>>, vector<1x2x18x3xf32>
    %4 = vector.shape_cast %3 : vector<1x2x18x3xf32> to vector<2x18x3xf32>
    %c16 = arith.constant 16 : index
    %c0_10 = arith.constant 0 : index
    %c0_11 = arith.constant 0 : index
    %5 = vector.load %arg8[%c16, %c0_10, %c0_11] : memref<18x18x3xf32, #tpu.memory_space<vmem>>, vector<2x18x3xf32>
    tpu.vector_store %arg8[%c16, %c0_10, %c0_11], %4 {strides = array<i32>} : memref<18x18x3xf32, #tpu.memory_space<vmem>>, vector<2x18x3xf32>,
    %c0_12 = arith.constant 0 : index
    %c0_13 = arith.constant 0 : index
    %c0_14 = arith.constant 0 : index
    %6 = vector.load %arg8[%c0_12, %c0_13, %c0_14] : memref<18x18x3xf32, #tpu.memory_space<vmem>>, vector<18x16x3xf32>
    %c0_15 = arith.constant 0 : index
    %c1 = arith.constant 1 : index
    %c0_16 = arith.constant 0 : index
    %7 = vector.load %arg8[%c0_15, %c1, %c0_16] : memref<18x18x3xf32, #tpu.memory_space<vmem>>, vector<18x16x3xf32>
    %c0_17 = arith.constant 0 : index
    %c2 = arith.constant 2 : index
    %c0_18 = arith.constant 0 : index
    %8 = vector.load %arg8[%c0_17, %c2, %c0_18] : memref<18x18x3xf32, #tpu.memory_space<vmem>>, vector<18x16x3xf32>
    %9 = tpu.concatenate %6, %7, %8 in 2 : vector<18x16x3xf32>, vector<18x16x3xf32>, vector<18x16x3xf32> -> vector<18x16x9xf32>
    %c0_19 = arith.constant 0 : index
    %c0_20 = arith.constant 0 : index
    %10 = vector.load %arg5[%c0_19, %c0_20] : memref<1x32xf32, #tpu.memory_space<vmem>>, vector<1x32xf32>
    %11 = vector.shape_cast %10 : vector<1x32xf32> to vector<1x32xf32>
    %12 = vector.broadcast %11 : vector<1x32xf32> to vector<256x32xf32>
    %13 = vector.extract_strided_slice %9 {offsets = [0, 0, 0], sizes = [16, 16, 9], strides = [1, 1, 1]} : vector<18x16x9xf32> to vector<16x16x9xf32>
    %14 = vector.shape_cast %13 : vector<16x16x9xf32> to vector<256x9xf32>
    %15 = arith.truncf %14 : vector<256x9xf32> to vector<256x9xbf16>
    %c0_21 = arith.constant 0 : index
    %c0_22 = arith.constant 0 : index
    %c0_23 = arith.constant 0 : index
    %16 = vector.load %arg4[%c0_21, %c0_22, %c0_23] : memref<3x9x32xbf16, #tpu.memory_space<vmem>>, vector<1x9x32xbf16>
    %17 = vector.shape_cast %16 : vector<1x9x32xbf16> to vector<9x32xbf16>
    %cst = arith.constant dense<0.000000e+00> : vector<256x32xf32>
    %18 = tpu.matmul %15, %17, %cst {dimension_numbers = #tpu.dot_dimension_numbers<[1], [0], [0], [1], [0, 0, 1, 1], [], []>} : vector<256x9xbf16>, vector<9x32xbf16>, vector<256x32xf32> -> vector<256x32xf32>
    %19 = arith.addf %12, %18 : vector<256x32xf32>
    %20 = vector.extract_strided_slice %9 {offsets = [1, 0, 0], sizes = [16, 16, 9], strides = [1, 1, 1]} : vector<18x16x9xf32> to vector<16x16x9xf32>
    %21 = vector.shape_cast %20 : vector<16x16x9xf32> to vector<256x9xf32>
    %22 = arith.truncf %21 : vector<256x9xf32> to vector<256x9xbf16>
    %c1_24 = arith.constant 1 : index
    %c0_25 = arith.constant 0 : index
    %c0_26 = arith.constant 0 : index
    %23 = vector.load %arg4[%c1_24, %c0_25, %c0_26] : memref<3x9x32xbf16, #tpu.memory_space<vmem>>, vector<1x9x32xbf16>
    %24 = vector.shape_cast %23 : vector<1x9x32xbf16> to vector<9x32xbf16>
    %cst_27 = arith.constant dense<0.000000e+00> : vector<256x32xf32>
    %25 = tpu.matmul %22, %24, %cst_27 {dimension_numbers = #tpu.dot_dimension_numbers<[1], [0], [0], [1], [0, 0, 1, 1], [], []>} : vector<256x9xbf16>, vector<9x32xbf16>, vector<256x32xf32> -> vector<256x32xf32>
    %26 = arith.addf %19, %25 : vector<256x32xf32>
    %27 = vector.extract_strided_slice %9 {offsets = [2, 0, 0], sizes = [16, 16, 9], strides = [1, 1, 1]} : vector<18x16x9xf32> to vector<16x16x9xf32>
    %28 = vector.shape_cast %27 : vector<16x16x9xf32> to vector<256x9xf32>
    %29 = arith.truncf %28 : vector<256x9xf32> to vector<256x9xbf16>
    %c2_28 = arith.constant 2 : index
    %c0_29 = arith.constant 0 : index
    %c0_30 = arith.constant 0 : index
    %30 = vector.load %arg4[%c2_28, %c0_29, %c0_30] : memref<3x9x32xbf16, #tpu.memory_space<vmem>>, vector<1x9x32xbf16>
    %31 = vector.shape_cast %30 : vector<1x9x32xbf16> to vector<9x32xbf16>
    %cst_31 = arith.constant dense<0.000000e+00> : vector<256x32xf32>
    %32 = tpu.matmul %29, %31, %cst_31 {dimension_numbers = #tpu.dot_dimension_numbers<[1], [0], [0], [1], [0, 0, 1, 1], [], []>} : vector<256x9xbf16>, vector<9x32xbf16>, vector<256x32xf32> -> vector<256x32xf32>
    %33 = arith.addf %26, %32 : vector<256x32xf32>
    %c0_32 = arith.constant 0 : index
    %34 = memref.load %arg6[%c0_32] : memref<1xf32, #tpu.memory_space<smem>>
    %cst_33 = arith.constant 0.000000e+00 : f32
    %35 = vector.broadcast %cst_33 : f32 to vector<256x32xf32>
    %36 = arith.cmpf ogt, %33, %35 : vector<256x32xf32>
    %37 = vector.broadcast %34 : f32 to vector<256x32xf32>
    %38 = arith.mulf %37, %33 : vector<256x32xf32>
    %39 = arith.select %36, %33, %38 : vector<256x32xi1>, vector<256x32xf32>
    %40 = vector.shape_cast %39 : vector<256x32xf32> to vector<16x16x32xf32>
    %c0_34 = arith.constant 0 : index
    %c0_35 = arith.constant 0 : index
    %c0_36 = arith.constant 0 : index
    %c0_37 = arith.constant 0 : index
    %41 = vector.load %arg7[%c0_34, %c0_35, %c0_36, %c0_37] : memref<1x16x16x32xf32, #tpu.memory_space<vmem>>, vector<1x16x16x32xf32>
    %42 = vector.shape_cast %41 : vector<1x16x16x32xf32> to vector<16x16x32xf32>
    %43 = vector.shape_cast %40 : vector<16x16x32xf32> to vector<1x16x16x32xf32>
    tpu.vector_store %arg7[%c0_34, %c0_35, %c0_36, %c0_37], %43 {strides = array<i32>} : memref<1x16x16x32xf32, #tpu.memory_space<vmem>>, vector<1x16x16x32xf32>,
    return
  }
  func.func @transform_0(%arg0: i32, %arg1: i32) -> (i32, i32, i32, i32) {
    %c0_i32 = arith.constant 0 : i32
    %c0_i32_0 = arith.constant 0 : i32
    %c0_i32_1 = arith.constant 0 : i32
    return %arg0, %arg1, %c0_i32, %c0_i32_0 : i32, i32, i32, i32
  }
  func.func @transform_1(%arg0: i32, %arg1: i32) -> (i32, i32, i32, i32) {
    %c1_i32 = arith.constant 1 : i32
    %0 = arith.addi %arg1, %c1_i32 : i32
    %c8_i32 = arith.constant 8 : i32
    %1 = arith.muli %0, %c8_i32 : i32
    %c0_i32 = arith.constant 0 : i32
    %c0_i32_0 = arith.constant 0 : i32
    %c0_i32_1 = arith.constant 0 : i32
    return %arg0, %1, %c0_i32, %c0_i32_0 : i32, i32, i32, i32
  }
  func.func @transform_2(%arg0: i32, %arg1: i32) -> (i32, i32, i32) {
    %c0_i32 = arith.constant 0 : i32
    %c0_i32_0 = arith.constant 0 : i32
    %c0_i32_1 = arith.constant 0 : i32
    %c0_i32_2 = arith.constant 0 : i32
    return %c0_i32, %c0_i32_0, %c0_i32_1 : i32, i32, i32
  }
  func.func @transform_3(%arg0: i32, %arg1: i32) -> (i32, i32) {
    %c0_i32 = arith.constant 0 : i32
    %c0_i32_0 = arith.constant 0 : i32
    %c0_i32_1 = arith.constant 0 : i32
    return %c0_i32, %c0_i32_0 : i32, i32
  }
  func.func @transform_4(%arg0: i32, %arg1: i32) -> i32 {
    %c0_i32 = arith.constant 0 : i32
    %c0_i32_0 = arith.constant 0 : i32
    return %c0_i32 : i32
  }
  func.func @transform_5(%arg0: i32, %arg1: i32) -> (i32, i32, i32, i32) {
    %c0_i32 = arith.constant 0 : i32
    %c0_i32_0 = arith.constant 0 : i32
    %c0_i32_1 = arith.constant 0 : i32
    return %arg0, %arg1, %c0_i32, %c0_i32_0 : i32, i32, i32, i32
  }
}

module attributes {stable_mosaic.version = 11 : i64} {
  func.func @_conv3x3_prelu_kernel(%arg0: i32, %arg1: i32, %arg2: memref<1x16x18x32xf32, #tpu.memory_space<vmem>>, %arg3: memref<1x2x18x32xf32, #tpu.memory_space<vmem>>, %arg4: memref<3x96x32xbf16, #tpu.memory_space<vmem>>, %arg5: memref<1x32xf32, #tpu.memory_space<vmem>>, %arg6: memref<1xf32, #tpu.memory_space<smem>>, %arg7: memref<1x16x16x32xf32, #tpu.memory_space<vmem>>, %arg8: memref<18x18x32xf32, #tpu.memory_space<vmem>>) attributes {dimension_semantics = [#tpu.dimension_semantics<parallel>, #tpu.dimension_semantics<parallel>], iteration_bounds = array<i64: 2, 1>, scalar_prefetch = 0 : i64, scratch_operands = 1 : i64, tpu.core_type = #tpu.core_type<tc>, window_params = [{transform_indices = @transform_0, window_bounds = array<i64: 1, 16, 18, 32>}, {transform_indices = @transform_1, window_bounds = array<i64: 1, 2, 18, 32>}, {pipeline_mode = #tpu.pipeline_mode<synchronous>, transform_indices = @transform_2, window_bounds = array<i64: 3, 96, 32>}, {pipeline_mode = #tpu.pipeline_mode<synchronous>, transform_indices = @transform_3, window_bounds = array<i64: 1, 32>}, {transform_indices = @transform_4, window_bounds = array<i64: 1>}, {transform_indices = @transform_5, window_bounds = array<i64: 1, 16, 16, 32>}]} {
    %c0 = arith.constant 0 : index
    %c0_0 = arith.constant 0 : index
    %c0_1 = arith.constant 0 : index
    %c0_2 = arith.constant 0 : index
    %0 = vector.load %arg2[%c0, %c0_0, %c0_1, %c0_2] : memref<1x16x18x32xf32, #tpu.memory_space<vmem>>, vector<1x16x18x32xf32>
    %1 = vector.shape_cast %0 : vector<1x16x18x32xf32> to vector<16x18x32xf32>
    %c0_3 = arith.constant 0 : index
    %c0_4 = arith.constant 0 : index
    %c0_5 = arith.constant 0 : index
    %2 = vector.load %arg8[%c0_3, %c0_4, %c0_5] : memref<18x18x32xf32, #tpu.memory_space<vmem>>, vector<16x18x32xf32>
    tpu.vector_store %arg8[%c0_3, %c0_4, %c0_5], %1 {strides = array<i32>} : memref<18x18x32xf32, #tpu.memory_space<vmem>>, vector<16x18x32xf32>,
    %c0_6 = arith.constant 0 : index
    %c0_7 = arith.constant 0 : index
    %c0_8 = arith.constant 0 : index
    %c0_9 = arith.constant 0 : index
    %3 = vector.load %arg3[%c0_6, %c0_7, %c0_8, %c0_9] : memref<1x2x18x32xf32, #tpu.memory_space<vmem>>, vector<1x2x18x32xf32>
    %4 = vector.shape_cast %3 : vector<1x2x18x32xf32> to vector<2x18x32xf32>
    %c16 = arith.constant 16 : index
    %c0_10 = arith.constant 0 : index
    %c0_11 = arith.constant 0 : index
    %5 = vector.load %arg8[%c16, %c0_10, %c0_11] : memref<18x18x32xf32, #tpu.memory_space<vmem>>, vector<2x18x32xf32>
    tpu.vector_store %arg8[%c16, %c0_10, %c0_11], %4 {strides = array<i32>} : memref<18x18x32xf32, #tpu.memory_space<vmem>>, vector<2x18x32xf32>,
    %c0_12 = arith.constant 0 : index
    %c0_13 = arith.constant 0 : index
    %c0_14 = arith.constant 0 : index
    %6 = vector.load %arg8[%c0_12, %c0_13, %c0_14] : memref<18x18x32xf32, #tpu.memory_space<vmem>>, vector<18x16x32xf32>
    %c0_15 = arith.constant 0 : index
    %c1 = arith.constant 1 : index
    %c0_16 = arith.constant 0 : index
    %7 = vector.load %arg8[%c0_15, %c1, %c0_16] : memref<18x18x32xf32, #tpu.memory_space<vmem>>, vector<18x16x32xf32>
    %c0_17 = arith.constant 0 : index
    %c2 = arith.constant 2 : index
    %c0_18 = arith.constant 0 : index
    %8 = vector.load %arg8[%c0_17, %c2, %c0_18] : memref<18x18x32xf32, #tpu.memory_space<vmem>>, vector<18x16x32xf32>
    %9 = tpu.concatenate %6, %7, %8 in 2 : vector<18x16x32xf32>, vector<18x16x32xf32>, vector<18x16x32xf32> -> vector<18x16x96xf32>
    %c0_19 = arith.constant 0 : index
    %c0_20 = arith.constant 0 : index
    %10 = vector.load %arg5[%c0_19, %c0_20] : memref<1x32xf32, #tpu.memory_space<vmem>>, vector<1x32xf32>
    %11 = vector.shape_cast %10 : vector<1x32xf32> to vector<1x32xf32>
    %12 = vector.broadcast %11 : vector<1x32xf32> to vector<256x32xf32>
    %13 = vector.extract_strided_slice %9 {offsets = [0, 0, 0], sizes = [16, 16, 96], strides = [1, 1, 1]} : vector<18x16x96xf32> to vector<16x16x96xf32>
    %14 = vector.shape_cast %13 : vector<16x16x96xf32> to vector<256x96xf32>
    %15 = arith.truncf %14 : vector<256x96xf32> to vector<256x96xbf16>
    %c0_21 = arith.constant 0 : index
    %c0_22 = arith.constant 0 : index
    %c0_23 = arith.constant 0 : index
    %16 = vector.load %arg4[%c0_21, %c0_22, %c0_23] : memref<3x96x32xbf16, #tpu.memory_space<vmem>>, vector<1x96x32xbf16>
    %17 = vector.shape_cast %16 : vector<1x96x32xbf16> to vector<96x32xbf16>
    %cst = arith.constant dense<0.000000e+00> : vector<256x32xf32>
    %18 = tpu.matmul %15, %17, %cst {dimension_numbers = #tpu.dot_dimension_numbers<[1], [0], [0], [1], [0, 0, 1, 1], [], []>} : vector<256x96xbf16>, vector<96x32xbf16>, vector<256x32xf32> -> vector<256x32xf32>
    %19 = arith.addf %12, %18 : vector<256x32xf32>
    %20 = vector.extract_strided_slice %9 {offsets = [1, 0, 0], sizes = [16, 16, 96], strides = [1, 1, 1]} : vector<18x16x96xf32> to vector<16x16x96xf32>
    %21 = vector.shape_cast %20 : vector<16x16x96xf32> to vector<256x96xf32>
    %22 = arith.truncf %21 : vector<256x96xf32> to vector<256x96xbf16>
    %c1_24 = arith.constant 1 : index
    %c0_25 = arith.constant 0 : index
    %c0_26 = arith.constant 0 : index
    %23 = vector.load %arg4[%c1_24, %c0_25, %c0_26] : memref<3x96x32xbf16, #tpu.memory_space<vmem>>, vector<1x96x32xbf16>
    %24 = vector.shape_cast %23 : vector<1x96x32xbf16> to vector<96x32xbf16>
    %cst_27 = arith.constant dense<0.000000e+00> : vector<256x32xf32>
    %25 = tpu.matmul %22, %24, %cst_27 {dimension_numbers = #tpu.dot_dimension_numbers<[1], [0], [0], [1], [0, 0, 1, 1], [], []>} : vector<256x96xbf16>, vector<96x32xbf16>, vector<256x32xf32> -> vector<256x32xf32>
    %26 = arith.addf %19, %25 : vector<256x32xf32>
    %27 = vector.extract_strided_slice %9 {offsets = [2, 0, 0], sizes = [16, 16, 96], strides = [1, 1, 1]} : vector<18x16x96xf32> to vector<16x16x96xf32>
    %28 = vector.shape_cast %27 : vector<16x16x96xf32> to vector<256x96xf32>
    %29 = arith.truncf %28 : vector<256x96xf32> to vector<256x96xbf16>
    %c2_28 = arith.constant 2 : index
    %c0_29 = arith.constant 0 : index
    %c0_30 = arith.constant 0 : index
    %30 = vector.load %arg4[%c2_28, %c0_29, %c0_30] : memref<3x96x32xbf16, #tpu.memory_space<vmem>>, vector<1x96x32xbf16>
    %31 = vector.shape_cast %30 : vector<1x96x32xbf16> to vector<96x32xbf16>
    %cst_31 = arith.constant dense<0.000000e+00> : vector<256x32xf32>
    %32 = tpu.matmul %29, %31, %cst_31 {dimension_numbers = #tpu.dot_dimension_numbers<[1], [0], [0], [1], [0, 0, 1, 1], [], []>} : vector<256x96xbf16>, vector<96x32xbf16>, vector<256x32xf32> -> vector<256x32xf32>
    %33 = arith.addf %26, %32 : vector<256x32xf32>
    %c0_32 = arith.constant 0 : index
    %34 = memref.load %arg6[%c0_32] : memref<1xf32, #tpu.memory_space<smem>>
    %cst_33 = arith.constant 0.000000e+00 : f32
    %35 = vector.broadcast %cst_33 : f32 to vector<256x32xf32>
    %36 = arith.cmpf ogt, %33, %35 : vector<256x32xf32>
    %37 = vector.broadcast %34 : f32 to vector<256x32xf32>
    %38 = arith.mulf %37, %33 : vector<256x32xf32>
    %39 = arith.select %36, %33, %38 : vector<256x32xi1>, vector<256x32xf32>
    %40 = vector.shape_cast %39 : vector<256x32xf32> to vector<16x16x32xf32>
    %c0_34 = arith.constant 0 : index
    %c0_35 = arith.constant 0 : index
    %c0_36 = arith.constant 0 : index
    %c0_37 = arith.constant 0 : index
    %41 = vector.load %arg7[%c0_34, %c0_35, %c0_36, %c0_37] : memref<1x16x16x32xf32, #tpu.memory_space<vmem>>, vector<1x16x16x32xf32>
    %42 = vector.shape_cast %41 : vector<1x16x16x32xf32> to vector<16x16x32xf32>
    %43 = vector.shape_cast %40 : vector<16x16x32xf32> to vector<1x16x16x32xf32>
    tpu.vector_store %arg7[%c0_34, %c0_35, %c0_36, %c0_37], %43 {strides = array<i32>} : memref<1x16x16x32xf32, #tpu.memory_space<vmem>>, vector<1x16x16x32xf32>,
    return
  }
  func.func @transform_0(%arg0: i32, %arg1: i32) -> (i32, i32, i32, i32) {
    %c0_i32 = arith.constant 0 : i32
    %c0_i32_0 = arith.constant 0 : i32
    %c0_i32_1 = arith.constant 0 : i32
    return %arg0, %arg1, %c0_i32, %c0_i32_0 : i32, i32, i32, i32
  }
  func.func @transform_1(%arg0: i32, %arg1: i32) -> (i32, i32, i32, i32) {
    %c1_i32 = arith.constant 1 : i32
    %0 = arith.addi %arg1, %c1_i32 : i32
    %c8_i32 = arith.constant 8 : i32
    %1 = arith.muli %0, %c8_i32 : i32
    %c0_i32 = arith.constant 0 : i32
    %c0_i32_0 = arith.constant 0 : i32
    %c0_i32_1 = arith.constant 0 : i32
    return %arg0, %1, %c0_i32, %c0_i32_0 : i32, i32, i32, i32
  }
  func.func @transform_2(%arg0: i32, %arg1: i32) -> (i32, i32, i32) {
    %c0_i32 = arith.constant 0 : i32
    %c0_i32_0 = arith.constant 0 : i32
    %c0_i32_1 = arith.constant 0 : i32
    %c0_i32_2 = arith.constant 0 : i32
    return %c0_i32, %c0_i32_0, %c0_i32_1 : i32, i32, i32
  }
  func.func @transform_3(%arg0: i32, %arg1: i32) -> (i32, i32) {
    %c0_i32 = arith.constant 0 : i32
    %c0_i32_0 = arith.constant 0 : i32
    %c0_i32_1 = arith.constant 0 : i32
    return %c0_i32, %c0_i32_0 : i32, i32
  }
  func.func @transform_4(%arg0: i32, %arg1: i32) -> i32 {
    %c0_i32 = arith.constant 0 : i32
    %c0_i32_0 = arith.constant 0 : i32
    return %c0_i32 : i32
  }
  func.func @transform_5(%arg0: i32, %arg1: i32) -> (i32, i32, i32, i32) {
    %c0_i32 = arith.constant 0 : i32
    %c0_i32_0 = arith.constant 0 : i32
    %c0_i32_1 = arith.constant 0 : i32
    return %arg0, %arg1, %c0_i32, %c0_i32_0 : i32, i32, i32, i32
  }
}

module attributes {stable_mosaic.version = 11 : i64} {
  func.func @_conv3x3_prelu_kernel(%arg0: i32, %arg1: i32, %arg2: memref<1x16x18x32xf32, #tpu.memory_space<vmem>>, %arg3: memref<1x2x18x32xf32, #tpu.memory_space<vmem>>, %arg4: memref<3x96x64xbf16, #tpu.memory_space<vmem>>, %arg5: memref<1x64xf32, #tpu.memory_space<vmem>>, %arg6: memref<1xf32, #tpu.memory_space<smem>>, %arg7: memref<1x8x8x64xf32, #tpu.memory_space<vmem>>, %arg8: memref<18x18x32xf32, #tpu.memory_space<vmem>>) attributes {dimension_semantics = [#tpu.dimension_semantics<parallel>, #tpu.dimension_semantics<parallel>], iteration_bounds = array<i64: 2, 1>, scalar_prefetch = 0 : i64, scratch_operands = 1 : i64, tpu.core_type = #tpu.core_type<tc>, window_params = [{transform_indices = @transform_0, window_bounds = array<i64: 1, 16, 18, 32>}, {transform_indices = @transform_1, window_bounds = array<i64: 1, 2, 18, 32>}, {pipeline_mode = #tpu.pipeline_mode<synchronous>, transform_indices = @transform_2, window_bounds = array<i64: 3, 96, 64>}, {pipeline_mode = #tpu.pipeline_mode<synchronous>, transform_indices = @transform_3, window_bounds = array<i64: 1, 64>}, {transform_indices = @transform_4, window_bounds = array<i64: 1>}, {transform_indices = @transform_5, window_bounds = array<i64: 1, 8, 8, 64>}]} {
    %c0 = arith.constant 0 : index
    %c0_0 = arith.constant 0 : index
    %c0_1 = arith.constant 0 : index
    %c0_2 = arith.constant 0 : index
    %0 = vector.load %arg2[%c0, %c0_0, %c0_1, %c0_2] : memref<1x16x18x32xf32, #tpu.memory_space<vmem>>, vector<1x16x18x32xf32>
    %1 = vector.shape_cast %0 : vector<1x16x18x32xf32> to vector<16x18x32xf32>
    %c0_3 = arith.constant 0 : index
    %c0_4 = arith.constant 0 : index
    %c0_5 = arith.constant 0 : index
    %2 = vector.load %arg8[%c0_3, %c0_4, %c0_5] : memref<18x18x32xf32, #tpu.memory_space<vmem>>, vector<16x18x32xf32>
    tpu.vector_store %arg8[%c0_3, %c0_4, %c0_5], %1 {strides = array<i32>} : memref<18x18x32xf32, #tpu.memory_space<vmem>>, vector<16x18x32xf32>,
    %c0_6 = arith.constant 0 : index
    %c0_7 = arith.constant 0 : index
    %c0_8 = arith.constant 0 : index
    %c0_9 = arith.constant 0 : index
    %3 = vector.load %arg3[%c0_6, %c0_7, %c0_8, %c0_9] : memref<1x2x18x32xf32, #tpu.memory_space<vmem>>, vector<1x2x18x32xf32>
    %4 = vector.shape_cast %3 : vector<1x2x18x32xf32> to vector<2x18x32xf32>
    %c16 = arith.constant 16 : index
    %c0_10 = arith.constant 0 : index
    %c0_11 = arith.constant 0 : index
    %5 = vector.load %arg8[%c16, %c0_10, %c0_11] : memref<18x18x32xf32, #tpu.memory_space<vmem>>, vector<2x18x32xf32>
    tpu.vector_store %arg8[%c16, %c0_10, %c0_11], %4 {strides = array<i32>} : memref<18x18x32xf32, #tpu.memory_space<vmem>>, vector<2x18x32xf32>,
    %c0_12 = arith.constant 0 : index
    %c0_13 = arith.constant 0 : index
    %c0_14 = arith.constant 0 : index
    %6 = tpu.strided_load %arg8[%c0_12, %c0_13, %c0_14] {strides = array<i32: 1, 2, 1>} : memref<18x18x32xf32, #tpu.memory_space<vmem>>, vector<18x8x32xf32>
    %c0_15 = arith.constant 0 : index
    %c1 = arith.constant 1 : index
    %c0_16 = arith.constant 0 : index
    %7 = tpu.strided_load %arg8[%c0_15, %c1, %c0_16] {strides = array<i32: 1, 2, 1>} : memref<18x18x32xf32, #tpu.memory_space<vmem>>, vector<18x8x32xf32>
    %c0_17 = arith.constant 0 : index
    %c2 = arith.constant 2 : index
    %c0_18 = arith.constant 0 : index
    %8 = tpu.strided_load %arg8[%c0_17, %c2, %c0_18] {strides = array<i32: 1, 2, 1>} : memref<18x18x32xf32, #tpu.memory_space<vmem>>, vector<18x8x32xf32>
    %9 = tpu.concatenate %6, %7, %8 in 2 : vector<18x8x32xf32>, vector<18x8x32xf32>, vector<18x8x32xf32> -> vector<18x8x96xf32>
    %c0_19 = arith.constant 0 : index
    %c0_20 = arith.constant 0 : index
    %10 = vector.load %arg5[%c0_19, %c0_20] : memref<1x64xf32, #tpu.memory_space<vmem>>, vector<1x64xf32>
    %11 = vector.shape_cast %10 : vector<1x64xf32> to vector<1x64xf32>
    %12 = vector.broadcast %11 : vector<1x64xf32> to vector<64x64xf32>
    %13 = vector.extract_strided_slice %9 {offsets = [0, 0, 0], sizes = [16, 8, 96], strides = [1, 1, 1]} : vector<18x8x96xf32> to vector<16x8x96xf32>
    %14 = vector.shape_cast %13 : vector<16x8x96xf32> to vector<8x2x8x96xf32>
    %15 = vector.extract_strided_slice %14 {offsets = [0, 0, 0, 0], sizes = [8, 1, 8, 96], strides = [1, 1, 1, 1]} : vector<8x2x8x96xf32> to vector<8x1x8x96xf32>
    %16 = vector.shape_cast %15 : vector<8x1x8x96xf32> to vector<8x8x96xf32>
    %17 = vector.shape_cast %16 : vector<8x8x96xf32> to vector<64x96xf32>
    %18 = arith.truncf %17 : vector<64x96xf32> to vector<64x96xbf16>
    %c0_21 = arith.constant 0 : index
    %c0_22 = arith.constant 0 : index
    %c0_23 = arith.constant 0 : index
    %19 = vector.load %arg4[%c0_21, %c0_22, %c0_23] : memref<3x96x64xbf16, #tpu.memory_space<vmem>>, vector<1x96x64xbf16>
    %20 = vector.shape_cast %19 : vector<1x96x64xbf16> to vector<96x64xbf16>
    %cst = arith.constant dense<0.000000e+00> : vector<64x64xf32>
    %21 = tpu.matmul %18, %20, %cst {dimension_numbers = #tpu.dot_dimension_numbers<[1], [0], [0], [1], [0, 0, 1, 1], [], []>} : vector<64x96xbf16>, vector<96x64xbf16>, vector<64x64xf32> -> vector<64x64xf32>
    %22 = arith.addf %12, %21 : vector<64x64xf32>
    %23 = vector.extract_strided_slice %9 {offsets = [1, 0, 0], sizes = [16, 8, 96], strides = [1, 1, 1]} : vector<18x8x96xf32> to vector<16x8x96xf32>
    %24 = vector.shape_cast %23 : vector<16x8x96xf32> to vector<8x2x8x96xf32>
    %25 = vector.extract_strided_slice %24 {offsets = [0, 0, 0, 0], sizes = [8, 1, 8, 96], strides = [1, 1, 1, 1]} : vector<8x2x8x96xf32> to vector<8x1x8x96xf32>
    %26 = vector.shape_cast %25 : vector<8x1x8x96xf32> to vector<8x8x96xf32>
    %27 = vector.shape_cast %26 : vector<8x8x96xf32> to vector<64x96xf32>
    %28 = arith.truncf %27 : vector<64x96xf32> to vector<64x96xbf16>
    %c1_24 = arith.constant 1 : index
    %c0_25 = arith.constant 0 : index
    %c0_26 = arith.constant 0 : index
    %29 = vector.load %arg4[%c1_24, %c0_25, %c0_26] : memref<3x96x64xbf16, #tpu.memory_space<vmem>>, vector<1x96x64xbf16>
    %30 = vector.shape_cast %29 : vector<1x96x64xbf16> to vector<96x64xbf16>
    %cst_27 = arith.constant dense<0.000000e+00> : vector<64x64xf32>
    %31 = tpu.matmul %28, %30, %cst_27 {dimension_numbers = #tpu.dot_dimension_numbers<[1], [0], [0], [1], [0, 0, 1, 1], [], []>} : vector<64x96xbf16>, vector<96x64xbf16>, vector<64x64xf32> -> vector<64x64xf32>
    %32 = arith.addf %22, %31 : vector<64x64xf32>
    %33 = vector.extract_strided_slice %9 {offsets = [2, 0, 0], sizes = [16, 8, 96], strides = [1, 1, 1]} : vector<18x8x96xf32> to vector<16x8x96xf32>
    %34 = vector.shape_cast %33 : vector<16x8x96xf32> to vector<8x2x8x96xf32>
    %35 = vector.extract_strided_slice %34 {offsets = [0, 0, 0, 0], sizes = [8, 1, 8, 96], strides = [1, 1, 1, 1]} : vector<8x2x8x96xf32> to vector<8x1x8x96xf32>
    %36 = vector.shape_cast %35 : vector<8x1x8x96xf32> to vector<8x8x96xf32>
    %37 = vector.shape_cast %36 : vector<8x8x96xf32> to vector<64x96xf32>
    %38 = arith.truncf %37 : vector<64x96xf32> to vector<64x96xbf16>
    %c2_28 = arith.constant 2 : index
    %c0_29 = arith.constant 0 : index
    %c0_30 = arith.constant 0 : index
    %39 = vector.load %arg4[%c2_28, %c0_29, %c0_30] : memref<3x96x64xbf16, #tpu.memory_space<vmem>>, vector<1x96x64xbf16>
    %40 = vector.shape_cast %39 : vector<1x96x64xbf16> to vector<96x64xbf16>
    %cst_31 = arith.constant dense<0.000000e+00> : vector<64x64xf32>
    %41 = tpu.matmul %38, %40, %cst_31 {dimension_numbers = #tpu.dot_dimension_numbers<[1], [0], [0], [1], [0, 0, 1, 1], [], []>} : vector<64x96xbf16>, vector<96x64xbf16>, vector<64x64xf32> -> vector<64x64xf32>
    %42 = arith.addf %32, %41 : vector<64x64xf32>
    %c0_32 = arith.constant 0 : index
    %43 = memref.load %arg6[%c0_32] : memref<1xf32, #tpu.memory_space<smem>>
    %cst_33 = arith.constant 0.000000e+00 : f32
    %44 = vector.broadcast %cst_33 : f32 to vector<64x64xf32>
    %45 = arith.cmpf ogt, %42, %44 : vector<64x64xf32>
    %46 = vector.broadcast %43 : f32 to vector<64x64xf32>
    %47 = arith.mulf %46, %42 : vector<64x64xf32>
    %48 = arith.select %45, %42, %47 : vector<64x64xi1>, vector<64x64xf32>
    %49 = vector.shape_cast %48 : vector<64x64xf32> to vector<8x8x64xf32>
    %c0_34 = arith.constant 0 : index
    %c0_35 = arith.constant 0 : index
    %c0_36 = arith.constant 0 : index
    %c0_37 = arith.constant 0 : index
    %50 = vector.load %arg7[%c0_34, %c0_35, %c0_36, %c0_37] : memref<1x8x8x64xf32, #tpu.memory_space<vmem>>, vector<1x8x8x64xf32>
    %51 = vector.shape_cast %50 : vector<1x8x8x64xf32> to vector<8x8x64xf32>
    %52 = vector.shape_cast %49 : vector<8x8x64xf32> to vector<1x8x8x64xf32>
    tpu.vector_store %arg7[%c0_34, %c0_35, %c0_36, %c0_37], %52 {strides = array<i32>} : memref<1x8x8x64xf32, #tpu.memory_space<vmem>>, vector<1x8x8x64xf32>,
    return
  }
  func.func @transform_0(%arg0: i32, %arg1: i32) -> (i32, i32, i32, i32) {
    %c0_i32 = arith.constant 0 : i32
    %c0_i32_0 = arith.constant 0 : i32
    %c0_i32_1 = arith.constant 0 : i32
    return %arg0, %arg1, %c0_i32, %c0_i32_0 : i32, i32, i32, i32
  }
  func.func @transform_1(%arg0: i32, %arg1: i32) -> (i32, i32, i32, i32) {
    %c1_i32 = arith.constant 1 : i32
    %0 = arith.addi %arg1, %c1_i32 : i32
    %c8_i32 = arith.constant 8 : i32
    %1 = arith.muli %0, %c8_i32 : i32
    %c0_i32 = arith.constant 0 : i32
    %c0_i32_0 = arith.constant 0 : i32
    %c0_i32_1 = arith.constant 0 : i32
    return %arg0, %1, %c0_i32, %c0_i32_0 : i32, i32, i32, i32
  }
  func.func @transform_2(%arg0: i32, %arg1: i32) -> (i32, i32, i32) {
    %c0_i32 = arith.constant 0 : i32
    %c0_i32_0 = arith.constant 0 : i32
    %c0_i32_1 = arith.constant 0 : i32
    %c0_i32_2 = arith.constant 0 : i32
    return %c0_i32, %c0_i32_0, %c0_i32_1 : i32, i32, i32
  }
  func.func @transform_3(%arg0: i32, %arg1: i32) -> (i32, i32) {
    %c0_i32 = arith.constant 0 : i32
    %c0_i32_0 = arith.constant 0 : i32
    %c0_i32_1 = arith.constant 0 : i32
    return %c0_i32, %c0_i32_0 : i32, i32
  }
  func.func @transform_4(%arg0: i32, %arg1: i32) -> i32 {
    %c0_i32 = arith.constant 0 : i32
    %c0_i32_0 = arith.constant 0 : i32
    return %c0_i32 : i32
  }
  func.func @transform_5(%arg0: i32, %arg1: i32) -> (i32, i32, i32, i32) {
    %c0_i32 = arith.constant 0 : i32
    %c0_i32_0 = arith.constant 0 : i32
    %c0_i32_1 = arith.constant 0 : i32
    return %arg0, %arg1, %c0_i32, %c0_i32_0 : i32, i32, i32, i32
  }
}

module attributes {stable_mosaic.version = 11 : i64} {
  func.func @_conv3x3_prelu_kernel(%arg0: i32, %arg1: i32, %arg2: memref<1x8x10x64xf32, #tpu.memory_space<vmem>>, %arg3: memref<1x2x10x64xf32, #tpu.memory_space<vmem>>, %arg4: memref<3x192x64xbf16, #tpu.memory_space<vmem>>, %arg5: memref<1x64xf32, #tpu.memory_space<vmem>>, %arg6: memref<1xf32, #tpu.memory_space<smem>>, %arg7: memref<1x8x8x64xf32, #tpu.memory_space<vmem>>, %arg8: memref<10x10x64xf32, #tpu.memory_space<vmem>>) attributes {dimension_semantics = [#tpu.dimension_semantics<parallel>, #tpu.dimension_semantics<parallel>], iteration_bounds = array<i64: 2, 1>, scalar_prefetch = 0 : i64, scratch_operands = 1 : i64, tpu.core_type = #tpu.core_type<tc>, window_params = [{transform_indices = @transform_0, window_bounds = array<i64: 1, 8, 10, 64>}, {transform_indices = @transform_1, window_bounds = array<i64: 1, 2, 10, 64>}, {pipeline_mode = #tpu.pipeline_mode<synchronous>, transform_indices = @transform_2, window_bounds = array<i64: 3, 192, 64>}, {pipeline_mode = #tpu.pipeline_mode<synchronous>, transform_indices = @transform_3, window_bounds = array<i64: 1, 64>}, {transform_indices = @transform_4, window_bounds = array<i64: 1>}, {transform_indices = @transform_5, window_bounds = array<i64: 1, 8, 8, 64>}]} {
    %c0 = arith.constant 0 : index
    %c0_0 = arith.constant 0 : index
    %c0_1 = arith.constant 0 : index
    %c0_2 = arith.constant 0 : index
    %0 = vector.load %arg2[%c0, %c0_0, %c0_1, %c0_2] : memref<1x8x10x64xf32, #tpu.memory_space<vmem>>, vector<1x8x10x64xf32>
    %1 = vector.shape_cast %0 : vector<1x8x10x64xf32> to vector<8x10x64xf32>
    %c0_3 = arith.constant 0 : index
    %c0_4 = arith.constant 0 : index
    %c0_5 = arith.constant 0 : index
    %2 = vector.load %arg8[%c0_3, %c0_4, %c0_5] : memref<10x10x64xf32, #tpu.memory_space<vmem>>, vector<8x10x64xf32>
    tpu.vector_store %arg8[%c0_3, %c0_4, %c0_5], %1 {strides = array<i32>} : memref<10x10x64xf32, #tpu.memory_space<vmem>>, vector<8x10x64xf32>,
    %c0_6 = arith.constant 0 : index
    %c0_7 = arith.constant 0 : index
    %c0_8 = arith.constant 0 : index
    %c0_9 = arith.constant 0 : index
    %3 = vector.load %arg3[%c0_6, %c0_7, %c0_8, %c0_9] : memref<1x2x10x64xf32, #tpu.memory_space<vmem>>, vector<1x2x10x64xf32>
    %4 = vector.shape_cast %3 : vector<1x2x10x64xf32> to vector<2x10x64xf32>
    %c8 = arith.constant 8 : index
    %c0_10 = arith.constant 0 : index
    %c0_11 = arith.constant 0 : index
    %5 = vector.load %arg8[%c8, %c0_10, %c0_11] : memref<10x10x64xf32, #tpu.memory_space<vmem>>, vector<2x10x64xf32>
    tpu.vector_store %arg8[%c8, %c0_10, %c0_11], %4 {strides = array<i32>} : memref<10x10x64xf32, #tpu.memory_space<vmem>>, vector<2x10x64xf32>,
    %c0_12 = arith.constant 0 : index
    %c0_13 = arith.constant 0 : index
    %c0_14 = arith.constant 0 : index
    %6 = vector.load %arg8[%c0_12, %c0_13, %c0_14] : memref<10x10x64xf32, #tpu.memory_space<vmem>>, vector<10x8x64xf32>
    %c0_15 = arith.constant 0 : index
    %c1 = arith.constant 1 : index
    %c0_16 = arith.constant 0 : index
    %7 = vector.load %arg8[%c0_15, %c1, %c0_16] : memref<10x10x64xf32, #tpu.memory_space<vmem>>, vector<10x8x64xf32>
    %c0_17 = arith.constant 0 : index
    %c2 = arith.constant 2 : index
    %c0_18 = arith.constant 0 : index
    %8 = vector.load %arg8[%c0_17, %c2, %c0_18] : memref<10x10x64xf32, #tpu.memory_space<vmem>>, vector<10x8x64xf32>
    %9 = tpu.concatenate %6, %7, %8 in 2 : vector<10x8x64xf32>, vector<10x8x64xf32>, vector<10x8x64xf32> -> vector<10x8x192xf32>
    %c0_19 = arith.constant 0 : index
    %c0_20 = arith.constant 0 : index
    %10 = vector.load %arg5[%c0_19, %c0_20] : memref<1x64xf32, #tpu.memory_space<vmem>>, vector<1x64xf32>
    %11 = vector.shape_cast %10 : vector<1x64xf32> to vector<1x64xf32>
    %12 = vector.broadcast %11 : vector<1x64xf32> to vector<64x64xf32>
    %13 = vector.extract_strided_slice %9 {offsets = [0, 0, 0], sizes = [8, 8, 192], strides = [1, 1, 1]} : vector<10x8x192xf32> to vector<8x8x192xf32>
    %14 = vector.shape_cast %13 : vector<8x8x192xf32> to vector<64x192xf32>
    %15 = arith.truncf %14 : vector<64x192xf32> to vector<64x192xbf16>
    %c0_21 = arith.constant 0 : index
    %c0_22 = arith.constant 0 : index
    %c0_23 = arith.constant 0 : index
    %16 = vector.load %arg4[%c0_21, %c0_22, %c0_23] : memref<3x192x64xbf16, #tpu.memory_space<vmem>>, vector<1x192x64xbf16>
    %17 = vector.shape_cast %16 : vector<1x192x64xbf16> to vector<192x64xbf16>
    %cst = arith.constant dense<0.000000e+00> : vector<64x64xf32>
    %18 = tpu.matmul %15, %17, %cst {dimension_numbers = #tpu.dot_dimension_numbers<[1], [0], [0], [1], [0, 0, 1, 1], [], []>} : vector<64x192xbf16>, vector<192x64xbf16>, vector<64x64xf32> -> vector<64x64xf32>
    %19 = arith.addf %12, %18 : vector<64x64xf32>
    %20 = vector.extract_strided_slice %9 {offsets = [1, 0, 0], sizes = [8, 8, 192], strides = [1, 1, 1]} : vector<10x8x192xf32> to vector<8x8x192xf32>
    %21 = vector.shape_cast %20 : vector<8x8x192xf32> to vector<64x192xf32>
    %22 = arith.truncf %21 : vector<64x192xf32> to vector<64x192xbf16>
    %c1_24 = arith.constant 1 : index
    %c0_25 = arith.constant 0 : index
    %c0_26 = arith.constant 0 : index
    %23 = vector.load %arg4[%c1_24, %c0_25, %c0_26] : memref<3x192x64xbf16, #tpu.memory_space<vmem>>, vector<1x192x64xbf16>
    %24 = vector.shape_cast %23 : vector<1x192x64xbf16> to vector<192x64xbf16>
    %cst_27 = arith.constant dense<0.000000e+00> : vector<64x64xf32>
    %25 = tpu.matmul %22, %24, %cst_27 {dimension_numbers = #tpu.dot_dimension_numbers<[1], [0], [0], [1], [0, 0, 1, 1], [], []>} : vector<64x192xbf16>, vector<192x64xbf16>, vector<64x64xf32> -> vector<64x64xf32>
    %26 = arith.addf %19, %25 : vector<64x64xf32>
    %27 = vector.extract_strided_slice %9 {offsets = [2, 0, 0], sizes = [8, 8, 192], strides = [1, 1, 1]} : vector<10x8x192xf32> to vector<8x8x192xf32>
    %28 = vector.shape_cast %27 : vector<8x8x192xf32> to vector<64x192xf32>
    %29 = arith.truncf %28 : vector<64x192xf32> to vector<64x192xbf16>
    %c2_28 = arith.constant 2 : index
    %c0_29 = arith.constant 0 : index
    %c0_30 = arith.constant 0 : index
    %30 = vector.load %arg4[%c2_28, %c0_29, %c0_30] : memref<3x192x64xbf16, #tpu.memory_space<vmem>>, vector<1x192x64xbf16>
    %31 = vector.shape_cast %30 : vector<1x192x64xbf16> to vector<192x64xbf16>
    %cst_31 = arith.constant dense<0.000000e+00> : vector<64x64xf32>
    %32 = tpu.matmul %29, %31, %cst_31 {dimension_numbers = #tpu.dot_dimension_numbers<[1], [0], [0], [1], [0, 0, 1, 1], [], []>} : vector<64x192xbf16>, vector<192x64xbf16>, vector<64x64xf32> -> vector<64x64xf32>
    %33 = arith.addf %26, %32 : vector<64x64xf32>
    %c0_32 = arith.constant 0 : index
    %34 = memref.load %arg6[%c0_32] : memref<1xf32, #tpu.memory_space<smem>>
    %cst_33 = arith.constant 0.000000e+00 : f32
    %35 = vector.broadcast %cst_33 : f32 to vector<64x64xf32>
    %36 = arith.cmpf ogt, %33, %35 : vector<64x64xf32>
    %37 = vector.broadcast %34 : f32 to vector<64x64xf32>
    %38 = arith.mulf %37, %33 : vector<64x64xf32>
    %39 = arith.select %36, %33, %38 : vector<64x64xi1>, vector<64x64xf32>
    %40 = vector.shape_cast %39 : vector<64x64xf32> to vector<8x8x64xf32>
    %c0_34 = arith.constant 0 : index
    %c0_35 = arith.constant 0 : index
    %c0_36 = arith.constant 0 : index
    %c0_37 = arith.constant 0 : index
    %41 = vector.load %arg7[%c0_34, %c0_35, %c0_36, %c0_37] : memref<1x8x8x64xf32, #tpu.memory_space<vmem>>, vector<1x8x8x64xf32>
    %42 = vector.shape_cast %41 : vector<1x8x8x64xf32> to vector<8x8x64xf32>
    %43 = vector.shape_cast %40 : vector<8x8x64xf32> to vector<1x8x8x64xf32>
    tpu.vector_store %arg7[%c0_34, %c0_35, %c0_36, %c0_37], %43 {strides = array<i32>} : memref<1x8x8x64xf32, #tpu.memory_space<vmem>>, vector<1x8x8x64xf32>,
    return
  }
  func.func @transform_0(%arg0: i32, %arg1: i32) -> (i32, i32, i32, i32) {
    %c0_i32 = arith.constant 0 : i32
    %c0_i32_0 = arith.constant 0 : i32
    %c0_i32_1 = arith.constant 0 : i32
    return %arg0, %arg1, %c0_i32, %c0_i32_0 : i32, i32, i32, i32
  }
  func.func @transform_1(%arg0: i32, %arg1: i32) -> (i32, i32, i32, i32) {
    %c1_i32 = arith.constant 1 : i32
    %0 = arith.addi %arg1, %c1_i32 : i32
    %c4_i32 = arith.constant 4 : i32
    %1 = arith.muli %0, %c4_i32 : i32
    %c0_i32 = arith.constant 0 : i32
    %c0_i32_0 = arith.constant 0 : i32
    %c0_i32_1 = arith.constant 0 : i32
    return %arg0, %1, %c0_i32, %c0_i32_0 : i32, i32, i32, i32
  }
  func.func @transform_2(%arg0: i32, %arg1: i32) -> (i32, i32, i32) {
    %c0_i32 = arith.constant 0 : i32
    %c0_i32_0 = arith.constant 0 : i32
    %c0_i32_1 = arith.constant 0 : i32
    %c0_i32_2 = arith.constant 0 : i32
    return %c0_i32, %c0_i32_0, %c0_i32_1 : i32, i32, i32
  }
  func.func @transform_3(%arg0: i32, %arg1: i32) -> (i32, i32) {
    %c0_i32 = arith.constant 0 : i32
    %c0_i32_0 = arith.constant 0 : i32
    %c0_i32_1 = arith.constant 0 : i32
    return %c0_i32, %c0_i32_0 : i32, i32
  }
  func.func @transform_4(%arg0: i32, %arg1: i32) -> i32 {
    %c0_i32 = arith.constant 0 : i32
    %c0_i32_0 = arith.constant 0 : i32
    return %c0_i32 : i32
  }
  func.func @transform_5(%arg0: i32, %arg1: i32) -> (i32, i32, i32, i32) {
    %c0_i32 = arith.constant 0 : i32
    %c0_i32_0 = arith.constant 0 : i32
    %c0_i32_1 = arith.constant 0 : i32
    return %arg0, %arg1, %c0_i32, %c0_i32_0 : i32, i32, i32, i32
  }
}

module attributes {stable_mosaic.version = 11 : i64} {
  func.func @_conv3x3_prelu_kernel(%arg0: i32, %arg1: i32, %arg2: memref<1x8x10x64xf32, #tpu.memory_space<vmem>>, %arg3: memref<1x2x10x64xf32, #tpu.memory_space<vmem>>, %arg4: memref<3x192x96xbf16, #tpu.memory_space<vmem>>, %arg5: memref<1x96xf32, #tpu.memory_space<vmem>>, %arg6: memref<1xf32, #tpu.memory_space<smem>>, %arg7: memref<1x4x4x96xf32, #tpu.memory_space<vmem>>, %arg8: memref<10x10x64xf32, #tpu.memory_space<vmem>>) attributes {dimension_semantics = [#tpu.dimension_semantics<parallel>, #tpu.dimension_semantics<parallel>], iteration_bounds = array<i64: 2, 1>, scalar_prefetch = 0 : i64, scratch_operands = 1 : i64, tpu.core_type = #tpu.core_type<tc>, window_params = [{transform_indices = @transform_0, window_bounds = array<i64: 1, 8, 10, 64>}, {transform_indices = @transform_1, window_bounds = array<i64: 1, 2, 10, 64>}, {pipeline_mode = #tpu.pipeline_mode<synchronous>, transform_indices = @transform_2, window_bounds = array<i64: 3, 192, 96>}, {pipeline_mode = #tpu.pipeline_mode<synchronous>, transform_indices = @transform_3, window_bounds = array<i64: 1, 96>}, {transform_indices = @transform_4, window_bounds = array<i64: 1>}, {transform_indices = @transform_5, window_bounds = array<i64: 1, 4, 4, 96>}]} {
    %c0 = arith.constant 0 : index
    %c0_0 = arith.constant 0 : index
    %c0_1 = arith.constant 0 : index
    %c0_2 = arith.constant 0 : index
    %0 = vector.load %arg2[%c0, %c0_0, %c0_1, %c0_2] : memref<1x8x10x64xf32, #tpu.memory_space<vmem>>, vector<1x8x10x64xf32>
    %1 = vector.shape_cast %0 : vector<1x8x10x64xf32> to vector<8x10x64xf32>
    %c0_3 = arith.constant 0 : index
    %c0_4 = arith.constant 0 : index
    %c0_5 = arith.constant 0 : index
    %2 = vector.load %arg8[%c0_3, %c0_4, %c0_5] : memref<10x10x64xf32, #tpu.memory_space<vmem>>, vector<8x10x64xf32>
    tpu.vector_store %arg8[%c0_3, %c0_4, %c0_5], %1 {strides = array<i32>} : memref<10x10x64xf32, #tpu.memory_space<vmem>>, vector<8x10x64xf32>,
    %c0_6 = arith.constant 0 : index
    %c0_7 = arith.constant 0 : index
    %c0_8 = arith.constant 0 : index
    %c0_9 = arith.constant 0 : index
    %3 = vector.load %arg3[%c0_6, %c0_7, %c0_8, %c0_9] : memref<1x2x10x64xf32, #tpu.memory_space<vmem>>, vector<1x2x10x64xf32>
    %4 = vector.shape_cast %3 : vector<1x2x10x64xf32> to vector<2x10x64xf32>
    %c8 = arith.constant 8 : index
    %c0_10 = arith.constant 0 : index
    %c0_11 = arith.constant 0 : index
    %5 = vector.load %arg8[%c8, %c0_10, %c0_11] : memref<10x10x64xf32, #tpu.memory_space<vmem>>, vector<2x10x64xf32>
    tpu.vector_store %arg8[%c8, %c0_10, %c0_11], %4 {strides = array<i32>} : memref<10x10x64xf32, #tpu.memory_space<vmem>>, vector<2x10x64xf32>,
    %c0_12 = arith.constant 0 : index
    %c0_13 = arith.constant 0 : index
    %c0_14 = arith.constant 0 : index
    %6 = tpu.strided_load %arg8[%c0_12, %c0_13, %c0_14] {strides = array<i32: 1, 2, 1>} : memref<10x10x64xf32, #tpu.memory_space<vmem>>, vector<10x4x64xf32>
    %c0_15 = arith.constant 0 : index
    %c1 = arith.constant 1 : index
    %c0_16 = arith.constant 0 : index
    %7 = tpu.strided_load %arg8[%c0_15, %c1, %c0_16] {strides = array<i32: 1, 2, 1>} : memref<10x10x64xf32, #tpu.memory_space<vmem>>, vector<10x4x64xf32>
    %c0_17 = arith.constant 0 : index
    %c2 = arith.constant 2 : index
    %c0_18 = arith.constant 0 : index
    %8 = tpu.strided_load %arg8[%c0_17, %c2, %c0_18] {strides = array<i32: 1, 2, 1>} : memref<10x10x64xf32, #tpu.memory_space<vmem>>, vector<10x4x64xf32>
    %9 = tpu.concatenate %6, %7, %8 in 2 : vector<10x4x64xf32>, vector<10x4x64xf32>, vector<10x4x64xf32> -> vector<10x4x192xf32>
    %c0_19 = arith.constant 0 : index
    %c0_20 = arith.constant 0 : index
    %10 = vector.load %arg5[%c0_19, %c0_20] : memref<1x96xf32, #tpu.memory_space<vmem>>, vector<1x96xf32>
    %11 = vector.shape_cast %10 : vector<1x96xf32> to vector<1x96xf32>
    %12 = vector.broadcast %11 : vector<1x96xf32> to vector<16x96xf32>
    %13 = vector.extract_strided_slice %9 {offsets = [0, 0, 0], sizes = [8, 4, 192], strides = [1, 1, 1]} : vector<10x4x192xf32> to vector<8x4x192xf32>
    %14 = vector.shape_cast %13 : vector<8x4x192xf32> to vector<4x2x4x192xf32>
    %15 = vector.extract_strided_slice %14 {offsets = [0, 0, 0, 0], sizes = [4, 1, 4, 192], strides = [1, 1, 1, 1]} : vector<4x2x4x192xf32> to vector<4x1x4x192xf32>
    %16 = vector.shape_cast %15 : vector<4x1x4x192xf32> to vector<4x4x192xf32>
    %17 = vector.shape_cast %16 : vector<4x4x192xf32> to vector<16x192xf32>
    %18 = arith.truncf %17 : vector<16x192xf32> to vector<16x192xbf16>
    %c0_21 = arith.constant 0 : index
    %c0_22 = arith.constant 0 : index
    %c0_23 = arith.constant 0 : index
    %19 = vector.load %arg4[%c0_21, %c0_22, %c0_23] : memref<3x192x96xbf16, #tpu.memory_space<vmem>>, vector<1x192x96xbf16>
    %20 = vector.shape_cast %19 : vector<1x192x96xbf16> to vector<192x96xbf16>
    %cst = arith.constant dense<0.000000e+00> : vector<16x96xf32>
    %21 = tpu.matmul %18, %20, %cst {dimension_numbers = #tpu.dot_dimension_numbers<[1], [0], [0], [1], [0, 0, 1, 1], [], []>} : vector<16x192xbf16>, vector<192x96xbf16>, vector<16x96xf32> -> vector<16x96xf32>
    %22 = arith.addf %12, %21 : vector<16x96xf32>
    %23 = vector.extract_strided_slice %9 {offsets = [1, 0, 0], sizes = [8, 4, 192], strides = [1, 1, 1]} : vector<10x4x192xf32> to vector<8x4x192xf32>
    %24 = vector.shape_cast %23 : vector<8x4x192xf32> to vector<4x2x4x192xf32>
    %25 = vector.extract_strided_slice %24 {offsets = [0, 0, 0, 0], sizes = [4, 1, 4, 192], strides = [1, 1, 1, 1]} : vector<4x2x4x192xf32> to vector<4x1x4x192xf32>
    %26 = vector.shape_cast %25 : vector<4x1x4x192xf32> to vector<4x4x192xf32>
    %27 = vector.shape_cast %26 : vector<4x4x192xf32> to vector<16x192xf32>
    %28 = arith.truncf %27 : vector<16x192xf32> to vector<16x192xbf16>
    %c1_24 = arith.constant 1 : index
    %c0_25 = arith.constant 0 : index
    %c0_26 = arith.constant 0 : index
    %29 = vector.load %arg4[%c1_24, %c0_25, %c0_26] : memref<3x192x96xbf16, #tpu.memory_space<vmem>>, vector<1x192x96xbf16>
    %30 = vector.shape_cast %29 : vector<1x192x96xbf16> to vector<192x96xbf16>
    %cst_27 = arith.constant dense<0.000000e+00> : vector<16x96xf32>
    %31 = tpu.matmul %28, %30, %cst_27 {dimension_numbers = #tpu.dot_dimension_numbers<[1], [0], [0], [1], [0, 0, 1, 1], [], []>} : vector<16x192xbf16>, vector<192x96xbf16>, vector<16x96xf32> -> vector<16x96xf32>
    %32 = arith.addf %22, %31 : vector<16x96xf32>
    %33 = vector.extract_strided_slice %9 {offsets = [2, 0, 0], sizes = [8, 4, 192], strides = [1, 1, 1]} : vector<10x4x192xf32> to vector<8x4x192xf32>
    %34 = vector.shape_cast %33 : vector<8x4x192xf32> to vector<4x2x4x192xf32>
    %35 = vector.extract_strided_slice %34 {offsets = [0, 0, 0, 0], sizes = [4, 1, 4, 192], strides = [1, 1, 1, 1]} : vector<4x2x4x192xf32> to vector<4x1x4x192xf32>
    %36 = vector.shape_cast %35 : vector<4x1x4x192xf32> to vector<4x4x192xf32>
    %37 = vector.shape_cast %36 : vector<4x4x192xf32> to vector<16x192xf32>
    %38 = arith.truncf %37 : vector<16x192xf32> to vector<16x192xbf16>
    %c2_28 = arith.constant 2 : index
    %c0_29 = arith.constant 0 : index
    %c0_30 = arith.constant 0 : index
    %39 = vector.load %arg4[%c2_28, %c0_29, %c0_30] : memref<3x192x96xbf16, #tpu.memory_space<vmem>>, vector<1x192x96xbf16>
    %40 = vector.shape_cast %39 : vector<1x192x96xbf16> to vector<192x96xbf16>
    %cst_31 = arith.constant dense<0.000000e+00> : vector<16x96xf32>
    %41 = tpu.matmul %38, %40, %cst_31 {dimension_numbers = #tpu.dot_dimension_numbers<[1], [0], [0], [1], [0, 0, 1, 1], [], []>} : vector<16x192xbf16>, vector<192x96xbf16>, vector<16x96xf32> -> vector<16x96xf32>
    %42 = arith.addf %32, %41 : vector<16x96xf32>
    %c0_32 = arith.constant 0 : index
    %43 = memref.load %arg6[%c0_32] : memref<1xf32, #tpu.memory_space<smem>>
    %cst_33 = arith.constant 0.000000e+00 : f32
    %44 = vector.broadcast %cst_33 : f32 to vector<16x96xf32>
    %45 = arith.cmpf ogt, %42, %44 : vector<16x96xf32>
    %46 = vector.broadcast %43 : f32 to vector<16x96xf32>
    %47 = arith.mulf %46, %42 : vector<16x96xf32>
    %48 = arith.select %45, %42, %47 : vector<16x96xi1>, vector<16x96xf32>
    %49 = vector.shape_cast %48 : vector<16x96xf32> to vector<4x4x96xf32>
    %c0_34 = arith.constant 0 : index
    %c0_35 = arith.constant 0 : index
    %c0_36 = arith.constant 0 : index
    %c0_37 = arith.constant 0 : index
    %50 = vector.load %arg7[%c0_34, %c0_35, %c0_36, %c0_37] : memref<1x4x4x96xf32, #tpu.memory_space<vmem>>, vector<1x4x4x96xf32>
    %51 = vector.shape_cast %50 : vector<1x4x4x96xf32> to vector<4x4x96xf32>
    %52 = vector.shape_cast %49 : vector<4x4x96xf32> to vector<1x4x4x96xf32>
    tpu.vector_store %arg7[%c0_34, %c0_35, %c0_36, %c0_37], %52 {strides = array<i32>} : memref<1x4x4x96xf32, #tpu.memory_space<vmem>>, vector<1x4x4x96xf32>,
    return
  }
  func.func @transform_0(%arg0: i32, %arg1: i32) -> (i32, i32, i32, i32) {
    %c0_i32 = arith.constant 0 : i32
    %c0_i32_0 = arith.constant 0 : i32
    %c0_i32_1 = arith.constant 0 : i32
    return %arg0, %arg1, %c0_i32, %c0_i32_0 : i32, i32, i32, i32
  }
  func.func @transform_1(%arg0: i32, %arg1: i32) -> (i32, i32, i32, i32) {
    %c1_i32 = arith.constant 1 : i32
    %0 = arith.addi %arg1, %c1_i32 : i32
    %c4_i32 = arith.constant 4 : i32
    %1 = arith.muli %0, %c4_i32 : i32
    %c0_i32 = arith.constant 0 : i32
    %c0_i32_0 = arith.constant 0 : i32
    %c0_i32_1 = arith.constant 0 : i32
    return %arg0, %1, %c0_i32, %c0_i32_0 : i32, i32, i32, i32
  }
  func.func @transform_2(%arg0: i32, %arg1: i32) -> (i32, i32, i32) {
    %c0_i32 = arith.constant 0 : i32
    %c0_i32_0 = arith.constant 0 : i32
    %c0_i32_1 = arith.constant 0 : i32
    %c0_i32_2 = arith.constant 0 : i32
    return %c0_i32, %c0_i32_0, %c0_i32_1 : i32, i32, i32
  }
  func.func @transform_3(%arg0: i32, %arg1: i32) -> (i32, i32) {
    %c0_i32 = arith.constant 0 : i32
    %c0_i32_0 = arith.constant 0 : i32
    %c0_i32_1 = arith.constant 0 : i32
    return %c0_i32, %c0_i32_0 : i32, i32
  }
  func.func @transform_4(%arg0: i32, %arg1: i32) -> i32 {
    %c0_i32 = arith.constant 0 : i32
    %c0_i32_0 = arith.constant 0 : i32
    return %c0_i32 : i32
  }
  func.func @transform_5(%arg0: i32, %arg1: i32) -> (i32, i32, i32, i32) {
    %c0_i32 = arith.constant 0 : i32
    %c0_i32_0 = arith.constant 0 : i32
    %c0_i32_1 = arith.constant 0 : i32
    return %arg0, %arg1, %c0_i32, %c0_i32_0 : i32, i32, i32, i32
  }
}

module attributes {stable_mosaic.version = 11 : i64} {
  func.func @_conv3x3_prelu_kernel(%arg0: i32, %arg1: i32, %arg2: memref<1x4x6x96xf32, #tpu.memory_space<vmem>>, %arg3: memref<1x2x6x96xf32, #tpu.memory_space<vmem>>, %arg4: memref<3x288x96xbf16, #tpu.memory_space<vmem>>, %arg5: memref<1x96xf32, #tpu.memory_space<vmem>>, %arg6: memref<1xf32, #tpu.memory_space<smem>>, %arg7: memref<1x4x4x96xf32, #tpu.memory_space<vmem>>, %arg8: memref<6x6x96xf32, #tpu.memory_space<vmem>>) attributes {dimension_semantics = [#tpu.dimension_semantics<parallel>, #tpu.dimension_semantics<parallel>], iteration_bounds = array<i64: 2, 1>, scalar_prefetch = 0 : i64, scratch_operands = 1 : i64, tpu.core_type = #tpu.core_type<tc>, window_params = [{transform_indices = @transform_0, window_bounds = array<i64: 1, 4, 6, 96>}, {transform_indices = @transform_1, window_bounds = array<i64: 1, 2, 6, 96>}, {pipeline_mode = #tpu.pipeline_mode<synchronous>, transform_indices = @transform_2, window_bounds = array<i64: 3, 288, 96>}, {pipeline_mode = #tpu.pipeline_mode<synchronous>, transform_indices = @transform_3, window_bounds = array<i64: 1, 96>}, {transform_indices = @transform_4, window_bounds = array<i64: 1>}, {transform_indices = @transform_5, window_bounds = array<i64: 1, 4, 4, 96>}]} {
    %c0 = arith.constant 0 : index
    %c0_0 = arith.constant 0 : index
    %c0_1 = arith.constant 0 : index
    %c0_2 = arith.constant 0 : index
    %0 = vector.load %arg2[%c0, %c0_0, %c0_1, %c0_2] : memref<1x4x6x96xf32, #tpu.memory_space<vmem>>, vector<1x4x6x96xf32>
    %1 = vector.shape_cast %0 : vector<1x4x6x96xf32> to vector<4x6x96xf32>
    %c0_3 = arith.constant 0 : index
    %c0_4 = arith.constant 0 : index
    %c0_5 = arith.constant 0 : index
    %2 = vector.load %arg8[%c0_3, %c0_4, %c0_5] : memref<6x6x96xf32, #tpu.memory_space<vmem>>, vector<4x6x96xf32>
    tpu.vector_store %arg8[%c0_3, %c0_4, %c0_5], %1 {strides = array<i32>} : memref<6x6x96xf32, #tpu.memory_space<vmem>>, vector<4x6x96xf32>,
    %c0_6 = arith.constant 0 : index
    %c0_7 = arith.constant 0 : index
    %c0_8 = arith.constant 0 : index
    %c0_9 = arith.constant 0 : index
    %3 = vector.load %arg3[%c0_6, %c0_7, %c0_8, %c0_9] : memref<1x2x6x96xf32, #tpu.memory_space<vmem>>, vector<1x2x6x96xf32>
    %4 = vector.shape_cast %3 : vector<1x2x6x96xf32> to vector<2x6x96xf32>
    %c4 = arith.constant 4 : index
    %c0_10 = arith.constant 0 : index
    %c0_11 = arith.constant 0 : index
    %5 = vector.load %arg8[%c4, %c0_10, %c0_11] : memref<6x6x96xf32, #tpu.memory_space<vmem>>, vector<2x6x96xf32>
    tpu.vector_store %arg8[%c4, %c0_10, %c0_11], %4 {strides = array<i32>} : memref<6x6x96xf32, #tpu.memory_space<vmem>>, vector<2x6x96xf32>,
    %c0_12 = arith.constant 0 : index
    %c0_13 = arith.constant 0 : index
    %c0_14 = arith.constant 0 : index
    %6 = vector.load %arg8[%c0_12, %c0_13, %c0_14] : memref<6x6x96xf32, #tpu.memory_space<vmem>>, vector<6x4x96xf32>
    %c0_15 = arith.constant 0 : index
    %c1 = arith.constant 1 : index
    %c0_16 = arith.constant 0 : index
    %7 = vector.load %arg8[%c0_15, %c1, %c0_16] : memref<6x6x96xf32, #tpu.memory_space<vmem>>, vector<6x4x96xf32>
    %c0_17 = arith.constant 0 : index
    %c2 = arith.constant 2 : index
    %c0_18 = arith.constant 0 : index
    %8 = vector.load %arg8[%c0_17, %c2, %c0_18] : memref<6x6x96xf32, #tpu.memory_space<vmem>>, vector<6x4x96xf32>
    %9 = tpu.concatenate %6, %7, %8 in 2 : vector<6x4x96xf32>, vector<6x4x96xf32>, vector<6x4x96xf32> -> vector<6x4x288xf32>
    %c0_19 = arith.constant 0 : index
    %c0_20 = arith.constant 0 : index
    %10 = vector.load %arg5[%c0_19, %c0_20] : memref<1x96xf32, #tpu.memory_space<vmem>>, vector<1x96xf32>
    %11 = vector.shape_cast %10 : vector<1x96xf32> to vector<1x96xf32>
    %12 = vector.broadcast %11 : vector<1x96xf32> to vector<16x96xf32>
    %13 = vector.extract_strided_slice %9 {offsets = [0, 0, 0], sizes = [4, 4, 288], strides = [1, 1, 1]} : vector<6x4x288xf32> to vector<4x4x288xf32>
    %14 = vector.shape_cast %13 : vector<4x4x288xf32> to vector<16x288xf32>
    %15 = arith.truncf %14 : vector<16x288xf32> to vector<16x288xbf16>
    %c0_21 = arith.constant 0 : index
    %c0_22 = arith.constant 0 : index
    %c0_23 = arith.constant 0 : index
    %16 = vector.load %arg4[%c0_21, %c0_22, %c0_23] : memref<3x288x96xbf16, #tpu.memory_space<vmem>>, vector<1x288x96xbf16>
    %17 = vector.shape_cast %16 : vector<1x288x96xbf16> to vector<288x96xbf16>
    %cst = arith.constant dense<0.000000e+00> : vector<16x96xf32>
    %18 = tpu.matmul %15, %17, %cst {dimension_numbers = #tpu.dot_dimension_numbers<[1], [0], [0], [1], [0, 0, 1, 1], [], []>} : vector<16x288xbf16>, vector<288x96xbf16>, vector<16x96xf32> -> vector<16x96xf32>
    %19 = arith.addf %12, %18 : vector<16x96xf32>
    %20 = vector.extract_strided_slice %9 {offsets = [1, 0, 0], sizes = [4, 4, 288], strides = [1, 1, 1]} : vector<6x4x288xf32> to vector<4x4x288xf32>
    %21 = vector.shape_cast %20 : vector<4x4x288xf32> to vector<16x288xf32>
    %22 = arith.truncf %21 : vector<16x288xf32> to vector<16x288xbf16>
    %c1_24 = arith.constant 1 : index
    %c0_25 = arith.constant 0 : index
    %c0_26 = arith.constant 0 : index
    %23 = vector.load %arg4[%c1_24, %c0_25, %c0_26] : memref<3x288x96xbf16, #tpu.memory_space<vmem>>, vector<1x288x96xbf16>
    %24 = vector.shape_cast %23 : vector<1x288x96xbf16> to vector<288x96xbf16>
    %cst_27 = arith.constant dense<0.000000e+00> : vector<16x96xf32>
    %25 = tpu.matmul %22, %24, %cst_27 {dimension_numbers = #tpu.dot_dimension_numbers<[1], [0], [0], [1], [0, 0, 1, 1], [], []>} : vector<16x288xbf16>, vector<288x96xbf16>, vector<16x96xf32> -> vector<16x96xf32>
    %26 = arith.addf %19, %25 : vector<16x96xf32>
    %27 = vector.extract_strided_slice %9 {offsets = [2, 0, 0], sizes = [4, 4, 288], strides = [1, 1, 1]} : vector<6x4x288xf32> to vector<4x4x288xf32>
    %28 = vector.shape_cast %27 : vector<4x4x288xf32> to vector<16x288xf32>
    %29 = arith.truncf %28 : vector<16x288xf32> to vector<16x288xbf16>
    %c2_28 = arith.constant 2 : index
    %c0_29 = arith.constant 0 : index
    %c0_30 = arith.constant 0 : index
    %30 = vector.load %arg4[%c2_28, %c0_29, %c0_30] : memref<3x288x96xbf16, #tpu.memory_space<vmem>>, vector<1x288x96xbf16>
    %31 = vector.shape_cast %30 : vector<1x288x96xbf16> to vector<288x96xbf16>
    %cst_31 = arith.constant dense<0.000000e+00> : vector<16x96xf32>
    %32 = tpu.matmul %29, %31, %cst_31 {dimension_numbers = #tpu.dot_dimension_numbers<[1], [0], [0], [1], [0, 0, 1, 1], [], []>} : vector<16x288xbf16>, vector<288x96xbf16>, vector<16x96xf32> -> vector<16x96xf32>
    %33 = arith.addf %26, %32 : vector<16x96xf32>
    %c0_32 = arith.constant 0 : index
    %34 = memref.load %arg6[%c0_32] : memref<1xf32, #tpu.memory_space<smem>>
    %cst_33 = arith.constant 0.000000e+00 : f32
    %35 = vector.broadcast %cst_33 : f32 to vector<16x96xf32>
    %36 = arith.cmpf ogt, %33, %35 : vector<16x96xf32>
    %37 = vector.broadcast %34 : f32 to vector<16x96xf32>
    %38 = arith.mulf %37, %33 : vector<16x96xf32>
    %39 = arith.select %36, %33, %38 : vector<16x96xi1>, vector<16x96xf32>
    %40 = vector.shape_cast %39 : vector<16x96xf32> to vector<4x4x96xf32>
    %c0_34 = arith.constant 0 : index
    %c0_35 = arith.constant 0 : index
    %c0_36 = arith.constant 0 : index
    %c0_37 = arith.constant 0 : index
    %41 = vector.load %arg7[%c0_34, %c0_35, %c0_36, %c0_37] : memref<1x4x4x96xf32, #tpu.memory_space<vmem>>, vector<1x4x4x96xf32>
    %42 = vector.shape_cast %41 : vector<1x4x4x96xf32> to vector<4x4x96xf32>
    %43 = vector.shape_cast %40 : vector<4x4x96xf32> to vector<1x4x4x96xf32>
    tpu.vector_store %arg7[%c0_34, %c0_35, %c0_36, %c0_37], %43 {strides = array<i32>} : memref<1x4x4x96xf32, #tpu.memory_space<vmem>>, vector<1x4x4x96xf32>,
    return
  }
  func.func @transform_0(%arg0: i32, %arg1: i32) -> (i32, i32, i32, i32) {
    %c0_i32 = arith.constant 0 : i32
    %c0_i32_0 = arith.constant 0 : i32
    %c0_i32_1 = arith.constant 0 : i32
    return %arg0, %arg1, %c0_i32, %c0_i32_0 : i32, i32, i32, i32
  }
  func.func @transform_1(%arg0: i32, %arg1: i32) -> (i32, i32, i32, i32) {
    %c1_i32 = arith.constant 1 : i32
    %0 = arith.addi %arg1, %c1_i32 : i32
    %c2_i32 = arith.constant 2 : i32
    %1 = arith.muli %0, %c2_i32 : i32
    %c0_i32 = arith.constant 0 : i32
    %c0_i32_0 = arith.constant 0 : i32
    %c0_i32_1 = arith.constant 0 : i32
    return %arg0, %1, %c0_i32, %c0_i32_0 : i32, i32, i32, i32
  }
  func.func @transform_2(%arg0: i32, %arg1: i32) -> (i32, i32, i32) {
    %c0_i32 = arith.constant 0 : i32
    %c0_i32_0 = arith.constant 0 : i32
    %c0_i32_1 = arith.constant 0 : i32
    %c0_i32_2 = arith.constant 0 : i32
    return %c0_i32, %c0_i32_0, %c0_i32_1 : i32, i32, i32
  }
  func.func @transform_3(%arg0: i32, %arg1: i32) -> (i32, i32) {
    %c0_i32 = arith.constant 0 : i32
    %c0_i32_0 = arith.constant 0 : i32
    %c0_i32_1 = arith.constant 0 : i32
    return %c0_i32, %c0_i32_0 : i32, i32
  }
  func.func @transform_4(%arg0: i32, %arg1: i32) -> i32 {
    %c0_i32 = arith.constant 0 : i32
    %c0_i32_0 = arith.constant 0 : i32
    return %c0_i32 : i32
  }
  func.func @transform_5(%arg0: i32, %arg1: i32) -> (i32, i32, i32, i32) {
    %c0_i32 = arith.constant 0 : i32
    %c0_i32_0 = arith.constant 0 : i32
    %c0_i32_1 = arith.constant 0 : i32
    return %arg0, %arg1, %c0_i32, %c0_i32_0 : i32, i32, i32, i32
  }
}

</mosaic_0001>

<bundles_post_ra>
// kernel: feature_extractor.8
= control target key start
LH: loop header
LB: loop body
LE: loop exit
PB: predicated region body
PF: predicated region fallthrough
CT: control target
= control target key end

     0   :  { %s1677_s20 = smov 0   ;;  %s1679_s21 = smov 0   ;;  %s1979_s0 = inlined_call_operand.vmem [shape: f32[2,18,18,32], index: 0, kind: input, shape index: {}, may-alias: {0,1}]   ;;  %s1980_s1 = inlined_call_operand.vmem [shape: f32[2,18,18,32], index: 1, kind: input, shape index: {}, may-alias: {0,1}]   ;;  %s1981_s2 = inlined_call_operand.vmem [shape: bf16[3,96,64], index: 2, kind: input, shape index: {}]   ;;  %s1982_s3 = inlined_call_operand.vmem [shape: f32[1,64], index: 3, kind: input, shape index: {}]   ;;  %s1983_s4 = inlined_call_operand.<no memory space> [shape: f32[1], index: 4, kind: input, shape index: {}]   ;;  %s1984_s5 = inlined_call_operand.vmem [shape: f32[2,8,8,64], index: 5, kind: output, shape index: {}]  }
   0x1   :  { %10 = sst [smem:[#allocation3]] %s1983_s4  ;;  %s1681_s22 = smov 0  }
   0x2 LB: > { %s28_s4 = sadd.s32 1, %s1636_s21  ;;  %p1300_p0 = scmp.ge.s32.totalorder %s1640_s22, 1  ;;  %s1640_s22 = sphi %s1681_s22, %s16_s22   ;;  %s1636_s21 = sphi %s1679_s21, %s1986_s21   ;;  %s1632_s20 = sphi %s1677_s20, %s1985_s20  }
   0x3   : > { %p30_p1 = scmp.ge.s32.totalorder %s28_s4, 2  ;;  %p246_p2 = scmp.lt.s32.totalorder %s1640_s22, 3 }
   0x5   : > { %s1988_s4 = smov (%p30_p1, %s28_s4), 0  ;;  %p247_p3 = pnand %p1300_p0, %p246_p2 }
   0x6   : > { %p306_p4 = scmp.lt.s32.totalorder (!%p247_p3), %s1632_s20, 1  ;;  %v1600_v0 = vld [vmem:[%s1981_s2] sm:$0xff] (!%p247_p3)   ;;  %v1601_v1 = vld [vmem:[%s1981_s2 + $0x30] sm:$0xff] (!%p247_p3)   ;;  %v1602_v2 = vld [vmem:[%s1981_s2 + $0x8] sm:$0xff] (!%p247_p3)   ;;  %vm395_vm0 = vcmask (!%p247_p3), 261120   ;;  %vm398_vm1 = vcmask (!%p247_p3), 254976  }
   0x7   : > { %250 = sbr.rel (%p247_p3) target bundleno = 417 (0x1a1), region = 40  ;;  %1395 = vmatprep.subr.bf16.mxu1 (!%p247_p3), %v1600_v0  ;;  %1415 = vmatprep.subr.bf16.mxu0 (!%p247_p3), %v1601_v1  ;;  %v1603_v3 = vld [vmem:[%s1981_s2 + $0x38] sm:$0xff] (!%p247_p3)   ;;  %v1604_v4 = vld [vmem:[%s1981_s2 + $0x10] sm:$0xff] (!%p247_p3)   ;;  %v1605_v5 = vld [vmem:[%s1981_s2 + $0x40] sm:$0xff] (!%p247_p3)   ;;  %s1642_s14 = smov (!%p247_p3), 32   ;;  %vm712_vm2 = vcmask (!%p247_p3), 523264  }
   0x8   : > { %1396 = vmatpush3.bf16.msra.mxu1 (!%p247_p3), %v1600_v0  ;;  %1416 = vmatpush3.bf16.msra.mxu0 (!%p247_p3), %v1601_v1  ;;  %s1643_s19 = smov (!%p247_p3), 64   ;;  %vm789_vm3 = vcmask (!%p247_p3), 785408   ;;  %s1151_s27 = sld [smem:[#allocation3]] (!%p247_p3) }
   0x9   : > { %1397 = vmatprep.subr.bf16.mxu1 (!%p247_p3), %v1602_v2  ;;  %1417 = vmatprep.subr.bf16.mxu0 (!%p247_p3), %v1603_v3 }
   0xc   : > { %1398 = vmatpush3.bf16.msra.mxu1 (!%p247_p3), %v1602_v2  ;;  %1418 = vmatpush3.bf16.msra.mxu0 (!%p247_p3), %v1603_v3 }
   0xd   : > { %1399 = vmatprep.subr.bf16.mxu1 (!%p247_p3), %v1604_v4  ;;  %1419 = vmatprep.subr.bf16.mxu0 (!%p247_p3), %v1605_v5 }
   0xe   : > { %s1990_s20 = smov (!%p306_p4, %s1632_s20), 1 }
   0xf   : > { %s1491_s29 = smul.u32 432, %s1990_s20  ;;  %s1364_s28 = sshll.u32 %s1990_s20, 6 }
  0x10   : > { %1400 = vmatpush3.bf16.msra.mxu1 %v1604_v4  ;;  %1420 = vmatpush3.bf16.msra.mxu0 %v1605_v5  ;;  %s1952_s6 = scalar_lea.vmem %s1984_s5, %s1364_s28 }
  0x11   : > { %s1715_s9 = scalar_lea.vmem %s1979_s0, %s1491_s29  ;;  %s1363_s15 = sadd.s32 384, %s1491_s29 }
  0x12   : > { %v359_v6 = vld [vmem:[%s1715_s9 + $0x60] sm:$0xff]  ;;  %v360_v7 = vld [vmem:[%s1715_s9 + $0x68] sm:$0xff]  ;;  %v362_v8 = vld [vmem:[%s1715_s9 + $0x78] sm:$0xff]  ;;  %s332_s18 = scalar_lea.vmem %s1980_s1, %s1363_s15 }
  0x13   : > { %v363_v9 = vld [vmem:[%s1715_s9 + $0x80] sm:$0xff]  ;;  %409 = vst.msk [vmem:[#allocation2 + $0x60] sm:$0xff] %vm395_vm0, %v359_v6  ;;  %410 = vst.msk [vmem:[#allocation2 + $0x68] sm:$0xff] %vm395_vm0, %v360_v7  ;;  %v348_v11 = vld [vmem:[%s1715_s9 + $0x8] sm:$0xff] }
  0x14   : > { %412 = vst.msk [vmem:[#allocation2 + $0x78] sm:$0xff] %vm395_vm0, %v362_v8  ;;  %v347_v10 = vld [vmem:[%s1715_s9] sm:$0xff]  ;;  %413 = vst.msk [vmem:[#allocation2 + $0x80] sm:$0xff] %vm395_vm0, %v363_v9  ;;  %v350_v12 = vld [vmem:[%s1715_s9 + $0x18] sm:$0xff] }
  0x15   : > { %v351_v13 = vld [vmem:[%s1715_s9 + $0x20] sm:$0xff]  ;;  %396 = vst.msk [vmem:[#allocation2] sm:$0xff] %vm395_vm0, %v347_v10  ;;  %397 = vst.msk [vmem:[#allocation2 + $0x8] sm:$0xff] %vm395_vm0, %v348_v11  ;;  %v365_v14 = vld [vmem:[%s1715_s9 + $0x90] sm:$0xff] }
  0x16   : > { %400 = vst.msk [vmem:[#allocation2 + $0x18] sm:$0xff] %vm395_vm0, %v350_v12  ;;  %401 = vst.msk [vmem:[#allocation2 + $0x20] sm:$0xff] %vm395_vm0, %v351_v13  ;;  %v366_v15 = vld [vmem:[%s1715_s9 + $0x98] sm:$0xff]  ;;  %v368_v16 = vld [vmem:[%s1715_s9 + $0xa8] sm:$0xff] }
  0x17   : > { %v369_v17 = vld [vmem:[%s1715_s9 + $0xb0] sm:$0xff]  ;;  %415 = vst.msk [vmem:[#allocation2 + $0x90] sm:$0xff] %vm395_vm0, %v365_v14  ;;  %416 = vst.msk [vmem:[#allocation2 + $0x98] sm:$0xff] %vm395_vm0, %v366_v15  ;;  %v354_v19 = vld [vmem:[%s1715_s9 + $0x38] sm:$0xff] }
  0x18   : > { %418 = vst.msk [vmem:[#allocation2 + $0xa8] sm:$0xff] %vm395_vm0, %v368_v16  ;;  %419 = vst.msk [vmem:[#allocation2 + $0xb0] sm:$0xff] %vm395_vm0, %v369_v17  ;;  %v353_v18 = vld [vmem:[%s1715_s9 + $0x30] sm:$0xff]  ;;  %v356_v20 = vld [vmem:[%s1715_s9 + $0x48] sm:$0xff] }
  0x19   : > { %v357_v21 = vld [vmem:[%s1715_s9 + $0x50] sm:$0xff]  ;;  %403 = vst.msk [vmem:[#allocation2 + $0x30] sm:$0xff] %vm395_vm0, %v353_v18  ;;  %404 = vst.msk [vmem:[#allocation2 + $0x38] sm:$0xff] %vm395_vm0, %v354_v19  ;;  %v355_v22 = vld [vmem:[%s1715_s9 + $0x40] sm:$0x3] }
  0x1a   : > { %406 = vst.msk [vmem:[#allocation2 + $0x48] sm:$0xff] %vm395_vm0, %v356_v20  ;;  %v358_v23 = vld [vmem:[%s1715_s9 + $0x58] sm:$0x3]  ;;  %407 = vst.msk [vmem:[#allocation2 + $0x50] sm:$0xff] %vm395_vm0, %v357_v21  ;;  %v349_v24 = vld [vmem:[%s1715_s9 + $0x10] sm:$0x3] }
  0x1b   : > { %405 = vst.msk [vmem:[#allocation2 + $0x40] sm:$0x3] %vm398_vm1, %v355_v22  ;;  %408 = vst.msk [vmem:[#allocation2 + $0x58] sm:$0x3] %vm398_vm1, %v358_v23  ;;  %v352_v25 = vld [vmem:[%s1715_s9 + $0x28] sm:$0x3] }
  0x1c   : > { %v367_v26 = vld [vmem:[%s1715_s9 + $0xa0] sm:$0x3]  ;;  %399 = vst.msk [vmem:[#allocation2 + $0x10] sm:$0x3] %vm398_vm1, %v349_v24  ;;  %402 = vst.msk [vmem:[#allocation2 + $0x28] sm:$0x3] %vm398_vm1, %v352_v25 }
  0x1d   : > { %v370_v27 = vld [vmem:[%s1715_s9 + $0xb8] sm:$0x3]  ;;  %417 = vst.msk [vmem:[#allocation2 + $0xa0] sm:$0x3] %vm398_vm1, %v367_v26  ;;  %v361_v28 = vld [vmem:[%s1715_s9 + $0x70] sm:$0x3] }
  0x1e   : > { %v364_v29 = vld [vmem:[%s1715_s9 + $0x88] sm:$0x3]  ;;  %420 = vst.msk [vmem:[#allocation2 + $0xb8] sm:$0x3] %vm398_vm1, %v370_v27  ;;  %411 = vst.msk [vmem:[#allocation2 + $0x70] sm:$0x3] %vm398_vm1, %v361_v28 }
  0x1f   : > { %v500_v30 = vld [vmem:[#allocation2 + $0x61] ss:$2 sm:$0xff]  ;;  %414 = vst.msk [vmem:[#allocation2 + $0x88] sm:$0x3] %vm398_vm1, %v364_v29  ;;  %v377_v31 = vld [vmem:[%s1715_s9 + $0xf0] sm:$0xff]  ;;  %v378_v32 = vld [vmem:[%s1715_s9 + $0xf8] sm:$0xff] }
  0x20   : > { %v502_v33 = vld [vmem:[#allocation2 + $0x79] ss:$2 sm:$0xff]  ;;  %v380_v35 = vld [vmem:[%s1715_s9 + $0x108] sm:$0xff]  ;;  %427 = vst.msk [vmem:[#allocation2 + $0xf0] sm:$0xff] %vm395_vm0, %v377_v31  ;;  %428 = vst.msk [vmem:[#allocation2 + $0xf8] sm:$0xff] %vm395_vm0, %v378_v32 }
  0x21   : > { %v492_v34 = vld [vmem:[#allocation2 + $0x1] ss:$2 sm:$0xff]  ;;  %v1530_v36 = vpack.i.bf16 %v502_v33, %v500_v30  ;;  %v381_v38 = vld [vmem:[%s1715_s9 + $0x110] sm:$0xff]  ;;  %430 = vst.msk [vmem:[#allocation2 + $0x108] sm:$0xff] %vm395_vm0, %v380_v35  ;;  %v374_v46 = vld [vmem:[%s1715_s9 + $0xd8] sm:$0xff] }
  0x22   : > { %v494_v37 = vld [vmem:[#allocation2 + $0x19] ss:$2 sm:$0xff]  ;;  %v506_v42 = vld [vmem:[#allocation2 + $0xa9] ss:$2 sm:$0xff]  ;;  %431 = vst.msk [vmem:[#allocation2 + $0x110] sm:$0xff] %vm395_vm0, %v381_v38  ;;  %424 = vst.msk [vmem:[#allocation2 + $0xd8] sm:$0xff] %vm395_vm0, %v374_v46 }
  0x23   : > { %v371_v39 = vld [vmem:[%s1715_s9 + $0xc0] sm:$0xff]  ;;  %v1520_v40 = vpack.i.bf16 %v494_v37, %v492_v34  ;;  %v504_v41 = vld [vmem:[#allocation2 + $0x91] ss:$2 sm:$0xff]  ;;  %v372_v43 = vld [vmem:[%s1715_s9 + $0xc8] sm:$0xff]  ;;  %1531 = vrot.lane.b32.xlu1 %v1530_v36, %s1642_s14 }
  0x24   : > { %421 = vst.msk [vmem:[#allocation2 + $0xc0] sm:$0xff] %vm395_vm0, %v371_v39  ;;  %v1535_v44 = vpack.i.bf16 %v506_v42, %v504_v41  ;;  %v496_v45 = vld [vmem:[#allocation2 + $0x31] ss:$2 sm:$0xff]  ;;  %v375_v47 = vld [vmem:[%s1715_s9 + $0xe0] sm:$0xff]  ;;  %422 = vst.msk [vmem:[#allocation2 + $0xc8] sm:$0xff] %vm395_vm0, %v372_v43 }
  0x25   : > { %1521 = vrot.lane.b32.xlu0 %v1520_v40, %s1642_s14  ;;  %v498_v48 = vld [vmem:[#allocation2 + $0x49] ss:$2 sm:$0xff]  ;;  %v530_v49 = vld [vmem:[#allocation2 + $0x32] ss:$2 sm:$0xff]  ;;  %425 = vst.msk [vmem:[#allocation2 + $0xe0] sm:$0xff] %vm395_vm0, %v375_v47 }
  0x26   : > { %v532_v50 = vld [vmem:[#allocation2 + $0x4a] ss:$2 sm:$0xff]  ;;  %v1525_v51 = vpack.i.bf16 %v498_v48, %v496_v45  ;;  %v528_v53 = vld [vmem:[#allocation2 + $0x1a] ss:$2 sm:$0xff] }
  0x27   : > { %v526_v52 = vld [vmem:[#allocation2 + $0x2] ss:$2 sm:$0xff]  ;;  %v538_v54 = vld [vmem:[#allocation2 + $0x92] ss:$2 sm:$0xff]  ;;  %1536 = vrot.lane.b32.xlu1 %v1535_v44, %s1642_s14  ;;  %v1545_v56 = vpack.i.bf16 %v532_v50, %v530_v49  ;;  %v512_v3 = vld [vmem:[#allocation2 + $0xf1] ss:$2 sm:$0xff] }
  0x28   : > { %v540_v55 = vld [vmem:[#allocation2 + $0xaa] ss:$2 sm:$0xff]  ;;  %v1540_v60 = vpack.i.bf16 %v528_v53, %v526_v52  ;;  %v383_v63 = vld [vmem:[%s1715_s9 + $0x120] sm:$0xff]  ;;  %v376_v13 = vld [vmem:[%s1715_s9 + $0xe8] sm:$0x3] }
  0x29   : > { %v534_v57 = vld [vmem:[#allocation2 + $0x62] ss:$2 sm:$0xff]  ;;  %v390_v59 = vld [vmem:[%s1715_s9 + $0x158] sm:$0xff]  ;;  %1526 = vrot.lane.b32.xlu0 %v1525_v51, %s1642_s14  ;;  %433 = vst.msk [vmem:[#allocation2 + $0x120] sm:$0xff] %vm395_vm0, %v383_v63  ;;  %v514_v4 = vld [vmem:[#allocation2 + $0x109] ss:$2 sm:$0xff]  ;;  %v1555_v7 = vpack.i.bf16 %v540_v55, %v538_v54 }
  0x2a   : > { %v389_v58 = vld [vmem:[%s1715_s9 + $0x150] sm:$0xff]  ;;  %v392_v61 = vld [vmem:[%s1715_s9 + $0x168] sm:$0xff]  ;;  %440 = vst.msk [vmem:[#allocation2 + $0x158] sm:$0xff] %vm395_vm0, %v390_v59  ;;  %v386_v2 = vld [vmem:[%s1715_s9 + $0x138] sm:$0xff]  ;;  %v1565_v20 = vpack.i.bf16 %v514_v4, %v512_v3 }
  0x2b   : > { %v393_v62 = vld [vmem:[%s1715_s9 + $0x170] sm:$0xff]  ;;  %439 = vst.msk [vmem:[#allocation2 + $0x150] sm:$0xff] %vm395_vm0, %v389_v58  ;;  %v536_v0 = vld [vmem:[#allocation2 + $0x7a] ss:$2 sm:$0xff]  ;;  %442 = vst.msk [vmem:[#allocation2 + $0x168] sm:$0xff] %vm395_vm0, %v392_v61  ;;  %1546 = vrot.lane.b32.xlu1 %v1545_v56, %s1643_s19 }
  0x2c   : > { %443 = vst.msk [vmem:[#allocation2 + $0x170] sm:$0xff] %vm395_vm0, %v393_v62  ;;  %v384_v1 = vld [vmem:[%s1715_s9 + $0x128] sm:$0xff]  ;;  %v387_v5 = vld [vmem:[%s1715_s9 + $0x140] sm:$0xff]  ;;  %436 = vst.msk [vmem:[#allocation2 + $0x138] sm:$0xff] %vm395_vm0, %v386_v2  ;;  %v1550_v12 = vpack.i.bf16 %v536_v0, %v534_v57 }
  0x2d   : > { %434 = vst.msk [vmem:[#allocation2 + $0x128] sm:$0xff] %vm395_vm0, %v384_v1  ;;  %v379_v6 = vld [vmem:[%s1715_s9 + $0x100] sm:$0x3]  ;;  %437 = vst.msk [vmem:[#allocation2 + $0x140] sm:$0xff] %vm395_vm0, %v387_v5  ;;  %v382_v10 = vld [vmem:[%s1715_s9 + $0x118] sm:$0x3]  ;;  %1541 = vrot.lane.b32.xlu0 %v1540_v60, %s1643_s19 }
  0x2e   : > { %v508_v8 = vld [vmem:[#allocation2 + $0xc1] ss:$2 sm:$0xff]  ;;  %429 = vst.msk [vmem:[#allocation2 + $0x100] sm:$0x3] %vm398_vm1, %v379_v6  ;;  %v373_v11 = vld [vmem:[%s1715_s9 + $0xd0] sm:$0x3] }
  0x2f   : > { %v510_v9 = vld [vmem:[#allocation2 + $0xd9] ss:$2 sm:$0xff]  ;;  %432 = vst.msk [vmem:[#allocation2 + $0x118] sm:$0x3] %vm398_vm1, %v382_v10  ;;  %423 = vst.msk [vmem:[#allocation2 + $0xd0] sm:$0x3] %vm398_vm1, %v373_v11  ;;  %1556 = vrot.lane.b32.xlu1 %v1555_v7, %s1643_s19 }
  0x30   : > { %v391_v14 = vld [vmem:[%s1715_s9 + $0x160] sm:$0x3]  ;;  %v394_v15 = vld [vmem:[%s1715_s9 + $0x178] sm:$0x3]  ;;  %426 = vst.msk [vmem:[#allocation2 + $0xe8] sm:$0x3] %vm398_vm1, %v376_v13  ;;  %v1560_v22 = vpack.i.bf16 %v510_v9, %v508_v8 }
  0x31   : > { %441 = vst.msk [vmem:[#allocation2 + $0x160] sm:$0x3] %vm398_vm1, %v391_v14  ;;  %444 = vst.msk [vmem:[#allocation2 + $0x178] sm:$0x3] %vm398_vm1, %v394_v15  ;;  %v385_v16 = vld [vmem:[%s1715_s9 + $0x130] sm:$0x3]  ;;  %1551 = vrot.lane.b32.xlu0 %v1550_v12, %s1643_s19 }
  0x32   : > { %v388_v17 = vld [vmem:[%s1715_s9 + $0x148] sm:$0x3]  ;;  %v445_v18 = vld [vmem:[%s332_s18] sm:$0xff]  ;;  %435 = vst.msk [vmem:[#allocation2 + $0x130] sm:$0x3] %vm398_vm1, %v385_v16  ;;  %v1606_v33 = vld [vmem:[%s1981_s2 + $0x18] sm:$0xff]  }
  0x33   : > { %438 = vst.msk [vmem:[#allocation2 + $0x148] sm:$0x3] %vm398_vm1, %v388_v17  ;;  %v446_v19 = vld [vmem:[%s332_s18 + $0x8] sm:$0xff]  ;;  %v447_v21 = vld [vmem:[%s332_s18 + $0x10] sm:$0x3]  ;;  %1566 = vrot.lane.b32.xlu1 %v1565_v20, %s1642_s14  ;;  %1401 = vmatprep.subr.bf16.mxu1 %v1606_v33  ;;  %v1608_v41 = vld [vmem:[%s1981_s2 + $0x20] sm:$0xff]  }
  0x34   : > { %452 = vst.msk [vmem:[#allocation2 + $0x180] sm:$0xff] %vm395_vm0, %v445_v18  ;;  %453 = vst.msk [vmem:[#allocation2 + $0x188] sm:$0xff] %vm395_vm0, %v446_v19  ;;  %v520_v23 = vld [vmem:[#allocation2 + $0x151] ss:$2 sm:$0xff]  ;;  %v516_v25 = vld [vmem:[#allocation2 + $0x121] ss:$2 sm:$0xff]  ;;  %1402 = vmatpush3.bf16.msra.mxu1 %v1606_v33 }
  0x35   : > { %v522_v24 = vld [vmem:[#allocation2 + $0x169] ss:$2 sm:$0xff]  ;;  %454 = vst.msk [vmem:[#allocation2 + $0x190] sm:$0x3] %vm398_vm1, %v447_v21  ;;  %v518_v26 = vld [vmem:[#allocation2 + $0x139] ss:$2 sm:$0xff]  ;;  %1561 = vrot.lane.b32.xlu0 %v1560_v22, %s1642_s14  ;;  %1403 = vmatprep.subr.bf16.mxu1 %v1608_v41 }
  0x36   : > { %v1575_v27 = vpack.i.bf16 %v522_v24, %v520_v23  ;;  %v1570_v28 = vpack.i.bf16 %v518_v26, %v516_v25  ;;  %v546_v29 = vld [vmem:[#allocation2 + $0xf2] ss:$2 sm:$0xff]  ;;  %v542_v31 = vld [vmem:[#allocation2 + $0xc2] ss:$2 sm:$0xff] }
  0x37   : > { %v548_v30 = vld [vmem:[#allocation2 + $0x10a] ss:$2 sm:$0xff]  ;;  %v544_v32 = vld [vmem:[#allocation2 + $0xda] ss:$2 sm:$0xff] }
  0x38   : > { %v554_v34 = vld [vmem:[#allocation2 + $0x152] ss:$2 sm:$0xff]  ;;  %1576 = vrot.lane.b32.xlu1 %v1575_v27, %s1642_s14  ;;  %v1585_v36 = vpack.i.bf16 %v548_v30, %v546_v29  ;;  %v1607_v39 = vld [vmem:[%s1981_s2 + $0x48] sm:$0xff]   ;;  %v1580_v40 = vpack.i.bf16 %v544_v32, %v542_v31  ;;  %1404 = vmatpush3.bf16.msra.mxu1 %v1608_v41 }
  0x39   : > { %v556_v35 = vld [vmem:[#allocation2 + $0x16a] ss:$2 sm:$0xff]  ;;  %1571 = vrot.lane.b32.xlu0 %v1570_v28, %s1642_s14  ;;  %1421 = vmatprep.subr.bf16.mxu0 %v1607_v39  ;;  %v1863_v47 = vld [vmem:[%s1981_s2 + $0x60] sm:$0xff]  }
  0x3a   : > { %v550_v37 = vld [vmem:[#allocation2 + $0x122] ss:$2 sm:$0xff]  ;;  %1422 = vmatpush3.bf16.msra.mxu0 %v1607_v39  ;;  %v1595_v44 = vpack.i.bf16 %v556_v35, %v554_v34  ;;  %v1611_v46 = vld [vmem:[%s1981_s2 + $0x58] sm:$0xff]  }
  0x3b   : > { %v552_v38 = vld [vmem:[#allocation2 + $0x13a] ss:$2 sm:$0xff]  ;;  %v1609_v42 = vld [vmem:[%s1981_s2 + $0x50] sm:$0xff]   ;;  %v524_v49 = vld [vmem:[#allocation2 + $0x181] ss:$2 sm:$0xff] }
  0x3c   : > { %v1610_v43 = vld [vmem:[%s1981_s2 + $0x28] sm:$0xff]   ;;  %1586 = vrot.lane.b32.xlu1 %v1585_v36, %s1643_s19  ;;  %1423 = vmatprep.subr.bf16.mxu0 %v1609_v42  ;;  %v1590_v45 = vpack.i.bf16 %v552_v38, %v550_v37  ;;  %v462_v58 = vld [vmem:[#allocation2 + $0x30] ss:$2 sm:$0xff] }
  0x3d   : > { %1581 = vrot.lane.b32.xlu0 %v1580_v40, %s1643_s19  ;;  %1405 = vmatprep.subr.bf16.mxu1 %v1610_v43  ;;  %v558_v48 = vld [vmem:[#allocation2 + $0x182] ss:$2 sm:$0xff] }
  0x3e   : > { %1424 = vmatpush3.bf16.msra.mxu0 %v1609_v42  ;;  %1406 = vmatpush3.bf16.msra.mxu1 %v1610_v43  ;;  %v464_v59 = vld [vmem:[#allocation2 + $0x48] ss:$2 sm:$0xff]  ;;  %v460_v0 = vld [vmem:[#allocation2 + $0x18] ss:$2 sm:$0xff] }
  0x3f   : > { %1425 = vmatprep.subr.bf16.mxu0 %v1611_v46  ;;  %1455 = vmatprep.subr.bf16.mxu1 %v1863_v47  ;;  %v458_v63 = vld [vmem:[#allocation2] ss:$2 sm:$0xff]  ;;  %v470_v11 = vld [vmem:[#allocation2 + $0x90] ss:$2 sm:$0xff] }
  0x40   : > { %1596 = vrot.lane.b32.xlu1 %v1595_v44, %s1643_s19  ;;  %v468_v1 = vld [vmem:[#allocation2 + $0x78] ss:$2 sm:$0xff]  ;;  %v472_v12 = vld [vmem:[#allocation2 + $0xa8] ss:$2 sm:$0xff] }
  0x41   : > { %1591 = vrot.lane.b32.xlu0 %v1590_v45, %s1643_s19  ;;  %v466_v18 = vld [vmem:[#allocation2 + $0x60] ss:$2 sm:$0xff]  ;;  %v478_v44 = vld [vmem:[#allocation2 + $0xf0] ss:$2 sm:$0xff] }
  0x42   : > { %1426 = vmatpush3.bf16.msra.mxu0 %v1611_v46  ;;  %v1613_v40 = vld [vmem:[%s1981_s2 + $0x68] sm:$0xff]  }
  0x43   : > { %1435 = vmatprep.subr.bf16.mxu0 %v1863_v47  ;;  %v480_v45 = vld [vmem:[#allocation2 + $0x108] ss:$2 sm:$0xff] }
  0x44   : > { %676 = vrot.lane.b32.xlu1 %v558_v48, %s1643_s19 }
  0x45   : > { %608 = vrot.lane.b32.xlu0 %v524_v49, %s1642_s14  ;;  %v1614_v49 = vld [vmem:[%s1981_s2 + $0x70] sm:$0xff]  }
  0x95   : > { %v1532_v50 = vpop.permute.xlu1 %1531 }
  0x96   : > { %v1534_v60 = vunpack.i.h.bf16 %v1532_v50  ;;  %v1533_v61 = vunpack.i.l.bf16 %v1532_v50  ;;  %v476_v50 = vld [vmem:[#allocation2 + $0xd8] ss:$2 sm:$0xff] }
  0x97   : > { %v1522_v51 = vpop.permute.xlu0 %1521 }
  0x98   : > { %v1524_v56 = vunpack.i.h.bf16 %v1522_v51  ;;  %v1523_v57 = vunpack.i.l.bf16 %v1522_v51  ;;  %v700_v17 = vsel %vm395_vm0, %v468_v1, %v1534_v60  ;;  %v699_v31 = vsel %vm395_vm0, %v466_v18, %v1533_v61  ;;  %v1615_v60 = vld [vmem:[%s1981_s2 + $0x78] sm:$0xff]   ;;  %v1616_v18 = vld [vmem:[%s1981_s2 + $0x80] sm:$0xff]  }
  0x99   : > { %v1537_v52 = vpop.permute.xlu1 %1536 }
  0x9a   : > { %v1539_v2 = vunpack.i.h.bf16 %v1537_v52  ;;  %v1538_v3 = vunpack.i.l.bf16 %v1537_v52  ;;  %v695_v13 = vsel %vm395_vm0, %v458_v63, %v1523_v57  ;;  %v696_v15 = vsel %vm395_vm0, %v460_v0, %v1524_v56  ;;  %v474_v52 = vld [vmem:[#allocation2 + $0xc0] ss:$2 sm:$0xff] }
  0x9b   : > { %v1527_v53 = vpop.permute.xlu0 %1526 }
  0x9c   : > { %v1529_v54 = vunpack.i.h.bf16 %v1527_v53  ;;  %v1528_v55 = vunpack.i.l.bf16 %v1527_v53  ;;  %v702_v27 = vsel %vm395_vm0, %v472_v12, %v1539_v2  ;;  %v701_v28 = vsel %vm395_vm0, %v470_v11, %v1538_v3 }
  0x9d   : > { %v1547_v62 = vpop.permute.xlu1 %1546 }
  0x9e   : > { %v1549_v4 = vunpack.i.h.bf16 %v1547_v62  ;;  %v1548_v5 = vunpack.i.l.bf16 %v1547_v62  ;;  %v697_v9 = vsel %vm395_vm0, %v462_v58, %v1528_v55  ;;  %v698_v10 = vsel %vm395_vm0, %v464_v59, %v1529_v54  ;;  %v488_v62 = vld [vmem:[#allocation2 + $0x168] ss:$2 sm:$0xff] }
  0x9f   : > { %v1542_v6 = vpop.permute.xlu0 %1541 }
  0xa0   : > { %v1544_v7 = vunpack.i.h.bf16 %v1542_v6  ;;  %v1543_v8 = vunpack.i.l.bf16 %v1542_v6  ;;  %v1874_v14 = vsel %vm712_vm2, %v697_v9, %v1548_v5  ;;  %v716_v16 = vsel %vm712_vm2, %v698_v10, %v1549_v4  ;;  %v486_v6 = vld [vmem:[#allocation2 + $0x150] ss:$2 sm:$0xff] }
  0xa1   : > { %v1557_v19 = vpop.permute.xlu1 %1556 }
  0xa2   : > { %v713_v20 = vsel %vm712_vm2, %v695_v13, %v1543_v8  ;;  %v714_v21 = vsel %vm712_vm2, %v696_v15, %v1544_v7  ;;  %v1559_v22 = vunpack.i.h.bf16 %v1557_v19  ;;  %v1558_v23 = vunpack.i.l.bf16 %v1557_v19  ;;  %v482_v7 = vld [vmem:[#allocation2 + $0x120] ss:$2 sm:$0xff] }
  0xa3   : > { %v1552_v24 = vpop.permute.xlu0 %1551  ;;  %v737_v25 = vpack.c.bf16 %v1874_v14, %v713_v20  ;;  %v875_v26 = vpack.c.bf16 %v716_v16, %v714_v21  ;;  %v484_v8 = vld [vmem:[#allocation2 + $0x138] ss:$2 sm:$0xff] }
  0xa4   : > { %v1554_v29 = vunpack.i.h.bf16 %v1552_v24  ;;  %v1553_v30 = vunpack.i.l.bf16 %v1552_v24  ;;  %v720_v32 = vsel %vm712_vm2, %v702_v27, %v1559_v22  ;;  %v1887_v33 = vsel %vm712_vm2, %v701_v28, %v1558_v23  ;;  %v490_v27 = vld [vmem:[#allocation2 + $0x180] ss:$2 sm:$0xff] }
  0xa5   : > { %1407 = vmatprep.mubr.msk.bf16.mxu1 %vm789_vm3, %v737_v25  ;;  %1427 = vmatprep.mubr.msk.bf16.mxu0 %vm789_vm3, %v875_v26  ;;  %v1567_v36 = vpop.permute.xlu1 %1566 }
  0xa6   : > { %v718_v34 = vsel %vm712_vm2, %v700_v17, %v1554_v29  ;;  %v1893_v35 = vsel %vm712_vm2, %v699_v31, %v1553_v30  ;;  %v1569_v41 = vunpack.i.h.bf16 %v1567_v36  ;;  %v1568_v42 = vunpack.i.l.bf16 %v1567_v36  ;;  %v1617_v36 = vld [vmem:[%s1981_s2 + $0x88] sm:$0xff]  }
  0xa7   : > { %v876_v37 = vpack.c.bf16 %v720_v32, %v718_v34  ;;  %v738_v38 = vpack.c.bf16 %v1887_v33, %v1893_v35  ;;  %v1562_v39 = vpop.permute.xlu0 %1561 }
  0xa8   : > { %v1564_v46 = vunpack.i.h.bf16 %v1562_v39  ;;  %v1563_v51 = vunpack.i.l.bf16 %v1562_v39  ;;  %v706_v53 = vsel %vm395_vm0, %v480_v45, %v1569_v41  ;;  %v705_v54 = vsel %vm395_vm0, %v478_v44, %v1568_v42  ;;  %v1305_v45 = vld [vmem:[%s1982_s3] ss:$0 sm:$0xff] }
  0xa9   : > { %1408 = vmatmul.mubr.msk.bf16.vlgmr.msra.gmra.mrb[0].mxu1 %vm789_vm3, %v738_v38  ;;  %1428 = vmatmul.mubr.msk.bf16.vlgmr.msra.gmra.mrb[0].mxu0 %vm789_vm3, %v876_v37  ;;  %v1013_v37 = vpack.c.bf16 %v1893_v35, %v1874_v14 }
  0xaa   : > { %1436 = vmatpush3.bf16.msra.mxu0 %v1863_v47  ;;  %1461 = vmatpush3.bf16.msra.mxu1 %v1863_v47  ;;  %v1577_v43 = vpop.permute.xlu1 %1576  ;;  %v704_v55 = vsel %vm395_vm0, %v476_v50, %v1564_v46  ;;  %v703_v61 = vsel %vm395_vm0, %v474_v52, %v1563_v51 }
  0xab   : > { %v1572_v48 = vpop.permute.xlu0 %1571  ;;  %1437 = vmatprep.subr.bf16.mxu0 %v1613_v40  ;;  %1456 = vmatprep.subr.bf16.mxu1 %v1613_v40  ;;  %v1579_v56 = vunpack.i.h.bf16 %v1577_v43  ;;  %v1578_v63 = vunpack.i.l.bf16 %v1577_v43 }
  0xac   : > { %v1574_v2 = vunpack.i.h.bf16 %v1572_v48  ;;  %v1573_v3 = vunpack.i.l.bf16 %v1572_v48 }
  0xad   : > { %v710_v12 = vsel %vm395_vm0, %v488_v62, %v1579_v56  ;;  %v709_v22 = vsel %vm395_vm0, %v486_v6, %v1578_v63 }
  0xae   : > { %1438 = vmatpush3.bf16.msra.mxu0 %v1613_v40  ;;  %1462 = vmatpush3.bf16.msra.mxu1 %v1613_v40  ;;  %v1587_v47 = vpop.permute.xlu1 %1586  ;;  %v708_v23 = vsel %vm395_vm0, %v484_v8, %v1574_v2  ;;  %v707_v24 = vsel %vm395_vm0, %v482_v7, %v1573_v3 }
  0xaf   : > { %v1589_v57 = vunpack.i.h.bf16 %v1587_v47  ;;  %v1588_v58 = vunpack.i.l.bf16 %v1587_v47  ;;  %v1582_v59 = vpop.permute.xlu0 %1581  ;;  %1439 = vmatprep.subr.bf16.mxu0 %v1614_v49  ;;  %1457 = vmatprep.subr.bf16.mxu1 %v1614_v49 }
  0xb0   : > { %v1584_v0 = vunpack.i.h.bf16 %v1582_v59  ;;  %v1583_v1 = vunpack.i.l.bf16 %v1582_v59 }
  0xb1   : > { %v723_v4 = vsel %vm712_vm2, %v705_v54, %v1588_v58  ;;  %v724_v5 = vsel %vm712_vm2, %v706_v53, %v1589_v57 }
  0xb2   : > { %v721_v9 = vsel %vm712_vm2, %v703_v61, %v1583_v1  ;;  %v722_v10 = vsel %vm712_vm2, %v704_v55, %v1584_v0  ;;  %1440 = vmatpush3.bf16.msra.mxu0 %v1614_v49  ;;  %1463 = vmatpush3.bf16.msra.mxu1 %v1614_v49  ;;  %v1597_v11 = vpop.permute.xlu1 %1596  ;;  %v1160_v0 = vstv %s1151_s27 }
  0xb3   : > { %v739_v13 = vpack.c.bf16 %v723_v4, %v721_v9  ;;  %v877_v15 = vpack.c.bf16 %v724_v5, %v722_v10  ;;  %v1599_v16 = vunpack.i.h.bf16 %v1597_v11  ;;  %v1592_v17 = vpop.permute.xlu0 %1591  ;;  %1441 = vmatprep.subr.bf16.mxu0 %v1615_v60  ;;  %1458 = vmatprep.subr.bf16.mxu1 %v1615_v60  ;;  %v1598_v19 = vunpack.i.l.bf16 %v1597_v11 }
  0xb4   : > { %v1594_v20 = vunpack.i.h.bf16 %v1592_v17  ;;  %v1593_v21 = vunpack.i.l.bf16 %v1592_v17  ;;  %v1014_v14 = vpack.c.bf16 %v721_v9, %v1887_v33 }
  0xb5   : > { %v728_v25 = vsel %vm712_vm2, %v710_v12, %v1599_v16  ;;  %1411 = vmatprep.mubr.msk.bf16.mxu1 %vm789_vm3, %v739_v13  ;;  %1431 = vmatprep.mubr.msk.bf16.mxu0 %vm789_vm3, %v877_v15  ;;  %v727_v29 = vsel %vm712_vm2, %v709_v22, %v1598_v19 }
  0xb6   : > { %v726_v26 = vsel %vm712_vm2, %v708_v23, %v1594_v20  ;;  %1442 = vmatpush3.bf16.msra.mxu0 %v1615_v60  ;;  %1464 = vmatpush3.bf16.msra.mxu1 %v1615_v60  ;;  %v725_v28 = vsel %vm712_vm2, %v707_v24, %v1593_v21  ;;  %v677_v39 = vpop.permute.xlu1 %676 }
  0xb7   : > { %v878_v30 = vpack.c.bf16 %v728_v25, %v726_v26  ;;  %v609_v31 = vpop.permute.xlu0 %608  ;;  %v740_v32 = vpack.c.bf16 %v727_v29, %v725_v28  ;;  %v1015_v34 = vpack.c.bf16 %v725_v28, %v723_v4  ;;  %1443 = vmatprep.subr.bf16.mxu0 %v1616_v18  ;;  %1459 = vmatprep.subr.bf16.mxu1 %v1616_v18 }
  0xb8   : > { %v711_v38 = vsel %vm395_vm0, %v490_v27, %v609_v31 }
  0xb9   : > { %1412 = vmatmul.mubr.msk.bf16.gmra.mrb[4].mxu1 %vm789_vm3, %v740_v32  ;;  %1432 = vmatmul.mubr.msk.bf16.gmra.mrb[4].mxu0 %vm789_vm3, %v878_v30  ;;  %v729_v40 = vsel %vm712_vm2, %v711_v38, %v677_v39 }
  0xba   : > { %1444 = vmatpush3.bf16.msra.mxu0 %v1616_v18  ;;  %1465 = vmatpush3.bf16.msra.mxu1 %v1616_v18  ;;  %v1016_v35 = vpack.c.bf16 %v729_v40, %v727_v29 }
  0xbb   : > { %1447 = vmatprep.mubr.msk.bf16.mxu0 %vm789_vm3, %v1013_v37  ;;  %1451 = vmatprep.mubr.msk.bf16.mxu1 %vm789_vm3, %v1015_v34 }
  0xbc   : > { %1445 = vmatprep.subr.bf16.mxu0 %v1617_v36  ;;  %1460 = vmatprep.subr.bf16.mxu1 %v1617_v36 }
  0xbe   : > { %1446 = vmatpush3.bf16.msra.mxu0 %v1617_v36  ;;  %1466 = vmatpush3.bf16.msra.mxu1 %v1617_v36 }
  0xc1   : > { %1448 = vmatmul.mubr.msk.bf16.vlgmr.msra.gmra.mrb[0].mxu0 %vm789_vm3, %v1014_v14  ;;  %1452 = vmatmul.mubr.msk.bf16.vlgmr.msra.gmra.mrb[8].mxu1 %vm789_vm3, %v1016_v35 }
 0x17c   : > { %v1409_v41 = vpop.f32.mrb[0].mxu1 }
 0x17d   : > { %v836_v42 = vpop.f32.mrb[1].mxu1  ;;  %v869_v61 = vadd.f32 %v1409_v41, %v1305_v45 }
 0x17e   : > { %v1410_v43 = vpop.f32.mrb[2].mxu1  ;;  %v867_v62 = vadd.f32 %v1305_v45, %v836_v42 }
 0x17f   : > { %v839_v44 = vpop.f32.mrb[3].mxu1  ;;  %v870_v6 = vadd.f32 %v1410_v43, %v1305_v45 }
 0x180   : > { %v868_v7 = vadd.f32 %v1305_v45, %v839_v44 }
 0x18c   : > { %v1413_v46 = vpop.f32.mrb[4].mxu1  ;;  %v1433_v48 = vpop.f32.mrb[4].mxu0 }
 0x18d   : > { %v873_v49 = vadd.f32 %v1413_v46, %v1305_v45  ;;  %v852_v50 = vpop.f32.mrb[5].mxu1  ;;  %v990_v33 = vpop.f32.mrb[5].mxu0 }
 0x18e   : > { %v871_v51 = vadd.f32 %v1305_v45, %v852_v50  ;;  %v1414_v52 = vpop.f32.mrb[6].mxu1  ;;  %v1434_v53 = vpop.f32.mrb[6].mxu0 }
 0x18f   : > { %v1011_v54 = vadd.f32 %v1433_v48, %v873_v49  ;;  %v874_v47 = vadd.f32 %v1414_v52, %v1305_v45  ;;  %v855_v55 = vpop.f32.mrb[7].mxu1  ;;  %v993_v56 = vpop.f32.mrb[7].mxu0 }
 0x190   : > { %v1009_v57 = vadd.f32 %v990_v33, %v871_v51  ;;  %v872_v58 = vadd.f32 %v1305_v45, %v855_v55 }
 0x191   : > { %v1012_v59 = vadd.f32 %v1434_v53, %v874_v47 }
 0x192   : > { %v1010_v60 = vadd.f32 %v993_v56, %v872_v58 }
 0x194   : > { %v1449_v63 = vpop.f32.mrb[0].mxu0  ;;  %v1453_v1 = vpop.f32.mrb[8].mxu1 }
 0x195   : > { %v1468_v2 = vadd.f32 %v1449_v63, %v869_v61  ;;  %v1149_v3 = vadd.f32 %v1453_v1, %v1011_v54  ;;  %v1112_v4 = vpop.f32.mrb[1].mxu0  ;;  %v1128_v5 = vpop.f32.mrb[9].mxu1 }
 0x196   : > { %v1470_v8 = vadd.f32 %v1112_v4, %v867_v62  ;;  %v1147_v9 = vadd.f32 %v1128_v5, %v1009_v57  ;;  %v1450_v10 = vpop.f32.mrb[2].mxu0  ;;  %v1454_v11 = vpop.f32.mrb[10].mxu1 }
 0x197   : > { %vm1154_vm4 = vcmp.gt.f32.partialorder %v1468_v2, 0.0  ;;  %v1163_v12 = vmul.f32 %v1468_v2, %v1160_v0  ;;  %vm1158_vm5 = vcmp.gt.f32.partialorder %v1149_v3, 0.0  ;;  %v1167_v13 = vmul.f32 %v1160_v0, %v1149_v3  ;;  %v1115_v15 = vpop.f32.mrb[3].mxu0  ;;  %v1131_v16 = vpop.f32.mrb[11].mxu1 }
 0x198   : > { %vm1152_vm6 = vcmp.gt.f32.partialorder %v1470_v8, 0.0  ;;  %v1161_v17 = vmul.f32 %v1470_v8, %v1160_v0  ;;  %vm1156_vm7 = vcmp.gt.f32.partialorder %v1147_v9, 0.0  ;;  %v1165_v18 = vmul.f32 %v1160_v0, %v1147_v9 }
 0x199   : > { %v1171_v19 = vsel %vm1154_vm4, %v1468_v2, %v1163_v12  ;;  %v1175_v20 = vsel %vm1158_vm5, %v1149_v3, %v1167_v13  ;;  %v1472_v21 = vadd.f32 %v1450_v10, %v870_v6  ;;  %v1150_v22 = vadd.f32 %v1454_v11, %v1012_v59 }
 0x19a   : > { %1179 = vst.msk [vmem:[%s1952_s6 + $0x10] sm:$0xff] %vm712_vm2, %v1171_v19  ;;  %1183 = vst.msk [vmem:[%s1952_s6 + $0x30] sm:$0xff] %vm712_vm2, %v1175_v20  ;;  %v1169_v23 = vsel %vm1152_vm6, %v1470_v8, %v1161_v17  ;;  %v1173_v24 = vsel %vm1156_vm7, %v1147_v9, %v1165_v18  ;;  %v1474_v25 = vadd.f32 %v1115_v15, %v868_v7 }
 0x19b   : > { %v1148_v26 = vadd.f32 %v1131_v16, %v1010_v60  ;;  %1177 = vst.msk [vmem:[%s1952_s6] sm:$0xff] %vm712_vm2, %v1169_v23  ;;  %1181 = vst.msk [vmem:[%s1952_s6 + $0x20] sm:$0xff] %vm712_vm2, %v1173_v24  ;;  %vm1155_vm8 = vcmp.gt.f32.partialorder %v1472_v21, 0.0  ;;  %v1164_v27 = vmul.f32 %v1472_v21, %v1160_v0  ;;  %vm1159_vm9 = vcmp.gt.f32.partialorder %v1150_v22, 0.0 }
 0x19c   : > { %v1168_v28 = vmul.f32 %v1160_v0, %v1150_v22  ;;  %vm1153_vm10 = vcmp.gt.f32.partialorder %v1474_v25, 0.0  ;;  %v1162_v29 = vmul.f32 %v1474_v25, %v1160_v0 }
 0x19d   : > { %vm1157_vm11 = vcmp.gt.f32.partialorder %v1148_v26, 0.0  ;;  %v1166_v30 = vmul.f32 %v1160_v0, %v1148_v26  ;;  %v1172_v31 = vsel %vm1155_vm8, %v1472_v21, %v1164_v27 }
 0x19e   : > { %v1176_v32 = vsel %vm1159_vm9, %v1150_v22, %v1168_v28  ;;  %1180 = vst.msk [vmem:[%s1952_s6 + $0x18] sm:$0xff] %vm712_vm2, %v1172_v31  ;;  %v1170_v34 = vsel %vm1153_vm10, %v1474_v25, %v1162_v29 }
 0x19f   : > { %1184 = vst.msk [vmem:[%s1952_s6 + $0x38] sm:$0xff] %vm712_vm2, %v1176_v32  ;;  %v1174_v36 = vsel %vm1157_vm11, %v1148_v26, %v1166_v30  ;;  %1178 = vst.msk [vmem:[%s1952_s6 + $0x8] sm:$0xff] %vm712_vm2, %v1170_v34 }
 0x1a0   : > { %1182 = vst.msk [vmem:[%s1952_s6 + $0x28] sm:$0xff] %vm712_vm2, %v1174_v36 }
 0x1a1 PF: > { %s16_s22 = sadd.s32 1, %s1640_s22   ;;  %s1985_s20 = smov %s1636_s21 }
 0x1a2   : > { %p13_p5 = scmp.ge.s32.totalorder %s16_s22, 4   ;;  %s1986_s21 = smov %s1988_s4 }
 0x1a4   :  { %15 = sbr.rel (!%p13_p5) target bundleno = 2 (0x2), region = 126 }

// kernel: feature_extractor.6
= control target key start
LH: loop header
LB: loop body
LE: loop exit
PB: predicated region body
PF: predicated region fallthrough
CT: control target
= control target key end

     0   :  { %s2466_s20 = smov 0   ;;  %s2468_s21 = smov 0   ;;  %s3021_s0 = inlined_call_operand.vmem [shape: f32[2,18,18,3], index: 0, kind: input, shape index: {}, may-alias: {0,1}]   ;;  %s3022_s1 = inlined_call_operand.vmem [shape: f32[2,18,18,3], index: 1, kind: input, shape index: {}, may-alias: {0,1}]   ;;  %s3023_s2 = inlined_call_operand.vmem [shape: bf16[3,9,32], index: 2, kind: input, shape index: {}]   ;;  %s3024_s3 = inlined_call_operand.vmem [shape: f32[1,32], index: 3, kind: input, shape index: {}]   ;;  %s3025_s4 = inlined_call_operand.<no memory space> [shape: f32[1], index: 4, kind: input, shape index: {}]   ;;  %s3026_s5 = inlined_call_operand.vmem [shape: f32[2,16,16,32], index: 5, kind: output, shape index: {}]  }
   0x1   :  { %10 = sst [smem:[#allocation3]] %s3025_s4  ;;  %s2470_s22 = smov 0  }
   0x2 LB: > { %s28_s4 = sadd.s32 1, %s2424_s21  ;;  %p1876_p0 = scmp.ge.s32.totalorder %s2428_s22, 1  ;;  %s2428_s22 = sphi %s2470_s22, %s16_s22   ;;  %s2424_s21 = sphi %s2468_s21, %s3028_s21   ;;  %s2420_s20 = sphi %s2466_s20, %s3027_s20  }
   0x3   : > { %p30_p1 = scmp.ge.s32.totalorder %s28_s4, 2  ;;  %p246_p2 = scmp.lt.s32.totalorder %s2428_s22, 3 }
   0x5   : > { %s3030_s4 = smov (%p30_p1, %s28_s4), 0  ;;  %p247_p3 = pnand %p1876_p0, %p246_p2 }
   0x6   : > { %p307_p4 = scmp.lt.s32.totalorder (!%p247_p3), %s2420_s20, 1  ;;  %vm397_vm0 = vcmask (!%p247_p3), 23552   ;;  %vm400_vm1 = vcmask (!%p247_p3), 17408   ;;  %s2430_s27 = smov (!%p247_p3), 6   ;;  %vm1008_vm2 = vcmask (!%p247_p3), 1043456   ;;  %vm1009_vm3 = vcmask (!%p247_p3), 1044480  }
   0x7   : > { %250 = sbr.rel (%p247_p3) target bundleno = 471 (0x1d7), region = 40  ;;  %s2431_s28 = smov (!%p247_p3), 3   ;;  %vm892_vm4 = vcmask (!%p247_p3), 48128   ;;  %vm959_vm5 = vcmask (!%p247_p3), 72704   ;;  %vm1722_vm7 = vcmask (!%p247_p3), 261120  }
   0x8   : > { %s1624_s14 = sld [smem:[#allocation3]] (!%p247_p3) }
   0xe   : > { %s3032_s20 = smov (!%p307_p4, %s2420_s20), 1 }
   0xf   : > { %s2193_s23 = smul.u32 432, %s3032_s20  ;;  %s1941_s17 = sshll.u32 %s3032_s20, 8 }
  0x11   : > { %s2492_s26 = scalar_lea.vmem %s3021_s0, %s2193_s23  ;;  %s1940_s29 = sadd.s32 384, %s2193_s23 }
  0x12   : > { %v349_v0 = vld [vmem:[%s2492_s26] sm:$0xff]  ;;  %v350_v1 = vld [vmem:[%s2492_s26 + $0x8] sm:$0xff]  ;;  %v351_v2 = vld [vmem:[%s2492_s26 + $0x10] sm:$0x3]  ;;  %s2593_s7 = scalar_lea.vmem %s3022_s1, %s1940_s29  ;;  %s2878_s23 = scalar_lea.vmem %s3026_s5, %s1941_s17 }
  0x13   : > { %398 = vst.msk [vmem:[#allocation2] sm:$0xff] %vm397_vm0, %v349_v0  ;;  %399 = vst.msk [vmem:[#allocation2 + $0x8] sm:$0xff] %vm397_vm0, %v350_v1  ;;  %v352_v3 = vld [vmem:[%s2492_s26 + $0x18] sm:$0xff]  ;;  %v353_v4 = vld [vmem:[%s2492_s26 + $0x20] sm:$0xff] }
  0x14   : > { %401 = vst.msk [vmem:[#allocation2 + $0x10] sm:$0x3] %vm400_vm1, %v351_v2  ;;  %v354_v5 = vld [vmem:[%s2492_s26 + $0x28] sm:$0x3]  ;;  %v355_v6 = vld [vmem:[%s2492_s26 + $0x30] sm:$0xff]  ;;  %v356_v7 = vld [vmem:[%s2492_s26 + $0x38] sm:$0xff] }
  0x15   : > { %402 = vst.msk [vmem:[#allocation2 + $0x18] sm:$0xff] %vm397_vm0, %v352_v3  ;;  %403 = vst.msk [vmem:[#allocation2 + $0x20] sm:$0xff] %vm397_vm0, %v353_v4  ;;  %v357_v8 = vld [vmem:[%s2492_s26 + $0x40] sm:$0x3]  ;;  %v358_v9 = vld [vmem:[%s2492_s26 + $0x48] sm:$0xff] }
  0x16   : > { %404 = vst.msk [vmem:[#allocation2 + $0x28] sm:$0x3] %vm400_vm1, %v354_v5  ;;  %407 = vst.msk [vmem:[#allocation2 + $0x40] sm:$0x3] %vm400_vm1, %v357_v8  ;;  %v359_v10 = vld [vmem:[%s2492_s26 + $0x50] sm:$0xff]  ;;  %v361_v12 = vld [vmem:[%s2492_s26 + $0x60] sm:$0xff] }
  0x17   : > { %405 = vst.msk [vmem:[#allocation2 + $0x30] sm:$0xff] %vm397_vm0, %v355_v6  ;;  %406 = vst.msk [vmem:[#allocation2 + $0x38] sm:$0xff] %vm397_vm0, %v356_v7  ;;  %v360_v11 = vld [vmem:[%s2492_s26 + $0x58] sm:$0x3]  ;;  %v362_v13 = vld [vmem:[%s2492_s26 + $0x68] sm:$0xff] }
  0x18   : > { %408 = vst.msk [vmem:[#allocation2 + $0x48] sm:$0xff] %vm397_vm0, %v358_v9  ;;  %409 = vst.msk [vmem:[#allocation2 + $0x50] sm:$0xff] %vm397_vm0, %v359_v10  ;;  %v363_v14 = vld [vmem:[%s2492_s26 + $0x70] sm:$0x3]  ;;  %v364_v15 = vld [vmem:[%s2492_s26 + $0x78] sm:$0xff] }
  0x19   : > { %410 = vst.msk [vmem:[#allocation2 + $0x58] sm:$0x3] %vm400_vm1, %v360_v11  ;;  %413 = vst.msk [vmem:[#allocation2 + $0x70] sm:$0x3] %vm400_vm1, %v363_v14  ;;  %v365_v16 = vld [vmem:[%s2492_s26 + $0x80] sm:$0xff]  ;;  %v367_v18 = vld [vmem:[%s2492_s26 + $0x90] sm:$0xff] }
  0x1a   : > { %411 = vst.msk [vmem:[#allocation2 + $0x60] sm:$0xff] %vm397_vm0, %v361_v12  ;;  %412 = vst.msk [vmem:[#allocation2 + $0x68] sm:$0xff] %vm397_vm0, %v362_v13  ;;  %v366_v17 = vld [vmem:[%s2492_s26 + $0x88] sm:$0x3]  ;;  %v368_v19 = vld [vmem:[%s2492_s26 + $0x98] sm:$0xff] }
  0x1b   : > { %414 = vst.msk [vmem:[#allocation2 + $0x78] sm:$0xff] %vm397_vm0, %v364_v15  ;;  %415 = vst.msk [vmem:[#allocation2 + $0x80] sm:$0xff] %vm397_vm0, %v365_v16  ;;  %v369_v20 = vld [vmem:[%s2492_s26 + $0xa0] sm:$0x3]  ;;  %v370_v21 = vld [vmem:[%s2492_s26 + $0xa8] sm:$0xff] }
  0x1c   : > { %416 = vst.msk [vmem:[#allocation2 + $0x88] sm:$0x3] %vm400_vm1, %v366_v17  ;;  %419 = vst.msk [vmem:[#allocation2 + $0xa0] sm:$0x3] %vm400_vm1, %v369_v20  ;;  %v371_v22 = vld [vmem:[%s2492_s26 + $0xb0] sm:$0xff]  ;;  %v532_v24 = vld [vmem:[#allocation2 + $0x2] sm:$0xff] }
  0x1d   : > { %417 = vst.msk [vmem:[#allocation2 + $0x90] sm:$0xff] %vm397_vm0, %v367_v18  ;;  %418 = vst.msk [vmem:[#allocation2 + $0x98] sm:$0xff] %vm397_vm0, %v368_v19  ;;  %v372_v23 = vld [vmem:[%s2492_s26 + $0xb8] sm:$0x3]  ;;  %v533_v25 = vld [vmem:[#allocation2 + $0xa] sm:$0xff] }
  0x1e   : > { %v496_v26 = vld [vmem:[#allocation2 + $0x1] sm:$0xff]  ;;  %420 = vst.msk [vmem:[#allocation2 + $0xa8] sm:$0xff] %vm397_vm0, %v370_v21  ;;  %421 = vst.msk [vmem:[#allocation2 + $0xb0] sm:$0xff] %vm397_vm0, %v371_v22  ;;  %v2233_v27 = vpack.i.bf16 %v533_v25, %v532_v24  ;;  %v497_v28 = vld [vmem:[#allocation2 + $0x9] sm:$0xff] }
  0x1f   : > { %422 = vst.msk [vmem:[#allocation2 + $0xb8] sm:$0x3] %vm400_vm1, %v372_v23  ;;  %v534_v29 = vld [vmem:[#allocation2 + $0x1a] sm:$0xff]  ;;  %v535_v30 = vld [vmem:[#allocation2 + $0x22] sm:$0xff]  ;;  %v2223_v31 = vpack.i.bf16 %v497_v28, %v496_v26  ;;  %v536_v36 = vld [vmem:[#allocation2 + $0x32] sm:$0xff] }
  0x20   : > { %v498_v32 = vld [vmem:[#allocation2 + $0x19] sm:$0xff]  ;;  %v499_v33 = vld [vmem:[#allocation2 + $0x21] sm:$0xff]  ;;  %2234 = vrot.lane.b32.xlu1 %v2233_v27, %s2430_s27  ;;  %v2238_v34 = vpack.i.bf16 %v535_v30, %v534_v29  ;;  %v500_v38 = vld [vmem:[#allocation2 + $0x31] sm:$0xff] }
  0x21   : > { %2224 = vrot.lane.b32.xlu0 %v2223_v31, %s2431_s28  ;;  %v2228_v35 = vpack.i.bf16 %v499_v33, %v498_v32  ;;  %v537_v37 = vld [vmem:[#allocation2 + $0x3a] sm:$0xff]  ;;  %v538_v42 = vld [vmem:[#allocation2 + $0x4a] sm:$0xff]  ;;  %v539_v43 = vld [vmem:[#allocation2 + $0x52] sm:$0xff] }
  0x22   : > { %v501_v39 = vld [vmem:[#allocation2 + $0x39] sm:$0xff]  ;;  %v2248_v40 = vpack.i.bf16 %v537_v37, %v536_v36  ;;  %v502_v44 = vld [vmem:[#allocation2 + $0x49] sm:$0xff]  ;;  %v503_v45 = vld [vmem:[#allocation2 + $0x51] sm:$0xff]  ;;  %v2258_v49 = vpack.i.bf16 %v539_v43, %v538_v42 }
  0x23   : > { %v2243_v41 = vpack.i.bf16 %v501_v39, %v500_v38  ;;  %v2546_v46 = vld [vmem:[#allocation2 + $0x62] sm:$0xff]  ;;  %v2548_v47 = vld [vmem:[#allocation2 + $0x6a] sm:$0xff]  ;;  %v376_v54 = vld [vmem:[%s2492_s26 + $0xd8] sm:$0xff]  ;;  %v2253_v55 = vpack.i.bf16 %v503_v45, %v502_v44 }
  0x24   : > { %2239 = vrot.lane.b32.xlu1 %v2238_v34, %s2430_s27  ;;  %v373_v48 = vld [vmem:[%s2492_s26 + $0xc0] sm:$0xff]  ;;  %v2554_v51 = vld [vmem:[#allocation2 + $0x69] sm:$0xff]  ;;  %426 = vst.msk [vmem:[#allocation2 + $0xd8] sm:$0xff] %vm397_vm0, %v376_v54  ;;  %v384_v60 = vld [vmem:[%s2492_s26 + $0x118] sm:$0x3]  ;;  %v2268_v3 = vpack.i.bf16 %v2548_v47, %v2546_v46 }
  0x25   : > { %2229 = vrot.lane.b32.xlu0 %v2228_v35, %s2431_s28  ;;  %v2552_v50 = vld [vmem:[#allocation2 + $0x61] sm:$0xff]  ;;  %v375_v53 = vld [vmem:[%s2492_s26 + $0xd0] sm:$0x3]  ;;  %423 = vst.msk [vmem:[#allocation2 + $0xc0] sm:$0xff] %vm397_vm0, %v373_v48  ;;  %v380_v0 = vld [vmem:[%s2492_s26 + $0xf8] sm:$0xff]  ;;  %v2432_v35 = vmov 65535  }
  0x26   : > { %v374_v52 = vld [vmem:[%s2492_s26 + $0xc8] sm:$0xff]  ;;  %425 = vst.msk [vmem:[#allocation2 + $0xd0] sm:$0x3] %vm400_vm1, %v375_v53  ;;  %v377_v56 = vld [vmem:[%s2492_s26 + $0xe0] sm:$0xff]  ;;  %v383_v59 = vld [vmem:[%s2492_s26 + $0x110] sm:$0xff]  ;;  %v2263_v9 = vpack.i.bf16 %v2554_v51, %v2552_v50  ;;  %v1010_v36 = vsel %vm1008_vm2, 4294967295, %v2432_v35 }
  0x27   : > { %424 = vst.msk [vmem:[#allocation2 + $0xc8] sm:$0xff] %vm397_vm0, %v374_v52  ;;  %v378_v57 = vld [vmem:[%s2492_s26 + $0xe8] sm:$0x3]  ;;  %427 = vst.msk [vmem:[#allocation2 + $0xe0] sm:$0xff] %vm397_vm0, %v377_v56  ;;  %v379_v61 = vld [vmem:[%s2492_s26 + $0xf0] sm:$0xff]  ;;  %v1011_v46 = vsel %vm1009_vm3, %v1010_v36, 0 }
  0x28   : > { %2249 = vrot.lane.b32.xlu1 %v2248_v40, %s2430_s27  ;;  %v382_v58 = vld [vmem:[%s2492_s26 + $0x108] sm:$0xff]  ;;  %428 = vst.msk [vmem:[#allocation2 + $0xe8] sm:$0x3] %vm400_vm1, %v378_v57  ;;  %v542_v62 = vld [vmem:[#allocation2 + $0x7a] sm:$0xff]  ;;  %434 = vst.msk [vmem:[#allocation2 + $0x118] sm:$0x3] %vm400_vm1, %v384_v60 }
  0x29   : > { %2244 = vrot.lane.b32.xlu0 %v2243_v41, %s2431_s28  ;;  %432 = vst.msk [vmem:[#allocation2 + $0x108] sm:$0xff] %vm397_vm0, %v382_v58  ;;  %v543_v63 = vld [vmem:[#allocation2 + $0x82] sm:$0xff]  ;;  %433 = vst.msk [vmem:[#allocation2 + $0x110] sm:$0xff] %vm397_vm0, %v383_v59  ;;  %v381_v1 = vld [vmem:[%s2492_s26 + $0x100] sm:$0x3] }
  0x2a   : > { %429 = vst.msk [vmem:[#allocation2 + $0xf0] sm:$0xff] %vm397_vm0, %v379_v61  ;;  %v388_v2 = vld [vmem:[%s2492_s26 + $0x138] sm:$0xff]  ;;  %v507_v5 = vld [vmem:[#allocation2 + $0x81] sm:$0xff]  ;;  %430 = vst.msk [vmem:[#allocation2 + $0xf8] sm:$0xff] %vm397_vm0, %v380_v0  ;;  %v2278_v19 = vpack.i.bf16 %v543_v63, %v542_v62 }
  0x2b   : > { %v506_v4 = vld [vmem:[#allocation2 + $0x79] sm:$0xff]  ;;  %431 = vst.msk [vmem:[#allocation2 + $0x100] sm:$0x3] %vm400_vm1, %v381_v1  ;;  %v390_v7 = vld [vmem:[%s2492_s26 + $0x148] sm:$0x3]  ;;  %v395_v13 = vld [vmem:[%s2492_s26 + $0x170] sm:$0xff] }
  0x2c   : > { %2259 = vrot.lane.b32.xlu1 %v2258_v49, %s2430_s27  ;;  %v389_v6 = vld [vmem:[%s2492_s26 + $0x140] sm:$0xff]  ;;  %438 = vst.msk [vmem:[#allocation2 + $0x138] sm:$0xff] %vm397_vm0, %v388_v2  ;;  %v386_v10 = vld [vmem:[%s2492_s26 + $0x128] sm:$0xff]  ;;  %v387_v11 = vld [vmem:[%s2492_s26 + $0x130] sm:$0x3]  ;;  %v2273_v20 = vpack.i.bf16 %v507_v5, %v506_v4 }
  0x2d   : > { %v385_v8 = vld [vmem:[%s2492_s26 + $0x120] sm:$0xff]  ;;  %2254 = vrot.lane.b32.xlu0 %v2253_v55, %s2431_s28  ;;  %439 = vst.msk [vmem:[#allocation2 + $0x140] sm:$0xff] %vm397_vm0, %v389_v6  ;;  %v394_v12 = vld [vmem:[%s2492_s26 + $0x168] sm:$0xff]  ;;  %436 = vst.msk [vmem:[#allocation2 + $0x128] sm:$0xff] %vm397_vm0, %v386_v10 }
  0x2e   : > { %440 = vst.msk [vmem:[#allocation2 + $0x148] sm:$0x3] %vm400_vm1, %v390_v7  ;;  %437 = vst.msk [vmem:[#allocation2 + $0x130] sm:$0x3] %vm400_vm1, %v387_v11  ;;  %v396_v14 = vld [vmem:[%s2492_s26 + $0x178] sm:$0x3] }
  0x2f   : > { %435 = vst.msk [vmem:[#allocation2 + $0x120] sm:$0xff] %vm397_vm0, %v385_v8  ;;  %444 = vst.msk [vmem:[#allocation2 + $0x168] sm:$0xff] %vm397_vm0, %v394_v12  ;;  %v391_v15 = vld [vmem:[%s2492_s26 + $0x150] sm:$0xff]  ;;  %v392_v16 = vld [vmem:[%s2492_s26 + $0x158] sm:$0xff] }
  0x30   : > { %445 = vst.msk [vmem:[#allocation2 + $0x170] sm:$0xff] %vm397_vm0, %v395_v13  ;;  %v393_v17 = vld [vmem:[%s2492_s26 + $0x160] sm:$0x3]  ;;  %441 = vst.msk [vmem:[#allocation2 + $0x150] sm:$0xff] %vm397_vm0, %v391_v15  ;;  %2269 = vrot.lane.b32.xlu1 %v2268_v3, %s2430_s27  ;;  %v544_v21 = vld [vmem:[#allocation2 + $0x92] sm:$0xff] }
  0x31   : > { %446 = vst.msk [vmem:[#allocation2 + $0x178] sm:$0x3] %vm400_vm1, %v396_v14  ;;  %v447_v18 = vld [vmem:[%s2593_s7] sm:$0xff]  ;;  %443 = vst.msk [vmem:[#allocation2 + $0x160] sm:$0x3] %vm400_vm1, %v393_v17  ;;  %2264 = vrot.lane.b32.xlu0 %v2263_v9, %s2431_s28  ;;  %v508_v23 = vld [vmem:[#allocation2 + $0x91] sm:$0xff] }
  0x32   : > { %442 = vst.msk [vmem:[#allocation2 + $0x158] sm:$0xff] %vm397_vm0, %v392_v16  ;;  %454 = vst.msk [vmem:[#allocation2 + $0x180] sm:$0xff] %vm397_vm0, %v447_v18  ;;  %v545_v22 = vld [vmem:[#allocation2 + $0x9a] sm:$0xff]  ;;  %v546_v27 = vld [vmem:[#allocation2 + $0xaa] sm:$0xff] }
  0x33   : > { %v509_v24 = vld [vmem:[#allocation2 + $0x99] sm:$0xff]  ;;  %v2288_v25 = vpack.i.bf16 %v545_v22, %v544_v21  ;;  %v510_v29 = vld [vmem:[#allocation2 + $0xa9] sm:$0xff]  ;;  %v511_v30 = vld [vmem:[#allocation2 + $0xb1] sm:$0xff] }
  0x34   : > { %2279 = vrot.lane.b32.xlu1 %v2278_v19, %s2430_s27  ;;  %v2283_v26 = vpack.i.bf16 %v509_v24, %v508_v23  ;;  %v547_v28 = vld [vmem:[#allocation2 + $0xb2] sm:$0xff]  ;;  %v2293_v32 = vpack.i.bf16 %v511_v30, %v510_v29  ;;  %v548_v33 = vld [vmem:[#allocation2 + $0xc2] sm:$0xff]  ;;  %v549_v34 = vld [vmem:[#allocation2 + $0xca] sm:$0xff] }
  0x35   : > { %2274 = vrot.lane.b32.xlu0 %v2273_v20, %s2431_s28  ;;  %v2298_v31 = vpack.i.bf16 %v547_v28, %v546_v27  ;;  %v512_v37 = vld [vmem:[#allocation2 + $0xc1] sm:$0xff]  ;;  %v513_v38 = vld [vmem:[#allocation2 + $0xc9] sm:$0xff]  ;;  %v450_v41 = vld [vmem:[%s2593_s7 + $0x18] sm:$0xff]  ;;  %v2308_v43 = vpack.i.bf16 %v549_v34, %v548_v33 }
  0x36   : > { %v448_v39 = vld [vmem:[%s2593_s7 + $0x8] sm:$0xff]  ;;  %v449_v40 = vld [vmem:[%s2593_s7 + $0x10] sm:$0x3]  ;;  %v451_v42 = vld [vmem:[%s2593_s7 + $0x20] sm:$0xff]  ;;  %457 = vst.msk [vmem:[#allocation2 + $0x198] sm:$0xff] %vm397_vm0, %v450_v41  ;;  %v2303_v47 = vpack.i.bf16 %v513_v38, %v512_v37 }
  0x37   : > { %455 = vst.msk [vmem:[#allocation2 + $0x188] sm:$0xff] %vm397_vm0, %v448_v39  ;;  %v550_v44 = vld [vmem:[#allocation2 + $0xda] sm:$0xff]  ;;  %v452_v45 = vld [vmem:[%s2593_s7 + $0x28] sm:$0x3]  ;;  %458 = vst.msk [vmem:[#allocation2 + $0x1a0] sm:$0xff] %vm397_vm0, %v451_v42 }
  0x38   : > { %2289 = vrot.lane.b32.xlu1 %v2288_v25, %s2430_s27  ;;  %456 = vst.msk [vmem:[#allocation2 + $0x190] sm:$0x3] %vm400_vm1, %v449_v40  ;;  %v551_v48 = vld [vmem:[#allocation2 + $0xe2] sm:$0xff]  ;;  %459 = vst.msk [vmem:[#allocation2 + $0x1a8] sm:$0x3] %vm400_vm1, %v452_v45  ;;  %v514_v51 = vld [vmem:[#allocation2 + $0xd9] sm:$0xff] }
  0x39   : > { %2284 = vrot.lane.b32.xlu0 %v2283_v26, %s2431_s28  ;;  %v2403_v49 = vld [vmem:[%s3023_s2] sm:$0x1f]   ;;  %v2404_v50 = vld [vmem:[%s3023_s2 + $0x8] sm:$0x1f]   ;;  %v2405_v55 = vld [vmem:[%s3023_s2 + $0x10] sm:$0x1f]   ;;  %v2318_v56 = vpack.i.bf16 %v551_v48, %v550_v44 }
  0x3a   : > { %v515_v52 = vld [vmem:[#allocation2 + $0xe1] sm:$0xff]  ;;  %v1013_v53 = vand.u32 %v2403_v49, %v1011_v46  ;;  %v2644_v54 = vand.u32 %v2404_v50, %v1011_v46  ;;  %v518_v58 = vld [vmem:[#allocation2 + $0x109] sm:$0xff]  ;;  %v519_v59 = vld [vmem:[#allocation2 + $0x111] sm:$0xff]  ;;  %v2651_v60 = vand.u32 %v2405_v55, %v1011_v46 }
  0x3b   : > { %v2313_v57 = vpack.i.bf16 %v515_v52, %v514_v51  ;;  %v516_v61 = vld [vmem:[#allocation2 + $0xf1] sm:$0xff]  ;;  %v517_v62 = vld [vmem:[#allocation2 + $0xf9] sm:$0xff]  ;;  %v2328_v63 = vpack.i.bf16 %v519_v59, %v518_v58  ;;  %v523_v8 = vld [vmem:[#allocation2 + $0x141] sm:$0xff] }
  0x3c   : > { %2299 = vrot.lane.b32.xlu1 %v2298_v31, %s2430_s27  ;;  %1993 = vmatprep.subr.bf16.mxu1 %v1013_v53  ;;  %v2323_v0 = vpack.i.bf16 %v517_v62, %v516_v61  ;;  %v554_v1 = vld [vmem:[#allocation2 + $0x10a] sm:$0xff]  ;;  %v555_v2 = vld [vmem:[#allocation2 + $0x112] sm:$0xff]  ;;  %v553_v4 = vld [vmem:[#allocation2 + $0xfa] sm:$0xff] }
  0x3d   : > { %2294 = vrot.lane.b32.xlu0 %v2293_v32, %s2431_s28  ;;  %1994 = vmatpush3.bf16.msra.mxu1 %v1013_v53  ;;  %v552_v3 = vld [vmem:[#allocation2 + $0xf2] sm:$0xff]  ;;  %v2338_v5 = vpack.i.bf16 %v555_v2, %v554_v1  ;;  %v520_v9 = vld [vmem:[#allocation2 + $0x121] sm:$0xff]  ;;  %v521_v10 = vld [vmem:[#allocation2 + $0x129] sm:$0xff] }
  0x3e   : > { %2027 = vmatprep.subr.bf16.mxu0 %v2644_v54  ;;  %2095 = vmatprep.subr.bf16.mxu1 %v2644_v54  ;;  %v2333_v6 = vpack.i.bf16 %v553_v4, %v552_v3  ;;  %v522_v7 = vld [vmem:[#allocation2 + $0x139] sm:$0xff]  ;;  %v2343_v12 = vpack.i.bf16 %v521_v10, %v520_v9  ;;  %v559_v14 = vld [vmem:[#allocation2 + $0x142] sm:$0xff]  ;;  %v557_v16 = vld [vmem:[#allocation2 + $0x12a] sm:$0xff] }
  0x3f   : > { %2028 = vmatpush3.bf16.msra.mxu0 %v2644_v54  ;;  %v2348_v11 = vpack.i.bf16 %v523_v8, %v522_v7  ;;  %v558_v13 = vld [vmem:[#allocation2 + $0x13a] sm:$0xff]  ;;  %v556_v15 = vld [vmem:[#allocation2 + $0x122] sm:$0xff]  ;;  %v527_v20 = vld [vmem:[#allocation2 + $0x171] sm:$0xff] }
  0x40   : > { %2309 = vrot.lane.b32.xlu1 %v2308_v43, %s2430_s27  ;;  %2061 = vmatprep.subr.bf16.mxu0 %v2651_v60  ;;  %v2358_v17 = vpack.i.bf16 %v559_v14, %v558_v13  ;;  %v2353_v18 = vpack.i.bf16 %v557_v16, %v556_v15  ;;  %v526_v19 = vld [vmem:[#allocation2 + $0x169] sm:$0xff]  ;;  %v524_v21 = vld [vmem:[#allocation2 + $0x151] sm:$0xff]  ;;  %v525_v22 = vld [vmem:[#allocation2 + $0x159] sm:$0xff] }
  0x41   : > { %2304 = vrot.lane.b32.xlu0 %v2303_v47, %s2431_s28  ;;  %v2368_v23 = vpack.i.bf16 %v527_v20, %v526_v19  ;;  %v2363_v24 = vpack.i.bf16 %v525_v22, %v524_v21  ;;  %v562_v25 = vld [vmem:[#allocation2 + $0x16a] sm:$0xff]  ;;  %v563_v26 = vld [vmem:[#allocation2 + $0x172] sm:$0xff]  ;;  %v561_v28 = vld [vmem:[#allocation2 + $0x15a] sm:$0xff] }
  0x42   : > { %v560_v27 = vld [vmem:[#allocation2 + $0x152] sm:$0xff]  ;;  %v2378_v29 = vpack.i.bf16 %v563_v26, %v562_v25  ;;  %v564_v31 = vld [vmem:[#allocation2 + $0x182] sm:$0xff]  ;;  %v565_v32 = vld [vmem:[#allocation2 + $0x18a] sm:$0xff] }
  0x43   : > { %v2373_v30 = vpack.i.bf16 %v561_v28, %v560_v27  ;;  %v528_v33 = vld [vmem:[#allocation2 + $0x181] sm:$0xff]  ;;  %v529_v34 = vld [vmem:[#allocation2 + $0x189] sm:$0xff]  ;;  %v2388_v35 = vpack.i.bf16 %v565_v32, %v564_v31  ;;  %v530_v39 = vld [vmem:[#allocation2 + $0x199] sm:$0xff] }
  0x44   : > { %2319 = vrot.lane.b32.xlu1 %v2318_v56, %s2430_s27  ;;  %v2383_v36 = vpack.i.bf16 %v529_v34, %v528_v33  ;;  %v566_v37 = vld [vmem:[#allocation2 + $0x19a] sm:$0xff]  ;;  %v567_v38 = vld [vmem:[#allocation2 + $0x1a2] sm:$0xff]  ;;  %v464_v7 = vld [vmem:[#allocation2 + $0x30] sm:$0xff] }
  0x45   : > { %2314 = vrot.lane.b32.xlu0 %v2313_v57, %s2431_s28  ;;  %v531_v40 = vld [vmem:[#allocation2 + $0x1a1] sm:$0xff]  ;;  %v2398_v41 = vpack.i.bf16 %v567_v38, %v566_v37  ;;  %v462_v57 = vld [vmem:[#allocation2 + $0x18] sm:$0xff]  ;;  %v467_v21 = vld [vmem:[#allocation2 + $0x50] sm:$0xff] }
  0x46   : > { %v2393_v42 = vpack.i.bf16 %v531_v40, %v530_v39  ;;  %v460_v47 = vld [vmem:[#allocation2] sm:$0xff]  ;;  %v461_v48 = vld [vmem:[#allocation2 + $0x8] sm:$0xff]  ;;  %v465_v8 = vld [vmem:[#allocation2 + $0x38] sm:$0xff] }
  0x47   : > { %v463_v58 = vld [vmem:[#allocation2 + $0x20] sm:$0xff]  ;;  %v466_v20 = vld [vmem:[#allocation2 + $0x48] sm:$0xff] }
  0x48   : > { %2329 = vrot.lane.b32.xlu1 %v2328_v63, %s2431_s28  ;;  %v468_v32 = vld [vmem:[#allocation2 + $0x60] sm:$0xff]  ;;  %v469_v33 = vld [vmem:[#allocation2 + $0x68] sm:$0xff] }
  0x49   : > { %2324 = vrot.lane.b32.xlu0 %v2323_v0, %s2431_s28 }
  0x4c   : > { %2339 = vrot.lane.b32.xlu1 %v2338_v5, %s2430_s27 }
  0x4d   : > { %2334 = vrot.lane.b32.xlu0 %v2333_v6, %s2430_s27 }
  0x50   : > { %2349 = vrot.lane.b32.xlu1 %v2348_v11, %s2431_s28 }
  0x51   : > { %2344 = vrot.lane.b32.xlu0 %v2343_v12, %s2431_s28 }
  0x54   : > { %2359 = vrot.lane.b32.xlu1 %v2358_v17, %s2430_s27 }
  0x55   : > { %2354 = vrot.lane.b32.xlu0 %v2353_v18, %s2430_s27 }
  0x58   : > { %2369 = vrot.lane.b32.xlu1 %v2368_v23, %s2431_s28 }
  0x59   : > { %2364 = vrot.lane.b32.xlu0 %v2363_v24, %s2431_s28 }
  0x5c   : > { %2379 = vrot.lane.b32.xlu1 %v2378_v29, %s2430_s27 }
  0x5d   : > { %2374 = vrot.lane.b32.xlu0 %v2373_v30, %s2430_s27 }
  0x60   : > { %2389 = vrot.lane.b32.xlu1 %v2388_v35, %s2430_s27 }
  0x61   : > { %2384 = vrot.lane.b32.xlu0 %v2383_v36, %s2431_s28 }
  0x64   : > { %2399 = vrot.lane.b32.xlu1 %v2398_v41, %s2430_s27 }
  0x65   : > { %2394 = vrot.lane.b32.xlu0 %v2393_v42, %s2431_s28 }
  0x92   : > { %v2235_v43 = vpop.permute.xlu1 %2234 }
  0x93   : > { %v2237_v44 = vunpack.i.h.bf16 %v2235_v43  ;;  %v2236_v45 = vunpack.i.l.bf16 %v2235_v43  ;;  %v2225_v46 = vpop.permute.xlu0 %2224 }
  0x94   : > { %v2227_v49 = vunpack.i.h.bf16 %v2225_v46  ;;  %v2226_v50 = vunpack.i.l.bf16 %v2225_v46 }
  0x96   : > { %v2240_v51 = vpop.permute.xlu1 %2239  ;;  %v856_v52 = vsel %vm397_vm0, %v460_v47, %v2226_v50  ;;  %v857_v53 = vsel %vm397_vm0, %v461_v48, %v2227_v49 }
  0x97   : > { %v2242_v55 = vunpack.i.h.bf16 %v2240_v51  ;;  %v2241_v56 = vunpack.i.l.bf16 %v2240_v51  ;;  %v2230_v59 = vpop.permute.xlu0 %2229  ;;  %v893_v61 = vsel %vm892_vm4, %v856_v52, %v2236_v45  ;;  %v894_v62 = vsel %vm892_vm4, %v857_v53, %v2237_v44  ;;  %v470_v44 = vld [vmem:[#allocation2 + $0x78] sm:$0xff]  ;;  %v471_v45 = vld [vmem:[#allocation2 + $0x80] sm:$0xff] }
  0x98   : > { %v2232_v63 = vunpack.i.h.bf16 %v2230_v59  ;;  %v2231_v0 = vunpack.i.l.bf16 %v2230_v59  ;;  %v936_v1 = vpack.c.bf16 %v894_v62, %v893_v61  ;;  %v473_v59 = vld [vmem:[#allocation2 + $0x98] sm:$0xff] }
  0x9a   : > { %v859_v2 = vsel %vm397_vm0, %v463_v58, %v2232_v63  ;;  %v858_v3 = vsel %vm397_vm0, %v462_v57, %v2231_v0  ;;  %1995 = vmatprep.mubr.msk.bf16.mxu1 %vm959_vm5, %v936_v1  ;;  %v2250_v4 = vpop.permute.xlu1 %2249  ;;  %v472_v58 = vld [vmem:[#allocation2 + $0x90] sm:$0xff] }
  0x9b   : > { %v2252_v5 = vunpack.i.h.bf16 %v2250_v4  ;;  %v2251_v6 = vunpack.i.l.bf16 %v2250_v4  ;;  %v2245_v9 = vpop.permute.xlu0 %2244  ;;  %v895_v10 = vsel %vm892_vm4, %v858_v3, %v2241_v56  ;;  %v896_v11 = vsel %vm892_vm4, %v859_v2, %v2242_v55 }
  0x9c   : > { %v2247_v12 = vunpack.i.h.bf16 %v2245_v9  ;;  %v2246_v13 = vunpack.i.l.bf16 %v2245_v9  ;;  %v937_v14 = vpack.c.bf16 %v896_v11, %v895_v10  ;;  %v475_v9 = vld [vmem:[#allocation2 + $0xb0] sm:$0xff] }
  0x9e   : > { %v861_v15 = vsel %vm397_vm0, %v465_v8, %v2247_v12  ;;  %v860_v16 = vsel %vm397_vm0, %v464_v7, %v2246_v13  ;;  %1996 = vmatmul.mubr.msk.bf16.vlgmr.msra.gmra.mrb[0].mxu1 %vm959_vm5, %v937_v14  ;;  %2029 = vmatprep.mubr.msk.bf16.mxu0 %vm959_vm5, %v937_v14  ;;  %v2260_v17 = vpop.permute.xlu1 %2259  ;;  %v474_v8 = vld [vmem:[#allocation2 + $0xa8] sm:$0xff] }
  0x9f   : > { %v2262_v18 = vunpack.i.h.bf16 %v2260_v17  ;;  %v2261_v19 = vunpack.i.l.bf16 %v2260_v17  ;;  %v2255_v22 = vpop.permute.xlu0 %2254  ;;  %2096 = vmatpush3.bf16.msra.mxu1 %v2644_v54  ;;  %v897_v23 = vsel %vm892_vm4, %v860_v16, %v2251_v6  ;;  %v898_v24 = vsel %vm892_vm4, %v861_v15, %v2252_v5 }
  0xa0   : > { %v2257_v25 = vunpack.i.h.bf16 %v2255_v22  ;;  %v2256_v26 = vunpack.i.l.bf16 %v2255_v22  ;;  %v2691_v27 = vpack.c.bf16 %v898_v24, %v897_v23  ;;  %v477_v22 = vld [vmem:[#allocation2 + $0xc8] sm:$0xff] }
  0xa2   : > { %v863_v28 = vsel %vm397_vm0, %v467_v21, %v2257_v25  ;;  %v862_v29 = vsel %vm397_vm0, %v466_v20, %v2256_v26  ;;  %1999 = vmatprep.mubr.msk.bf16.mxu1 %vm959_vm5, %v2691_v27  ;;  %2030 = vmatmul.mubr.msk.bf16.vlgmr.msra.gmra.mrb[0].mxu0 %vm959_vm5, %v2691_v27  ;;  %v2270_v30 = vpop.permute.xlu1 %2269  ;;  %v476_v21 = vld [vmem:[#allocation2 + $0xc0] sm:$0xff] }
  0xa3   : > { %2062 = vmatpush3.bf16.msra.mxu0 %v2651_v60  ;;  %v2272_v54 = vunpack.i.h.bf16 %v2270_v30  ;;  %v2271_v31 = vunpack.i.l.bf16 %v2270_v30  ;;  %v2265_v34 = vpop.permute.xlu0 %2264  ;;  %v899_v35 = vsel %vm892_vm4, %v862_v29, %v2261_v19  ;;  %v900_v36 = vsel %vm892_vm4, %v863_v28, %v2262_v18 }
  0xa4   : > { %v2267_v37 = vunpack.i.h.bf16 %v2265_v34  ;;  %v2266_v38 = vunpack.i.l.bf16 %v2265_v34  ;;  %v2702_v39 = vpack.c.bf16 %v900_v36, %v899_v35  ;;  %v478_v34 = vld [vmem:[#allocation2 + $0xd8] sm:$0xff]  ;;  %v479_v35 = vld [vmem:[#allocation2 + $0xe0] sm:$0xff] }
  0xa6   : > { %v865_v40 = vsel %vm397_vm0, %v469_v33, %v2267_v37  ;;  %v864_v41 = vsel %vm397_vm0, %v468_v32, %v2266_v38  ;;  %2000 = vmatmul.mubr.msk.bf16.gmra.mrb[4].mxu1 %vm959_vm5, %v2702_v39  ;;  %2033 = vmatprep.mubr.msk.bf16.mxu0 %vm959_vm5, %v2702_v39  ;;  %v2280_v60 = vpop.permute.xlu1 %2279 }
  0xa7   : > { %v2282_v42 = vunpack.i.h.bf16 %v2280_v60  ;;  %v2281_v43 = vunpack.i.l.bf16 %v2280_v60  ;;  %v2275_v46 = vpop.permute.xlu0 %2274  ;;  %v901_v47 = vsel %vm892_vm4, %v864_v41, %v2271_v31  ;;  %v902_v48 = vsel %vm892_vm4, %v865_v40, %v2272_v54 }
  0xa8   : > { %v2277_v49 = vunpack.i.h.bf16 %v2275_v46  ;;  %v2276_v50 = vunpack.i.l.bf16 %v2275_v46  ;;  %v2712_v51 = vpack.c.bf16 %v902_v48, %v901_v47  ;;  %v483_v46 = vld [vmem:[#allocation2 + $0x110] sm:$0xff] }
  0xaa   : > { %v867_v52 = vsel %vm397_vm0, %v471_v45, %v2277_v49  ;;  %v866_v53 = vsel %vm397_vm0, %v470_v44, %v2276_v50  ;;  %2003 = vmatprep.mubr.msk.bf16.mxu1 %vm959_vm5, %v2712_v51  ;;  %2034 = vmatmul.mubr.msk.bf16.gmra.mrb[4].mxu0 %vm959_vm5, %v2712_v51  ;;  %v2290_v55 = vpop.permute.xlu1 %2289  ;;  %v482_v45 = vld [vmem:[#allocation2 + $0x108] sm:$0xff] }
  0xab   : > { %v2292_v56 = vunpack.i.h.bf16 %v2290_v55  ;;  %v2291_v57 = vunpack.i.l.bf16 %v2290_v55  ;;  %v2285_v61 = vpop.permute.xlu0 %2284  ;;  %v903_v62 = vsel %vm892_vm4, %v866_v53, %v2281_v43  ;;  %v904_v63 = vsel %vm892_vm4, %v867_v52, %v2282_v42  ;;  %v480_v53 = vld [vmem:[#allocation2 + $0xf0] sm:$0xff]  ;;  %v481_v55 = vld [vmem:[#allocation2 + $0xf8] sm:$0xff] }
  0xac   : > { %v2287_v0 = vunpack.i.h.bf16 %v2285_v61  ;;  %v2286_v1 = vunpack.i.l.bf16 %v2285_v61  ;;  %v2722_v2 = vpack.c.bf16 %v904_v63, %v903_v62 }
  0xae   : > { %v869_v3 = vsel %vm397_vm0, %v473_v59, %v2287_v0  ;;  %v868_v4 = vsel %vm397_vm0, %v472_v58, %v2286_v1  ;;  %2004 = vmatmul.mubr.msk.bf16.gmra.mrb[8].mxu1 %vm959_vm5, %v2722_v2  ;;  %2037 = vmatprep.mubr.msk.bf16.mxu0 %vm959_vm5, %v2722_v2  ;;  %v2300_v5 = vpop.permute.xlu1 %2299 }
  0xaf   : > { %v2302_v6 = vunpack.i.h.bf16 %v2300_v5  ;;  %v2301_v7 = vunpack.i.l.bf16 %v2300_v5  ;;  %v2295_v10 = vpop.permute.xlu0 %2294  ;;  %v905_v11 = vsel %vm892_vm4, %v868_v4, %v2291_v57  ;;  %v906_v12 = vsel %vm892_vm4, %v869_v3, %v2292_v56 }
  0xb0   : > { %v2297_v13 = vunpack.i.h.bf16 %v2295_v10  ;;  %v2296_v14 = vunpack.i.l.bf16 %v2295_v10  ;;  %v2732_v15 = vpack.c.bf16 %v906_v12, %v905_v11 }
  0xb2   : > { %v871_v16 = vsel %vm397_vm0, %v475_v9, %v2297_v13  ;;  %v870_v17 = vsel %vm397_vm0, %v474_v8, %v2296_v14  ;;  %2007 = vmatprep.mubr.msk.bf16.mxu1 %vm959_vm5, %v2732_v15  ;;  %2038 = vmatmul.mubr.msk.bf16.gmra.mrb[8].mxu0 %vm959_vm5, %v2732_v15  ;;  %v2310_v18 = vpop.permute.xlu1 %2309  ;;  %v486_v13 = vld [vmem:[#allocation2 + $0x138] sm:$0xff]  ;;  %v487_v14 = vld [vmem:[#allocation2 + $0x140] sm:$0xff] }
  0xb3   : > { %v2312_v19 = vunpack.i.h.bf16 %v2310_v18  ;;  %v2311_v20 = vunpack.i.l.bf16 %v2310_v18  ;;  %v2305_v23 = vpop.permute.xlu0 %2304  ;;  %v907_v24 = vsel %vm892_vm4, %v870_v17, %v2301_v7  ;;  %v908_v25 = vsel %vm892_vm4, %v871_v16, %v2302_v6 }
  0xb4   : > { %v2307_v26 = vunpack.i.h.bf16 %v2305_v23  ;;  %v2306_v28 = vunpack.i.l.bf16 %v2305_v23  ;;  %v2742_v29 = vpack.c.bf16 %v908_v25, %v907_v24 }
  0xb6   : > { %v873_v30 = vsel %vm397_vm0, %v477_v22, %v2307_v26  ;;  %v872_v54 = vsel %vm397_vm0, %v476_v21, %v2306_v28  ;;  %2008 = vmatmul.mubr.msk.bf16.gmra.mrb[12].mxu1 %vm959_vm5, %v2742_v29  ;;  %2041 = vmatprep.mubr.msk.bf16.mxu0 %vm959_vm5, %v2742_v29  ;;  %v2320_v31 = vpop.permute.xlu1 %2319 }
  0xb7   : > { %v2322_v32 = vunpack.i.h.bf16 %v2320_v31  ;;  %v2321_v33 = vunpack.i.l.bf16 %v2320_v31  ;;  %v2315_v36 = vpop.permute.xlu0 %2314  ;;  %v909_v37 = vsel %vm892_vm4, %v872_v54, %v2311_v20  ;;  %v910_v38 = vsel %vm892_vm4, %v873_v30, %v2312_v19  ;;  %v484_v19 = vld [vmem:[#allocation2 + $0x120] sm:$0xff]  ;;  %v485_v20 = vld [vmem:[#allocation2 + $0x128] sm:$0xff] }
  0xb8   : > { %v2317_v40 = vunpack.i.h.bf16 %v2315_v36  ;;  %v2316_v41 = vunpack.i.l.bf16 %v2315_v36  ;;  %v2752_v60 = vpack.c.bf16 %v910_v38, %v909_v37 }
  0xba   : > { %v875_v42 = vsel %vm397_vm0, %v479_v35, %v2317_v40  ;;  %v874_v43 = vsel %vm397_vm0, %v478_v34, %v2316_v41  ;;  %2011 = vmatprep.mubr.msk.bf16.mxu1 %vm959_vm5, %v2752_v60  ;;  %2042 = vmatmul.mubr.msk.bf16.gmra.mrb[12].mxu0 %vm959_vm5, %v2752_v60  ;;  %v2330_v44 = vpop.permute.xlu1 %2329  ;;  %v490_v40 = vld [vmem:[#allocation2 + $0x168] sm:$0xff]  ;;  %v491_v41 = vld [vmem:[#allocation2 + $0x170] sm:$0xff] }
  0xbb   : > { %v2332_v47 = vunpack.i.h.bf16 %v2330_v44  ;;  %v2331_v48 = vunpack.i.l.bf16 %v2330_v44  ;;  %v2325_v49 = vpop.permute.xlu0 %2324  ;;  %2063 = vmatprep.mubr.msk.bf16.mxu0 %vm959_vm5, %v2691_v27  ;;  %v911_v50 = vsel %vm892_vm4, %v874_v43, %v2321_v33  ;;  %v912_v52 = vsel %vm892_vm4, %v875_v42, %v2322_v32 }
  0xbc   : > { %v2327_v56 = vunpack.i.h.bf16 %v2325_v49  ;;  %v2326_v57 = vunpack.i.l.bf16 %v2325_v49  ;;  %v2764_v58 = vpack.c.bf16 %v912_v52, %v911_v50 }
  0xbd   : > { %v879_v59 = vsel %vm397_vm0, %v483_v46, %v2332_v47  ;;  %v878_v61 = vsel %vm397_vm0, %v482_v45, %v2331_v48  ;;  %v488_v45 = vld [vmem:[#allocation2 + $0x150] sm:$0xff]  ;;  %v489_v46 = vld [vmem:[#allocation2 + $0x158] sm:$0xff] }
  0xbe   : > { %2012 = vmatmul.mubr.msk.bf16.gmra.mrb[16].mxu1 %vm959_vm5, %v2764_v58  ;;  %v2340_v62 = vpop.permute.xlu1 %2339  ;;  %v877_v27 = vsel %vm397_vm0, %v481_v55, %v2327_v56  ;;  %v876_v63 = vsel %vm397_vm0, %v480_v53, %v2326_v57 }
  0xbf   : > { %v2342_v0 = vunpack.i.h.bf16 %v2340_v62  ;;  %v2341_v1 = vunpack.i.l.bf16 %v2340_v62  ;;  %v2335_v3 = vpop.permute.xlu0 %2334 }
  0xc0   : > { %v2337_v4 = vunpack.i.h.bf16 %v2335_v3  ;;  %v2336_v5 = vunpack.i.l.bf16 %v2335_v3 }
  0xc1   : > { %v915_v6 = vsel %vm892_vm4, %v878_v61, %v2341_v1  ;;  %v916_v7 = vsel %vm892_vm4, %v879_v59, %v2342_v0 }
  0xc2   : > { %v2774_v8 = vpack.c.bf16 %v916_v7, %v915_v6  ;;  %v913_v9 = vsel %vm892_vm4, %v876_v63, %v2336_v5  ;;  %v914_v10 = vsel %vm892_vm4, %v877_v27, %v2337_v4  ;;  %2064 = vmatmul.mubr.msk.bf16.vlgmr.msra.gmra.mrb[0].mxu0 %vm959_vm5, %v2702_v39  ;;  %v2350_v11 = vpop.permute.xlu1 %2349  ;;  %v493_v5 = vld [vmem:[#allocation2 + $0x188] sm:$0xff] }
  0xc3   : > { %v2780_v12 = vpack.c.bf16 %v914_v10, %v913_v9  ;;  %v2352_v16 = vunpack.i.h.bf16 %v2350_v11  ;;  %v2351_v17 = vunpack.i.l.bf16 %v2350_v11  ;;  %v2345_v18 = vpop.permute.xlu0 %2344  ;;  %2067 = vmatprep.mubr.msk.bf16.mxu0 %vm959_vm5, %v2712_v51 }
  0xc4   : > { %v2347_v21 = vunpack.i.h.bf16 %v2345_v18  ;;  %v2346_v22 = vunpack.i.l.bf16 %v2345_v18  ;;  %v495_v18 = vld [vmem:[#allocation2 + $0x1a0] sm:$0xff] }
  0xc5   : > { %2015 = vmatprep.mubr.msk.bf16.mxu1 %vm959_vm5, %v2780_v12  ;;  %v883_v39 = vsel %vm397_vm0, %v487_v14, %v2352_v16  ;;  %v882_v23 = vsel %vm397_vm0, %v486_v13, %v2351_v17  ;;  %v494_v17 = vld [vmem:[#allocation2 + $0x198] sm:$0xff] }
  0xc6   : > { %2016 = vmatmul.mubr.msk.bf16.gmra.mrb[20].mxu1 %vm959_vm5, %v2774_v8  ;;  %v2360_v24 = vpop.permute.xlu1 %2359  ;;  %v881_v25 = vsel %vm397_vm0, %v485_v20, %v2347_v21  ;;  %v880_v26 = vsel %vm397_vm0, %v484_v19, %v2346_v22 }
  0xc7   : > { %v2362_v51 = vunpack.i.h.bf16 %v2360_v24  ;;  %v2361_v28 = vunpack.i.l.bf16 %v2360_v24  ;;  %v2355_v30 = vpop.permute.xlu0 %2354 }
  0xc8   : > { %v2357_v54 = vunpack.i.h.bf16 %v2355_v30  ;;  %v2356_v31 = vunpack.i.l.bf16 %v2355_v30 }
  0xc9   : > { %v919_v32 = vsel %vm892_vm4, %v882_v23, %v2361_v28  ;;  %v920_v33 = vsel %vm892_vm4, %v883_v39, %v2362_v51 }
  0xca   : > { %v949_v34 = vpack.c.bf16 %v920_v33, %v919_v32  ;;  %v917_v35 = vsel %vm892_vm4, %v880_v26, %v2356_v31  ;;  %v918_v36 = vsel %vm892_vm4, %v881_v25, %v2357_v54  ;;  %2068 = vmatmul.mubr.msk.bf16.gmra.mrb[4].mxu0 %vm959_vm5, %v2722_v2  ;;  %v2370_v37 = vpop.permute.xlu1 %2369 }
  0xcb   : > { %v948_v38 = vpack.c.bf16 %v918_v36, %v917_v35  ;;  %v2372_v42 = vunpack.i.h.bf16 %v2370_v37  ;;  %v2371_v43 = vunpack.i.l.bf16 %v2370_v37  ;;  %v2365_v44 = vpop.permute.xlu0 %2364  ;;  %2071 = vmatprep.mubr.msk.bf16.mxu0 %vm959_vm5, %v2732_v15 }
  0xcc   : > { %v2367_v47 = vunpack.i.h.bf16 %v2365_v44  ;;  %v2366_v48 = vunpack.i.l.bf16 %v2365_v44 }
  0xcd   : > { %2019 = vmatprep.mubr.msk.bf16.mxu1 %vm959_vm5, %v948_v38  ;;  %v887_v49 = vsel %vm397_vm0, %v491_v41, %v2372_v42  ;;  %v886_v2 = vsel %vm397_vm0, %v490_v40, %v2371_v43  ;;  %v2866_v43 = vld [vmem:[%s3024_s3] ss:$0 sm:$0xff] }
  0xce   : > { %2020 = vmatmul.mubr.msk.bf16.gmra.mrb[24].mxu1 %vm959_vm5, %v949_v34  ;;  %v2380_v50 = vpop.permute.xlu1 %2379  ;;  %v885_v52 = vsel %vm397_vm0, %v489_v46, %v2367_v47  ;;  %v884_v53 = vsel %vm397_vm0, %v488_v45, %v2366_v48  ;;  %v2871_v47 = vstv %s1624_s14 }
  0xcf   : > { %v2382_v55 = vunpack.i.h.bf16 %v2380_v50  ;;  %v2381_v56 = vunpack.i.l.bf16 %v2380_v50  ;;  %v2375_v15 = vpop.permute.xlu0 %2374 }
  0xd0   : > { %v2377_v57 = vunpack.i.h.bf16 %v2375_v15  ;;  %v2376_v59 = vunpack.i.l.bf16 %v2375_v15 }
  0xd1   : > { %v923_v61 = vsel %vm892_vm4, %v886_v2, %v2381_v56  ;;  %v924_v62 = vsel %vm892_vm4, %v887_v49, %v2382_v55 }
  0xd2   : > { %v951_v27 = vpack.c.bf16 %v924_v62, %v923_v61  ;;  %v921_v63 = vsel %vm892_vm4, %v884_v53, %v2376_v59  ;;  %v922_v0 = vsel %vm892_vm4, %v885_v52, %v2377_v57  ;;  %2072 = vmatmul.mubr.msk.bf16.gmra.mrb[8].mxu0 %vm959_vm5, %v2742_v29  ;;  %v2390_v4 = vpop.permute.xlu1 %2389 }
  0xd3   : > { %v950_v1 = vpack.c.bf16 %v922_v0, %v921_v63  ;;  %2075 = vmatprep.mubr.msk.bf16.mxu0 %vm959_vm5, %v2752_v60  ;;  %v2385_v29 = vpop.permute.xlu0 %2384  ;;  %v2392_v6 = vunpack.i.h.bf16 %v2390_v4  ;;  %v2391_v7 = vunpack.i.l.bf16 %v2390_v4 }
  0xd4   : > { %v2387_v60 = vunpack.i.h.bf16 %v2385_v29  ;;  %v2386_v3 = vunpack.i.l.bf16 %v2385_v29 }
  0xd5   : > { %2023 = vmatprep.mubr.msk.bf16.mxu1 %vm959_vm5, %v950_v1 }
  0xd6   : > { %2024 = vmatmul.mubr.msk.bf16.gmra.mrb[28].mxu1 %vm959_vm5, %v951_v27  ;;  %v889_v9 = vsel %vm397_vm0, %v493_v5, %v2387_v60  ;;  %v2400_v16 = vpop.permute.xlu1 %2399 }
  0xd7   : > { %2045 = vmatprep.mubr.msk.bf16.mxu1 %vm959_vm5, %v2764_v58  ;;  %v2395_v11 = vpop.permute.xlu0 %2394  ;;  %v2402_v20 = vunpack.i.h.bf16 %v2400_v16  ;;  %v2401_v21 = vunpack.i.l.bf16 %v2400_v16 }
  0xd8   : > { %v2397_v13 = vunpack.i.h.bf16 %v2395_v11  ;;  %v2396_v14 = vunpack.i.l.bf16 %v2395_v11 }
  0xda   : > { %2076 = vmatmul.mubr.msk.bf16.gmra.mrb[12].mxu0 %vm959_vm5, %v2764_v58  ;;  %v492_v58 = vld [vmem:[#allocation2 + $0x180] sm:$0xff]  ;;  %v891_v22 = vsel %vm397_vm0, %v495_v18, %v2397_v13  ;;  %v890_v39 = vsel %vm397_vm0, %v494_v17, %v2396_v14 }
  0xdb   : > { %2079 = vmatprep.mubr.msk.bf16.mxu0 %vm959_vm5, %v2780_v12  ;;  %v888_v10 = vsel %vm397_vm0, %v492_v58, %v2386_v3  ;;  %v927_v23 = vsel %vm892_vm4, %v890_v39, %v2401_v21  ;;  %v928_v24 = vsel %vm892_vm4, %v891_v22, %v2402_v20 }
  0xdc   : > { %v1416_v25 = vpack.c.bf16 %v928_v24, %v927_v23 }
  0xde   : > { %2046 = vmatmul.mubr.msk.bf16.vlgmr.msra.gmra.mrb[16].mxu1 %vm959_vm5, %v2780_v12  ;;  %v926_v12 = vsel %vm892_vm4, %v889_v9, %v2392_v6 }
  0xdf   : > { %2049 = vmatprep.mubr.msk.bf16.mxu1 %vm959_vm5, %v2774_v8 }
  0xe2   : > { %2080 = vmatmul.mubr.msk.bf16.gmra.mrb[16].mxu0 %vm959_vm5, %v2774_v8  ;;  %v925_v8 = vsel %vm892_vm4, %v888_v10, %v2391_v7 }
  0xe3   : > { %2083 = vmatprep.mubr.msk.bf16.mxu0 %vm959_vm5, %v948_v38  ;;  %v1208_v19 = vpack.c.bf16 %v926_v12, %v925_v8 }
  0xe6   : > { %2050 = vmatmul.mubr.msk.bf16.gmra.mrb[20].mxu1 %vm959_vm5, %v948_v38 }
  0xe7   : > { %2053 = vmatprep.mubr.msk.bf16.mxu1 %vm959_vm5, %v949_v34 }
  0xea   : > { %2084 = vmatmul.mubr.msk.bf16.gmra.mrb[20].mxu0 %vm959_vm5, %v949_v34 }
  0xeb   : > { %2087 = vmatprep.mubr.msk.bf16.mxu0 %vm959_vm5, %v950_v1 }
  0xee   : > { %2054 = vmatmul.mubr.msk.bf16.gmra.mrb[24].mxu1 %vm959_vm5, %v950_v1 }
  0xef   : > { %2057 = vmatprep.mubr.msk.bf16.mxu1 %vm959_vm5, %v951_v27 }
  0xf2   : > { %2088 = vmatmul.mubr.msk.bf16.gmra.mrb[24].mxu0 %vm959_vm5, %v951_v27 }
  0xf3   : > { %2091 = vmatprep.mubr.msk.bf16.mxu0 %vm959_vm5, %v1208_v19 }
  0xf6   : > { %2058 = vmatmul.mubr.msk.bf16.gmra.mrb[28].mxu1 %vm959_vm5, %v1208_v19 }
  0xfa   : > { %2092 = vmatmul.mubr.msk.bf16.gmra.mrb[28].mxu0 %vm959_vm5, %v1416_v25 }
 0x171   : > { %v1997_v26 = vpop.f32.mrb[0].mxu1 }
 0x172   : > { %v1049_v51 = vpop.f32.mrb[1].mxu1  ;;  %v1178_v44 = vadd.f32 %v1997_v26, %v2866_v43 }
 0x173   : > { %v1998_v28 = vpop.f32.mrb[2].mxu1  ;;  %v1176_v45 = vadd.f32 %v2866_v43, %v1049_v51 }
 0x174   : > { %v1052_v30 = vpop.f32.mrb[3].mxu1  ;;  %v1179_v48 = vadd.f32 %v1998_v28, %v2866_v43 }
 0x175   : > { %v1177_v50 = vadd.f32 %v2866_v43, %v1052_v30 }
 0x179   : > { %v2001_v54 = vpop.f32.mrb[4].mxu1 }
 0x17a   : > { %v1065_v31 = vpop.f32.mrb[5].mxu1  ;;  %v1182_v0 = vadd.f32 %v2001_v54, %v2866_v43 }
 0x17b   : > { %v2002_v32 = vpop.f32.mrb[6].mxu1  ;;  %v1180_v29 = vadd.f32 %v2866_v43, %v1065_v31 }
 0x17c   : > { %v1068_v33 = vpop.f32.mrb[7].mxu1  ;;  %v1183_v4 = vadd.f32 %v2002_v32, %v2866_v43 }
 0x17d   : > { %v1181_v6 = vadd.f32 %v2866_v43, %v1068_v33 }
 0x181   : > { %v2847_v34 = vpop.f32.mrb[8].mxu1 }
 0x182   : > { %v2849_v35 = vpop.f32.mrb[9].mxu1  ;;  %v1186_v19 = vadd.f32 %v2847_v34, %v2866_v43 }
 0x183   : > { %v2851_v36 = vpop.f32.mrb[10].mxu1  ;;  %v1184_v21 = vadd.f32 %v2866_v43, %v2849_v35 }
 0x184   : > { %v2853_v37 = vpop.f32.mrb[11].mxu1  ;;  %v1187_v23 = vadd.f32 %v2851_v36, %v2866_v43 }
 0x185   : > { %v1185_v26 = vadd.f32 %v2866_v43, %v2853_v37 }
 0x189   : > { %v2855_v38 = vpop.f32.mrb[12].mxu1 }
 0x18a   : > { %v2857_v40 = vpop.f32.mrb[13].mxu1 }
 0x18b   : > { %v2859_v41 = vpop.f32.mrb[14].mxu1 }
 0x18c   : > { %v2861_v42 = vpop.f32.mrb[15].mxu1 }
 0x195   : > { %v2065_v46 = vpop.f32.mrb[0].mxu0 }
 0x196   : > { %v2098_v49 = vadd.f32 %v2065_v46, %v1178_v44  ;;  %v1465_v2 = vpop.f32.mrb[1].mxu0  ;;  %v1190_v44 = vadd.f32 %v2855_v38, %v2866_v43  ;;  %v1188_v46 = vadd.f32 %v2866_v43, %v2857_v40  ;;  %v1189_v38 = vadd.f32 %v2866_v43, %v2861_v42 }
 0x197   : > { %v2100_v52 = vadd.f32 %v1465_v2, %v1176_v45  ;;  %v2066_v53 = vpop.f32.mrb[2].mxu0  ;;  %v1191_v2 = vadd.f32 %v2859_v41, %v2866_v43 }
 0x198   : > { %vm1627_vm6 = vcmp.gt.f32.partialorder %v2098_v49, 0.0  ;;  %v1660_v55 = vmul.f32 %v2098_v49, %v2871_v47  ;;  %v2102_v56 = vadd.f32 %v2066_v53, %v1179_v48  ;;  %v1468_v15 = vpop.f32.mrb[3].mxu0 }
 0x199   : > { %vm1625_vm8 = vcmp.gt.f32.partialorder %v2100_v52, 0.0  ;;  %v1658_v57 = vmul.f32 %v2100_v52, %v2871_v47  ;;  %v2104_v59 = vadd.f32 %v1468_v15, %v1177_v50 }
 0x19a   : > { %v1692_v61 = vsel %vm1627_vm6, %v2098_v49, %v1660_v55  ;;  %vm1628_vm9 = vcmp.gt.f32.partialorder %v2102_v56, 0.0  ;;  %v1661_v62 = vmul.f32 %v2102_v56, %v2871_v47 }
 0x19b   : > { %1725 = vst.msk [vmem:[%s2878_s23 + $0x10] sm:$0xff] %vm1722_vm7, %v1692_v61  ;;  %v1690_v27 = vsel %vm1625_vm8, %v2100_v52, %v1658_v57  ;;  %vm1626_vm10 = vcmp.gt.f32.partialorder %v2104_v59, 0.0  ;;  %v1659_v63 = vmul.f32 %v2104_v59, %v2871_v47 }
 0x19c   : > { %1723 = vst.msk [vmem:[%s2878_s23] sm:$0xff] %vm1722_vm7, %v1690_v27  ;;  %v1693_v1 = vsel %vm1628_vm9, %v2102_v56, %v1661_v62 }
 0x19d   : > { %1726 = vst.msk [vmem:[%s2878_s23 + $0x18] sm:$0xff] %vm1722_vm7, %v1693_v1  ;;  %v1691_v60 = vsel %vm1626_vm10, %v2104_v59, %v1659_v63  ;;  %v2069_v3 = vpop.f32.mrb[4].mxu0 }
 0x19e   : > { %1724 = vst.msk [vmem:[%s2878_s23 + $0x8] sm:$0xff] %vm1722_vm7, %v1691_v60  ;;  %v2106_v58 = vadd.f32 %v2069_v3, %v1182_v0  ;;  %v1481_v5 = vpop.f32.mrb[5].mxu0 }
 0x19f   : > { %v2108_v7 = vadd.f32 %v1481_v5, %v1180_v29  ;;  %v2070_v9 = vpop.f32.mrb[6].mxu0 }
 0x1a0   : > { %vm1631_vm11 = vcmp.gt.f32.partialorder %v2106_v58, 0.0  ;;  %v1664_v10 = vmul.f32 %v2106_v58, %v2871_v47  ;;  %v2110_v11 = vadd.f32 %v2070_v9, %v1183_v4  ;;  %v1484_v8 = vpop.f32.mrb[7].mxu0 }
 0x1a1   : > { %vm1629_vm12 = vcmp.gt.f32.partialorder %v2108_v7, 0.0  ;;  %v1662_v12 = vmul.f32 %v2108_v7, %v2871_v47  ;;  %v2112_v13 = vadd.f32 %v1484_v8, %v1181_v6 }
 0x1a2   : > { %v1696_v14 = vsel %vm1631_vm11, %v2106_v58, %v1664_v10  ;;  %vm1632_vm13 = vcmp.gt.f32.partialorder %v2110_v11, 0.0  ;;  %v1665_v16 = vmul.f32 %v2110_v11, %v2871_v47 }
 0x1a3   : > { %1729 = vst.msk [vmem:[%s2878_s23 + $0x30] sm:$0xff] %vm1722_vm7, %v1696_v14  ;;  %v1694_v17 = vsel %vm1629_vm12, %v2108_v7, %v1662_v12  ;;  %vm1630_vm14 = vcmp.gt.f32.partialorder %v2112_v13, 0.0  ;;  %v1663_v18 = vmul.f32 %v2112_v13, %v2871_v47 }
 0x1a4   : > { %1727 = vst.msk [vmem:[%s2878_s23 + $0x20] sm:$0xff] %vm1722_vm7, %v1694_v17  ;;  %v1697_v20 = vsel %vm1632_vm13, %v2110_v11, %v1665_v16 }
 0x1a5   : > { %1730 = vst.msk [vmem:[%s2878_s23 + $0x38] sm:$0xff] %vm1722_vm7, %v1697_v20  ;;  %v1695_v22 = vsel %vm1630_vm14, %v2112_v13, %v1663_v18  ;;  %v2073_v39 = vpop.f32.mrb[8].mxu0 }
 0x1a6   : > { %1728 = vst.msk [vmem:[%s2878_s23 + $0x28] sm:$0xff] %vm1722_vm7, %v1695_v22  ;;  %v2114_v24 = vadd.f32 %v2073_v39, %v1186_v19  ;;  %v1497_v25 = vpop.f32.mrb[9].mxu0 }
 0x1a7   : > { %v2116_v51 = vadd.f32 %v1497_v25, %v1184_v21  ;;  %v2074_v28 = vpop.f32.mrb[10].mxu0 }
 0x1a8   : > { %vm1635_vm15 = vcmp.gt.f32.partialorder %v2114_v24, 0.0  ;;  %v1668_v30 = vmul.f32 %v2114_v24, %v2871_v47  ;;  %v2118_v54 = vadd.f32 %v2074_v28, %v1187_v23  ;;  %v1500_v31 = vpop.f32.mrb[11].mxu0 }
 0x1a9   : > { %vm1633_vm0 = vcmp.gt.f32.partialorder %v2116_v51, 0.0  ;;  %v1666_v32 = vmul.f32 %v2116_v51, %v2871_v47  ;;  %v2120_v33 = vadd.f32 %v1500_v31, %v1185_v26 }
 0x1aa   : > { %v1700_v34 = vsel %vm1635_vm15, %v2114_v24, %v1668_v30  ;;  %vm1636_vm1 = vcmp.gt.f32.partialorder %v2118_v54, 0.0  ;;  %v1669_v35 = vmul.f32 %v2118_v54, %v2871_v47 }
 0x1ab   : > { %1733 = vst.msk [vmem:[%s2878_s23 + $0x50] sm:$0xff] %vm1722_vm7, %v1700_v34  ;;  %v1698_v36 = vsel %vm1633_vm0, %v2116_v51, %v1666_v32  ;;  %vm1634_vm2 = vcmp.gt.f32.partialorder %v2120_v33, 0.0  ;;  %v1667_v37 = vmul.f32 %v2120_v33, %v2871_v47 }
 0x1ac   : > { %1731 = vst.msk [vmem:[%s2878_s23 + $0x40] sm:$0xff] %vm1722_vm7, %v1698_v36  ;;  %v1701_v45 = vsel %vm1636_vm1, %v2118_v54, %v1669_v35 }
 0x1ad   : > { %1734 = vst.msk [vmem:[%s2878_s23 + $0x58] sm:$0xff] %vm1722_vm7, %v1701_v45  ;;  %v1699_v48 = vsel %vm1634_vm2, %v2120_v33, %v1667_v37  ;;  %v2077_v49 = vpop.f32.mrb[12].mxu0 }
 0x1ae   : > { %1732 = vst.msk [vmem:[%s2878_s23 + $0x48] sm:$0xff] %vm1722_vm7, %v1699_v48  ;;  %v2122_v50 = vadd.f32 %v2077_v49, %v1190_v44  ;;  %v1513_v52 = vpop.f32.mrb[13].mxu0 }
 0x1af   : > { %v2124_v53 = vadd.f32 %v1513_v52, %v1188_v46  ;;  %v2078_v55 = vpop.f32.mrb[14].mxu0 }
 0x1b0   : > { %vm1639_vm3 = vcmp.gt.f32.partialorder %v2122_v50, 0.0  ;;  %v1672_v40 = vmul.f32 %v2122_v50, %v2871_v47  ;;  %v2126_v56 = vadd.f32 %v2078_v55, %v1191_v2  ;;  %v1516_v15 = vpop.f32.mrb[15].mxu0 }
 0x1b1   : > { %vm1637_vm4 = vcmp.gt.f32.partialorder %v2124_v53, 0.0  ;;  %v1670_v57 = vmul.f32 %v2124_v53, %v2871_v47  ;;  %v2128_v41 = vadd.f32 %v1516_v15, %v1189_v38  ;;  %v2047_v59 = vpop.f32.mrb[16].mxu1 }
 0x1b2   : > { %v1704_v61 = vsel %vm1639_vm3, %v2122_v50, %v1672_v40  ;;  %vm1640_vm5 = vcmp.gt.f32.partialorder %v2126_v56, 0.0  ;;  %v1673_v62 = vmul.f32 %v2126_v56, %v2871_v47  ;;  %v1321_v42 = vpop.f32.mrb[17].mxu1  ;;  %v2129_v29 = vadd.f32 %v2047_v59, %v2866_v43 }
 0x1b3   : > { %1737 = vst.msk [vmem:[%s2878_s23 + $0x70] sm:$0xff] %vm1722_vm7, %v1704_v61  ;;  %v1702_v27 = vsel %vm1637_vm4, %v2124_v53, %v1670_v57  ;;  %vm1638_vm6 = vcmp.gt.f32.partialorder %v2128_v41, 0.0  ;;  %v1671_v63 = vmul.f32 %v2128_v41, %v2871_v47  ;;  %v2048_v0 = vpop.f32.mrb[18].mxu1  ;;  %v2131_v4 = vadd.f32 %v2866_v43, %v1321_v42 }
 0x1b4   : > { %1735 = vst.msk [vmem:[%s2878_s23 + $0x60] sm:$0xff] %vm1722_vm7, %v1702_v27  ;;  %v1705_v1 = vsel %vm1640_vm5, %v2126_v56, %v1673_v62  ;;  %v1324_v60 = vpop.f32.mrb[19].mxu1  ;;  %v2133_v5 = vadd.f32 %v2048_v0, %v2866_v43 }
 0x1b5   : > { %1738 = vst.msk [vmem:[%s2878_s23 + $0x78] sm:$0xff] %vm1722_vm7, %v1705_v1  ;;  %v1703_v3 = vsel %vm1638_vm6, %v2128_v41, %v1671_v63  ;;  %v2081_v58 = vpop.f32.mrb[16].mxu0  ;;  %v2135_v9 = vadd.f32 %v2866_v43, %v1324_v60 }
 0x1b6   : > { %1736 = vst.msk [vmem:[%s2878_s23 + $0x68] sm:$0xff] %vm1722_vm7, %v1703_v3  ;;  %v2130_v6 = vadd.f32 %v2129_v29, %v2081_v58  ;;  %v1529_v7 = vpop.f32.mrb[17].mxu0 }
 0x1b7   : > { %v2132_v10 = vadd.f32 %v2131_v4, %v1529_v7  ;;  %v2082_v11 = vpop.f32.mrb[18].mxu0 }
 0x1b8   : > { %vm1643_vm8 = vcmp.gt.f32.partialorder %v2130_v6, 0.0  ;;  %v1676_v8 = vmul.f32 %v2130_v6, %v2871_v47  ;;  %v2134_v12 = vadd.f32 %v2133_v5, %v2082_v11  ;;  %v1532_v13 = vpop.f32.mrb[19].mxu0 }
 0x1b9   : > { %vm1641_vm9 = vcmp.gt.f32.partialorder %v2132_v10, 0.0  ;;  %v1674_v14 = vmul.f32 %v2132_v10, %v2871_v47  ;;  %v2136_v16 = vadd.f32 %v2135_v9, %v1532_v13  ;;  %v2051_v17 = vpop.f32.mrb[20].mxu1 }
 0x1ba   : > { %v1708_v18 = vsel %vm1643_vm8, %v2130_v6, %v1676_v8  ;;  %vm1644_vm10 = vcmp.gt.f32.partialorder %v2134_v12, 0.0  ;;  %v1677_v19 = vmul.f32 %v2134_v12, %v2871_v47  ;;  %v1337_v20 = vpop.f32.mrb[21].mxu1  ;;  %v2137_v24 = vadd.f32 %v2051_v17, %v2866_v43 }
 0x1bb   : > { %1741 = vst.msk [vmem:[%s2878_s23 + $0x90] sm:$0xff] %vm1722_vm7, %v1708_v18  ;;  %v1706_v21 = vsel %vm1641_vm9, %v2132_v10, %v1674_v14  ;;  %vm1642_vm11 = vcmp.gt.f32.partialorder %v2136_v16, 0.0  ;;  %v1675_v22 = vmul.f32 %v2136_v16, %v2871_v47  ;;  %v2052_v39 = vpop.f32.mrb[22].mxu1  ;;  %v2139_v51 = vadd.f32 %v2866_v43, %v1337_v20 }
 0x1bc   : > { %1739 = vst.msk [vmem:[%s2878_s23 + $0x80] sm:$0xff] %vm1722_vm7, %v1706_v21  ;;  %v1709_v23 = vsel %vm1644_vm10, %v2134_v12, %v1677_v19  ;;  %v1340_v25 = vpop.f32.mrb[23].mxu1  ;;  %v2141_v30 = vadd.f32 %v2052_v39, %v2866_v43 }
 0x1bd   : > { %1742 = vst.msk [vmem:[%s2878_s23 + $0x98] sm:$0xff] %vm1722_vm7, %v1709_v23  ;;  %v1707_v26 = vsel %vm1642_vm11, %v2136_v16, %v1675_v22  ;;  %v2085_v28 = vpop.f32.mrb[20].mxu0  ;;  %v2143_v32 = vadd.f32 %v2866_v43, %v1340_v25 }
 0x1be   : > { %1740 = vst.msk [vmem:[%s2878_s23 + $0x88] sm:$0xff] %vm1722_vm7, %v1707_v26  ;;  %v2138_v54 = vadd.f32 %v2137_v24, %v2085_v28  ;;  %v1545_v31 = vpop.f32.mrb[21].mxu0 }
 0x1bf   : > { %v2140_v33 = vadd.f32 %v2139_v51, %v1545_v31  ;;  %v2086_v34 = vpop.f32.mrb[22].mxu0 }
 0x1c0   : > { %vm1647_vm12 = vcmp.gt.f32.partialorder %v2138_v54, 0.0  ;;  %v1680_v35 = vmul.f32 %v2138_v54, %v2871_v47  ;;  %v2142_v36 = vadd.f32 %v2141_v30, %v2086_v34  ;;  %v1548_v37 = vpop.f32.mrb[23].mxu0 }
 0x1c1   : > { %vm1645_vm13 = vcmp.gt.f32.partialorder %v2140_v33, 0.0  ;;  %v1678_v44 = vmul.f32 %v2140_v33, %v2871_v47  ;;  %v2144_v45 = vadd.f32 %v2143_v32, %v1548_v37  ;;  %v2055_v46 = vpop.f32.mrb[24].mxu1 }
 0x1c2   : > { %v1712_v48 = vsel %vm1647_vm12, %v2138_v54, %v1680_v35  ;;  %vm1648_vm14 = vcmp.gt.f32.partialorder %v2142_v36, 0.0  ;;  %v1681_v49 = vmul.f32 %v2142_v36, %v2871_v47  ;;  %v1353_v2 = vpop.f32.mrb[25].mxu1  ;;  %v2145_v55 = vadd.f32 %v2055_v46, %v2866_v43 }
 0x1c3   : > { %1745 = vst.msk [vmem:[%s2878_s23 + $0xb0] sm:$0xff] %vm1722_vm7, %v1712_v48  ;;  %v1710_v50 = vsel %vm1645_vm13, %v2140_v33, %v1678_v44  ;;  %vm1646_vm15 = vcmp.gt.f32.partialorder %v2144_v45, 0.0  ;;  %v1679_v52 = vmul.f32 %v2144_v45, %v2871_v47  ;;  %v2056_v38 = vpop.f32.mrb[26].mxu1  ;;  %v2147_v15 = vadd.f32 %v2866_v43, %v1353_v2 }
 0x1c4   : > { %1743 = vst.msk [vmem:[%s2878_s23 + $0xa0] sm:$0xff] %vm1722_vm7, %v1710_v50  ;;  %v1713_v53 = vsel %vm1648_vm14, %v2142_v36, %v1681_v49  ;;  %v1356_v40 = vpop.f32.mrb[27].mxu1  ;;  %v2149_v41 = vadd.f32 %v2056_v38, %v2866_v43 }
 0x1c5   : > { %1746 = vst.msk [vmem:[%s2878_s23 + $0xb8] sm:$0xff] %vm1722_vm7, %v1713_v53  ;;  %v1711_v56 = vsel %vm1646_vm15, %v2144_v45, %v1679_v52  ;;  %v2089_v57 = vpop.f32.mrb[24].mxu0  ;;  %v2151_v62 = vadd.f32 %v2866_v43, %v1356_v40 }
 0x1c6   : > { %1744 = vst.msk [vmem:[%s2878_s23 + $0xa8] sm:$0xff] %vm1722_vm7, %v1711_v56  ;;  %v2146_v59 = vadd.f32 %v2145_v55, %v2089_v57  ;;  %v1561_v61 = vpop.f32.mrb[25].mxu0 }
 0x1c7   : > { %v2148_v42 = vadd.f32 %v2147_v15, %v1561_v61  ;;  %v2090_v27 = vpop.f32.mrb[26].mxu0 }
 0x1c8   : > { %vm1651_vm0 = vcmp.gt.f32.partialorder %v2146_v59, 0.0  ;;  %v1684_v63 = vmul.f32 %v2146_v59, %v2871_v47  ;;  %v2150_v0 = vadd.f32 %v2149_v41, %v2090_v27  ;;  %v1564_v1 = vpop.f32.mrb[27].mxu0 }
 0x1c9   : > { %vm1649_vm1 = vcmp.gt.f32.partialorder %v2148_v42, 0.0  ;;  %v1682_v29 = vmul.f32 %v2148_v42, %v2871_v47  ;;  %v2152_v60 = vadd.f32 %v2151_v62, %v1564_v1  ;;  %v2059_v3 = vpop.f32.mrb[28].mxu1 }
 0x1ca   : > { %v1716_v4 = vsel %vm1651_vm0, %v2146_v59, %v1684_v63  ;;  %vm1652_vm2 = vcmp.gt.f32.partialorder %v2150_v0, 0.0  ;;  %v1685_v58 = vmul.f32 %v2150_v0, %v2871_v47  ;;  %v1369_v5 = vpop.f32.mrb[29].mxu1  ;;  %v2153_v11 = vadd.f32 %v2059_v3, %v2866_v43 }
 0x1cb   : > { %1749 = vst.msk [vmem:[%s2878_s23 + $0xd0] sm:$0xff] %vm1722_vm7, %v1716_v4  ;;  %v1714_v6 = vsel %vm1649_vm1, %v2148_v42, %v1682_v29  ;;  %vm1650_vm3 = vcmp.gt.f32.partialorder %v2152_v60, 0.0  ;;  %v1683_v7 = vmul.f32 %v2152_v60, %v2871_v47  ;;  %v2060_v9 = vpop.f32.mrb[30].mxu1  ;;  %v2155_v13 = vadd.f32 %v2866_v43, %v1369_v5 }
 0x1cc   : > { %1747 = vst.msk [vmem:[%s2878_s23 + $0xc0] sm:$0xff] %vm1722_vm7, %v1714_v6  ;;  %v1717_v10 = vsel %vm1652_vm2, %v2150_v0, %v1685_v58  ;;  %v1372_v8 = vpop.f32.mrb[31].mxu1  ;;  %v2157_v16 = vadd.f32 %v2060_v9, %v2866_v43 }
 0x1cd   : > { %1750 = vst.msk [vmem:[%s2878_s23 + $0xd8] sm:$0xff] %vm1722_vm7, %v1717_v10  ;;  %v1715_v12 = vsel %vm1650_vm3, %v2152_v60, %v1683_v7  ;;  %v2093_v14 = vpop.f32.mrb[28].mxu0  ;;  %v2159_v19 = vadd.f32 %v2866_v43, %v1372_v8 }
 0x1ce   : > { %1748 = vst.msk [vmem:[%s2878_s23 + $0xc8] sm:$0xff] %vm1722_vm7, %v1715_v12  ;;  %v2154_v17 = vadd.f32 %v2153_v11, %v2093_v14  ;;  %v1577_v18 = vpop.f32.mrb[29].mxu0 }
 0x1cf   : > { %v2156_v20 = vadd.f32 %v2155_v13, %v1577_v18  ;;  %v2094_v21 = vpop.f32.mrb[30].mxu0 }
 0x1d0   : > { %vm1655_vm4 = vcmp.gt.f32.partialorder %v2154_v17, 0.0  ;;  %v1688_v22 = vmul.f32 %v2154_v17, %v2871_v47  ;;  %v2158_v39 = vadd.f32 %v2157_v16, %v2094_v21  ;;  %v1580_v23 = vpop.f32.mrb[31].mxu0 }
 0x1d1   : > { %vm1653_vm5 = vcmp.gt.f32.partialorder %v2156_v20, 0.0  ;;  %v1686_v24 = vmul.f32 %v2156_v20, %v2871_v47  ;;  %v2160_v25 = vadd.f32 %v2159_v19, %v1580_v23 }
 0x1d2   : > { %v1720_v26 = vsel %vm1655_vm4, %v2154_v17, %v1688_v22  ;;  %vm1656_vm6 = vcmp.gt.f32.partialorder %v2158_v39, 0.0  ;;  %v1689_v51 = vmul.f32 %v2158_v39, %v2871_v47 }
 0x1d3   : > { %1753 = vst.msk [vmem:[%s2878_s23 + $0xf0] sm:$0xff] %vm1722_vm7, %v1720_v26  ;;  %v1718_v43 = vsel %vm1653_vm5, %v2156_v20, %v1686_v24  ;;  %vm1654_vm8 = vcmp.gt.f32.partialorder %v2160_v25, 0.0  ;;  %v1687_v28 = vmul.f32 %v2160_v25, %v2871_v47 }
 0x1d4   : > { %1751 = vst.msk [vmem:[%s2878_s23 + $0xe0] sm:$0xff] %vm1722_vm7, %v1718_v43  ;;  %v1721_v30 = vsel %vm1656_vm6, %v2158_v39, %v1689_v51 }
 0x1d5   : > { %1754 = vst.msk [vmem:[%s2878_s23 + $0xf8] sm:$0xff] %vm1722_vm7, %v1721_v30  ;;  %v1719_v54 = vsel %vm1654_vm8, %v2160_v25, %v1687_v28 }
 0x1d6   : > { %1752 = vst.msk [vmem:[%s2878_s23 + $0xe8] sm:$0xff] %vm1722_vm7, %v1719_v54 }
 0x1d7 PF: > { %s16_s22 = sadd.s32 1, %s2428_s22   ;;  %s3027_s20 = smov %s2424_s21 }
 0x1d8   : > { %p13_p5 = scmp.ge.s32.totalorder %s16_s22, 4   ;;  %s3028_s21 = smov %s3030_s4 }
 0x1da   :  { %15 = sbr.rel (!%p13_p5) target bundleno = 2 (0x2), region = 76 }

// kernel: feature_extractor.7
= control target key start
LH: loop header
LB: loop body
LE: loop exit
PB: predicated region body
PF: predicated region fallthrough
CT: control target
= control target key end

     0   :  { %s2678_s20 = smov 0   ;;  %s2680_s21 = smov 0   ;;  %s3307_s0 = inlined_call_operand.vmem [shape: f32[2,18,18,32], index: 0, kind: input, shape index: {}, may-alias: {0,1}]   ;;  %s3308_s1 = inlined_call_operand.vmem [shape: f32[2,18,18,32], index: 1, kind: input, shape index: {}, may-alias: {0,1}]   ;;  %s3309_s2 = inlined_call_operand.vmem [shape: bf16[3,96,32], index: 2, kind: input, shape index: {}]   ;;  %s3310_s3 = inlined_call_operand.vmem [shape: f32[1,32], index: 3, kind: input, shape index: {}]   ;;  %s3311_s4 = inlined_call_operand.<no memory space> [shape: f32[1], index: 4, kind: input, shape index: {}]   ;;  %s3312_s5 = inlined_call_operand.vmem [shape: f32[2,16,16,32], index: 5, kind: output, shape index: {}]  }
   0x1   :  { %10 = sst [smem:[#allocation3]] %s3311_s4  ;;  %s2682_s22 = smov 0  }
   0x2 LB: > { %s28_s4 = sadd.s32 1, %s2637_s21  ;;  %p1985_p0 = scmp.ge.s32.totalorder %s2641_s22, 1  ;;  %s2641_s22 = sphi %s2682_s22, %s16_s22   ;;  %s2637_s21 = sphi %s2680_s21, %s3314_s21   ;;  %s2633_s20 = sphi %s2678_s20, %s3313_s20  }
   0x3   : > { %p30_p1 = scmp.ge.s32.totalorder %s28_s4, 2  ;;  %p246_p2 = scmp.lt.s32.totalorder %s2641_s22, 3 }
   0x5   : > { %s3316_s4 = smov (%p30_p1, %s28_s4), 0  ;;  %p247_p3 = pnand %p1985_p0, %p246_p2 }
   0x6   : > { %p307_p4 = scmp.lt.s32.totalorder (!%p247_p3), %s2633_s20, 1  ;;  %vm397_vm0 = vcmask (!%p247_p3), 261120   ;;  %v2601_v0 = vld [vmem:[%s3309_s2] sm:$0xff] (!%p247_p3)   ;;  %v2704_v1 = vld [vmem:[%s3309_s2 + $0x30] sm:$0xff] (!%p247_p3)   ;;  %vm400_vm1 = vcmask (!%p247_p3), 254976   ;;  %v2603_v2 = vld [vmem:[%s3309_s2 + $0x8] sm:$0xff] (!%p247_p3)  }
   0x7   : > { %250 = sbr.rel (%p247_p3) target bundleno = 471 (0x1d7), region = 40  ;;  %2152 = vmatprep.subr.bf16.mxu1 (!%p247_p3), %v2601_v0  ;;  %2196 = vmatprep.subr.bf16.mxu0 (!%p247_p3), %v2704_v1  ;;  %v2714_v3 = vld [vmem:[%s3309_s2 + $0x38] sm:$0xff] (!%p247_p3)   ;;  %v2605_v4 = vld [vmem:[%s3309_s2 + $0x10] sm:$0xff] (!%p247_p3)   ;;  %v2731_v5 = vld [vmem:[%s3309_s2 + $0x40] sm:$0xff] (!%p247_p3)   ;;  %s2643_s14 = smov (!%p247_p3), 64   ;;  %vm892_vm2 = vcmask (!%p247_p3), 523264  }
   0x8   : > { %2153 = vmatpush3.bf16.msra.mxu1 (!%p247_p3), %v2601_v0  ;;  %2197 = vmatpush3.bf16.msra.mxu0 (!%p247_p3), %v2704_v1  ;;  %s2644_s15 = smov (!%p247_p3), 32   ;;  %vm1000_vm3 = vcmask (!%p247_p3), 785408   ;;  %s1734_s25 = sld [smem:[#allocation3]] (!%p247_p3) }
   0x9   : > { %2154 = vmatprep.subr.bf16.mxu1 (!%p247_p3), %v2603_v2  ;;  %2198 = vmatprep.subr.bf16.mxu0 (!%p247_p3), %v2714_v3 }
   0xc   : > { %2155 = vmatpush3.bf16.msra.mxu1 (!%p247_p3), %v2603_v2  ;;  %2199 = vmatpush3.bf16.msra.mxu0 (!%p247_p3), %v2714_v3 }
   0xd   : > { %2156 = vmatprep.subr.bf16.mxu1 (!%p247_p3), %v2605_v4  ;;  %2200 = vmatprep.subr.bf16.mxu0 (!%p247_p3), %v2731_v5 }
   0xe   : > { %s3318_s20 = smov (!%p307_p4, %s2633_s20), 1 }
   0xf   : > { %s2392_s29 = smul.u32 432, %s3318_s20  ;;  %s2085_s28 = sshll.u32 %s3318_s20, 8 }
  0x10   : > { %2157 = vmatpush3.bf16.msra.mxu1 %v2605_v4  ;;  %2201 = vmatpush3.bf16.msra.mxu0 %v2731_v5  ;;  %s3164_s6 = scalar_lea.vmem %s3312_s5, %s2085_s28 }
  0x11   : > { %s2725_s11 = scalar_lea.vmem %s3307_s0, %s2392_s29  ;;  %s2084_s16 = sadd.s32 384, %s2392_s29 }
  0x12   : > { %v349_v6 = vld [vmem:[%s2725_s11] sm:$0xff]  ;;  %v350_v7 = vld [vmem:[%s2725_s11 + $0x8] sm:$0xff]  ;;  %v351_v8 = vld [vmem:[%s2725_s11 + $0x10] sm:$0x3]  ;;  %s2835_s19 = scalar_lea.vmem %s3308_s1, %s2084_s16 }
  0x13   : > { %398 = vst.msk [vmem:[#allocation2] sm:$0xff] %vm397_vm0, %v349_v6  ;;  %399 = vst.msk [vmem:[#allocation2 + $0x8] sm:$0xff] %vm397_vm0, %v350_v7  ;;  %v352_v9 = vld [vmem:[%s2725_s11 + $0x18] sm:$0xff]  ;;  %v353_v10 = vld [vmem:[%s2725_s11 + $0x20] sm:$0xff] }
  0x14   : > { %401 = vst.msk [vmem:[#allocation2 + $0x10] sm:$0x3] %vm400_vm1, %v351_v8  ;;  %v354_v11 = vld [vmem:[%s2725_s11 + $0x28] sm:$0x3]  ;;  %v355_v12 = vld [vmem:[%s2725_s11 + $0x30] sm:$0xff]  ;;  %v356_v13 = vld [vmem:[%s2725_s11 + $0x38] sm:$0xff] }
  0x15   : > { %402 = vst.msk [vmem:[#allocation2 + $0x18] sm:$0xff] %vm397_vm0, %v352_v9  ;;  %403 = vst.msk [vmem:[#allocation2 + $0x20] sm:$0xff] %vm397_vm0, %v353_v10  ;;  %v357_v14 = vld [vmem:[%s2725_s11 + $0x40] sm:$0x3]  ;;  %v358_v15 = vld [vmem:[%s2725_s11 + $0x48] sm:$0xff] }
  0x16   : > { %404 = vst.msk [vmem:[#allocation2 + $0x28] sm:$0x3] %vm400_vm1, %v354_v11  ;;  %407 = vst.msk [vmem:[#allocation2 + $0x40] sm:$0x3] %vm400_vm1, %v357_v14  ;;  %v359_v16 = vld [vmem:[%s2725_s11 + $0x50] sm:$0xff]  ;;  %v361_v18 = vld [vmem:[%s2725_s11 + $0x60] sm:$0xff] }
  0x17   : > { %405 = vst.msk [vmem:[#allocation2 + $0x30] sm:$0xff] %vm397_vm0, %v355_v12  ;;  %406 = vst.msk [vmem:[#allocation2 + $0x38] sm:$0xff] %vm397_vm0, %v356_v13  ;;  %v360_v17 = vld [vmem:[%s2725_s11 + $0x58] sm:$0x3]  ;;  %v362_v19 = vld [vmem:[%s2725_s11 + $0x68] sm:$0xff] }
  0x18   : > { %408 = vst.msk [vmem:[#allocation2 + $0x48] sm:$0xff] %vm397_vm0, %v358_v15  ;;  %409 = vst.msk [vmem:[#allocation2 + $0x50] sm:$0xff] %vm397_vm0, %v359_v16  ;;  %v363_v20 = vld [vmem:[%s2725_s11 + $0x70] sm:$0x3]  ;;  %v364_v21 = vld [vmem:[%s2725_s11 + $0x78] sm:$0xff] }
  0x19   : > { %410 = vst.msk [vmem:[#allocation2 + $0x58] sm:$0x3] %vm400_vm1, %v360_v17  ;;  %413 = vst.msk [vmem:[#allocation2 + $0x70] sm:$0x3] %vm400_vm1, %v363_v20  ;;  %v365_v22 = vld [vmem:[%s2725_s11 + $0x80] sm:$0xff]  ;;  %v367_v24 = vld [vmem:[%s2725_s11 + $0x90] sm:$0xff] }
  0x1a   : > { %411 = vst.msk [vmem:[#allocation2 + $0x60] sm:$0xff] %vm397_vm0, %v361_v18  ;;  %412 = vst.msk [vmem:[#allocation2 + $0x68] sm:$0xff] %vm397_vm0, %v362_v19  ;;  %v366_v23 = vld [vmem:[%s2725_s11 + $0x88] sm:$0x3]  ;;  %v368_v25 = vld [vmem:[%s2725_s11 + $0x98] sm:$0xff] }
  0x1b   : > { %414 = vst.msk [vmem:[#allocation2 + $0x78] sm:$0xff] %vm397_vm0, %v364_v21  ;;  %415 = vst.msk [vmem:[#allocation2 + $0x80] sm:$0xff] %vm397_vm0, %v365_v22  ;;  %v369_v26 = vld [vmem:[%s2725_s11 + $0xa0] sm:$0x3]  ;;  %v370_v27 = vld [vmem:[%s2725_s11 + $0xa8] sm:$0xff] }
  0x1c   : > { %416 = vst.msk [vmem:[#allocation2 + $0x88] sm:$0x3] %vm400_vm1, %v366_v23  ;;  %419 = vst.msk [vmem:[#allocation2 + $0xa0] sm:$0x3] %vm400_vm1, %v369_v26  ;;  %v371_v28 = vld [vmem:[%s2725_s11 + $0xb0] sm:$0xff]  ;;  %v532_v30 = vld [vmem:[#allocation2 + $0x2] sm:$0xff] }
  0x1d   : > { %417 = vst.msk [vmem:[#allocation2 + $0x90] sm:$0xff] %vm397_vm0, %v367_v24  ;;  %418 = vst.msk [vmem:[#allocation2 + $0x98] sm:$0xff] %vm397_vm0, %v368_v25  ;;  %v372_v29 = vld [vmem:[%s2725_s11 + $0xb8] sm:$0x3]  ;;  %v533_v31 = vld [vmem:[#allocation2 + $0xa] sm:$0xff] }
  0x1e   : > { %v496_v32 = vld [vmem:[#allocation2 + $0x1] sm:$0xff]  ;;  %420 = vst.msk [vmem:[#allocation2 + $0xa8] sm:$0xff] %vm397_vm0, %v370_v27  ;;  %421 = vst.msk [vmem:[#allocation2 + $0xb0] sm:$0xff] %vm397_vm0, %v371_v28  ;;  %v2431_v33 = vpack.i.bf16 %v533_v31, %v532_v30  ;;  %v497_v34 = vld [vmem:[#allocation2 + $0x9] sm:$0xff] }
  0x1f   : > { %422 = vst.msk [vmem:[#allocation2 + $0xb8] sm:$0x3] %vm400_vm1, %v372_v29  ;;  %v534_v35 = vld [vmem:[#allocation2 + $0x1a] sm:$0xff]  ;;  %v535_v36 = vld [vmem:[#allocation2 + $0x22] sm:$0xff]  ;;  %v2421_v37 = vpack.i.bf16 %v497_v34, %v496_v32  ;;  %v536_v42 = vld [vmem:[#allocation2 + $0x32] sm:$0xff] }
  0x20   : > { %v498_v38 = vld [vmem:[#allocation2 + $0x19] sm:$0xff]  ;;  %v499_v39 = vld [vmem:[#allocation2 + $0x21] sm:$0xff]  ;;  %2432 = vrot.lane.b32.xlu1 %v2431_v33, %s2643_s14  ;;  %v2436_v40 = vpack.i.bf16 %v535_v36, %v534_v35  ;;  %v500_v44 = vld [vmem:[#allocation2 + $0x31] sm:$0xff] }
  0x21   : > { %2422 = vrot.lane.b32.xlu0 %v2421_v37, %s2644_s15  ;;  %v2426_v41 = vpack.i.bf16 %v499_v39, %v498_v38  ;;  %v537_v43 = vld [vmem:[#allocation2 + $0x3a] sm:$0xff]  ;;  %v538_v48 = vld [vmem:[#allocation2 + $0x4a] sm:$0xff]  ;;  %v539_v49 = vld [vmem:[#allocation2 + $0x52] sm:$0xff] }
  0x22   : > { %v501_v45 = vld [vmem:[#allocation2 + $0x39] sm:$0xff]  ;;  %v2446_v46 = vpack.i.bf16 %v537_v43, %v536_v42  ;;  %v502_v50 = vld [vmem:[#allocation2 + $0x49] sm:$0xff]  ;;  %v503_v51 = vld [vmem:[#allocation2 + $0x51] sm:$0xff]  ;;  %v2456_v55 = vpack.i.bf16 %v539_v49, %v538_v48 }
  0x23   : > { %v2441_v47 = vpack.i.bf16 %v501_v45, %v500_v44  ;;  %v2788_v52 = vld [vmem:[#allocation2 + $0x62] sm:$0xff]  ;;  %v2790_v53 = vld [vmem:[#allocation2 + $0x6a] sm:$0xff]  ;;  %v376_v60 = vld [vmem:[%s2725_s11 + $0xd8] sm:$0xff]  ;;  %v2451_v61 = vpack.i.bf16 %v503_v51, %v502_v50 }
  0x24   : > { %2437 = vrot.lane.b32.xlu1 %v2436_v40, %s2643_s14  ;;  %v373_v54 = vld [vmem:[%s2725_s11 + $0xc0] sm:$0xff]  ;;  %v2796_v57 = vld [vmem:[#allocation2 + $0x69] sm:$0xff]  ;;  %426 = vst.msk [vmem:[#allocation2 + $0xd8] sm:$0xff] %vm397_vm0, %v376_v60  ;;  %v384_v4 = vld [vmem:[%s2725_s11 + $0x118] sm:$0x3]  ;;  %v2466_v12 = vpack.i.bf16 %v2790_v53, %v2788_v52 }
  0x25   : > { %2427 = vrot.lane.b32.xlu0 %v2426_v41, %s2644_s15  ;;  %v2794_v56 = vld [vmem:[#allocation2 + $0x61] sm:$0xff]  ;;  %v375_v59 = vld [vmem:[%s2725_s11 + $0xd0] sm:$0x3]  ;;  %423 = vst.msk [vmem:[#allocation2 + $0xc0] sm:$0xff] %vm397_vm0, %v373_v54  ;;  %v380_v9 = vld [vmem:[%s2725_s11 + $0xf8] sm:$0xff] }
  0x26   : > { %v374_v58 = vld [vmem:[%s2725_s11 + $0xc8] sm:$0xff]  ;;  %425 = vst.msk [vmem:[#allocation2 + $0xd0] sm:$0x3] %vm400_vm1, %v375_v59  ;;  %v377_v62 = vld [vmem:[%s2725_s11 + $0xe0] sm:$0xff]  ;;  %v383_v2 = vld [vmem:[%s2725_s11 + $0x110] sm:$0xff]  ;;  %v2461_v18 = vpack.i.bf16 %v2796_v57, %v2794_v56 }
  0x27   : > { %424 = vst.msk [vmem:[#allocation2 + $0xc8] sm:$0xff] %vm397_vm0, %v374_v58  ;;  %v378_v63 = vld [vmem:[%s2725_s11 + $0xe8] sm:$0x3]  ;;  %427 = vst.msk [vmem:[#allocation2 + $0xe0] sm:$0xff] %vm397_vm0, %v377_v62  ;;  %v379_v6 = vld [vmem:[%s2725_s11 + $0xf0] sm:$0xff] }
  0x28   : > { %2447 = vrot.lane.b32.xlu1 %v2446_v46, %s2643_s14  ;;  %v382_v0 = vld [vmem:[%s2725_s11 + $0x108] sm:$0xff]  ;;  %428 = vst.msk [vmem:[#allocation2 + $0xe8] sm:$0x3] %vm400_vm1, %v378_v63  ;;  %v542_v7 = vld [vmem:[#allocation2 + $0x7a] sm:$0xff]  ;;  %434 = vst.msk [vmem:[#allocation2 + $0x118] sm:$0x3] %vm400_vm1, %v384_v4 }
  0x29   : > { %2442 = vrot.lane.b32.xlu0 %v2441_v47, %s2644_s15  ;;  %432 = vst.msk [vmem:[#allocation2 + $0x108] sm:$0xff] %vm397_vm0, %v382_v0  ;;  %v543_v8 = vld [vmem:[#allocation2 + $0x82] sm:$0xff]  ;;  %433 = vst.msk [vmem:[#allocation2 + $0x110] sm:$0xff] %vm397_vm0, %v383_v2  ;;  %v381_v10 = vld [vmem:[%s2725_s11 + $0x100] sm:$0x3] }
  0x2a   : > { %429 = vst.msk [vmem:[#allocation2 + $0xf0] sm:$0xff] %vm397_vm0, %v379_v6  ;;  %v388_v11 = vld [vmem:[%s2725_s11 + $0x138] sm:$0xff]  ;;  %v507_v14 = vld [vmem:[#allocation2 + $0x81] sm:$0xff]  ;;  %430 = vst.msk [vmem:[#allocation2 + $0xf8] sm:$0xff] %vm397_vm0, %v380_v9  ;;  %v2476_v28 = vpack.i.bf16 %v543_v8, %v542_v7 }
  0x2b   : > { %v506_v13 = vld [vmem:[#allocation2 + $0x79] sm:$0xff]  ;;  %431 = vst.msk [vmem:[#allocation2 + $0x100] sm:$0x3] %vm400_vm1, %v381_v10  ;;  %v390_v16 = vld [vmem:[%s2725_s11 + $0x148] sm:$0x3]  ;;  %v395_v22 = vld [vmem:[%s2725_s11 + $0x170] sm:$0xff] }
  0x2c   : > { %2457 = vrot.lane.b32.xlu1 %v2456_v55, %s2643_s14  ;;  %v389_v15 = vld [vmem:[%s2725_s11 + $0x140] sm:$0xff]  ;;  %438 = vst.msk [vmem:[#allocation2 + $0x138] sm:$0xff] %vm397_vm0, %v388_v11  ;;  %v386_v19 = vld [vmem:[%s2725_s11 + $0x128] sm:$0xff]  ;;  %v387_v20 = vld [vmem:[%s2725_s11 + $0x130] sm:$0x3]  ;;  %v2471_v29 = vpack.i.bf16 %v507_v14, %v506_v13 }
  0x2d   : > { %v385_v17 = vld [vmem:[%s2725_s11 + $0x120] sm:$0xff]  ;;  %2452 = vrot.lane.b32.xlu0 %v2451_v61, %s2644_s15  ;;  %439 = vst.msk [vmem:[#allocation2 + $0x140] sm:$0xff] %vm397_vm0, %v389_v15  ;;  %v394_v21 = vld [vmem:[%s2725_s11 + $0x168] sm:$0xff]  ;;  %436 = vst.msk [vmem:[#allocation2 + $0x128] sm:$0xff] %vm397_vm0, %v386_v19 }
  0x2e   : > { %440 = vst.msk [vmem:[#allocation2 + $0x148] sm:$0x3] %vm400_vm1, %v390_v16  ;;  %437 = vst.msk [vmem:[#allocation2 + $0x130] sm:$0x3] %vm400_vm1, %v387_v20  ;;  %v396_v23 = vld [vmem:[%s2725_s11 + $0x178] sm:$0x3] }
  0x2f   : > { %435 = vst.msk [vmem:[#allocation2 + $0x120] sm:$0xff] %vm397_vm0, %v385_v17  ;;  %444 = vst.msk [vmem:[#allocation2 + $0x168] sm:$0xff] %vm397_vm0, %v394_v21  ;;  %v391_v24 = vld [vmem:[%s2725_s11 + $0x150] sm:$0xff]  ;;  %v392_v25 = vld [vmem:[%s2725_s11 + $0x158] sm:$0xff] }
  0x30   : > { %445 = vst.msk [vmem:[#allocation2 + $0x170] sm:$0xff] %vm397_vm0, %v395_v22  ;;  %v393_v26 = vld [vmem:[%s2725_s11 + $0x160] sm:$0x3]  ;;  %441 = vst.msk [vmem:[#allocation2 + $0x150] sm:$0xff] %vm397_vm0, %v391_v24  ;;  %2467 = vrot.lane.b32.xlu1 %v2466_v12, %s2643_s14  ;;  %v544_v30 = vld [vmem:[#allocation2 + $0x92] sm:$0xff] }
  0x31   : > { %446 = vst.msk [vmem:[#allocation2 + $0x178] sm:$0x3] %vm400_vm1, %v396_v23  ;;  %v447_v27 = vld [vmem:[%s2835_s19] sm:$0xff]  ;;  %443 = vst.msk [vmem:[#allocation2 + $0x160] sm:$0x3] %vm400_vm1, %v393_v26  ;;  %2462 = vrot.lane.b32.xlu0 %v2461_v18, %s2644_s15  ;;  %v508_v32 = vld [vmem:[#allocation2 + $0x91] sm:$0xff] }
  0x32   : > { %442 = vst.msk [vmem:[#allocation2 + $0x158] sm:$0xff] %vm397_vm0, %v392_v25  ;;  %454 = vst.msk [vmem:[#allocation2 + $0x180] sm:$0xff] %vm397_vm0, %v447_v27  ;;  %v545_v31 = vld [vmem:[#allocation2 + $0x9a] sm:$0xff]  ;;  %v546_v36 = vld [vmem:[#allocation2 + $0xaa] sm:$0xff] }
  0x33   : > { %v509_v33 = vld [vmem:[#allocation2 + $0x99] sm:$0xff]  ;;  %v2486_v34 = vpack.i.bf16 %v545_v31, %v544_v30  ;;  %v510_v38 = vld [vmem:[#allocation2 + $0xa9] sm:$0xff]  ;;  %v511_v39 = vld [vmem:[#allocation2 + $0xb1] sm:$0xff] }
  0x34   : > { %2477 = vrot.lane.b32.xlu1 %v2476_v28, %s2643_s14  ;;  %v2481_v35 = vpack.i.bf16 %v509_v33, %v508_v32  ;;  %v547_v37 = vld [vmem:[#allocation2 + $0xb2] sm:$0xff]  ;;  %v2491_v41 = vpack.i.bf16 %v511_v39, %v510_v38  ;;  %v548_v42 = vld [vmem:[#allocation2 + $0xc2] sm:$0xff]  ;;  %v549_v43 = vld [vmem:[#allocation2 + $0xca] sm:$0xff] }
  0x35   : > { %2472 = vrot.lane.b32.xlu0 %v2471_v29, %s2644_s15  ;;  %v2496_v40 = vpack.i.bf16 %v547_v37, %v546_v36  ;;  %v512_v44 = vld [vmem:[#allocation2 + $0xc1] sm:$0xff]  ;;  %v513_v45 = vld [vmem:[#allocation2 + $0xc9] sm:$0xff]  ;;  %v450_v50 = vld [vmem:[%s2835_s19 + $0x18] sm:$0xff]  ;;  %v2506_v52 = vpack.i.bf16 %v549_v43, %v548_v42 }
  0x36   : > { %v448_v46 = vld [vmem:[%s2835_s19 + $0x8] sm:$0xff]  ;;  %v550_v47 = vld [vmem:[#allocation2 + $0xda] sm:$0xff]  ;;  %v449_v49 = vld [vmem:[%s2835_s19 + $0x10] sm:$0x3]  ;;  %457 = vst.msk [vmem:[#allocation2 + $0x198] sm:$0xff] %vm397_vm0, %v450_v50  ;;  %v2501_v57 = vpack.i.bf16 %v513_v45, %v512_v44 }
  0x37   : > { %v551_v48 = vld [vmem:[#allocation2 + $0xe2] sm:$0xff]  ;;  %455 = vst.msk [vmem:[#allocation2 + $0x188] sm:$0xff] %vm397_vm0, %v448_v46  ;;  %v514_v53 = vld [vmem:[#allocation2 + $0xd9] sm:$0xff]  ;;  %v2895_v62 = vld [vmem:[%s3309_s2 + $0x50] sm:$0xff]  }
  0x38   : > { %2487 = vrot.lane.b32.xlu1 %v2486_v34, %s2643_s14  ;;  %v451_v51 = vld [vmem:[%s2835_s19 + $0x20] sm:$0xff]  ;;  %456 = vst.msk [vmem:[#allocation2 + $0x190] sm:$0x3] %vm400_vm1, %v449_v49  ;;  %v452_v55 = vld [vmem:[%s2835_s19 + $0x28] sm:$0x3]  ;;  %v2607_v56 = vld [vmem:[%s3309_s2 + $0x18] sm:$0xff]   ;;  %v2516_v61 = vpack.i.bf16 %v551_v48, %v550_v47 }
  0x39   : > { %2482 = vrot.lane.b32.xlu0 %v2481_v35, %s2644_s15  ;;  %v515_v54 = vld [vmem:[#allocation2 + $0xe1] sm:$0xff]  ;;  %458 = vst.msk [vmem:[#allocation2 + $0x1a0] sm:$0xff] %vm397_vm0, %v451_v51  ;;  %2158 = vmatprep.subr.bf16.mxu1 %v2607_v56  ;;  %v518_v60 = vld [vmem:[#allocation2 + $0x109] sm:$0xff]  ;;  %v519_v0 = vld [vmem:[#allocation2 + $0x111] sm:$0xff] }
  0x3a   : > { %459 = vst.msk [vmem:[#allocation2 + $0x1a8] sm:$0x3] %vm400_vm1, %v452_v55  ;;  %v2885_v58 = vld [vmem:[%s3309_s2 + $0x48] sm:$0xff]   ;;  %v2609_v59 = vld [vmem:[%s3309_s2 + $0x20] sm:$0xff]   ;;  %2159 = vmatpush3.bf16.msra.mxu1 %v2607_v56  ;;  %v2511_v63 = vpack.i.bf16 %v515_v54, %v514_v53  ;;  %v516_v4 = vld [vmem:[#allocation2 + $0xf1] sm:$0xff]  ;;  %v2526_v7 = vpack.i.bf16 %v519_v0, %v518_v60 }
  0x3b   : > { %2202 = vmatprep.subr.bf16.mxu0 %v2885_v58  ;;  %2160 = vmatprep.subr.bf16.mxu1 %v2609_v59  ;;  %v2611_v2 = vld [vmem:[%s3309_s2 + $0x28] sm:$0xff]   ;;  %v517_v6 = vld [vmem:[#allocation2 + $0xf9] sm:$0xff]  ;;  %v527_v30 = vld [vmem:[#allocation2 + $0x171] sm:$0xff] }
  0x3c   : > { %2497 = vrot.lane.b32.xlu1 %v2496_v40, %s2643_s14  ;;  %2203 = vmatpush3.bf16.msra.mxu0 %v2885_v58  ;;  %v554_v8 = vld [vmem:[#allocation2 + $0x10a] sm:$0xff]  ;;  %v2521_v9 = vpack.i.bf16 %v517_v6, %v516_v4  ;;  %v555_v10 = vld [vmem:[#allocation2 + $0x112] sm:$0xff]  ;;  %v553_v12 = vld [vmem:[#allocation2 + $0xfa] sm:$0xff] }
  0x3d   : > { %2492 = vrot.lane.b32.xlu0 %v2491_v41, %s2644_s15  ;;  %2204 = vmatprep.subr.bf16.mxu0 %v2895_v62  ;;  %v552_v11 = vld [vmem:[#allocation2 + $0xf2] sm:$0xff]  ;;  %v2536_v14 = vpack.i.bf16 %v555_v10, %v554_v8  ;;  %v2916_v15 = vld [vmem:[%s3309_s2 + $0x60] sm:$0xff]   ;;  %v521_v20 = vld [vmem:[#allocation2 + $0x129] sm:$0xff] }
  0x3e   : > { %2161 = vmatpush3.bf16.msra.mxu1 %v2609_v59  ;;  %v2909_v13 = vld [vmem:[%s3309_s2 + $0x58] sm:$0xff]   ;;  %v2531_v16 = vpack.i.bf16 %v553_v12, %v552_v11  ;;  %v523_v18 = vld [vmem:[#allocation2 + $0x141] sm:$0xff]  ;;  %v557_v26 = vld [vmem:[#allocation2 + $0x12a] sm:$0xff] }
  0x3f   : > { %2162 = vmatprep.subr.bf16.mxu1 %v2611_v2  ;;  %v522_v17 = vld [vmem:[#allocation2 + $0x139] sm:$0xff]  ;;  %v520_v19 = vld [vmem:[#allocation2 + $0x121] sm:$0xff]  ;;  %v526_v29 = vld [vmem:[#allocation2 + $0x169] sm:$0xff] }
  0x40   : > { %2507 = vrot.lane.b32.xlu1 %v2506_v52, %s2643_s14  ;;  %2205 = vmatpush3.bf16.msra.mxu0 %v2895_v62  ;;  %v2546_v21 = vpack.i.bf16 %v523_v18, %v522_v17  ;;  %v558_v22 = vld [vmem:[#allocation2 + $0x13a] sm:$0xff]  ;;  %v2541_v23 = vpack.i.bf16 %v521_v20, %v520_v19  ;;  %v559_v24 = vld [vmem:[#allocation2 + $0x142] sm:$0xff]  ;;  %v524_v31 = vld [vmem:[#allocation2 + $0x151] sm:$0xff]  ;;  %v2566_v33 = vpack.i.bf16 %v527_v30, %v526_v29 }
  0x41   : > { %2502 = vrot.lane.b32.xlu0 %v2501_v57, %s2644_s15  ;;  %2206 = vmatprep.subr.bf16.mxu0 %v2909_v13  ;;  %v556_v25 = vld [vmem:[#allocation2 + $0x122] sm:$0xff]  ;;  %v2556_v27 = vpack.i.bf16 %v559_v24, %v558_v22  ;;  %v525_v32 = vld [vmem:[#allocation2 + $0x159] sm:$0xff]  ;;  %v562_v35 = vld [vmem:[#allocation2 + $0x16a] sm:$0xff] }
  0x42   : > { %2163 = vmatpush3.bf16.msra.mxu1 %v2611_v2  ;;  %v2551_v28 = vpack.i.bf16 %v557_v26, %v556_v25  ;;  %v2561_v34 = vpack.i.bf16 %v525_v32, %v524_v31  ;;  %v563_v36 = vld [vmem:[#allocation2 + $0x172] sm:$0xff]  ;;  %v561_v38 = vld [vmem:[#allocation2 + $0x15a] sm:$0xff]  ;;  %v564_v41 = vld [vmem:[#allocation2 + $0x182] sm:$0xff] }
  0x43   : > { %2284 = vmatprep.subr.bf16.mxu1 %v2704_v1  ;;  %v560_v37 = vld [vmem:[#allocation2 + $0x152] sm:$0xff]  ;;  %v2576_v39 = vpack.i.bf16 %v563_v36, %v562_v35  ;;  %v565_v42 = vld [vmem:[#allocation2 + $0x18a] sm:$0xff]  ;;  %v528_v43 = vld [vmem:[#allocation2 + $0x181] sm:$0xff] }
  0x44   : > { %2517 = vrot.lane.b32.xlu1 %v2516_v61, %s2643_s14  ;;  %2207 = vmatpush3.bf16.msra.mxu0 %v2909_v13  ;;  %v2571_v40 = vpack.i.bf16 %v561_v38, %v560_v37  ;;  %v529_v44 = vld [vmem:[#allocation2 + $0x189] sm:$0xff]  ;;  %v2586_v45 = vpack.i.bf16 %v565_v42, %v564_v41  ;;  %v566_v47 = vld [vmem:[#allocation2 + $0x19a] sm:$0xff] }
  0x45   : > { %2512 = vrot.lane.b32.xlu0 %v2511_v63, %s2644_s15  ;;  %2240 = vmatprep.subr.bf16.mxu0 %v2916_v15  ;;  %v2581_v46 = vpack.i.bf16 %v529_v44, %v528_v43  ;;  %v567_v48 = vld [vmem:[#allocation2 + $0x1a2] sm:$0xff]  ;;  %v530_v49 = vld [vmem:[#allocation2 + $0x199] sm:$0xff]  ;;  %v464_v22 = vld [vmem:[#allocation2 + $0x30] sm:$0xff] }
  0x46   : > { %v531_v50 = vld [vmem:[#allocation2 + $0x1a1] sm:$0xff]  ;;  %v2596_v51 = vpack.i.bf16 %v567_v48, %v566_v47  ;;  %v467_v36 = vld [vmem:[#allocation2 + $0x50] sm:$0xff] }
  0x47   : > { %v2591_v52 = vpack.i.bf16 %v531_v50, %v530_v49  ;;  %v460_v57 = vld [vmem:[#allocation2] sm:$0xff]  ;;  %v461_v59 = vld [vmem:[#allocation2 + $0x8] sm:$0xff] }
  0x48   : > { %2527 = vrot.lane.b32.xlu1 %v2526_v7, %s2644_s15  ;;  %v462_v7 = vld [vmem:[#allocation2 + $0x18] sm:$0xff]  ;;  %v463_v8 = vld [vmem:[#allocation2 + $0x20] sm:$0xff]  ;;  %v466_v35 = vld [vmem:[#allocation2 + $0x48] sm:$0xff] }
  0x49   : > { %2522 = vrot.lane.b32.xlu0 %v2521_v9, %s2644_s15  ;;  %v2614_v43 = vld [vmem:[%s3309_s2 + $0x68] sm:$0xff]   ;;  %v468_v48 = vld [vmem:[#allocation2 + $0x60] sm:$0xff] }
  0x4a   : > { %v469_v49 = vld [vmem:[#allocation2 + $0x68] sm:$0xff] }
  0x4c   : > { %2537 = vrot.lane.b32.xlu1 %v2536_v14, %s2643_s14 }
  0x4d   : > { %2532 = vrot.lane.b32.xlu0 %v2531_v16, %s2643_s14 }
  0x50   : > { %2547 = vrot.lane.b32.xlu1 %v2546_v21, %s2644_s15 }
  0x51   : > { %2542 = vrot.lane.b32.xlu0 %v2541_v23, %s2644_s15  ;;  %v465_v23 = vld [vmem:[#allocation2 + $0x38] sm:$0xff] }
  0x54   : > { %2557 = vrot.lane.b32.xlu1 %v2556_v27, %s2643_s14 }
  0x55   : > { %2552 = vrot.lane.b32.xlu0 %v2551_v28, %s2643_s14 }
  0x58   : > { %2567 = vrot.lane.b32.xlu1 %v2566_v33, %s2644_s15 }
  0x59   : > { %2562 = vrot.lane.b32.xlu0 %v2561_v34, %s2644_s15 }
  0x5c   : > { %2577 = vrot.lane.b32.xlu1 %v2576_v39, %s2643_s14 }
  0x5d   : > { %2572 = vrot.lane.b32.xlu0 %v2571_v40, %s2643_s14 }
  0x60   : > { %2587 = vrot.lane.b32.xlu1 %v2586_v45, %s2643_s14 }
  0x61   : > { %2582 = vrot.lane.b32.xlu0 %v2581_v46, %s2644_s15 }
  0x64   : > { %2597 = vrot.lane.b32.xlu1 %v2596_v51, %s2643_s14 }
  0x65   : > { %2592 = vrot.lane.b32.xlu0 %v2591_v52, %s2644_s15 }
  0x92   : > { %v2433_v53 = vpop.permute.xlu1 %2432 }
  0x93   : > { %v2435_v54 = vunpack.i.h.bf16 %v2433_v53  ;;  %v2434_v55 = vunpack.i.l.bf16 %v2433_v53  ;;  %v2423_v56 = vpop.permute.xlu0 %2422 }
  0x94   : > { %v2425_v60 = vunpack.i.h.bf16 %v2423_v56  ;;  %v2424_v61 = vunpack.i.l.bf16 %v2423_v56 }
  0x96   : > { %v2438_v63 = vpop.permute.xlu1 %2437  ;;  %v856_v0 = vsel %vm397_vm0, %v460_v57, %v2424_v61  ;;  %v857_v2 = vsel %vm397_vm0, %v461_v59, %v2425_v60  ;;  %v470_v61 = vld [vmem:[#allocation2 + $0x78] sm:$0xff] }
  0x97   : > { %v2440_v4 = vunpack.i.h.bf16 %v2438_v63  ;;  %v2439_v6 = vunpack.i.l.bf16 %v2438_v63  ;;  %v2428_v9 = vpop.permute.xlu0 %2427  ;;  %v893_v10 = vsel %vm892_vm2, %v856_v0, %v2434_v55  ;;  %v894_v11 = vsel %vm892_vm2, %v857_v2, %v2435_v54  ;;  %v471_v63 = vld [vmem:[#allocation2 + $0x80] sm:$0xff] }
  0x98   : > { %v2430_v12 = vunpack.i.h.bf16 %v2428_v9  ;;  %v2429_v14 = vunpack.i.l.bf16 %v2428_v9  ;;  %v936_v16 = vpack.c.bf16 %v894_v11, %v893_v10  ;;  %v2616_v9 = vld [vmem:[%s3309_s2 + $0x78] sm:$0xff]  }
  0x9a   : > { %v859_v17 = vsel %vm397_vm0, %v463_v8, %v2430_v12  ;;  %v858_v18 = vsel %vm397_vm0, %v462_v7, %v2429_v14  ;;  %2164 = vmatprep.mubr.msk.bf16.mxu1 %vm1000_vm3, %v936_v16  ;;  %v2448_v19 = vpop.permute.xlu1 %2447  ;;  %v472_v16 = vld [vmem:[#allocation2 + $0x90] sm:$0xff] }
  0x9b   : > { %v2450_v20 = vunpack.i.h.bf16 %v2448_v19  ;;  %v2449_v21 = vunpack.i.l.bf16 %v2448_v19  ;;  %v2443_v24 = vpop.permute.xlu0 %2442  ;;  %v895_v25 = vsel %vm892_vm2, %v858_v18, %v2439_v6  ;;  %v896_v26 = vsel %vm892_vm2, %v859_v17, %v2440_v4  ;;  %v473_v17 = vld [vmem:[#allocation2 + $0x98] sm:$0xff] }
  0x9c   : > { %v2445_v27 = vunpack.i.h.bf16 %v2443_v24  ;;  %v2444_v28 = vunpack.i.l.bf16 %v2443_v24  ;;  %v937_v29 = vpack.c.bf16 %v896_v26, %v895_v25  ;;  %v2617_v24 = vld [vmem:[%s3309_s2 + $0x80] sm:$0xff]  }
  0x9e   : > { %v861_v30 = vsel %vm397_vm0, %v465_v23, %v2445_v27  ;;  %v860_v31 = vsel %vm397_vm0, %v464_v22, %v2444_v28  ;;  %2165 = vmatmul.mubr.msk.bf16.vlgmr.msra.gmra.mrb[0].mxu1 %vm1000_vm3, %v937_v29  ;;  %2208 = vmatprep.mubr.msk.bf16.mxu0 %vm1000_vm3, %v937_v29  ;;  %v2458_v32 = vpop.permute.xlu1 %2457  ;;  %v474_v29 = vld [vmem:[#allocation2 + $0xa8] sm:$0xff] }
  0x9f   : > { %v2460_v33 = vunpack.i.h.bf16 %v2458_v32  ;;  %v2459_v34 = vunpack.i.l.bf16 %v2458_v32  ;;  %v2453_v37 = vpop.permute.xlu0 %2452  ;;  %2290 = vmatpush3.bf16.msra.mxu1 %v2704_v1  ;;  %v897_v38 = vsel %vm892_vm2, %v860_v31, %v2449_v21  ;;  %v898_v39 = vsel %vm892_vm2, %v861_v30, %v2450_v20  ;;  %v475_v30 = vld [vmem:[#allocation2 + $0xb0] sm:$0xff] }
  0xa0   : > { %v2455_v40 = vunpack.i.h.bf16 %v2453_v37  ;;  %v2454_v41 = vunpack.i.l.bf16 %v2453_v37  ;;  %v2952_v42 = vpack.c.bf16 %v898_v39, %v897_v38  ;;  %2285 = vmatprep.subr.bf16.mxu1 %v2714_v3  ;;  %v2618_v37 = vld [vmem:[%s3309_s2 + $0x88] sm:$0xff]  }
  0xa2   : > { %v863_v44 = vsel %vm397_vm0, %v467_v36, %v2455_v40  ;;  %v862_v45 = vsel %vm397_vm0, %v466_v35, %v2454_v41  ;;  %2168 = vmatprep.mubr.msk.bf16.mxu1 %vm1000_vm3, %v2952_v42  ;;  %2209 = vmatmul.mubr.msk.bf16.vlgmr.msra.gmra.mrb[0].mxu0 %vm1000_vm3, %v2952_v42  ;;  %v2468_v1 = vpop.permute.xlu1 %2467 }
  0xa3   : > { %2241 = vmatpush3.bf16.msra.mxu0 %v2916_v15  ;;  %v2470_v46 = vunpack.i.h.bf16 %v2468_v1  ;;  %v2469_v47 = vunpack.i.l.bf16 %v2468_v1  ;;  %v2463_v50 = vpop.permute.xlu0 %2462  ;;  %v899_v51 = vsel %vm892_vm2, %v862_v45, %v2459_v34  ;;  %v900_v52 = vsel %vm892_vm2, %v863_v44, %v2460_v33  ;;  %2291 = vmatpush3.bf16.msra.mxu1 %v2714_v3  ;;  %v2615_v15 = vld [vmem:[%s3309_s2 + $0x70] sm:$0xff]   ;;  %v477_v44 = vld [vmem:[#allocation2 + $0xc8] sm:$0xff] }
  0xa4   : > { %v2465_v53 = vunpack.i.h.bf16 %v2463_v50  ;;  %v2464_v54 = vunpack.i.l.bf16 %v2463_v50  ;;  %v2968_v55 = vpack.c.bf16 %v900_v52, %v899_v51  ;;  %2242 = vmatprep.subr.bf16.mxu0 %v2614_v43  ;;  %2286 = vmatprep.subr.bf16.mxu1 %v2731_v5 }
  0xa6   : > { %v865_v56 = vsel %vm397_vm0, %v469_v49, %v2465_v53  ;;  %v864_v57 = vsel %vm397_vm0, %v468_v48, %v2464_v54  ;;  %2169 = vmatmul.mubr.msk.bf16.gmra.mrb[4].mxu1 %vm1000_vm3, %v2968_v55  ;;  %2212 = vmatprep.mubr.msk.bf16.mxu0 %vm1000_vm3, %v2968_v55  ;;  %v2478_v3 = vpop.permute.xlu1 %2477 }
  0xa7   : > { %v2480_v59 = vunpack.i.h.bf16 %v2478_v3  ;;  %v2479_v60 = vunpack.i.l.bf16 %v2478_v3  ;;  %v2473_v0 = vpop.permute.xlu0 %2472  ;;  %2243 = vmatpush3.bf16.msra.mxu0 %v2614_v43  ;;  %v901_v2 = vsel %vm892_vm2, %v864_v57, %v2469_v47  ;;  %v902_v4 = vsel %vm892_vm2, %v865_v56, %v2470_v46  ;;  %2292 = vmatpush3.bf16.msra.mxu1 %v2731_v5  ;;  %v476_v43 = vld [vmem:[#allocation2 + $0xc0] sm:$0xff] }
  0xa8   : > { %v2475_v6 = vunpack.i.h.bf16 %v2473_v0  ;;  %v2474_v7 = vunpack.i.l.bf16 %v2473_v0  ;;  %v2983_v8 = vpack.c.bf16 %v902_v4, %v901_v2  ;;  %2244 = vmatprep.subr.bf16.mxu0 %v2615_v15  ;;  %2287 = vmatprep.subr.bf16.mxu1 %v2885_v58  ;;  %v482_v4 = vld [vmem:[#allocation2 + $0x108] sm:$0xff] }
  0xaa   : > { %v867_v10 = vsel %vm397_vm0, %v471_v63, %v2475_v6  ;;  %v866_v11 = vsel %vm397_vm0, %v470_v61, %v2474_v7  ;;  %2172 = vmatprep.mubr.msk.bf16.mxu1 %vm1000_vm3, %v2983_v8  ;;  %2213 = vmatmul.mubr.msk.bf16.gmra.mrb[4].mxu0 %vm1000_vm3, %v2983_v8  ;;  %v2488_v5 = vpop.permute.xlu1 %2487  ;;  %v483_v6 = vld [vmem:[#allocation2 + $0x110] sm:$0xff] }
  0xab   : > { %v2490_v12 = vunpack.i.h.bf16 %v2488_v5  ;;  %v2489_v14 = vunpack.i.l.bf16 %v2488_v5  ;;  %v2483_v18 = vpop.permute.xlu0 %2482  ;;  %2245 = vmatpush3.bf16.msra.mxu0 %v2615_v15  ;;  %v903_v19 = vsel %vm892_vm2, %v866_v11, %v2479_v60  ;;  %v904_v20 = vsel %vm892_vm2, %v867_v10, %v2480_v59  ;;  %2293 = vmatpush3.bf16.msra.mxu1 %v2885_v58  ;;  %v478_v15 = vld [vmem:[#allocation2 + $0xd8] sm:$0xff] }
  0xac   : > { %v2485_v21 = vunpack.i.h.bf16 %v2483_v18  ;;  %v2484_v22 = vunpack.i.l.bf16 %v2483_v18  ;;  %v2998_v23 = vpack.c.bf16 %v904_v20, %v903_v19  ;;  %2246 = vmatprep.subr.bf16.mxu0 %v2616_v9  ;;  %2288 = vmatprep.subr.bf16.mxu1 %v2895_v62 }
  0xae   : > { %v869_v25 = vsel %vm397_vm0, %v473_v17, %v2485_v21  ;;  %v868_v26 = vsel %vm397_vm0, %v472_v16, %v2484_v22  ;;  %2173 = vmatmul.mubr.msk.bf16.gmra.mrb[8].mxu1 %vm1000_vm3, %v2998_v23  ;;  %2216 = vmatprep.mubr.msk.bf16.mxu0 %vm1000_vm3, %v2998_v23  ;;  %v2498_v58 = vpop.permute.xlu1 %2497 }
  0xaf   : > { %v2500_v27 = vunpack.i.h.bf16 %v2498_v58  ;;  %v2499_v28 = vunpack.i.l.bf16 %v2498_v58  ;;  %v2493_v31 = vpop.permute.xlu0 %2492  ;;  %v905_v32 = vsel %vm892_vm2, %v868_v26, %v2489_v14  ;;  %v906_v33 = vsel %vm892_vm2, %v869_v25, %v2490_v12  ;;  %2247 = vmatpush3.bf16.msra.mxu0 %v2616_v9  ;;  %2294 = vmatpush3.bf16.msra.mxu1 %v2895_v62  ;;  %v480_v12 = vld [vmem:[#allocation2 + $0xf0] sm:$0xff]  ;;  %v481_v14 = vld [vmem:[#allocation2 + $0xf8] sm:$0xff] }
  0xb0   : > { %v2495_v34 = vunpack.i.h.bf16 %v2493_v31  ;;  %v2494_v35 = vunpack.i.l.bf16 %v2493_v31  ;;  %v3013_v36 = vpack.c.bf16 %v906_v33, %v905_v32  ;;  %2248 = vmatprep.subr.bf16.mxu0 %v2617_v24  ;;  %2289 = vmatprep.subr.bf16.mxu1 %v2909_v13 }
  0xb2   : > { %v871_v38 = vsel %vm397_vm0, %v475_v30, %v2495_v34  ;;  %v870_v39 = vsel %vm397_vm0, %v474_v29, %v2494_v35  ;;  %2176 = vmatprep.mubr.msk.bf16.mxu1 %vm1000_vm3, %v3013_v36  ;;  %2217 = vmatmul.mubr.msk.bf16.gmra.mrb[8].mxu0 %vm1000_vm3, %v3013_v36  ;;  %v2508_v62 = vpop.permute.xlu1 %2507  ;;  %v486_v35 = vld [vmem:[#allocation2 + $0x138] sm:$0xff] }
  0xb3   : > { %v2510_v40 = vunpack.i.h.bf16 %v2508_v62  ;;  %v2509_v41 = vunpack.i.l.bf16 %v2508_v62  ;;  %v2503_v45 = vpop.permute.xlu0 %2502  ;;  %v907_v1 = vsel %vm892_vm2, %v870_v39, %v2499_v28  ;;  %v908_v46 = vsel %vm892_vm2, %v871_v38, %v2500_v27  ;;  %2249 = vmatpush3.bf16.msra.mxu0 %v2617_v24  ;;  %2295 = vmatpush3.bf16.msra.mxu1 %v2909_v13  ;;  %v479_v13 = vld [vmem:[#allocation2 + $0xe0] sm:$0xff] }
  0xb4   : > { %v2505_v47 = vunpack.i.h.bf16 %v2503_v45  ;;  %v2504_v48 = vunpack.i.l.bf16 %v2503_v45  ;;  %v3028_v49 = vpack.c.bf16 %v908_v46, %v907_v1  ;;  %2250 = vmatprep.subr.bf16.mxu0 %v2618_v37 }
  0xb6   : > { %v873_v50 = vsel %vm397_vm0, %v477_v44, %v2505_v47  ;;  %v872_v51 = vsel %vm397_vm0, %v476_v43, %v2504_v48  ;;  %2177 = vmatmul.mubr.msk.bf16.gmra.mrb[12].mxu1 %vm1000_vm3, %v3028_v49  ;;  %2220 = vmatprep.mubr.msk.bf16.mxu0 %vm1000_vm3, %v3028_v49  ;;  %v2518_v52 = vpop.permute.xlu1 %2517 }
  0xb7   : > { %v2520_v53 = vunpack.i.h.bf16 %v2518_v52  ;;  %v2519_v54 = vunpack.i.l.bf16 %v2518_v52  ;;  %v2513_v56 = vpop.permute.xlu0 %2512  ;;  %v909_v57 = vsel %vm892_vm2, %v872_v51, %v2509_v41  ;;  %v910_v3 = vsel %vm892_vm2, %v873_v50, %v2510_v40  ;;  %2251 = vmatpush3.bf16.msra.mxu0 %v2618_v37  ;;  %v487_v37 = vld [vmem:[#allocation2 + $0x140] sm:$0xff]  ;;  %v485_v41 = vld [vmem:[#allocation2 + $0x128] sm:$0xff] }
  0xb8   : > { %v2515_v59 = vunpack.i.h.bf16 %v2513_v56  ;;  %v2514_v60 = vunpack.i.l.bf16 %v2513_v56  ;;  %v3038_v61 = vpack.c.bf16 %v910_v3, %v909_v57  ;;  %v484_v40 = vld [vmem:[#allocation2 + $0x120] sm:$0xff] }
  0xba   : > { %v875_v63 = vsel %vm397_vm0, %v479_v13, %v2515_v59  ;;  %v874_v0 = vsel %vm397_vm0, %v478_v15, %v2514_v60  ;;  %2180 = vmatprep.mubr.msk.bf16.mxu1 %vm1000_vm3, %v3038_v61  ;;  %2221 = vmatmul.mubr.msk.bf16.gmra.mrb[12].mxu0 %vm1000_vm3, %v3038_v61  ;;  %v2528_v2 = vpop.permute.xlu1 %2527  ;;  %v490_v59 = vld [vmem:[#allocation2 + $0x168] sm:$0xff]  ;;  %v491_v60 = vld [vmem:[#allocation2 + $0x170] sm:$0xff] }
  0xbb   : > { %v2530_v7 = vunpack.i.h.bf16 %v2528_v2  ;;  %v2529_v9 = vunpack.i.l.bf16 %v2528_v2  ;;  %v2523_v10 = vpop.permute.xlu0 %2522  ;;  %2252 = vmatprep.mubr.msk.bf16.mxu0 %vm1000_vm3, %v2952_v42  ;;  %v911_v11 = vsel %vm892_vm2, %v874_v0, %v2519_v54  ;;  %v912_v5 = vsel %vm892_vm2, %v875_v63, %v2520_v53 }
  0xbc   : > { %v2525_v16 = vunpack.i.h.bf16 %v2523_v10  ;;  %v2524_v17 = vunpack.i.l.bf16 %v2523_v10  ;;  %v3050_v18 = vpack.c.bf16 %v912_v5, %v911_v11 }
  0xbd   : > { %v879_v19 = vsel %vm397_vm0, %v483_v6, %v2530_v7  ;;  %v878_v20 = vsel %vm397_vm0, %v482_v4, %v2529_v9  ;;  %v488_v4 = vld [vmem:[#allocation2 + $0x150] sm:$0xff]  ;;  %v489_v6 = vld [vmem:[#allocation2 + $0x158] sm:$0xff] }
  0xbe   : > { %2181 = vmatmul.mubr.msk.bf16.gmra.mrb[16].mxu1 %vm1000_vm3, %v3050_v18  ;;  %v2538_v21 = vpop.permute.xlu1 %2537  ;;  %v877_v42 = vsel %vm397_vm0, %v481_v14, %v2525_v16  ;;  %v876_v22 = vsel %vm397_vm0, %v480_v12, %v2524_v17 }
  0xbf   : > { %v2540_v24 = vunpack.i.h.bf16 %v2538_v21  ;;  %v2539_v25 = vunpack.i.l.bf16 %v2538_v21  ;;  %v2533_v26 = vpop.permute.xlu0 %2532 }
  0xc0   : > { %v2535_v58 = vunpack.i.h.bf16 %v2533_v26  ;;  %v2534_v27 = vunpack.i.l.bf16 %v2533_v26 }
  0xc1   : > { %v915_v28 = vsel %vm892_vm2, %v878_v20, %v2539_v25  ;;  %v916_v29 = vsel %vm892_vm2, %v879_v19, %v2540_v24 }
  0xc2   : > { %v3060_v30 = vpack.c.bf16 %v916_v29, %v915_v28  ;;  %v913_v31 = vsel %vm892_vm2, %v876_v22, %v2534_v27  ;;  %v914_v32 = vsel %vm892_vm2, %v877_v42, %v2535_v58  ;;  %2253 = vmatmul.mubr.msk.bf16.vlgmr.msra.gmra.mrb[0].mxu0 %vm1000_vm3, %v2968_v55  ;;  %v2548_v33 = vpop.permute.xlu1 %2547  ;;  %v493_v27 = vld [vmem:[#allocation2 + $0x188] sm:$0xff] }
  0xc3   : > { %v3066_v34 = vpack.c.bf16 %v914_v32, %v913_v31  ;;  %v2550_v38 = vunpack.i.h.bf16 %v2548_v33  ;;  %v2549_v39 = vunpack.i.l.bf16 %v2548_v33  ;;  %v2543_v62 = vpop.permute.xlu0 %2542  ;;  %2256 = vmatprep.mubr.msk.bf16.mxu0 %vm1000_vm3, %v2983_v8 }
  0xc4   : > { %v2545_v43 = vunpack.i.h.bf16 %v2543_v62  ;;  %v2544_v44 = vunpack.i.l.bf16 %v2543_v62  ;;  %v495_v62 = vld [vmem:[#allocation2 + $0x1a0] sm:$0xff] }
  0xc5   : > { %2184 = vmatprep.mubr.msk.bf16.mxu1 %vm1000_vm3, %v3066_v34  ;;  %v883_v55 = vsel %vm397_vm0, %v487_v37, %v2550_v38  ;;  %v882_v45 = vsel %vm397_vm0, %v486_v35, %v2549_v39  ;;  %v494_v39 = vld [vmem:[#allocation2 + $0x198] sm:$0xff] }
  0xc6   : > { %2185 = vmatmul.mubr.msk.bf16.gmra.mrb[20].mxu1 %vm1000_vm3, %v3060_v30  ;;  %v2558_v1 = vpop.permute.xlu1 %2557  ;;  %v881_v46 = vsel %vm397_vm0, %v485_v41, %v2545_v43  ;;  %v880_v47 = vsel %vm397_vm0, %v484_v40, %v2544_v44 }
  0xc7   : > { %v2560_v8 = vunpack.i.h.bf16 %v2558_v1  ;;  %v2559_v48 = vunpack.i.l.bf16 %v2558_v1  ;;  %v2553_v50 = vpop.permute.xlu0 %2552 }
  0xc8   : > { %v2555_v51 = vunpack.i.h.bf16 %v2553_v50  ;;  %v2554_v52 = vunpack.i.l.bf16 %v2553_v50 }
  0xc9   : > { %v919_v53 = vsel %vm892_vm2, %v882_v45, %v2559_v48  ;;  %v920_v54 = vsel %vm892_vm2, %v883_v55, %v2560_v8 }
  0xca   : > { %v949_v15 = vpack.c.bf16 %v920_v54, %v919_v53  ;;  %v917_v13 = vsel %vm892_vm2, %v880_v47, %v2554_v52  ;;  %v918_v56 = vsel %vm892_vm2, %v881_v46, %v2555_v51  ;;  %2257 = vmatmul.mubr.msk.bf16.gmra.mrb[4].mxu0 %vm1000_vm3, %v2998_v23  ;;  %v2568_v57 = vpop.permute.xlu1 %2567 }
  0xcb   : > { %v948_v3 = vpack.c.bf16 %v918_v56, %v917_v13  ;;  %v2570_v63 = vunpack.i.h.bf16 %v2568_v57  ;;  %v2569_v0 = vunpack.i.l.bf16 %v2568_v57  ;;  %v2563_v2 = vpop.permute.xlu0 %2562  ;;  %2260 = vmatprep.mubr.msk.bf16.mxu0 %vm1000_vm3, %v3013_v36 }
  0xcc   : > { %v2565_v7 = vunpack.i.h.bf16 %v2563_v2  ;;  %v2564_v9 = vunpack.i.l.bf16 %v2563_v2 }
  0xcd   : > { %2188 = vmatprep.mubr.msk.bf16.mxu1 %vm1000_vm3, %v948_v3  ;;  %v887_v10 = vsel %vm397_vm0, %v491_v60, %v2570_v63  ;;  %v886_v23 = vsel %vm397_vm0, %v490_v59, %v2569_v0  ;;  %v3152_v0 = vld [vmem:[%s3310_s3] ss:$0 sm:$0xff] }
  0xce   : > { %2189 = vmatmul.mubr.msk.bf16.gmra.mrb[24].mxu1 %vm1000_vm3, %v949_v15  ;;  %v2578_v11 = vpop.permute.xlu1 %2577  ;;  %v885_v5 = vsel %vm397_vm0, %v489_v6, %v2565_v7  ;;  %v884_v12 = vsel %vm397_vm0, %v488_v4, %v2564_v9  ;;  %v3157_v7 = vstv %s1734_s25 }
  0xcf   : > { %v2580_v14 = vunpack.i.h.bf16 %v2578_v11  ;;  %v2579_v16 = vunpack.i.l.bf16 %v2578_v11  ;;  %v2573_v36 = vpop.permute.xlu0 %2572 }
  0xd0   : > { %v2575_v17 = vunpack.i.h.bf16 %v2573_v36  ;;  %v2574_v19 = vunpack.i.l.bf16 %v2573_v36 }
  0xd1   : > { %v923_v20 = vsel %vm892_vm2, %v886_v23, %v2579_v16  ;;  %v924_v21 = vsel %vm892_vm2, %v887_v10, %v2580_v14 }
  0xd2   : > { %v951_v42 = vpack.c.bf16 %v924_v21, %v923_v20  ;;  %v921_v22 = vsel %vm892_vm2, %v884_v12, %v2574_v19  ;;  %v922_v24 = vsel %vm892_vm2, %v885_v5, %v2575_v17  ;;  %2261 = vmatmul.mubr.msk.bf16.gmra.mrb[8].mxu0 %vm1000_vm3, %v3028_v49  ;;  %v2588_v58 = vpop.permute.xlu1 %2587 }
  0xd3   : > { %v950_v25 = vpack.c.bf16 %v922_v24, %v921_v22  ;;  %2264 = vmatprep.mubr.msk.bf16.mxu0 %vm1000_vm3, %v3038_v61  ;;  %v2583_v49 = vpop.permute.xlu0 %2582  ;;  %v2590_v28 = vunpack.i.h.bf16 %v2588_v58  ;;  %v2589_v29 = vunpack.i.l.bf16 %v2588_v58 }
  0xd4   : > { %v2585_v61 = vunpack.i.h.bf16 %v2583_v49  ;;  %v2584_v26 = vunpack.i.l.bf16 %v2583_v49 }
  0xd5   : > { %2192 = vmatprep.mubr.msk.bf16.mxu1 %vm1000_vm3, %v950_v25 }
  0xd6   : > { %2193 = vmatmul.mubr.msk.bf16.gmra.mrb[28].mxu1 %vm1000_vm3, %v951_v42  ;;  %v889_v31 = vsel %vm397_vm0, %v493_v27, %v2585_v61  ;;  %v2598_v38 = vpop.permute.xlu1 %2597 }
  0xd7   : > { %2224 = vmatprep.mubr.msk.bf16.mxu1 %vm1000_vm3, %v3050_v18  ;;  %v2593_v33 = vpop.permute.xlu0 %2592  ;;  %v2600_v41 = vunpack.i.h.bf16 %v2598_v38  ;;  %v2599_v43 = vunpack.i.l.bf16 %v2598_v38 }
  0xd8   : > { %v2595_v35 = vunpack.i.h.bf16 %v2593_v33  ;;  %v2594_v37 = vunpack.i.l.bf16 %v2593_v33 }
  0xda   : > { %2265 = vmatmul.mubr.msk.bf16.gmra.mrb[12].mxu0 %vm1000_vm3, %v3050_v18  ;;  %v492_v18 = vld [vmem:[#allocation2 + $0x180] sm:$0xff]  ;;  %v891_v44 = vsel %vm397_vm0, %v495_v62, %v2595_v35  ;;  %v890_v55 = vsel %vm397_vm0, %v494_v39, %v2594_v37 }
  0xdb   : > { %2268 = vmatprep.mubr.msk.bf16.mxu0 %vm1000_vm3, %v3066_v34  ;;  %v888_v32 = vsel %vm397_vm0, %v492_v18, %v2584_v26  ;;  %v927_v45 = vsel %vm892_vm2, %v890_v55, %v2599_v43  ;;  %v928_v1 = vsel %vm892_vm2, %v891_v44, %v2600_v41 }
  0xdc   : > { %v1488_v46 = vpack.c.bf16 %v928_v1, %v927_v45 }
  0xde   : > { %2225 = vmatmul.mubr.msk.bf16.vlgmr.msra.gmra.mrb[16].mxu1 %vm1000_vm3, %v3066_v34  ;;  %v926_v34 = vsel %vm892_vm2, %v889_v31, %v2590_v28 }
  0xdf   : > { %2228 = vmatprep.mubr.msk.bf16.mxu1 %vm1000_vm3, %v3060_v30 }
  0xe2   : > { %2269 = vmatmul.mubr.msk.bf16.gmra.mrb[16].mxu0 %vm1000_vm3, %v3060_v30  ;;  %v925_v30 = vsel %vm892_vm2, %v888_v32, %v2589_v29 }
  0xe3   : > { %2272 = vmatprep.mubr.msk.bf16.mxu0 %vm1000_vm3, %v948_v3  ;;  %v1242_v40 = vpack.c.bf16 %v926_v34, %v925_v30 }
  0xe6   : > { %2229 = vmatmul.mubr.msk.bf16.gmra.mrb[20].mxu1 %vm1000_vm3, %v948_v3 }
  0xe7   : > { %2232 = vmatprep.mubr.msk.bf16.mxu1 %vm1000_vm3, %v949_v15 }
  0xea   : > { %2273 = vmatmul.mubr.msk.bf16.gmra.mrb[20].mxu0 %vm1000_vm3, %v949_v15 }
  0xeb   : > { %2276 = vmatprep.mubr.msk.bf16.mxu0 %vm1000_vm3, %v950_v25 }
  0xee   : > { %2233 = vmatmul.mubr.msk.bf16.gmra.mrb[24].mxu1 %vm1000_vm3, %v950_v25 }
  0xef   : > { %2236 = vmatprep.mubr.msk.bf16.mxu1 %vm1000_vm3, %v951_v42 }
  0xf2   : > { %2277 = vmatmul.mubr.msk.bf16.gmra.mrb[24].mxu0 %vm1000_vm3, %v951_v42 }
  0xf3   : > { %2280 = vmatprep.mubr.msk.bf16.mxu0 %vm1000_vm3, %v1242_v40 }
  0xf6   : > { %2237 = vmatmul.mubr.msk.bf16.gmra.mrb[28].mxu1 %vm1000_vm3, %v1242_v40 }
  0xfa   : > { %2281 = vmatmul.mubr.msk.bf16.gmra.mrb[28].mxu0 %vm1000_vm3, %v1488_v46 }
 0x171   : > { %v2166_v47 = vpop.f32.mrb[0].mxu1 }
 0x172   : > { %v1083_v8 = vpop.f32.mrb[1].mxu1  ;;  %v1212_v2 = vadd.f32 %v2166_v47, %v3152_v0 }
 0x173   : > { %v2167_v48 = vpop.f32.mrb[2].mxu1  ;;  %v1210_v4 = vadd.f32 %v3152_v0, %v1083_v8 }
 0x174   : > { %v1086_v50 = vpop.f32.mrb[3].mxu1  ;;  %v1213_v9 = vadd.f32 %v2167_v48, %v3152_v0 }
 0x175   : > { %v1211_v11 = vadd.f32 %v3152_v0, %v1086_v50 }
 0x179   : > { %v2170_v51 = vpop.f32.mrb[4].mxu1 }
 0x17a   : > { %v1099_v52 = vpop.f32.mrb[5].mxu1  ;;  %v1216_v24 = vadd.f32 %v2170_v51, %v3152_v0 }
 0x17b   : > { %v2171_v53 = vpop.f32.mrb[6].mxu1  ;;  %v1214_v49 = vadd.f32 %v3152_v0, %v1099_v52 }
 0x17c   : > { %v1102_v54 = vpop.f32.mrb[7].mxu1  ;;  %v1217_v58 = vadd.f32 %v2171_v53, %v3152_v0 }
 0x17d   : > { %v1215_v28 = vadd.f32 %v3152_v0, %v1102_v54 }
 0x181   : > { %v3133_v15 = vpop.f32.mrb[8].mxu1 }
 0x182   : > { %v3135_v13 = vpop.f32.mrb[9].mxu1  ;;  %v1220_v40 = vadd.f32 %v3133_v15, %v3152_v0 }
 0x183   : > { %v3137_v56 = vpop.f32.mrb[10].mxu1  ;;  %v1218_v43 = vadd.f32 %v3152_v0, %v3135_v13 }
 0x184   : > { %v3139_v57 = vpop.f32.mrb[11].mxu1  ;;  %v1221_v45 = vadd.f32 %v3137_v56, %v3152_v0 }
 0x185   : > { %v1219_v47 = vadd.f32 %v3152_v0, %v3139_v57 }
 0x189   : > { %v3141_v3 = vpop.f32.mrb[12].mxu1 }
 0x18a   : > { %v3143_v59 = vpop.f32.mrb[13].mxu1 }
 0x18b   : > { %v3145_v60 = vpop.f32.mrb[14].mxu1 }
 0x18c   : > { %v3147_v63 = vpop.f32.mrb[15].mxu1 }
 0x195   : > { %v2254_v6 = vpop.f32.mrb[0].mxu0 }
 0x196   : > { %v2297_v10 = vadd.f32 %v2254_v6, %v1212_v2  ;;  %v1575_v23 = vpop.f32.mrb[1].mxu0  ;;  %v1224_v2 = vadd.f32 %v3141_v3, %v3152_v0  ;;  %v1222_v6 = vadd.f32 %v3152_v0, %v3143_v59  ;;  %v1223_v3 = vadd.f32 %v3152_v0, %v3147_v63 }
 0x197   : > { %v2299_v5 = vadd.f32 %v1575_v23, %v1210_v4  ;;  %v2255_v12 = vpop.f32.mrb[2].mxu0  ;;  %v1225_v23 = vadd.f32 %v3145_v60, %v3152_v0 }
 0x198   : > { %vm1737_vm4 = vcmp.gt.f32.partialorder %v2297_v10, 0.0  ;;  %v1770_v14 = vmul.f32 %v2297_v10, %v3157_v7  ;;  %v2301_v16 = vadd.f32 %v2255_v12, %v1213_v9  ;;  %v1578_v36 = vpop.f32.mrb[3].mxu0 }
 0x199   : > { %vm1735_vm5 = vcmp.gt.f32.partialorder %v2299_v5, 0.0  ;;  %v1768_v17 = vmul.f32 %v2299_v5, %v3157_v7  ;;  %v2303_v19 = vadd.f32 %v1578_v36, %v1211_v11 }
 0x19a   : > { %v1802_v20 = vsel %vm1737_vm4, %v2297_v10, %v1770_v14  ;;  %vm1738_vm6 = vcmp.gt.f32.partialorder %v2301_v16, 0.0  ;;  %v1771_v21 = vmul.f32 %v2301_v16, %v3157_v7 }
 0x19b   : > { %1834 = vst.msk [vmem:[%s3164_s6 + $0x10] sm:$0xff] %vm397_vm0, %v1802_v20  ;;  %v1800_v42 = vsel %vm1735_vm5, %v2299_v5, %v1768_v17  ;;  %vm1736_vm7 = vcmp.gt.f32.partialorder %v2303_v19, 0.0  ;;  %v1769_v22 = vmul.f32 %v2303_v19, %v3157_v7 }
 0x19c   : > { %1832 = vst.msk [vmem:[%s3164_s6] sm:$0xff] %vm397_vm0, %v1800_v42  ;;  %v1803_v25 = vsel %vm1738_vm6, %v2301_v16, %v1771_v21 }
 0x19d   : > { %1835 = vst.msk [vmem:[%s3164_s6 + $0x18] sm:$0xff] %vm397_vm0, %v1803_v25  ;;  %v1801_v61 = vsel %vm1736_vm7, %v2303_v19, %v1769_v22  ;;  %v2258_v26 = vpop.f32.mrb[4].mxu0 }
 0x19e   : > { %1833 = vst.msk [vmem:[%s3164_s6 + $0x8] sm:$0xff] %vm397_vm0, %v1801_v61  ;;  %v2305_v18 = vadd.f32 %v2258_v26, %v1216_v24  ;;  %v1591_v27 = vpop.f32.mrb[5].mxu0 }
 0x19f   : > { %v2307_v29 = vadd.f32 %v1591_v27, %v1214_v49  ;;  %v2259_v31 = vpop.f32.mrb[6].mxu0 }
 0x1a0   : > { %vm1741_vm8 = vcmp.gt.f32.partialorder %v2305_v18, 0.0  ;;  %v1774_v32 = vmul.f32 %v2305_v18, %v3157_v7  ;;  %v2309_v33 = vadd.f32 %v2259_v31, %v1217_v58  ;;  %v1594_v30 = vpop.f32.mrb[7].mxu0 }
 0x1a1   : > { %vm1739_vm9 = vcmp.gt.f32.partialorder %v2307_v29, 0.0  ;;  %v1772_v34 = vmul.f32 %v2307_v29, %v3157_v7  ;;  %v2311_v35 = vadd.f32 %v1594_v30, %v1215_v28 }
 0x1a2   : > { %v1806_v37 = vsel %vm1741_vm8, %v2305_v18, %v1774_v32  ;;  %vm1742_vm10 = vcmp.gt.f32.partialorder %v2309_v33, 0.0  ;;  %v1775_v38 = vmul.f32 %v2309_v33, %v3157_v7 }
 0x1a3   : > { %1838 = vst.msk [vmem:[%s3164_s6 + $0x30] sm:$0xff] %vm397_vm0, %v1806_v37  ;;  %v1804_v39 = vsel %vm1739_vm9, %v2307_v29, %v1772_v34  ;;  %vm1740_vm11 = vcmp.gt.f32.partialorder %v2311_v35, 0.0  ;;  %v1773_v62 = vmul.f32 %v2311_v35, %v3157_v7 }
 0x1a4   : > { %1836 = vst.msk [vmem:[%s3164_s6 + $0x20] sm:$0xff] %vm397_vm0, %v1804_v39  ;;  %v1807_v41 = vsel %vm1742_vm10, %v2309_v33, %v1775_v38 }
 0x1a5   : > { %1839 = vst.msk [vmem:[%s3164_s6 + $0x38] sm:$0xff] %vm397_vm0, %v1807_v41  ;;  %v1805_v44 = vsel %vm1740_vm11, %v2311_v35, %v1773_v62  ;;  %v2262_v55 = vpop.f32.mrb[8].mxu0 }
 0x1a6   : > { %1837 = vst.msk [vmem:[%s3164_s6 + $0x28] sm:$0xff] %vm397_vm0, %v1805_v44  ;;  %v2313_v1 = vadd.f32 %v2262_v55, %v1220_v40  ;;  %v1607_v46 = vpop.f32.mrb[9].mxu0 }
 0x1a7   : > { %v2315_v8 = vadd.f32 %v1607_v46, %v1218_v43  ;;  %v2263_v48 = vpop.f32.mrb[10].mxu0 }
 0x1a8   : > { %vm1745_vm12 = vcmp.gt.f32.partialorder %v2313_v1, 0.0  ;;  %v1778_v50 = vmul.f32 %v2313_v1, %v3157_v7  ;;  %v2317_v51 = vadd.f32 %v2263_v48, %v1221_v45  ;;  %v1610_v52 = vpop.f32.mrb[11].mxu0 }
 0x1a9   : > { %vm1743_vm13 = vcmp.gt.f32.partialorder %v2315_v8, 0.0  ;;  %v1776_v53 = vmul.f32 %v2315_v8, %v3157_v7  ;;  %v2319_v54 = vadd.f32 %v1610_v52, %v1219_v47 }
 0x1aa   : > { %v1810_v15 = vsel %vm1745_vm12, %v2313_v1, %v1778_v50  ;;  %vm1746_vm14 = vcmp.gt.f32.partialorder %v2317_v51, 0.0  ;;  %v1779_v13 = vmul.f32 %v2317_v51, %v3157_v7 }
 0x1ab   : > { %1842 = vst.msk [vmem:[%s3164_s6 + $0x50] sm:$0xff] %vm397_vm0, %v1810_v15  ;;  %v1808_v56 = vsel %vm1743_vm13, %v2315_v8, %v1776_v53  ;;  %vm1744_vm15 = vcmp.gt.f32.partialorder %v2319_v54, 0.0  ;;  %v1777_v57 = vmul.f32 %v2319_v54, %v3157_v7 }
 0x1ac   : > { %1840 = vst.msk [vmem:[%s3164_s6 + $0x40] sm:$0xff] %vm397_vm0, %v1808_v56  ;;  %v1811_v4 = vsel %vm1746_vm14, %v2317_v51, %v1779_v13 }
 0x1ad   : > { %1843 = vst.msk [vmem:[%s3164_s6 + $0x58] sm:$0xff] %vm397_vm0, %v1811_v4  ;;  %v1809_v9 = vsel %vm1744_vm15, %v2319_v54, %v1777_v57  ;;  %v2266_v10 = vpop.f32.mrb[12].mxu0 }
 0x1ae   : > { %1841 = vst.msk [vmem:[%s3164_s6 + $0x48] sm:$0xff] %vm397_vm0, %v1809_v9  ;;  %v2321_v11 = vadd.f32 %v2266_v10, %v1224_v2  ;;  %v1623_v5 = vpop.f32.mrb[13].mxu0 }
 0x1af   : > { %v2323_v12 = vadd.f32 %v1623_v5, %v1222_v6  ;;  %v2267_v14 = vpop.f32.mrb[14].mxu0 }
 0x1b0   : > { %vm1749_vm1 = vcmp.gt.f32.partialorder %v2321_v11, 0.0  ;;  %v1782_v59 = vmul.f32 %v2321_v11, %v3157_v7  ;;  %v2325_v16 = vadd.f32 %v2267_v14, %v1225_v23  ;;  %v1626_v36 = vpop.f32.mrb[15].mxu0 }
 0x1b1   : > { %vm1747_vm2 = vcmp.gt.f32.partialorder %v2323_v12, 0.0  ;;  %v1780_v17 = vmul.f32 %v2323_v12, %v3157_v7  ;;  %v2327_v60 = vadd.f32 %v1626_v36, %v1223_v3  ;;  %v2226_v19 = vpop.f32.mrb[16].mxu1 }
 0x1b2   : > { %v1814_v20 = vsel %vm1749_vm1, %v2321_v11, %v1782_v59  ;;  %vm1750_vm3 = vcmp.gt.f32.partialorder %v2325_v16, 0.0  ;;  %v1783_v21 = vmul.f32 %v2325_v16, %v3157_v7  ;;  %v1393_v63 = vpop.f32.mrb[17].mxu1  ;;  %v2328_v49 = vadd.f32 %v2226_v19, %v3152_v0 }
 0x1b3   : > { %1846 = vst.msk [vmem:[%s3164_s6 + $0x70] sm:$0xff] %vm397_vm0, %v1814_v20  ;;  %v1812_v42 = vsel %vm1747_vm2, %v2323_v12, %v1780_v17  ;;  %vm1748_vm4 = vcmp.gt.f32.partialorder %v2327_v60, 0.0  ;;  %v1781_v22 = vmul.f32 %v2327_v60, %v3157_v7  ;;  %v2227_v24 = vpop.f32.mrb[18].mxu1  ;;  %v2330_v58 = vadd.f32 %v3152_v0, %v1393_v63 }
 0x1b4   : > { %1844 = vst.msk [vmem:[%s3164_s6 + $0x60] sm:$0xff] %vm397_vm0, %v1812_v42  ;;  %v1815_v25 = vsel %vm1750_vm3, %v2325_v16, %v1783_v21  ;;  %v1396_v61 = vpop.f32.mrb[19].mxu1  ;;  %v2332_v27 = vadd.f32 %v2227_v24, %v3152_v0 }
 0x1b5   : > { %1847 = vst.msk [vmem:[%s3164_s6 + $0x78] sm:$0xff] %vm397_vm0, %v1815_v25  ;;  %v1813_v26 = vsel %vm1748_vm4, %v2327_v60, %v1781_v22  ;;  %v2270_v18 = vpop.f32.mrb[16].mxu0  ;;  %v2334_v31 = vadd.f32 %v3152_v0, %v1396_v61 }
 0x1b6   : > { %1845 = vst.msk [vmem:[%s3164_s6 + $0x68] sm:$0xff] %vm397_vm0, %v1813_v26  ;;  %v2329_v28 = vadd.f32 %v2328_v49, %v2270_v18  ;;  %v1639_v29 = vpop.f32.mrb[17].mxu0 }
 0x1b7   : > { %v2331_v32 = vadd.f32 %v2330_v58, %v1639_v29  ;;  %v2271_v33 = vpop.f32.mrb[18].mxu0 }
 0x1b8   : > { %vm1753_vm5 = vcmp.gt.f32.partialorder %v2329_v28, 0.0  ;;  %v1786_v30 = vmul.f32 %v2329_v28, %v3157_v7  ;;  %v2333_v34 = vadd.f32 %v2332_v27, %v2271_v33  ;;  %v1642_v35 = vpop.f32.mrb[19].mxu0 }
 0x1b9   : > { %vm1751_vm6 = vcmp.gt.f32.partialorder %v2331_v32, 0.0  ;;  %v1784_v37 = vmul.f32 %v2331_v32, %v3157_v7  ;;  %v2335_v38 = vadd.f32 %v2334_v31, %v1642_v35  ;;  %v2230_v39 = vpop.f32.mrb[20].mxu1 }
 0x1ba   : > { %v1818_v62 = vsel %vm1753_vm5, %v2329_v28, %v1786_v30  ;;  %vm1754_vm7 = vcmp.gt.f32.partialorder %v2333_v34, 0.0  ;;  %v1787_v40 = vmul.f32 %v2333_v34, %v3157_v7  ;;  %v1409_v41 = vpop.f32.mrb[21].mxu1  ;;  %v2336_v1 = vadd.f32 %v2230_v39, %v3152_v0 }
 0x1bb   : > { %1850 = vst.msk [vmem:[%s3164_s6 + $0x90] sm:$0xff] %vm397_vm0, %v1818_v62  ;;  %v1816_v43 = vsel %vm1751_vm6, %v2331_v32, %v1784_v37  ;;  %vm1752_vm8 = vcmp.gt.f32.partialorder %v2335_v38, 0.0  ;;  %v1785_v44 = vmul.f32 %v2335_v38, %v3157_v7  ;;  %v2231_v55 = vpop.f32.mrb[22].mxu1  ;;  %v2338_v8 = vadd.f32 %v3152_v0, %v1409_v41 }
 0x1bc   : > { %1848 = vst.msk [vmem:[%s3164_s6 + $0x80] sm:$0xff] %vm397_vm0, %v1816_v43  ;;  %v1819_v45 = vsel %vm1754_vm7, %v2333_v34, %v1787_v40  ;;  %v1412_v46 = vpop.f32.mrb[23].mxu1  ;;  %v2340_v50 = vadd.f32 %v2231_v55, %v3152_v0 }
 0x1bd   : > { %1851 = vst.msk [vmem:[%s3164_s6 + $0x98] sm:$0xff] %vm397_vm0, %v1819_v45  ;;  %v1817_v47 = vsel %vm1752_vm8, %v2335_v38, %v1785_v44  ;;  %v2274_v48 = vpop.f32.mrb[20].mxu0  ;;  %v2342_v53 = vadd.f32 %v3152_v0, %v1412_v46 }
 0x1be   : > { %1849 = vst.msk [vmem:[%s3164_s6 + $0x88] sm:$0xff] %vm397_vm0, %v1817_v47  ;;  %v2337_v51 = vadd.f32 %v2336_v1, %v2274_v48  ;;  %v1655_v52 = vpop.f32.mrb[21].mxu0 }
 0x1bf   : > { %v2339_v54 = vadd.f32 %v2338_v8, %v1655_v52  ;;  %v2275_v15 = vpop.f32.mrb[22].mxu0 }
 0x1c0   : > { %vm1757_vm9 = vcmp.gt.f32.partialorder %v2337_v51, 0.0  ;;  %v1790_v13 = vmul.f32 %v2337_v51, %v3157_v7  ;;  %v2341_v56 = vadd.f32 %v2340_v50, %v2275_v15  ;;  %v1658_v57 = vpop.f32.mrb[23].mxu0 }
 0x1c1   : > { %vm1755_vm10 = vcmp.gt.f32.partialorder %v2339_v54, 0.0  ;;  %v1788_v2 = vmul.f32 %v2339_v54, %v3157_v7  ;;  %v2343_v4 = vadd.f32 %v2342_v53, %v1658_v57  ;;  %v2234_v6 = vpop.f32.mrb[24].mxu1 }
 0x1c2   : > { %v1822_v9 = vsel %vm1757_vm9, %v2337_v51, %v1790_v13  ;;  %vm1758_vm11 = vcmp.gt.f32.partialorder %v2341_v56, 0.0  ;;  %v1791_v10 = vmul.f32 %v2341_v56, %v3157_v7  ;;  %v1425_v23 = vpop.f32.mrb[25].mxu1  ;;  %v2344_v14 = vadd.f32 %v2234_v6, %v3152_v0 }
 0x1c3   : > { %1854 = vst.msk [vmem:[%s3164_s6 + $0xb0] sm:$0xff] %vm397_vm0, %v1822_v9  ;;  %v1820_v11 = vsel %vm1755_vm10, %v2339_v54, %v1788_v2  ;;  %vm1756_vm12 = vcmp.gt.f32.partialorder %v2343_v4, 0.0  ;;  %v1789_v5 = vmul.f32 %v2343_v4, %v3157_v7  ;;  %v2235_v3 = vpop.f32.mrb[26].mxu1  ;;  %v2346_v36 = vadd.f32 %v3152_v0, %v1425_v23 }
 0x1c4   : > { %1852 = vst.msk [vmem:[%s3164_s6 + $0xa0] sm:$0xff] %vm397_vm0, %v1820_v11  ;;  %v1823_v12 = vsel %vm1758_vm11, %v2341_v56, %v1791_v10  ;;  %v1428_v59 = vpop.f32.mrb[27].mxu1  ;;  %v2348_v60 = vadd.f32 %v2235_v3, %v3152_v0 }
 0x1c5   : > { %1855 = vst.msk [vmem:[%s3164_s6 + $0xb8] sm:$0xff] %vm397_vm0, %v1823_v12  ;;  %v1821_v16 = vsel %vm1756_vm12, %v2343_v4, %v1789_v5  ;;  %v2278_v17 = vpop.f32.mrb[24].mxu0  ;;  %v2350_v21 = vadd.f32 %v3152_v0, %v1428_v59 }
 0x1c6   : > { %1853 = vst.msk [vmem:[%s3164_s6 + $0xa8] sm:$0xff] %vm397_vm0, %v1821_v16  ;;  %v2345_v19 = vadd.f32 %v2344_v14, %v2278_v17  ;;  %v1671_v20 = vpop.f32.mrb[25].mxu0 }
 0x1c7   : > { %v2347_v63 = vadd.f32 %v2346_v36, %v1671_v20  ;;  %v2279_v42 = vpop.f32.mrb[26].mxu0 }
 0x1c8   : > { %vm1761_vm13 = vcmp.gt.f32.partialorder %v2345_v19, 0.0  ;;  %v1794_v22 = vmul.f32 %v2345_v19, %v3157_v7  ;;  %v2349_v24 = vadd.f32 %v2348_v60, %v2279_v42  ;;  %v1674_v25 = vpop.f32.mrb[27].mxu0 }
 0x1c9   : > { %vm1759_vm14 = vcmp.gt.f32.partialorder %v2347_v63, 0.0  ;;  %v1792_v49 = vmul.f32 %v2347_v63, %v3157_v7  ;;  %v2351_v61 = vadd.f32 %v2350_v21, %v1674_v25  ;;  %v2238_v26 = vpop.f32.mrb[28].mxu1 }
 0x1ca   : > { %v1826_v58 = vsel %vm1761_vm13, %v2345_v19, %v1794_v22  ;;  %vm1762_vm15 = vcmp.gt.f32.partialorder %v2349_v24, 0.0  ;;  %v1795_v18 = vmul.f32 %v2349_v24, %v3157_v7  ;;  %v1441_v27 = vpop.f32.mrb[29].mxu1  ;;  %v2352_v33 = vadd.f32 %v2238_v26, %v3152_v0 }
 0x1cb   : > { %1858 = vst.msk [vmem:[%s3164_s6 + $0xd0] sm:$0xff] %vm397_vm0, %v1826_v58  ;;  %v1824_v28 = vsel %vm1759_vm14, %v2347_v63, %v1792_v49  ;;  %vm1760_vm1 = vcmp.gt.f32.partialorder %v2351_v61, 0.0  ;;  %v1793_v29 = vmul.f32 %v2351_v61, %v3157_v7  ;;  %v2239_v31 = vpop.f32.mrb[30].mxu1  ;;  %v2354_v35 = vadd.f32 %v3152_v0, %v1441_v27 }
 0x1cc   : > { %1856 = vst.msk [vmem:[%s3164_s6 + $0xc0] sm:$0xff] %vm397_vm0, %v1824_v28  ;;  %v1827_v32 = vsel %vm1762_vm15, %v2349_v24, %v1795_v18  ;;  %v1444_v30 = vpop.f32.mrb[31].mxu1  ;;  %v2356_v38 = vadd.f32 %v2239_v31, %v3152_v0 }
 0x1cd   : > { %1859 = vst.msk [vmem:[%s3164_s6 + $0xd8] sm:$0xff] %vm397_vm0, %v1827_v32  ;;  %v1825_v34 = vsel %vm1760_vm1, %v2351_v61, %v1793_v29  ;;  %v2282_v37 = vpop.f32.mrb[28].mxu0  ;;  %v2358_v40 = vadd.f32 %v3152_v0, %v1444_v30 }
 0x1ce   : > { %1857 = vst.msk [vmem:[%s3164_s6 + $0xc8] sm:$0xff] %vm397_vm0, %v1825_v34  ;;  %v2353_v39 = vadd.f32 %v2352_v33, %v2282_v37  ;;  %v1687_v62 = vpop.f32.mrb[29].mxu0 }
 0x1cf   : > { %v2355_v41 = vadd.f32 %v2354_v35, %v1687_v62  ;;  %v2283_v43 = vpop.f32.mrb[30].mxu0 }
 0x1d0   : > { %vm1765_vm2 = vcmp.gt.f32.partialorder %v2353_v39, 0.0  ;;  %v1798_v44 = vmul.f32 %v2353_v39, %v3157_v7  ;;  %v2357_v55 = vadd.f32 %v2356_v38, %v2283_v43  ;;  %v1690_v45 = vpop.f32.mrb[31].mxu0 }
 0x1d1   : > { %vm1763_vm3 = vcmp.gt.f32.partialorder %v2355_v41, 0.0  ;;  %v1796_v1 = vmul.f32 %v2355_v41, %v3157_v7  ;;  %v2359_v46 = vadd.f32 %v2358_v40, %v1690_v45 }
 0x1d2   : > { %v1830_v47 = vsel %vm1765_vm2, %v2353_v39, %v1798_v44  ;;  %vm1766_vm4 = vcmp.gt.f32.partialorder %v2357_v55, 0.0  ;;  %v1799_v8 = vmul.f32 %v2357_v55, %v3157_v7 }
 0x1d3   : > { %1862 = vst.msk [vmem:[%s3164_s6 + $0xf0] sm:$0xff] %vm397_vm0, %v1830_v47  ;;  %v1828_v0 = vsel %vm1763_vm3, %v2355_v41, %v1796_v1  ;;  %vm1764_vm5 = vcmp.gt.f32.partialorder %v2359_v46, 0.0  ;;  %v1797_v48 = vmul.f32 %v2359_v46, %v3157_v7 }
 0x1d4   : > { %1860 = vst.msk [vmem:[%s3164_s6 + $0xe0] sm:$0xff] %vm397_vm0, %v1828_v0  ;;  %v1831_v50 = vsel %vm1766_vm4, %v2357_v55, %v1799_v8 }
 0x1d5   : > { %1863 = vst.msk [vmem:[%s3164_s6 + $0xf8] sm:$0xff] %vm397_vm0, %v1831_v50  ;;  %v1829_v51 = vsel %vm1764_vm5, %v2359_v46, %v1797_v48 }
 0x1d6   : > { %1861 = vst.msk [vmem:[%s3164_s6 + $0xe8] sm:$0xff] %vm397_vm0, %v1829_v51 }
 0x1d7 PF: > { %s16_s22 = sadd.s32 1, %s2641_s22   ;;  %s3313_s20 = smov %s2637_s21 }
 0x1d8   : > { %p13_p5 = scmp.ge.s32.totalorder %s16_s22, 4   ;;  %s3314_s21 = smov %s3316_s4 }
 0x1da   :  { %15 = sbr.rel (!%p13_p5) target bundleno = 2 (0x2), region = 76 }

// kernel: feature_extractor.9
= control target key start
LH: loop header
LB: loop body
LE: loop exit
PB: predicated region body
PF: predicated region fallthrough
CT: control target
= control target key end

     0   :  { %s1483_s20 = smov 0   ;;  %s1485_s21 = smov 0   ;;  %s1793_s0 = inlined_call_operand.vmem [shape: f32[2,10,10,64], index: 0, kind: input, shape index: {}, may-alias: {0,1}]   ;;  %s1794_s1 = inlined_call_operand.vmem [shape: f32[2,10,10,64], index: 1, kind: input, shape index: {}, may-alias: {0,1}]   ;;  %s1795_s2 = inlined_call_operand.vmem [shape: bf16[3,192,64], index: 2, kind: input, shape index: {}]   ;;  %s1796_s3 = inlined_call_operand.vmem [shape: f32[1,64], index: 3, kind: input, shape index: {}]   ;;  %s1797_s4 = inlined_call_operand.<no memory space> [shape: f32[1], index: 4, kind: input, shape index: {}]   ;;  %s1798_s5 = inlined_call_operand.vmem [shape: f32[2,8,8,64], index: 5, kind: output, shape index: {}]  }
   0x1   :  { %10 = sst [smem:[#allocation3]] %s1797_s4  ;;  %s1487_s22 = smov 0  }
   0x2 LB: > { %s28_s4 = sadd.s32 1, %s1442_s21  ;;  %p1180_p0 = scmp.ge.s32.totalorder %s1446_s22, 1  ;;  %s1446_s22 = sphi %s1487_s22, %s16_s22   ;;  %s1442_s21 = sphi %s1485_s21, %s1800_s21   ;;  %s1438_s20 = sphi %s1483_s20, %s1799_s20  }
   0x3   : > { %p30_p1 = scmp.ge.s32.totalorder %s28_s4, 2  ;;  %p246_p2 = scmp.lt.s32.totalorder %s1446_s22, 3 }
   0x5   : > { %s1802_s4 = smov (%p30_p1, %s28_s4), 0  ;;  %p247_p3 = pnand %p1180_p0, %p246_p2 }
   0x6   : > { %p306_p4 = scmp.lt.s32.totalorder (!%p247_p3), %s1438_s20, 1  ;;  %vm363_vm0 = vcmask (!%p247_p3), 523264   ;;  %v1388_v0 = vld [vmem:[%s1795_s2] sm:$0xff] (!%p247_p3)   ;;  %v1448_v1 = vmov (!%p247_p3), 0   ;;  %vm365_vm1 = vcmask (!%p247_p3), 517120   ;;  %v1390_v3 = vld [vmem:[%s1795_s2 + $0x8] sm:$0xff] (!%p247_p3)  }
   0x7   : > { %250 = sbr.rel (%p247_p3) target bundleno = 430 (0x1ae), region = 40  ;;  %593 = vmatprep.subr.bf16.mxu1 (!%p247_p3), %v1448_v1  ;;  %783 = vmatprep.subr.bf16.mxu0 (!%p247_p3), %v1448_v1  ;;  %v1389_v2 = vld [vmem:[%s1795_s2 + $0x60] sm:$0xff] (!%p247_p3)   ;;  %v1391_v4 = vld [vmem:[%s1795_s2 + $0x68] sm:$0xff] (!%p247_p3)   ;;  %v1392_v5 = vld [vmem:[%s1795_s2 + $0x10] sm:$0xff] (!%p247_p3)   ;;  %s1449_s27 = smov (!%p247_p3), 64  }
   0x8   : > { %594 = vmatpush1.bf16.msra.mxu1 (!%p247_p3), %v1388_v0  ;;  %784 = vmatpush1.bf16.msra.mxu0 (!%p247_p3), %v1389_v2  ;;  %v1393_v6 = vld [vmem:[%s1795_s2 + $0x70] sm:$0xff] (!%p247_p3)   ;;  %v1394_v27 = vld [vmem:[%s1795_s2 + $0x18] sm:$0xff] (!%p247_p3)   ;;  %v1396_v34 = vld [vmem:[%s1795_s2 + $0x20] sm:$0xff] (!%p247_p3)   ;;  %s1031_s15 = sld [smem:[#allocation3]] (!%p247_p3) }
   0x9   : > { %595 = vmatprep.subr.bf16.mxu1 (!%p247_p3), %v1448_v1  ;;  %785 = vmatprep.subr.bf16.mxu0 (!%p247_p3), %v1448_v1  ;;  %v1395_v29 = vld [vmem:[%s1795_s2 + $0x78] sm:$0xff] (!%p247_p3)   ;;  %v1397_v39 = vld [vmem:[%s1795_s2 + $0x80] sm:$0xff] (!%p247_p3)   ;;  %v1398_v43 = vld [vmem:[%s1795_s2 + $0x28] sm:$0xff] (!%p247_p3)  }
   0xa   : > { %v1399_v44 = vld [vmem:[%s1795_s2 + $0x88] sm:$0xff] (!%p247_p3)   ;;  %v1400_v47 = vld [vmem:[%s1795_s2 + $0x30] sm:$0xff] (!%p247_p3)   ;;  %v1402_v49 = vld [vmem:[%s1795_s2 + $0x38] sm:$0xff] (!%p247_p3)  }
   0xb   : > { %v1401_v48 = vld [vmem:[%s1795_s2 + $0x90] sm:$0xff] (!%p247_p3)   ;;  %v1403_v50 = vld [vmem:[%s1795_s2 + $0x98] sm:$0xff] (!%p247_p3)   ;;  %v1404_v51 = vld [vmem:[%s1795_s2 + $0x40] sm:$0xff] (!%p247_p3)  }
   0xc   : > { %596 = vmatpush1.bf16.msra.mxu1 (!%p247_p3), %v1390_v3  ;;  %786 = vmatpush1.bf16.msra.mxu0 (!%p247_p3), %v1391_v4  ;;  %v1405_v52 = vld [vmem:[%s1795_s2 + $0xa0] sm:$0xff] (!%p247_p3)   ;;  %v1406_v54 = vld [vmem:[%s1795_s2 + $0x48] sm:$0xff] (!%p247_p3)   ;;  %v1408_v60 = vld [vmem:[%s1795_s2 + $0x50] sm:$0xff] (!%p247_p3)  }
   0xd   : > { %597 = vmatprep.subr.bf16.mxu1 (!%p247_p3), %v1448_v1  ;;  %787 = vmatprep.subr.bf16.mxu0 (!%p247_p3), %v1448_v1  ;;  %v1407_v56 = vld [vmem:[%s1795_s2 + $0xa8] sm:$0xff] (!%p247_p3)   ;;  %v1409_v61 = vld [vmem:[%s1795_s2 + $0xb0] sm:$0xff] (!%p247_p3)   ;;  %v1410_v62 = vld [vmem:[%s1795_s2 + $0x58] sm:$0xff] (!%p247_p3)  }
   0xe   : > { %s1804_s20 = smov (!%p306_p4, %s1438_s20), 1  ;;  %v1411_v63 = vld [vmem:[%s1795_s2 + $0xb8] sm:$0xff]  }
   0xf   : > { %s1339_s29 = smul.u32 160, %s1804_s20  ;;  %s1286_s16 = sshll.u32 %s1804_s20, 6 }
  0x10   : > { %598 = vmatpush1.bf16.msra.mxu1 %v1392_v5  ;;  %788 = vmatpush1.bf16.msra.mxu0 %v1393_v6  ;;  %s1762_s19 = scalar_lea.vmem %s1798_s5, %s1286_s16 }
  0x11   : > { %s1526_s11 = scalar_lea.vmem %s1793_s0, %s1339_s29  ;;  %s1285_s12 = sadd.s32 128, %s1339_s29  ;;  %599 = vmatprep.subr.bf16.mxu1 %v1448_v1  ;;  %789 = vmatprep.subr.bf16.mxu0 %v1448_v1 }
  0x12   : > { %v347_v7 = vld [vmem:[%s1526_s11] sm:$0xff]  ;;  %v348_v8 = vld [vmem:[%s1526_s11 + $0x8] sm:$0x3]  ;;  %v349_v9 = vld [vmem:[%s1526_s11 + $0x10] sm:$0xff]  ;;  %s332_s17 = scalar_lea.vmem %s1794_s1, %s1285_s12 }
  0x13   : > { %v350_v10 = vld [vmem:[%s1526_s11 + $0x18] sm:$0x3]  ;;  %364 = vst.msk [vmem:[#allocation2] sm:$0xff] %vm363_vm0, %v347_v7  ;;  %367 = vst.msk [vmem:[#allocation2 + $0x10] sm:$0xff] %vm363_vm0, %v349_v9  ;;  %v353_v11 = vld [vmem:[%s1526_s11 + $0x30] sm:$0xff] }
  0x14   : > { %366 = vst.msk [vmem:[#allocation2 + $0x8] sm:$0x3] %vm365_vm1, %v348_v8  ;;  %v354_v12 = vld [vmem:[%s1526_s11 + $0x38] sm:$0x3]  ;;  %368 = vst.msk [vmem:[#allocation2 + $0x18] sm:$0x3] %vm365_vm1, %v350_v10  ;;  %600 = vmatpush1.bf16.msra.mxu1 %v1394_v27  ;;  %790 = vmatpush1.bf16.msra.mxu0 %v1395_v29 }
  0x15   : > { %v355_v13 = vld [vmem:[%s1526_s11 + $0x40] sm:$0xff]  ;;  %v356_v14 = vld [vmem:[%s1526_s11 + $0x48] sm:$0x3]  ;;  %371 = vst.msk [vmem:[#allocation2 + $0x30] sm:$0xff] %vm363_vm0, %v353_v11  ;;  %v357_v17 = vld [vmem:[%s1526_s11 + $0x50] sm:$0xff]  ;;  %601 = vmatprep.subr.bf16.mxu1 %v1448_v1  ;;  %791 = vmatprep.subr.bf16.mxu0 %v1448_v1 }
  0x16   : > { %372 = vst.msk [vmem:[#allocation2 + $0x38] sm:$0x3] %vm365_vm1, %v354_v12  ;;  %v351_v15 = vld [vmem:[%s1526_s11 + $0x20] sm:$0xff]  ;;  %374 = vst.msk [vmem:[#allocation2 + $0x48] sm:$0x3] %vm365_vm1, %v356_v14  ;;  %v361_v21 = vld [vmem:[%s1526_s11 + $0x70] sm:$0xff] }
  0x17   : > { %373 = vst.msk [vmem:[#allocation2 + $0x40] sm:$0xff] %vm363_vm0, %v355_v13  ;;  %v352_v16 = vld [vmem:[%s1526_s11 + $0x28] sm:$0x3]  ;;  %369 = vst.msk [vmem:[#allocation2 + $0x20] sm:$0xff] %vm363_vm0, %v351_v15  ;;  %v358_v18 = vld [vmem:[%s1526_s11 + $0x58] sm:$0x3] }
  0x18   : > { %370 = vst.msk [vmem:[#allocation2 + $0x28] sm:$0x3] %vm365_vm1, %v352_v16  ;;  %v359_v19 = vld [vmem:[%s1526_s11 + $0x60] sm:$0xff]  ;;  %v360_v20 = vld [vmem:[%s1526_s11 + $0x68] sm:$0x3]  ;;  %v383_v25 = vld [vmem:[%s332_s17 + $0x10] sm:$0xff]  ;;  %602 = vmatpush1.bf16.msra.mxu1 %v1396_v34  ;;  %792 = vmatpush1.bf16.msra.mxu0 %v1397_v39 }
  0x19   : > { %375 = vst.msk [vmem:[#allocation2 + $0x50] sm:$0xff] %vm363_vm0, %v357_v17  ;;  %377 = vst.msk [vmem:[#allocation2 + $0x60] sm:$0xff] %vm363_vm0, %v359_v19  ;;  %v362_v22 = vld [vmem:[%s1526_s11 + $0x78] sm:$0x3]  ;;  %v381_v23 = vld [vmem:[%s332_s17] sm:$0xff]  ;;  %603 = vmatprep.subr.bf16.mxu1 %v1448_v1  ;;  %793 = vmatprep.subr.bf16.mxu0 %v1448_v1 }
  0x1a   : > { %376 = vst.msk [vmem:[#allocation2 + $0x58] sm:$0x3] %vm365_vm1, %v358_v18  ;;  %378 = vst.msk [vmem:[#allocation2 + $0x68] sm:$0x3] %vm365_vm1, %v360_v20  ;;  %v382_v24 = vld [vmem:[%s332_s17 + $0x8] sm:$0x3] }
  0x1b   : > { %379 = vst.msk [vmem:[#allocation2 + $0x70] sm:$0xff] %vm363_vm0, %v361_v21  ;;  %386 = vst.msk [vmem:[#allocation2 + $0x80] sm:$0xff] %vm363_vm0, %v381_v23  ;;  %v384_v26 = vld [vmem:[%s332_s17 + $0x18] sm:$0x3]  ;;  %v400_v28 = vld [vmem:[#allocation2 + $0x1] sm:$0xff] }
  0x1c   : > { %380 = vst.msk [vmem:[#allocation2 + $0x78] sm:$0x3] %vm365_vm1, %v362_v22  ;;  %387 = vst.msk [vmem:[#allocation2 + $0x88] sm:$0x3] %vm365_vm1, %v382_v24  ;;  %v401_v30 = vld [vmem:[#allocation2 + $0x11] sm:$0xff]  ;;  %604 = vmatpush1.bf16.msra.mxu1 %v1398_v43  ;;  %794 = vmatpush1.bf16.msra.mxu0 %v1399_v44  ;;  %v410_v53 = vld [vmem:[#allocation2 + $0x2] sm:$0xff] }
  0x1d   : > { %388 = vst.msk [vmem:[#allocation2 + $0x90] sm:$0xff] %vm363_vm0, %v383_v25  ;;  %v403_v31 = vld [vmem:[#allocation2 + $0x31] sm:$0xff]  ;;  %v1368_v32 = vpack.i.bf16 %v401_v30, %v400_v28  ;;  %605 = vmatprep.subr.bf16.mxu1 %v1448_v1  ;;  %795 = vmatprep.subr.bf16.mxu0 %v1448_v1  ;;  %v390_v3 = vld [vmem:[#allocation2] sm:$0xff]  ;;  %v1413_v23 = vld [vmem:[%s1795_s2 + $0xc8] sm:$0xff]  }
  0x1e   : > { %389 = vst.msk [vmem:[#allocation2 + $0x98] sm:$0x3] %vm365_vm1, %v384_v26  ;;  %v404_v33 = vld [vmem:[#allocation2 + $0x41] sm:$0xff]  ;;  %v411_v55 = vld [vmem:[#allocation2 + $0x12] sm:$0xff] }
  0x1f   : > { %v1373_v35 = vpack.i.bf16 %v404_v33, %v403_v31  ;;  %v402_v36 = vld [vmem:[#allocation2 + $0x21] sm:$0xff]  ;;  %1369 = vrot.lane.b32.xlu0 %v1368_v32, %s1449_s27  ;;  %v478_v57 = vpack.c.bf16 %v411_v55, %v410_v53  ;;  %v391_v2 = vld [vmem:[#allocation2 + $0x10] sm:$0xff] }
  0x20   : > { %606 = vmatpush1.bf16.msra.mxu1 %v1400_v47  ;;  %796 = vmatpush1.bf16.msra.mxu0 %v1401_v48  ;;  %v412_v58 = vld [vmem:[#allocation2 + $0x22] sm:$0xff]  ;;  %v413_v4 = vld [vmem:[#allocation2 + $0x32] sm:$0xff] }
  0x21   : > { %v405_v37 = vld [vmem:[#allocation2 + $0x51] sm:$0xff]  ;;  %v406_v38 = vld [vmem:[#allocation2 + $0x61] sm:$0xff]  ;;  %1374 = vrot.lane.b32.xlu1 %v1373_v35, %s1449_s27  ;;  %607 = vmatprep.subr.bf16.mxu1 %v1448_v1  ;;  %v667_v59 = vpack.c.bf16 %v412_v58, %v411_v55  ;;  %v1653_v13 = vpack.c.bf16 %v413_v4, %v412_v58 }
  0x22   : > { %v1378_v40 = vpack.i.bf16 %v406_v38, %v405_v37  ;;  %797 = vmatprep.subr.bf16.mxu0 %v1448_v1  ;;  %1198 = vmatprep.mubr.msk.bf16.mxu1 %vm363_vm0, %v478_v57  ;;  %v392_v8 = vld [vmem:[#allocation2 + $0x20] sm:$0xff]  ;;  %v393_v20 = vld [vmem:[#allocation2 + $0x30] sm:$0xff]  ;;  %v1415_v38 = vld [vmem:[%s1795_s2 + $0xd8] sm:$0xff]  }
  0x23   : > { %v407_v41 = vld [vmem:[#allocation2 + $0x71] sm:$0xff]  ;;  %v408_v42 = vld [vmem:[#allocation2 + $0x81] sm:$0xff]  ;;  %434 = vrot.lane.b32.xlu0 %v402_v36, %s1449_s27  ;;  %1238 = vmatprep.mubr.msk.bf16.mxu0 %vm363_vm0, %v667_v59 }
  0x24   : > { %v1383_v45 = vpack.i.bf16 %v408_v42, %v407_v41  ;;  %608 = vmatpush1.bf16.msra.mxu1 %v1402_v49  ;;  %798 = vmatpush1.bf16.msra.mxu0 %v1403_v50  ;;  %v414_v9 = vld [vmem:[#allocation2 + $0x42] sm:$0xff]  ;;  %v415_v25 = vld [vmem:[#allocation2 + $0x52] sm:$0xff] }
  0x25   : > { %v409_v46 = vld [vmem:[#allocation2 + $0x91] sm:$0xff]  ;;  %1379 = vrot.lane.b32.xlu1 %v1378_v40, %s1449_s27  ;;  %609 = vmatprep.subr.bf16.mxu1 %v1448_v1  ;;  %v1412_v12 = vld [vmem:[%s1795_s2 + $0xc0] sm:$0xff]   ;;  %v669_v19 = vpack.c.bf16 %v414_v9, %v413_v4  ;;  %v1669_v31 = vpack.c.bf16 %v415_v25, %v414_v9  ;;  %v1417_v53 = vld [vmem:[%s1795_s2 + $0xe8] sm:$0xff]  }
  0x26   : > { %799 = vmatprep.subr.bf16.mxu0 %v1448_v1  ;;  %v394_v22 = vld [vmem:[#allocation2 + $0x40] sm:$0xff]  ;;  %v1414_v29 = vld [vmem:[%s1795_s2 + $0xd0] sm:$0xff]   ;;  %v1419_v59 = vld [vmem:[%s1795_s2 + $0xf8] sm:$0xff]  }
  0x27   : > { %1384 = vrot.lane.b32.xlu0 %v1383_v45, %s1449_s27  ;;  %v416_v28 = vld [vmem:[#allocation2 + $0x62] sm:$0xff]  ;;  %v395_v34 = vld [vmem:[#allocation2 + $0x50] sm:$0xff] }
  0x28   : > { %610 = vmatpush1.bf16.msra.mxu1 %v1404_v51  ;;  %800 = vmatpush1.bf16.msra.mxu0 %v1405_v52  ;;  %v671_v36 = vpack.c.bf16 %v416_v28, %v415_v25  ;;  %v396_v37 = vld [vmem:[#allocation2 + $0x60] sm:$0xff]  ;;  %v417_v41 = vld [vmem:[#allocation2 + $0x72] sm:$0xff] }
  0x29   : > { %448 = vrot.lane.b32.xlu1 %v409_v46, %s1449_s27  ;;  %611 = vmatprep.subr.bf16.mxu1 %v1448_v1  ;;  %v1688_v44 = vld [vmem:[#allocation2 + $0x82] sm:$0xff]  ;;  %v484_v47 = vpack.c.bf16 %v417_v41, %v416_v28  ;;  %v397_v49 = vld [vmem:[#allocation2 + $0x70] sm:$0xff] }
  0x2a   : > { %801 = vmatprep.subr.bf16.mxu0 %v1448_v1  ;;  %v1416_v45 = vld [vmem:[%s1795_s2 + $0xe0] sm:$0xff]   ;;  %v673_v51 = vpack.c.bf16 %v1688_v44, %v417_v41  ;;  %v1418_v57 = vld [vmem:[%s1795_s2 + $0xf0] sm:$0xff]  }
  0x2b   : > { %v398_v52 = vld [vmem:[#allocation2 + $0x80] sm:$0xff] }
  0x2c   : > { %612 = vmatpush1.bf16.msra.mxu1 %v1406_v54  ;;  %802 = vmatpush1.bf16.msra.mxu0 %v1407_v56 }
  0x2d   : > { %613 = vmatprep.subr.bf16.mxu1 %v1448_v1  ;;  %803 = vmatprep.subr.bf16.mxu0 %v1448_v1 }
  0x30   : > { %614 = vmatpush1.bf16.msra.mxu1 %v1408_v60  ;;  %804 = vmatpush1.bf16.msra.mxu0 %v1409_v61  ;;  %v1420_v60 = vld [vmem:[%s1795_s2 + $0x100] sm:$0xff]   ;;  %v1421_v61 = vld [vmem:[%s1795_s2 + $0x108] sm:$0xff]  }
  0x31   : > { %615 = vmatprep.subr.bf16.mxu1 %v1448_v1  ;;  %805 = vmatprep.subr.bf16.mxu0 %v1448_v1 }
  0x34   : > { %616 = vmatpush1.bf16.msra.mxu1 %v1410_v62  ;;  %806 = vmatpush1.bf16.msra.mxu0 %v1411_v63  ;;  %v1422_v62 = vld [vmem:[%s1795_s2 + $0x110] sm:$0xff]   ;;  %v1423_v63 = vld [vmem:[%s1795_s2 + $0x118] sm:$0xff]  }
  0x35   : > { %1287 = vmatprep.subr.bf16.mxu1 %v1448_v1  ;;  %958 = vmatprep.subr.bf16.mxu0 %v1448_v1 }
  0x91   : > { %v1370_v0 = vpop.permute.xlu0 %1369 }
  0x92   : > { %v1372_v5 = vunpack.i.h.bf16 %v1370_v0  ;;  %v1371_v6 = vunpack.i.l.bf16 %v1370_v0  ;;  %v419_v0 = vld [vmem:[#allocation2 + $0x92] sm:$0xff] }
  0x93   : > { %v1375_v7 = vpop.permute.xlu1 %1374 }
  0x94   : > { %v461_v10 = vsel %vm363_vm0, %v391_v2, %v1372_v5  ;;  %v460_v11 = vsel %vm363_vm0, %v390_v3, %v1371_v6  ;;  %v1377_v16 = vunpack.i.h.bf16 %v1375_v7  ;;  %v1376_v17 = vunpack.i.l.bf16 %v1375_v7  ;;  %v399_v3 = vld [vmem:[#allocation2 + $0x90] sm:$0xff] }
  0x95   : > { %v435_v14 = vpop.permute.xlu0 %434  ;;  %v477_v15 = vpack.c.bf16 %v461_v10, %v460_v11  ;;  %v857_v2 = vpack.c.bf16 %v419_v0, %v1688_v44 }
  0x96   : > { %v462_v18 = vsel %vm363_vm0, %v392_v8, %v435_v14  ;;  %v463_v26 = vsel %vm363_vm0, %v393_v20, %v1376_v17  ;;  %v464_v27 = vsel %vm363_vm0, %v394_v22, %v1377_v16  ;;  %v1751_v14 = vld [vmem:[%s1796_s3] ss:$0 sm:$0xff] }
  0x97   : > { %v666_v21 = vpack.c.bf16 %v462_v18, %v461_v10  ;;  %626 = vmatmul.mubr.bf16.vlgmr.msra.gmra.mrb[0].mxu1 %v477_v15  ;;  %v1380_v24 = vpop.permute.xlu1 %1379  ;;  %v1671_v32 = vpack.c.bf16 %v463_v26, %v462_v18  ;;  %v668_v33 = vpack.c.bf16 %v464_v27, %v463_v26 }
  0x98   : > { %1299 = vmatpush1.bf16.msra.mxu1 %v1412_v12  ;;  %1199 = vmatprep.mubr.msk.bf16.mxu1 %vm363_vm0, %v1653_v13  ;;  %v1381_v30 = vunpack.i.l.bf16 %v1380_v24  ;;  %v1382_v35 = vunpack.i.h.bf16 %v1380_v24 }
  0x99   : > { %816 = vmatmul.mubr.bf16.vlgmr.msra.gmra.mrb[0].mxu0 %v666_v21  ;;  %1288 = vmatprep.subr.bf16.mxu1 %v1448_v1  ;;  %v1385_v40 = vpop.permute.xlu0 %1384 }
  0x9a   : > { %959 = vmatpush1.bf16.msra.mxu0 %v1412_v12  ;;  %1239 = vmatprep.mubr.msk.bf16.mxu0 %vm363_vm0, %v669_v19  ;;  %v465_v39 = vsel %vm363_vm0, %v395_v34, %v1381_v30  ;;  %v466_v42 = vsel %vm363_vm0, %v396_v37, %v1382_v35  ;;  %v1386_v46 = vunpack.i.l.bf16 %v1385_v40  ;;  %v1387_v50 = vunpack.i.h.bf16 %v1385_v40 }
  0x9b   : > { %960 = vmatprep.subr.bf16.mxu0 %v1448_v1  ;;  %v1686_v43 = vpack.c.bf16 %v465_v39, %v464_v27  ;;  %v670_v48 = vpack.c.bf16 %v466_v42, %v465_v39  ;;  %v449_v4 = vpop.permute.xlu1 %448  ;;  %v1040_v40 = vstv %s1031_s15 }
  0x9c   : > { %1300 = vmatpush1.bf16.msra.mxu1 %v1413_v23  ;;  %v467_v54 = vsel %vm363_vm0, %v397_v49, %v1386_v46  ;;  %v468_v55 = vsel %vm363_vm0, %v398_v52, %v1387_v50  ;;  %v469_v5 = vsel %vm363_vm0, %v399_v3, %v449_v4 }
  0x9d   : > { %1289 = vmatprep.subr.bf16.mxu1 %v1448_v1  ;;  %v483_v56 = vpack.c.bf16 %v467_v54, %v466_v42  ;;  %v672_v58 = vpack.c.bf16 %v468_v55, %v467_v54  ;;  %v856_v6 = vpack.c.bf16 %v469_v5, %v468_v55 }
  0x9e   : > { %961 = vmatpush1.bf16.msra.mxu0 %v1413_v23 }
  0x9f   : > { %634 = vmatmul.mubr.bf16.gmra.mrb[4].mxu1 %v1671_v32  ;;  %962 = vmatprep.subr.bf16.mxu0 %v1448_v1 }
  0xa0   : > { %1301 = vmatpush1.bf16.msra.mxu1 %v1414_v29  ;;  %1200 = vmatprep.mubr.msk.bf16.mxu1 %vm363_vm0, %v1669_v31 }
  0xa1   : > { %1290 = vmatprep.subr.bf16.mxu1 %v1448_v1  ;;  %824 = vmatmul.mubr.bf16.gmra.mrb[4].mxu0 %v668_v33 }
  0xa2   : > { %963 = vmatpush1.bf16.msra.mxu0 %v1414_v29  ;;  %1240 = vmatprep.mubr.msk.bf16.mxu0 %vm363_vm0, %v671_v36 }
  0xa3   : > { %964 = vmatprep.subr.bf16.mxu0 %v1448_v1 }
  0xa4   : > { %1302 = vmatpush1.bf16.msra.mxu1 %v1415_v38 }
  0xa5   : > { %1291 = vmatprep.subr.bf16.mxu1 %v1448_v1 }
  0xa6   : > { %965 = vmatpush1.bf16.msra.mxu0 %v1415_v38 }
  0xa7   : > { %966 = vmatprep.subr.bf16.mxu0 %v1448_v1  ;;  %642 = vmatmul.mubr.bf16.gmra.mrb[8].mxu1 %v1686_v43 }
  0xa8   : > { %1303 = vmatpush1.bf16.msra.mxu1 %v1416_v45  ;;  %1201 = vmatprep.mubr.msk.bf16.mxu1 %vm363_vm0, %v484_v47 }
  0xa9   : > { %1292 = vmatprep.subr.bf16.mxu1 %v1448_v1  ;;  %832 = vmatmul.mubr.bf16.gmra.mrb[8].mxu0 %v670_v48 }
  0xaa   : > { %967 = vmatpush1.bf16.msra.mxu0 %v1416_v45  ;;  %1241 = vmatprep.mubr.msk.bf16.mxu0 %vm363_vm0, %v673_v51 }
  0xab   : > { %968 = vmatprep.subr.bf16.mxu0 %v1448_v1 }
  0xac   : > { %1304 = vmatpush1.bf16.msra.mxu1 %v1417_v53 }
  0xad   : > { %1293 = vmatprep.subr.bf16.mxu1 %v1448_v1 }
  0xae   : > { %969 = vmatpush1.bf16.msra.mxu0 %v1417_v53 }
  0xaf   : > { %970 = vmatprep.subr.bf16.mxu0 %v1448_v1  ;;  %650 = vmatmul.mubr.bf16.gmra.mrb[12].mxu1 %v483_v56 }
  0xb0   : > { %1305 = vmatpush1.bf16.msra.mxu1 %v1418_v57  ;;  %1280 = vmatprep.mubr.msk.bf16.mxu1 %vm363_vm0, %v484_v47 }
  0xb1   : > { %1294 = vmatprep.subr.bf16.mxu1 %v1448_v1  ;;  %840 = vmatmul.mubr.bf16.gmra.mrb[12].mxu0 %v672_v58 }
  0xb2   : > { %971 = vmatpush1.bf16.msra.mxu0 %v1418_v57  ;;  %1278 = vmatprep.mubr.msk.bf16.mxu0 %vm363_vm0, %v1653_v13 }
  0xb3   : > { %972 = vmatprep.subr.bf16.mxu0 %v1448_v1 }
  0xb4   : > { %1306 = vmatpush1.bf16.msra.mxu1 %v1419_v59 }
  0xb5   : > { %1295 = vmatprep.subr.bf16.mxu1 %v1448_v1 }
  0xb6   : > { %973 = vmatpush1.bf16.msra.mxu0 %v1419_v59 }
  0xb7   : > { %974 = vmatprep.subr.bf16.mxu0 %v1448_v1 }
  0xb8   : > { %1307 = vmatpush1.bf16.msra.mxu1 %v1420_v60 }
  0xb9   : > { %1296 = vmatprep.subr.bf16.mxu1 %v1448_v1 }
  0xba   : > { %975 = vmatpush1.bf16.msra.mxu0 %v1420_v60 }
  0xbb   : > { %976 = vmatprep.subr.bf16.mxu0 %v1448_v1 }
  0xbc   : > { %1308 = vmatpush1.bf16.msra.mxu1 %v1421_v61 }
  0xbd   : > { %1297 = vmatprep.subr.bf16.mxu1 %v1448_v1 }
  0xbe   : > { %977 = vmatpush1.bf16.msra.mxu0 %v1421_v61 }
  0xbf   : > { %978 = vmatprep.subr.bf16.mxu0 %v1448_v1 }
  0xc0   : > { %1309 = vmatpush1.bf16.msra.mxu1 %v1422_v62 }
  0xc1   : > { %1298 = vmatprep.subr.bf16.mxu1 %v1448_v1 }
  0xc2   : > { %979 = vmatpush1.bf16.msra.mxu0 %v1422_v62 }
  0xc3   : > { %980 = vmatprep.subr.bf16.mxu0 %v1448_v1 }
  0xc4   : > { %1310 = vmatpush1.bf16.msra.mxu1 %v1423_v63 }
  0xc6   : > { %981 = vmatpush1.bf16.msra.mxu0 %v1423_v63 }
  0xc7   : > { %1007 = vmatmul.mubr.bf16.vlgmr.msra.gmra.mrb[16].mxu1 %v483_v56 }
  0xc8   : > { %1281 = vmatprep.mubr.msk.bf16.mxu1 %vm363_vm0, %v857_v2 }
  0xc9   : > { %991 = vmatmul.mubr.bf16.vlgmr.msra.gmra.mrb[0].mxu0 %v1671_v32 }
  0xca   : > { %1279 = vmatprep.mubr.msk.bf16.mxu0 %vm363_vm0, %v1669_v31 }
  0xcf   : > { %1015 = vmatmul.mubr.bf16.gmra.mrb[20].mxu1 %v856_v6 }
  0xd1   : > { %999 = vmatmul.mubr.bf16.gmra.mrb[4].mxu0 %v1686_v43 }
 0x16a   : > { %v627_v1 = vpop.f32.mrb[0].mxu1 }
 0x16b   : > { %v629_v7 = vpop.f32.mrb[1].mxu1  ;;  %v658_v41 = vadd.f32 %v1751_v14, %v627_v1 }
 0x16c   : > { %v630_v8 = vpop.f32.mrb[2].mxu1 }
 0x16d   : > { %v632_v9 = vpop.f32.mrb[3].mxu1  ;;  %v659_v51 = vadd.f32 %v1751_v14, %v630_v8 }
 0x172   : > { %v635_v10 = vpop.f32.mrb[4].mxu1 }
 0x173   : > { %v637_v11 = vpop.f32.mrb[5].mxu1  ;;  %v660_v62 = vadd.f32 %v1751_v14, %v635_v10 }
 0x174   : > { %v1746_v12 = vpop.f32.mrb[6].mxu1 }
 0x175   : > { %v640_v13 = vpop.f32.mrb[7].mxu1  ;;  %v661_v9 = vadd.f32 %v1751_v14, %v1746_v12 }
 0x17a   : > { %v643_v15 = vpop.f32.mrb[8].mxu1 }
 0x17b   : > { %v662_v16 = vadd.f32 %v1751_v14, %v643_v15  ;;  %v645_v17 = vpop.f32.mrb[9].mxu1 }
 0x17c   : > { %v646_v18 = vpop.f32.mrb[10].mxu1  ;;  %v833_v19 = vpop.f32.mrb[8].mxu0 }
 0x17d   : > { %v663_v20 = vadd.f32 %v1751_v14, %v646_v18  ;;  %v648_v21 = vpop.f32.mrb[11].mxu1  ;;  %v852_v22 = vadd.f32 %v833_v19, %v662_v16  ;;  %v835_v23 = vpop.f32.mrb[9].mxu0 }
 0x17e   : > { %v836_v24 = vpop.f32.mrb[10].mxu0 }
 0x17f   : > { %v853_v25 = vadd.f32 %v836_v24, %v663_v20  ;;  %v838_v26 = vpop.f32.mrb[11].mxu0 }
 0x182   : > { %v651_v27 = vpop.f32.mrb[12].mxu1 }
 0x183   : > { %v664_v28 = vadd.f32 %v1751_v14, %v651_v27  ;;  %v653_v29 = vpop.f32.mrb[13].mxu1 }
 0x184   : > { %v654_v30 = vpop.f32.mrb[14].mxu1  ;;  %v841_v31 = vpop.f32.mrb[12].mxu0 }
 0x185   : > { %v665_v32 = vadd.f32 %v1751_v14, %v654_v30  ;;  %v656_v33 = vpop.f32.mrb[15].mxu1  ;;  %v854_v34 = vadd.f32 %v841_v31, %v664_v28  ;;  %v843_v35 = vpop.f32.mrb[13].mxu0 }
 0x186   : > { %v844_v36 = vpop.f32.mrb[14].mxu0 }
 0x187   : > { %v855_v37 = vadd.f32 %v844_v36, %v665_v32  ;;  %v846_v38 = vpop.f32.mrb[15].mxu0 }
 0x19a   : > { %v1008_v39 = vpop.f32.mrb[16].mxu1 }
 0x19b   : > { %v1027_v42 = vadd.f32 %v1008_v39, %v852_v22  ;;  %v1010_v43 = vpop.f32.mrb[17].mxu1 }
 0x19c   : > { %v992_v44 = vpop.f32.mrb[0].mxu0  ;;  %v1011_v45 = vpop.f32.mrb[18].mxu1 }
 0x19d   : > { %vm1036_vm2 = vcmp.gt.f32.partialorder %v1027_v42, 0.0  ;;  %v1045_v46 = vmul.f32 %v1040_v40, %v1027_v42  ;;  %v1312_v47 = vadd.f32 %v992_v44, %v658_v41  ;;  %v1028_v48 = vadd.f32 %v1011_v45, %v853_v25  ;;  %v994_v49 = vpop.f32.mrb[1].mxu0  ;;  %v1013_v50 = vpop.f32.mrb[19].mxu1 }
 0x19e   : > { %v995_v52 = vpop.f32.mrb[2].mxu0 }
 0x19f   : > { %v1053_v53 = vsel %vm1036_vm2, %v1027_v42, %v1045_v46  ;;  %vm1032_vm3 = vcmp.gt.f32.partialorder %v1312_v47, 0.0  ;;  %v1041_v54 = vmul.f32 %v1312_v47, %v1040_v40  ;;  %vm1037_vm4 = vcmp.gt.f32.partialorder %v1028_v48, 0.0  ;;  %v997_v55 = vpop.f32.mrb[3].mxu0 }
 0x1a0   : > { %1061 = vst.msk [vmem:[%s1762_s19 + $0x20] sm:$0xff] %vm363_vm0, %v1053_v53  ;;  %v1046_v56 = vmul.f32 %v1040_v40, %v1028_v48  ;;  %v1314_v57 = vadd.f32 %v995_v52, %v659_v51 }
 0x1a1   : > { %v1049_v58 = vsel %vm1032_vm3, %v1312_v47, %v1041_v54 }
 0x1a2   : > { %1057 = vst.msk [vmem:[%s1762_s19] sm:$0xff] %vm363_vm0, %v1049_v58  ;;  %v1054_v59 = vsel %vm1037_vm4, %v1028_v48, %v1046_v56  ;;  %vm1033_vm5 = vcmp.gt.f32.partialorder %v1314_v57, 0.0  ;;  %v1042_v60 = vmul.f32 %v1314_v57, %v1040_v40  ;;  %v1016_v61 = vpop.f32.mrb[20].mxu1 }
 0x1a3   : > { %1062 = vst.msk [vmem:[%s1762_s19 + $0x28] sm:$0xff] %vm363_vm0, %v1054_v59  ;;  %v1029_v63 = vadd.f32 %v1016_v61, %v854_v34  ;;  %v1018_v0 = vpop.f32.mrb[21].mxu1 }
 0x1a4   : > { %v1050_v2 = vsel %vm1033_vm5, %v1314_v57, %v1042_v60  ;;  %v1000_v3 = vpop.f32.mrb[4].mxu0  ;;  %v1019_v4 = vpop.f32.mrb[22].mxu1 }
 0x1a5   : > { %1058 = vst.msk [vmem:[%s1762_s19 + $0x8] sm:$0xff] %vm363_vm0, %v1050_v2  ;;  %vm1038_vm6 = vcmp.gt.f32.partialorder %v1029_v63, 0.0  ;;  %v1047_v5 = vmul.f32 %v1040_v40, %v1029_v63  ;;  %v1316_v6 = vadd.f32 %v1000_v3, %v660_v62  ;;  %v1030_v1 = vadd.f32 %v1019_v4, %v855_v37  ;;  %v1002_v7 = vpop.f32.mrb[5].mxu0  ;;  %v1021_v8 = vpop.f32.mrb[23].mxu1 }
 0x1a6   : > { %v1003_v10 = vpop.f32.mrb[6].mxu0 }
 0x1a7   : > { %v1055_v11 = vsel %vm1038_vm6, %v1029_v63, %v1047_v5  ;;  %vm1034_vm7 = vcmp.gt.f32.partialorder %v1316_v6, 0.0  ;;  %v1043_v13 = vmul.f32 %v1316_v6, %v1040_v40  ;;  %vm1039_vm8 = vcmp.gt.f32.partialorder %v1030_v1, 0.0  ;;  %v1005_v15 = vpop.f32.mrb[7].mxu0 }
 0x1a8   : > { %1063 = vst.msk [vmem:[%s1762_s19 + $0x30] sm:$0xff] %vm363_vm0, %v1055_v11  ;;  %v1048_v16 = vmul.f32 %v1040_v40, %v1030_v1  ;;  %v1318_v17 = vadd.f32 %v1003_v10, %v661_v9 }
 0x1a9   : > { %v1051_v18 = vsel %vm1034_vm7, %v1316_v6, %v1043_v13 }
 0x1aa   : > { %1059 = vst.msk [vmem:[%s1762_s19 + $0x10] sm:$0xff] %vm363_vm0, %v1051_v18  ;;  %v1056_v19 = vsel %vm1039_vm8, %v1030_v1, %v1048_v16  ;;  %vm1035_vm9 = vcmp.gt.f32.partialorder %v1318_v17, 0.0  ;;  %v1044_v20 = vmul.f32 %v1318_v17, %v1040_v40 }
 0x1ab   : > { %1064 = vst.msk [vmem:[%s1762_s19 + $0x38] sm:$0xff] %vm363_vm0, %v1056_v19 }
 0x1ac   : > { %v1052_v12 = vsel %vm1035_vm9, %v1318_v17, %v1044_v20 }
 0x1ad   : > { %1060 = vst.msk [vmem:[%s1762_s19 + $0x18] sm:$0xff] %vm363_vm0, %v1052_v12 }
 0x1ae PF: > { %s16_s22 = sadd.s32 1, %s1446_s22   ;;  %s1799_s20 = smov %s1442_s21 }
 0x1af   : > { %p13_p5 = scmp.ge.s32.totalorder %s16_s22, 4   ;;  %s1800_s21 = smov %s1802_s4 }
 0x1b1   :  { %15 = sbr.rel (!%p13_p5) target bundleno = 2 (0x2), region = 76 }

// kernel: feature_extractor.10
= control target key start
LH: loop header
LB: loop body
LE: loop exit
PB: predicated region body
PF: predicated region fallthrough
CT: control target
= control target key end

     0   :  { %s1356_s20 = smov 0   ;;  %s1358_s21 = smov 0   ;;  %s1604_s0 = inlined_call_operand.vmem [shape: f32[2,10,10,64], index: 0, kind: input, shape index: {}, may-alias: {0,1}]   ;;  %s1605_s1 = inlined_call_operand.vmem [shape: f32[2,10,10,64], index: 1, kind: input, shape index: {}, may-alias: {0,1}]   ;;  %s1606_s2 = inlined_call_operand.vmem [shape: bf16[3,192,96], index: 2, kind: input, shape index: {}]   ;;  %s1607_s3 = inlined_call_operand.vmem [shape: f32[1,96], index: 3, kind: input, shape index: {}]   ;;  %s1608_s4 = inlined_call_operand.<no memory space> [shape: f32[1], index: 4, kind: input, shape index: {}]   ;;  %s1609_s5 = inlined_call_operand.vmem [shape: f32[2,4,4,96], index: 5, kind: output, shape index: {}]  }
   0x1   :  { %10 = sst [smem:[#allocation3]] %s1608_s4  ;;  %s1360_s22 = smov 0  }
   0x2 LB: > { %s28_s4 = sadd.s32 1, %s1315_s21  ;;  %p1114_p0 = scmp.ge.s32.totalorder %s1319_s22, 1  ;;  %s1319_s22 = sphi %s1360_s22, %s16_s22   ;;  %s1315_s21 = sphi %s1358_s21, %s1611_s21   ;;  %s1311_s20 = sphi %s1356_s20, %s1610_s20  }
   0x3   : > { %p30_p1 = scmp.ge.s32.totalorder %s28_s4, 2  ;;  %p246_p2 = scmp.lt.s32.totalorder %s1319_s22, 3 }
   0x5   : > { %s1613_s4 = smov (%p30_p1, %s28_s4), 0  ;;  %p247_p3 = pnand %p1114_p0, %p246_p2 }
   0x6   : > { %p306_p4 = scmp.lt.s32.totalorder (!%p247_p3), %s1311_s20, 1  ;;  %v1261_v0 = vld [vmem:[%s1606_s2 + $0x60] sm:$0xff] (!%p247_p3)   ;;  %v1321_v1 = vmov (!%p247_p3), 0   ;;  %v1262_v2 = vld [vmem:[%s1606_s2 + $0x68] sm:$0xff] (!%p247_p3)   ;;  %vm363_vm0 = vcmask (!%p247_p3), 523264   ;;  %v1263_v3 = vld [vmem:[%s1606_s2 + $0x70] sm:$0xff] (!%p247_p3)  }
   0x7   : > { %250 = sbr.rel (%p247_p3) target bundleno = 422 (0x1a6), region = 40  ;;  %781 = vmatprep.subr.bf16.mxu0 (!%p247_p3), %v1321_v1  ;;  %616 = vmatprep.subr.bf16.mxu1 (!%p247_p3), %v1321_v1  ;;  %v1264_v10 = vld [vmem:[%s1606_s2 + $0x78] sm:$0xff] (!%p247_p3)   ;;  %vm365_vm1 = vcmask (!%p247_p3), 517120   ;;  %v1265_v14 = vld [vmem:[%s1606_s2 + $0x80] sm:$0xff] (!%p247_p3)   ;;  %s1322_s16 = smov (!%p247_p3), 64   ;;  %v1266_v19 = vld [vmem:[%s1606_s2 + $0x88] sm:$0xff] (!%p247_p3)  }
   0x8   : > { %782 = vmatpush1.bf16.msra.mxu0 (!%p247_p3), %v1261_v0  ;;  %v1271_v20 = vld [vmem:[%s1606_s2] sm:$0xff] (!%p247_p3)   ;;  %v1267_v23 = vld [vmem:[%s1606_s2 + $0x90] sm:$0xff] (!%p247_p3)   ;;  %v1273_v24 = vld [vmem:[%s1606_s2 + $0x8] sm:$0xff] (!%p247_p3)   ;;  %s980_s15 = sld [smem:[#allocation3]] (!%p247_p3)  ;;  %vm994_vm3 = vcmask (!%p247_p3), 781312  }
   0x9   : > { %783 = vmatprep.subr.bf16.mxu0 (!%p247_p3), %v1321_v1  ;;  %617 = vmatpush1.bf16.msra.mxu1 (!%p247_p3), %v1271_v20  ;;  %v1268_v27 = vld [vmem:[%s1606_s2 + $0x98] sm:$0xff] (!%p247_p3)   ;;  %v1275_v28 = vld [vmem:[%s1606_s2 + $0x10] sm:$0xff] (!%p247_p3)   ;;  %v1269_v35 = vld [vmem:[%s1606_s2 + $0xa0] sm:$0xff] (!%p247_p3)  }
   0xa   : > { %618 = vmatprep.subr.bf16.mxu1 (!%p247_p3), %v1321_v1  ;;  %v1277_v34 = vld [vmem:[%s1606_s2 + $0x18] sm:$0xff] (!%p247_p3)   ;;  %v1270_v36 = vld [vmem:[%s1606_s2 + $0xa8] sm:$0xff] (!%p247_p3)   ;;  %v1279_v38 = vld [vmem:[%s1606_s2 + $0x20] sm:$0xff] (!%p247_p3)  }
   0xb   : > { %v1281_v44 = vld [vmem:[%s1606_s2 + $0x28] sm:$0xff] (!%p247_p3)   ;;  %v1272_v45 = vld [vmem:[%s1606_s2 + $0xb0] sm:$0xff] (!%p247_p3)   ;;  %v1274_v48 = vld [vmem:[%s1606_s2 + $0xb8] sm:$0xff] (!%p247_p3)  }
   0xc   : > { %784 = vmatpush1.bf16.msra.mxu0 (!%p247_p3), %v1262_v2  ;;  %v1283_v47 = vld [vmem:[%s1606_s2 + $0x30] sm:$0xff] (!%p247_p3)   ;;  %v1285_v49 = vld [vmem:[%s1606_s2 + $0x38] sm:$0xff] (!%p247_p3)   ;;  %v1287_v50 = vld [vmem:[%s1606_s2 + $0x40] sm:$0xff] (!%p247_p3)  }
   0xd   : > { %785 = vmatprep.subr.bf16.mxu0 (!%p247_p3), %v1321_v1  ;;  %619 = vmatpush1.bf16.msra.mxu1 (!%p247_p3), %v1273_v24  ;;  %v1289_v56 = vld [vmem:[%s1606_s2 + $0x48] sm:$0xff] (!%p247_p3)   ;;  %v1291_v57 = vld [vmem:[%s1606_s2 + $0x50] sm:$0xff] (!%p247_p3)  }
   0xe   : > { %s1615_s20 = smov (!%p306_p4, %s1311_s20), 1  ;;  %620 = vmatprep.subr.bf16.mxu1 %v1321_v1 }
   0xf   : > { %s1232_s27 = smul.u32 160, %s1615_s20  ;;  %s1223_s18 = sshll.u32 %s1615_s20, 4 }
  0x10   : > { %786 = vmatpush1.bf16.msra.mxu0 %v1263_v3  ;;  %s344_s24 = scalar_lea.vmem %s1609_s5, %s1223_s18 }
  0x11   : > { %s1389_s30 = scalar_lea.vmem %s1604_s0, %s1232_s27  ;;  %s1222_s6 = sadd.s32 128, %s1232_s27  ;;  %787 = vmatprep.subr.bf16.mxu0 %v1321_v1  ;;  %621 = vmatpush1.bf16.msra.mxu1 %v1275_v28 }
  0x12   : > { %v357_v4 = vld [vmem:[%s1389_s30 + $0x50] sm:$0xff]  ;;  %s1400_s11 = scalar_lea.vmem %s1605_s1, %s1222_s6  ;;  %v351_v8 = vld [vmem:[%s1389_s30 + $0x20] sm:$0xff]  ;;  %v350_v29 = vld [vmem:[%s1389_s30 + $0x18] sm:$0x3]  ;;  %622 = vmatprep.subr.bf16.mxu1 %v1321_v1 }
  0x13   : > { %v349_v5 = vld [vmem:[%s1389_s30 + $0x10] sm:$0xff]  ;;  %375 = vst.msk [vmem:[#allocation2 + $0x50] sm:$0xff] %vm363_vm0, %v357_v4  ;;  %v347_v9 = vld [vmem:[%s1389_s30] sm:$0xff]  ;;  %369 = vst.msk [vmem:[#allocation2 + $0x20] sm:$0xff] %vm363_vm0, %v351_v8 }
  0x14   : > { %v361_v6 = vld [vmem:[%s1389_s30 + $0x70] sm:$0xff]  ;;  %367 = vst.msk [vmem:[#allocation2 + $0x10] sm:$0xff] %vm363_vm0, %v349_v5  ;;  %364 = vst.msk [vmem:[#allocation2] sm:$0xff] %vm363_vm0, %v347_v9  ;;  %v359_v11 = vld [vmem:[%s1389_s30 + $0x60] sm:$0xff]  ;;  %788 = vmatpush1.bf16.msra.mxu0 %v1264_v10 }
  0x15   : > { %379 = vst.msk [vmem:[#allocation2 + $0x70] sm:$0xff] %vm363_vm0, %v361_v6  ;;  %v353_v7 = vld [vmem:[%s1389_s30 + $0x30] sm:$0xff]  ;;  %v355_v12 = vld [vmem:[%s1389_s30 + $0x40] sm:$0xff]  ;;  %377 = vst.msk [vmem:[#allocation2 + $0x60] sm:$0xff] %vm363_vm0, %v359_v11  ;;  %789 = vmatprep.subr.bf16.mxu0 %v1321_v1  ;;  %623 = vmatpush1.bf16.msra.mxu1 %v1277_v34 }
  0x16   : > { %371 = vst.msk [vmem:[#allocation2 + $0x30] sm:$0xff] %vm363_vm0, %v353_v7  ;;  %v381_v13 = vld [vmem:[%s1400_s11] sm:$0xff]  ;;  %373 = vst.msk [vmem:[#allocation2 + $0x40] sm:$0xff] %vm363_vm0, %v355_v12  ;;  %v354_v30 = vld [vmem:[%s1389_s30 + $0x38] sm:$0x3]  ;;  %624 = vmatprep.subr.bf16.mxu1 %v1321_v1 }
  0x17   : > { %386 = vst.msk [vmem:[#allocation2 + $0x80] sm:$0xff] %vm363_vm0, %v381_v13  ;;  %v358_v31 = vld [vmem:[%s1389_s30 + $0x58] sm:$0x3]  ;;  %v348_v51 = vld [vmem:[%s1389_s30 + $0x8] sm:$0x3] }
  0x18   : > { %790 = vmatpush1.bf16.msra.mxu0 %v1265_v14  ;;  %v362_v32 = vld [vmem:[%s1389_s30 + $0x78] sm:$0x3]  ;;  %368 = vst.msk [vmem:[#allocation2 + $0x18] sm:$0x3] %vm365_vm1, %v350_v29  ;;  %372 = vst.msk [vmem:[#allocation2 + $0x38] sm:$0x3] %vm365_vm1, %v354_v30 }
  0x19   : > { %791 = vmatprep.subr.bf16.mxu0 %v1321_v1  ;;  %376 = vst.msk [vmem:[#allocation2 + $0x58] sm:$0x3] %vm365_vm1, %v358_v31  ;;  %380 = vst.msk [vmem:[#allocation2 + $0x78] sm:$0x3] %vm365_vm1, %v362_v32  ;;  %625 = vmatpush1.bf16.msra.mxu1 %v1279_v38  ;;  %v352_v52 = vld [vmem:[%s1389_s30 + $0x28] sm:$0x3] }
  0x1a   : > { %v418_v15 = vld [vmem:[#allocation2 + $0x51] ss:$2 sm:$0xf]  ;;  %v412_v21 = vld [vmem:[#allocation2 + $0x21] ss:$2 sm:$0xf]  ;;  %626 = vmatprep.subr.bf16.mxu1 %v1321_v1 }
  0x1b   : > { %v410_v16 = vld [vmem:[#allocation2 + $0x11] ss:$2 sm:$0xf]  ;;  %462 = vrot.lane.b32.xlu1 %v418_v15, %s1322_s16  ;;  %v408_v22 = vld [vmem:[#allocation2 + $0x1] ss:$2 sm:$0xf] }
  0x1c   : > { %454 = vrot.lane.b32.xlu0 %v410_v16, %s1322_s16  ;;  %v422_v17 = vld [vmem:[#allocation2 + $0x71] ss:$2 sm:$0xf]  ;;  %792 = vmatpush1.bf16.msra.mxu0 %v1266_v19  ;;  %v420_v25 = vld [vmem:[#allocation2 + $0x61] ss:$2 sm:$0xf] }
  0x1d   : > { %v414_v18 = vld [vmem:[#allocation2 + $0x31] ss:$2 sm:$0xf]  ;;  %v416_v26 = vld [vmem:[#allocation2 + $0x41] ss:$2 sm:$0xf]  ;;  %793 = vmatprep.subr.bf16.mxu0 %v1321_v1  ;;  %627 = vmatpush1.bf16.msra.mxu1 %v1281_v44 }
  0x1e   : > { %v424_v33 = vld [vmem:[#allocation2 + $0x81] ss:$2 sm:$0xf]  ;;  %628 = vmatprep.subr.bf16.mxu1 %v1321_v1  ;;  %v356_v53 = vld [vmem:[%s1389_s30 + $0x48] sm:$0x3]  ;;  %v1293_v4 = vld [vmem:[%s1606_s2 + $0x58] sm:$0xff]  }
  0x1f   : > { %466 = vrot.lane.b32.xlu1 %v422_v17, %s1322_s16  ;;  %v428_v37 = vld [vmem:[#allocation2 + $0x12] ss:$2 sm:$0xf]  ;;  %v360_v54 = vld [vmem:[%s1389_s30 + $0x68] sm:$0x3] }
  0x20   : > { %458 = vrot.lane.b32.xlu0 %v414_v18, %s1322_s16  ;;  %794 = vmatpush1.bf16.msra.mxu0 %v1267_v23  ;;  %v432_v39 = vld [vmem:[#allocation2 + $0x32] ss:$2 sm:$0xf]  ;;  %366 = vst.msk [vmem:[#allocation2 + $0x8] sm:$0x3] %vm365_vm1, %v348_v51  ;;  %v1276_v23 = vld [vmem:[%s1606_s2 + $0xc0] sm:$0xff]  }
  0x21   : > { %795 = vmatprep.subr.bf16.mxu0 %v1321_v1  ;;  %v436_v40 = vld [vmem:[#allocation2 + $0x52] ss:$2 sm:$0xf]  ;;  %v1138_v42 = vcombine.low %v428_v37, %v432_v39  ;;  %629 = vmatpush1.bf16.msra.mxu1 %v1283_v47  ;;  %370 = vst.msk [vmem:[#allocation2 + $0x28] sm:$0x3] %vm365_vm1, %v352_v52  ;;  %v1278_v31 = vld [vmem:[%s1606_s2 + $0xc8] sm:$0xff]  }
  0x22   : > { %v440_v41 = vld [vmem:[#allocation2 + $0x72] ss:$2 sm:$0xf]  ;;  %630 = vmatprep.subr.bf16.mxu1 %v1321_v1  ;;  %374 = vst.msk [vmem:[#allocation2 + $0x48] sm:$0x3] %vm365_vm1, %v356_v53 }
  0x23   : > { %456 = vrot.lane.b32.xlu1 %v412_v21, %s1322_s16  ;;  %v1140_v43 = vcombine.low %v436_v40, %v440_v41  ;;  %v382_v55 = vld [vmem:[%s1400_s11 + $0x8] sm:$0x3]  ;;  %378 = vst.msk [vmem:[#allocation2 + $0x68] sm:$0x3] %vm365_vm1, %v360_v54  ;;  %v1280_v38 = vld [vmem:[%s1606_s2 + $0xd0] sm:$0xff]   ;;  %v1282_v40 = vld [vmem:[%s1606_s2 + $0xd8] sm:$0xff]  }
  0x24   : > { %452 = vrot.lane.b32.xlu0 %v408_v22, %s1322_s16  ;;  %796 = vmatpush1.bf16.msra.mxu0 %v1268_v27  ;;  %387 = vst.msk [vmem:[#allocation2 + $0x88] sm:$0x3] %vm365_vm1, %v382_v55  ;;  %v400_v9 = vld [vmem:[#allocation2 + $0x50] ss:$2 sm:$0xf]  ;;  %v1284_v41 = vld [vmem:[%s1606_s2 + $0xe0] sm:$0xff]  }
  0x25   : > { %797 = vmatprep.subr.bf16.mxu0 %v1321_v1  ;;  %v680_v46 = vpack.c.bf16 %v1140_v43, %v1138_v42  ;;  %631 = vmatpush1.bf16.msra.mxu1 %v1285_v49  ;;  %v392_v10 = vld [vmem:[#allocation2 + $0x10] ss:$2 sm:$0xf]  ;;  %v394_v21 = vld [vmem:[#allocation2 + $0x20] ss:$2 sm:$0xf] }
  0x26   : > { %632 = vmatprep.subr.bf16.mxu1 %v1321_v1  ;;  %v404_v11 = vld [vmem:[#allocation2 + $0x70] ss:$2 sm:$0xf]  ;;  %v390_v22 = vld [vmem:[#allocation2] ss:$2 sm:$0xf] }
  0x27   : > { %464 = vrot.lane.b32.xlu1 %v420_v25, %s1322_s16  ;;  %1177 = vmatprep.mubr.msk.bf16.mxu0 %vm363_vm0, %v680_v46  ;;  %v426_v58 = vld [vmem:[#allocation2 + $0x2] ss:$2 sm:$0xf]  ;;  %v396_v12 = vld [vmem:[#allocation2 + $0x30] ss:$2 sm:$0xf] }
  0x28   : > { %460 = vrot.lane.b32.xlu0 %v416_v26, %s1322_s16  ;;  %798 = vmatpush1.bf16.msra.mxu0 %v1269_v35  ;;  %v430_v59 = vld [vmem:[#allocation2 + $0x22] ss:$2 sm:$0xf]  ;;  %v1288_v43 = vld [vmem:[%s1606_s2 + $0xf0] sm:$0xff]   ;;  %v1290_v44 = vld [vmem:[%s1606_s2 + $0xf8] sm:$0xff]  }
  0x29   : > { %799 = vmatprep.subr.bf16.mxu0 %v1321_v1  ;;  %633 = vmatpush1.bf16.msra.mxu1 %v1287_v50  ;;  %v434_v60 = vld [vmem:[#allocation2 + $0x42] ss:$2 sm:$0xf]  ;;  %v1121_v62 = vcombine.low %v426_v58, %v430_v59  ;;  %v1295_v49 = vld [vmem:[%s1606_s2 + $0x110] sm:$0xff]   ;;  %v1296_v51 = vld [vmem:[%s1606_s2 + $0x118] sm:$0xff]  }
  0x2a   : > { %634 = vmatprep.subr.bf16.mxu1 %v1321_v1  ;;  %v438_v61 = vld [vmem:[#allocation2 + $0x62] ss:$2 sm:$0xf]  ;;  %v1179_v2 = vcombine.low %v430_v59, %v434_v60  ;;  %v1119_v59 = vld [vmem:[%s1607_s3] ss:$0 sm:$0xff] }
  0x2b   : > { %v442_v63 = vld [vmem:[#allocation2 + $0x82] ss:$2 sm:$0xf]  ;;  %v1123_v0 = vcombine.low %v434_v60, %v438_v61 }
  0x2c   : > { %468 = vrot.lane.b32.xlu0 %v424_v33, %s1322_s16  ;;  %800 = vmatpush1.bf16.msra.mxu0 %v1270_v36  ;;  %v1181_v3 = vcombine.low %v438_v61, %v442_v63  ;;  %v402_v29 = vld [vmem:[#allocation2 + $0x60] ss:$2 sm:$0xf]  ;;  %v1286_v42 = vld [vmem:[%s1606_s2 + $0xe8] sm:$0xff]  }
  0x2d   : > { %801 = vmatprep.subr.bf16.mxu0 %v1321_v1  ;;  %635 = vmatpush1.bf16.msra.mxu1 %v1289_v56  ;;  %v516_v5 = vpack.c.bf16 %v1123_v0, %v1121_v62  ;;  %v398_v30 = vld [vmem:[#allocation2 + $0x40] ss:$2 sm:$0xf]  ;;  %v1294_v46 = vld [vmem:[%s1606_s2 + $0x108] sm:$0xff]   ;;  %v983_v62 = vstv %s980_s15 }
  0x2e   : > { %636 = vmatprep.subr.bf16.mxu1 %v1321_v1  ;;  %v836_v6 = vpack.c.bf16 %v1181_v3, %v1179_v2  ;;  %v406_v47 = vld [vmem:[#allocation2 + $0x80] ss:$2 sm:$0xf] }
  0x2f   : > { %1136 = vmatprep.mubr.msk.bf16.mxu1 %vm363_vm0, %v516_v5 }
  0x30   : > { %802 = vmatpush1.bf16.msra.mxu0 %v1272_v45  ;;  %v1292_v45 = vld [vmem:[%s1606_s2 + $0x100] sm:$0xff]  }
  0x31   : > { %803 = vmatprep.subr.bf16.mxu0 %v1321_v1  ;;  %637 = vmatpush1.bf16.msra.mxu1 %v1291_v57 }
  0x32   : > { %638 = vmatprep.subr.bf16.mxu1 %v1321_v1 }
  0x34   : > { %804 = vmatpush1.bf16.msra.mxu0 %v1274_v48 }
  0x35   : > { %937 = vmatprep.subr.bf16.mxu0 %v1321_v1  ;;  %639 = vmatpush1.bf16.msra.mxu1 %v1293_v4 }
  0x8d   : > { %v463_v7 = vpop.permute.xlu1 %462 }
  0x8e   : > { %v455_v8 = vpop.permute.xlu0 %454  ;;  %v484_v15 = vsel %vm363_vm0, %v400_v9, %v463_v7 }
  0x8f   : > { %v480_v16 = vsel %vm363_vm0, %v392_v10, %v455_v8 }
  0x91   : > { %v467_v13 = vpop.permute.xlu1 %466 }
  0x92   : > { %v459_v14 = vpop.permute.xlu0 %458  ;;  %v486_v17 = vsel %vm363_vm0, %v404_v11, %v467_v13 }
  0x93   : > { %v482_v18 = vsel %vm363_vm0, %v396_v12, %v459_v14  ;;  %v1139_v19 = vcombine.low %v484_v15, %v486_v17 }
  0x94   : > { %v1137_v20 = vcombine.low %v480_v16, %v482_v18 }
  0x95   : > { %v457_v25 = vpop.permute.xlu1 %456 }
  0x96   : > { %v679_v24 = vpack.c.bf16 %v1139_v19, %v1137_v20  ;;  %v453_v26 = vpop.permute.xlu0 %452  ;;  %v481_v27 = vsel %vm363_vm0, %v394_v21, %v457_v25 }
  0x97   : > { %v479_v28 = vsel %vm363_vm0, %v390_v22, %v453_v26 }
  0x98   : > { %814 = vmatmul.mubr.bf16.vlgmr.msra.gmra.mrb[0].mxu0 %v679_v24  ;;  %v1120_v32 = vcombine.low %v479_v28, %v481_v27 }
  0x99   : > { %938 = vmatpush1.bf16.msra.mxu0 %v1276_v23  ;;  %1218 = vmatprep.mubr.msk.bf16.mxu0 %vm363_vm0, %v836_v6  ;;  %v465_v33 = vpop.permute.xlu1 %464 }
  0x9a   : > { %939 = vmatprep.subr.bf16.mxu0 %v1321_v1  ;;  %v461_v34 = vpop.permute.xlu0 %460  ;;  %v485_v35 = vsel %vm363_vm0, %v402_v29, %v465_v33 }
  0x9b   : > { %v483_v36 = vsel %vm363_vm0, %v398_v30, %v461_v34 }
  0x9c   : > { %v1122_v37 = vcombine.low %v483_v36, %v485_v35  ;;  %v1178_v52 = vcombine.low %v481_v27, %v483_v36 }
  0x9d   : > { %940 = vmatpush1.bf16.msra.mxu0 %v1278_v31 }
  0x9e   : > { %941 = vmatprep.subr.bf16.mxu0 %v1321_v1  ;;  %v515_v39 = vpack.c.bf16 %v1122_v37, %v1120_v32  ;;  %v469_v48 = vpop.permute.xlu0 %468 }
  0x9f   : > { %v487_v50 = vsel %vm363_vm0, %v406_v47, %v469_v48 }
  0xa0   : > { %649 = vmatmul.mubr.bf16.vlgmr.msra.gmra.mrb[0].mxu1 %v515_v39  ;;  %v1180_v53 = vcombine.low %v485_v35, %v487_v50 }
  0xa1   : > { %942 = vmatpush1.bf16.msra.mxu0 %v1280_v38 }
  0xa2   : > { %943 = vmatprep.subr.bf16.mxu0 %v1321_v1  ;;  %v835_v54 = vpack.c.bf16 %v1180_v53, %v1178_v52 }
  0xa5   : > { %944 = vmatpush1.bf16.msra.mxu0 %v1282_v40 }
  0xa6   : > { %945 = vmatprep.subr.bf16.mxu0 %v1321_v1 }
  0xa9   : > { %946 = vmatpush1.bf16.msra.mxu0 %v1284_v41 }
  0xaa   : > { %947 = vmatprep.subr.bf16.mxu0 %v1321_v1 }
  0xad   : > { %948 = vmatpush1.bf16.msra.mxu0 %v1286_v42 }
  0xae   : > { %949 = vmatprep.subr.bf16.mxu0 %v1321_v1 }
  0xb1   : > { %950 = vmatpush1.bf16.msra.mxu0 %v1288_v43 }
  0xb2   : > { %951 = vmatprep.subr.bf16.mxu0 %v1321_v1 }
  0xb5   : > { %952 = vmatpush1.bf16.msra.mxu0 %v1290_v44 }
  0xb6   : > { %953 = vmatprep.subr.bf16.mxu0 %v1321_v1 }
  0xb9   : > { %954 = vmatpush1.bf16.msra.mxu0 %v1292_v45 }
  0xba   : > { %955 = vmatprep.subr.bf16.mxu0 %v1321_v1 }
  0xbd   : > { %956 = vmatpush1.bf16.msra.mxu0 %v1294_v46 }
  0xbe   : > { %957 = vmatprep.subr.bf16.mxu0 %v1321_v1 }
  0xc1   : > { %958 = vmatpush1.bf16.msra.mxu0 %v1295_v49 }
  0xc2   : > { %959 = vmatprep.subr.bf16.mxu0 %v1321_v1 }
  0xc5   : > { %960 = vmatpush1.bf16.msra.mxu0 %v1296_v51 }
  0xc8   : > { %970 = vmatmul.mubr.bf16.vlgmr.msra.gmra.mrb[0].mxu0 %v835_v54 }
 0x173   : > { %v650_v55 = vpop.f32.mrb[0].mxu1 }
 0x174   : > { %v652_v56 = vpop.f32.mrb[1].mxu1  ;;  %v657_v60 = vadd.f32 %v1119_v59, %v650_v55 }
 0x175   : > { %v653_v57 = vpop.f32.mrb[2].mxu1 }
 0x176   : > { %v655_v58 = vpop.f32.mrb[3].mxu1  ;;  %v658_v63 = vadd.f32 %v1119_v59, %v653_v57 }
 0x19b   : > { %v971_v61 = vpop.f32.mrb[0].mxu0 }
 0x19c   : > { %v1225_v0 = vadd.f32 %v971_v61, %v657_v60  ;;  %v973_v2 = vpop.f32.mrb[1].mxu0 }
 0x19d   : > { %v974_v1 = vpop.f32.mrb[2].mxu0 }
 0x19e   : > { %vm981_vm2 = vcmp.gt.f32.partialorder %v1225_v0, 0.0  ;;  %v984_v3 = vmul.f32 %v1225_v0, %v983_v62  ;;  %v1227_v4 = vadd.f32 %v974_v1, %v658_v63  ;;  %v976_v5 = vpop.f32.mrb[3].mxu0 }
 0x1a0   : > { %v986_v6 = vsel %vm981_vm2, %v1225_v0, %v984_v3  ;;  %vm982_vm4 = vcmp.gt.f32.partialorder %v1227_v4, 0.0  ;;  %v985_v7 = vmul.f32 %v1227_v4, %v983_v62 }
 0x1a1   : > { %v990_v8 = vcombine.high %v986_v6, %v986_v6  ;;  %995 = vst.msk [vmem:[%s344_s24] sm:$0xf] %vm994_vm3, %v986_v6 }
 0x1a2   : > { %v987_v9 = vsel %vm982_vm4, %v1227_v4, %v985_v7 }
 0x1a3   : > { %996 = vst.msk [vmem:[%s344_s24 + $0x4] sm:$0xf] %vm994_vm3, %v990_v8  ;;  %v991_v10 = vcombine.high %v987_v9, %v987_v9  ;;  %997 = vst.msk [vmem:[%s344_s24 + $0x8] sm:$0xf] %vm994_vm3, %v987_v9 }
 0x1a5   : > { %998 = vst.msk [vmem:[%s344_s24 + $0xc] sm:$0xf] %vm994_vm3, %v991_v10 }
 0x1a6 PF: > { %s16_s22 = sadd.s32 1, %s1319_s22   ;;  %s1610_s20 = smov %s1315_s21 }
 0x1a7   : > { %p13_p5 = scmp.ge.s32.totalorder %s16_s22, 4   ;;  %s1611_s21 = smov %s1613_s4 }
 0x1a9   :  { %15 = sbr.rel (!%p13_p5) target bundleno = 2 (0x2), region = 102 }

// kernel: feature_extractor.11
= control target key start
LH: loop header
LB: loop body
LE: loop exit
PB: predicated region body
PF: predicated region fallthrough
CT: control target
= control target key end

     0   :  { %s2191_s0 = inlined_call_operand.vmem [shape: f32[2,6,6,96], index: 0, kind: input, shape index: {}, may-alias: {0,1}]   ;;  %s2192_s1 = inlined_call_operand.vmem [shape: f32[2,6,6,96], index: 1, kind: input, shape index: {}, may-alias: {0,1}]   ;;  %s2193_s2 = inlined_call_operand.vmem [shape: bf16[3,288,96], index: 2, kind: input, shape index: {}]   ;;  %s2194_s3 = inlined_call_operand.vmem [shape: f32[1,96], index: 3, kind: input, shape index: {}]   ;;  %s2195_s4 = inlined_call_operand.<no memory space> [shape: f32[1], index: 4, kind: input, shape index: {}]   ;;  %s2196_s5 = inlined_call_operand.hbm [shape: f32[2,4,4,96], index: 5, kind: output, shape index: {}]  }
   0x1   :  { %10 = sst [smem:[#allocation3]] %s2195_s4 }
   0x2   :  { %11 = vsyncpa [#allocation5], 0 }
   0x3   :  { %13 = vsyncpa [#allocation5 + $0x1], 0  ;;  %s1819_s20 = smov 0   ;;  %s1821_s21 = smov 0  }
   0x4   :  { %s1823_s22 = smov 0   ;;  %s1825_s23 = smov 0  }
   0x5   :  { %s1827_s24 = smov 0   ;;  %s1829_s25 = smov 0  }
   0x6 LB: > { %s1312_s4 = sadd.s32 4294967295, %s1778_s25   ;;  %s1313_s26 = sadd.s32 4294967294, %s1778_s25   ;;  %s1778_s25 = sphi %s1829_s25, %s19_s25   ;;  %s1774_s24 = sphi %s1827_s24, %s2203_s24   ;;  %s1770_s23 = sphi %s1825_s23, %s2202_s23   ;;  %s1766_s22 = sphi %s1823_s22, %s2201_s22   ;;  %s1762_s21 = sphi %s1821_s21, %s2200_s21   ;;  %s1758_s20 = sphi %s1819_s20, %s2199_s20  }
   0x7   : > { %s31_s27 = sadd.s32 1, %s1774_s24  ;;  %s163_s28 = sadd.s32 1, %s1766_s22 }
   0x8   : > { %p33_p0 = scmp.ge.s32.totalorder %s31_s27, 2  ;;  %p173_p1 = scmp.ne.s32.totalorder %s1766_s22, %s1762_s21 }
   0x9   : > { %p174_p2 = scmp.eq.s32.totalorder %s1312_s4, 1  ;;  %p179_p3 = scmp.ne.s32.totalorder %s1762_s21, %s1758_s20 }
   0xa   : > { %s2205_s27 = smov (%p33_p0, %s31_s27), 0  ;;  %p180_p5 = scmp.eq.s32.totalorder %s1313_s26, 1 }
   0xb   : > { %p1859_p4 = por %p174_p2, %p173_p1  ;;  %s158_s30 = ssub.s32 %s1774_s24, %s2205_s27 }
   0xc   : > { %p1316_p6 = scmp.ge.s32.totalorder %s1778_s25, 1  ;;  %p161_p7 = scmp.eq.s32.totalorder %s158_s30, 0 }
   0xd   : > { %p1866_p8 = por %p180_p5, %p179_p3  ;;  %p245_p9 = scmp.lt.s32.totalorder %s1778_s25, 3 }
   0xe   : > { %s1872_s7 = scalar_select %p161_p7, %s1766_s22, %s163_s28  }
   0xf   : > { %p246_p10 = pnand %p1316_p6, %p245_p9 }
  0x10   : > { %p297_p11 = scmp.lt.s32.totalorder (!%p246_p10), %s1770_s23, 1  ;;  %v1646_v0 = vld [vmem:[%s2193_s2 + $0x40] sm:$0xff] (!%p246_p10)   ;;  %vm330_vm0 = vcmask (!%p246_p10), 783360   ;;  %v1648_v2 = vld [vmem:[%s2193_s2 + $0x48] sm:$0xff] (!%p246_p10)   ;;  %v1650_v4 = vld [vmem:[%s2193_s2 + $0x50] sm:$0xff] (!%p246_p10)   ;;  %v1780_v14 = vmov (!%p246_p10), 0.0  }
  0x11   : > { %249 = sbr.rel (%p246_p10) target bundleno = 449 (0x1c1), region = 40  ;;  %v1647_v1 = vld [vmem:[%s2193_s2] sm:$0xff] (!%p246_p10)   ;;  %1468 = vmatprep.subr.bf16.mxu0 (!%p246_p10), %v1646_v0  ;;  %v1649_v3 = vld [vmem:[%s2193_s2 + $0x8] sm:$0xff] (!%p246_p10)   ;;  %v1651_v5 = vld [vmem:[%s2193_s2 + $0x10] sm:$0xff] (!%p246_p10)   ;;  %1543 = vmatprep.subr.bf16.mxu1 (!%p246_p10), %v1780_v14  ;;  %vm1781_vm1 = vmmov (!%p246_p10), 0   ;;  %s1782_s9 = smov (!%p246_p10), 64  }
  0x12   : > { %1469 = vmatpush3.bf16.msra.mxu0 (!%p246_p10), %v1647_v1  ;;  %v1652_v12 = vld [vmem:[%s2193_s2 + $0x58] sm:$0xff] (!%p246_p10)   ;;  %v1654_v15 = vld [vmem:[%s2193_s2 + $0x80] sm:$0xff] (!%p246_p10)   ;;  %1547 = vmatprep.mubr.msk.bf16.mxu1 (!%p246_p10), %vm1781_vm1, %v1780_v14  ;;  %v1657_v17 = vld [vmem:[%s2193_s2 + $0x88] sm:$0xff] (!%p246_p10)   ;;  %s1783_s18 = smov (!%p246_p10), 96   ;;  %vm406_vm2 = vcmask (!%p246_p10), 785408   ;;  %vm598_vm3 = vcmask (!%p246_p10), 261120  }
  0x13   : > { %1470 = vmatprep.subr.bf16.mxu0 (!%p246_p10), %v1648_v2  ;;  %v1653_v13 = vld [vmem:[%s2193_s2 + $0x18] sm:$0xff] (!%p246_p10)   ;;  %1544 = vmatpush3.bf16.msra.mxu1 (!%p246_p10), %v1654_v15  ;;  %v1655_v16 = vld [vmem:[%s2193_s2 + $0x60] sm:$0xff] (!%p246_p10)   ;;  %v1658_v23 = vld [vmem:[%s2193_s2 + $0x68] sm:$0xff] (!%p246_p10)   ;;  %vm413_vm4 = vcmask (!%p246_p10), 523264   ;;  %vm1194_vm6 = vcmask (!%p246_p10), 781312   ;;  %s1467_s10 = sshll.u32 (!%p246_p10), %s1770_s23, 8 }
  0x14   : > { %1545 = vmatprep.subr.bf16.mxu1 (!%p246_p10), %v1780_v14  ;;  %v1656_v20 = vld [vmem:[%s2193_s2 + $0x20] sm:$0xff] (!%p246_p10)   ;;  %v1659_v25 = vld [vmem:[%s2193_s2 + $0x28] sm:$0xff] (!%p246_p10)   ;;  %v1660_v27 = vld [vmem:[%s2193_s2 + $0xd0] sm:$0xff] (!%p246_p10)   ;;  %s1784_s17 = smov (!%p246_p10), [#allocation4]  }
  0x15   : > { %v1662_v29 = vld [vmem:[%s2193_s2 + $0x70] sm:$0xff] (!%p246_p10)   ;;  %v1666_v34 = vld [vmem:[%s2193_s2 + $0x78] sm:$0xff] (!%p246_p10)   ;;  %v1670_v38 = vld [vmem:[%s2193_s2 + $0x160] sm:$0xff] (!%p246_p10)  }
  0x16   : > { %1471 = vmatpush3.bf16.msra.mxu0 (!%p246_p10), %v1649_v3  ;;  %v1663_v31 = vld [vmem:[%s2193_s2 + $0x30] sm:$0xff] (!%p246_p10)   ;;  %v1667_v35 = vld [vmem:[%s2193_s2 + $0x38] sm:$0xff] (!%p246_p10)   ;;  %v1668_v59 = vld [vmem:[%s2193_s2 + $0xe0] sm:$0xff] (!%p246_p10)  }
  0x17   : > { %1472 = vmatprep.subr.bf16.mxu0 (!%p246_p10), %v1650_v4  ;;  %1546 = vmatpush3.bf16.msra.mxu1 (!%p246_p10), %v1657_v17  ;;  %v1661_v47 = vld [vmem:[%s2193_s2 + $0x90] sm:$0xff] (!%p246_p10)   ;;  %v1664_v49 = vld [vmem:[%s2193_s2 + $0xd8] sm:$0xff] (!%p246_p10)   ;;  %v1669_v4 = vld [vmem:[%s2193_s2 + $0xa0] sm:$0xff] (!%p246_p10)  }
  0x18   : > { %s298_s12 = scalar_select %p297_p11, %s1770_s23, 1  ;;  %1493 = vmatprep.subr.bf16.mxu1 %v1660_v27  ;;  %v1665_v56 = vld [vmem:[%s2193_s2 + $0x98] sm:$0xff]   ;;  %v1674_v15 = vld [vmem:[%s2193_s2 + $0x168] sm:$0xff]   ;;  %v1677_v27 = vld [vmem:[%s2193_s2 + $0xb0] sm:$0xff]  }
  0x1a   : > { %s1583_s15 = smul.u32 48, %s298_s12  ;;  %1473 = vmatpush3.bf16.msra.mxu0 %v1651_v5 }
  0x1b   : > { %1474 = vmatprep.subr.bf16.mxu0 %v1652_v12  ;;  %v1671_v12 = vld [vmem:[%s2193_s2 + $0x120] sm:$0xff]  }
  0x1c   : > { %s304_s28 = scalar_lea.vmem %s2191_s0, %s1583_s15  ;;  %s1466_s30 = sadd.s32 32, %s1583_s15 }
  0x1d   : > { %v328_v6 = vld [vmem:[%s304_s28 + $0x10] sm:$0x3f]  ;;  %v326_v7 = vld [vmem:[%s304_s28] sm:$0x3f]  ;;  %v329_v8 = vld [vmem:[%s304_s28 + $0x18] sm:$0x3f]  ;;  %s320_s12 = scalar_lea.vmem %s2192_s1, %s1466_s30  ;;  %s2136_s15 = scalar_lea.hbm %s2196_s5, %s1467_s10 }
  0x1e   : > { %333 = vst.msk [vmem:[#allocation2 + $0x10] sm:$0x3f] %vm330_vm0, %v328_v6  ;;  %331 = vst.msk [vmem:[#allocation2] sm:$0x3f] %vm330_vm0, %v326_v7  ;;  %v327_v9 = vld [vmem:[%s304_s28 + $0x8] sm:$0x3f]  ;;  %1475 = vmatpush3.bf16.msra.mxu0 %v1653_v13 }
  0x1f   : > { %334 = vst.msk [vmem:[#allocation2 + $0x18] sm:$0x3f] %vm330_vm0, %v329_v8  ;;  %v335_v10 = vld [vmem:[%s320_s12] sm:$0x3f]  ;;  %v336_v11 = vld [vmem:[%s320_s12 + $0x8] sm:$0x3f]  ;;  %1476 = vmatprep.subr.bf16.mxu0 %v1655_v16 }
  0x20   : > { %332 = vst.msk [vmem:[#allocation2 + $0x8] sm:$0x3f] %vm330_vm0, %v327_v9  ;;  %338 = vst.msk [vmem:[#allocation2 + $0x20] sm:$0x3f] %vm330_vm0, %v335_v10  ;;  %v1672_v7 = vld [vmem:[%s2193_s2 + $0xe8] sm:$0xff]   ;;  %s1180_s28 = sld [smem:[#allocation3]] }
  0x21   : > { %339 = vst.msk [vmem:[#allocation2 + $0x28] sm:$0x3f] %vm330_vm0, %v336_v11  ;;  %s289_s30 = sand.u32 1, %s1762_s21  }
  0x22   : > { %1477 = vmatpush3.bf16.msra.mxu0 %v1656_v20  ;;  %s1317_s8 = sshll.u32 %s289_s30, 4  ;;  %s2143_s23 = scalar_lea.sflag [#allocation5], %s289_s30 }
  0x23   : > { %1478 = vmatprep.subr.bf16.mxu0 %v1658_v23  ;;  %v1675_v23 = vld [vmem:[%s2193_s2 + $0x128] sm:$0xff]   ;;  %s291_s11 = scalar_lea.vmem [#allocation4], %s1317_s8 }
  0x24   : > { %s1215_s12 = sshll.u32 %s291_s11, 4  ;;  %s2140_s12 = int_to_ptr.vmem [resolvable:$true] %s1215_s12 }
  0x25   : > { %v354_v18 = vld [vmem:[#allocation2 + $0x12] sm:$0xf]  ;;  %v352_v19 = vld [vmem:[#allocation2 + $0x2] sm:$0xf]  ;;  %s1700_s16 = scalar_lea.vmem %s2140_s12, 256 }
  0x26   : > { %392 = vrot.lane.b32.xlu1 %v354_v18, %s1782_s9  ;;  %388 = vrot.lane.b32.xlu0 %v352_v19, %s1782_s9  ;;  %v355_v21 = vld [vmem:[#allocation2 + $0x1a] sm:$0xf]  ;;  %v346_v26 = vld [vmem:[#allocation2 + $0x1] sm:$0xf]  ;;  %v348_v30 = vld [vmem:[#allocation2 + $0x11] sm:$0xf]  ;;  %p1701_p12 = scmp.ne.s32.totalorder %s2140_s12, %s1700_s16 }
  0x27   : > { %v353_v22 = vld [vmem:[#allocation2 + $0xa] sm:$0xf]  ;;  %v349_v28 = vld [vmem:[#allocation2 + $0x19] sm:$0xf]  ;;  %1479 = vmatpush3.bf16.msra.mxu0 %v1659_v25  ;;  %v356_v32 = vld [vmem:[#allocation2 + $0x22] sm:$0xf] }
  0x28   : > { %v347_v24 = vld [vmem:[#allocation2 + $0x9] sm:$0xf]  ;;  %1480 = vmatprep.subr.bf16.mxu0 %v1662_v29  ;;  %v350_v33 = vld [vmem:[#allocation2 + $0x21] sm:$0xf]  ;;  %v343_v54 = vld [vmem:[#allocation2 + $0x18] sm:$0xf]  ;;  %p1702_p13 = pnand %p1701_p12, %p1859_p4 }
  0x29   : > { %v357_v36 = vld [vmem:[#allocation2 + $0x2a] sm:$0xf]  ;;  %v340_v46 = vld [vmem:[#allocation2] sm:$0xf]  ;;  %v342_v55 = vld [vmem:[#allocation2 + $0x10] sm:$0xf] }
  0x2a   : > { %394 = vrot.lane.b32.xlu1 %v355_v21, %s1782_s9  ;;  %390 = vrot.lane.b32.xlu0 %v353_v22, %s1782_s9  ;;  %v351_v37 = vld [vmem:[#allocation2 + $0x29] sm:$0xf]  ;;  %v1676_v19 = vld [vmem:[%s2193_s2 + $0xf0] sm:$0xff]   ;;  %p1703_p0 = pneg %p1702_p13 }
  0x2b   : > { %1481 = vmatpush3.bf16.msra.mxu0 %v1663_v31  ;;  %v341_v45 = vld [vmem:[#allocation2 + $0x8] sm:$0xf]  ;;  %v1678_v25 = vld [vmem:[%s2193_s2 + $0x170] sm:$0xff]   ;;  %v1682_v31 = vld [vmem:[%s2193_s2 + $0x178] sm:$0xff]  }
  0x2c   : > { %1482 = vmatprep.subr.bf16.mxu0 %v1666_v34  ;;  %v1673_v18 = vld [vmem:[%s2193_s2 + $0xa8] sm:$0xff]   ;;  %v1683_v34 = vld [vmem:[%s2193_s2 + $0x138] sm:$0xff]  }
  0x2e   : > { %366 = vrot.lane.b32.xlu1 %v347_v24, %s1783_s18  ;;  %364 = vrot.lane.b32.xlu0 %v346_v26, %s1783_s18 }
  0x2f   : > { %1483 = vmatpush3.bf16.msra.mxu0 %v1667_v35  ;;  %v344_v35 = vld [vmem:[#allocation2 + $0x20] sm:$0xf] }
  0x30   : > { %1518 = vmatprep.subr.bf16.mxu0 %v1670_v38  ;;  %v1688_v38 = vld [vmem:[%s2193_s2 + $0x108] sm:$0xff]  }
  0x32   : > { %370 = vrot.lane.b32.xlu1 %v349_v28, %s1783_s18  ;;  %368 = vrot.lane.b32.xlu0 %v348_v30, %s1783_s18  ;;  %v1680_v28 = vld [vmem:[%s2193_s2 + $0xf8] sm:$0xff]   ;;  %v1679_v30 = vld [vmem:[%s2193_s2 + $0x130] sm:$0xff]  }
  0x36   : > { %396 = vrot.lane.b32.xlu1 %v356_v32, %s1782_s9  ;;  %372 = vrot.lane.b32.xlu0 %v350_v33, %s1783_s18  ;;  %v1681_v32 = vld [vmem:[%s2193_s2 + $0xb8] sm:$0xff]   ;;  %v1684_v33 = vld [vmem:[%s2193_s2 + $0x100] sm:$0xff]  }
  0x3a   : > { %398 = vrot.lane.b32.xlu1 %v357_v36, %s1782_s9  ;;  %374 = vrot.lane.b32.xlu0 %v351_v37, %s1783_s18  ;;  %v1686_v36 = vld [vmem:[%s2193_s2 + $0x180] sm:$0xff]   ;;  %s1704_s18 = sshll.u32 %s1784_s17, 4  ;;  %s1705_s18 = int_to_ptr.vmem [resolvable:$false] %s1704_s18 }
  0x3b   : > { %v1685_v37 = vld [vmem:[%s2193_s2 + $0xc0] sm:$0xff]   ;;  %s1706_s19 = scalar_lea.vmem %s1705_s18, 512  ;;  %p1707_p1 = scmp.lt.s32.totalorder %s2140_s12, %s1705_s18 }
  0x3c   : > { %p1708_p2 = scmp.lt.s32.totalorder %s1706_s19, %s1700_s16 }
  0x3e   : > { %p1709_p3 = por %p1708_p2, %p1707_p1 }
  0x40   : > { %p1710_p5 = pnand %p1709_p3, %p1703_p0 }
  0x98   : > { %v1958_v39 = vpop.permute.xlu1 %392  ;;  %v389_v40 = vpop.permute.xlu0 %388 }
  0x9c   : > { %v1960_v41 = vpop.permute.xlu1 %394  ;;  %v1962_v42 = vpop.permute.xlu0 %390 }
  0x9d   : > { %v1966_v43 = vcombine.low %v1958_v39, %v1960_v41  ;;  %v441_v44 = vcombine.low %v389_v40, %v1962_v42 }
  0x9f   : > { %v453_v48 = vpack.c.bf16 %v1966_v43, %v441_v44  ;;  %v1687_v44 = vld [vmem:[%s2193_s2 + $0x140] sm:$0xff]  }
  0xa0   : > { %v367_v50 = vpop.permute.xlu1 %366  ;;  %v365_v51 = vpop.permute.xlu0 %364 }
  0xa1   : > { %v1977_v52 = vsel %vm406_vm2, %v341_v45, %v367_v50  ;;  %v407_v53 = vsel %vm406_vm2, %v340_v46, %v365_v51  ;;  %1548 = vmatmul.mubr.msk.bf16.vlgmr.msra.gmra.mrb[0].mxu1 %vm598_vm3, %v453_v48  ;;  %v415_v57 = vsel %vm413_vm4, %v367_v50, %v1962_v42  ;;  %v414_v58 = vsel %vm413_vm4, %v365_v51, %v389_v40  ;;  %v1690_v45 = vld [vmem:[%s2193_s2 + $0x188] sm:$0xff]   ;;  %v1693_v50 = vld [vmem:[%s2193_s2 + $0x190] sm:$0xff]  }
  0xa2   : > { %1494 = vmatpush3.bf16.msra.mxu1 %v1661_v47  ;;  %v1321_v60 = vcombine.low %v407_v53, %v1977_v52  ;;  %v1322_v5 = vcombine.low %v414_v58, %v415_v57  ;;  %v1689_v46 = vld [vmem:[%s2193_s2 + $0xc8] sm:$0xff]   ;;  %v1692_v51 = vld [vmem:[%s2193_s2 + $0x110] sm:$0xff]  }
  0xa3   : > { %1495 = vmatprep.subr.bf16.mxu1 %v1664_v49  ;;  %v1691_v48 = vld [vmem:[%s2193_s2 + $0x148] sm:$0xff]  }
  0xa4   : > { %v371_v61 = vpop.permute.xlu1 %370  ;;  %v369_v62 = vpop.permute.xlu0 %368 }
  0xa5   : > { %v1992_v63 = vsel %vm406_vm2, %v343_v54, %v371_v61  ;;  %v417_v0 = vsel %vm413_vm4, %v371_v61, %v1960_v41  ;;  %v1997_v1 = vsel %vm406_vm2, %v342_v55, %v369_v62  ;;  %v416_v2 = vsel %vm413_vm4, %v369_v62, %v1958_v39  ;;  %v345_v54 = vld [vmem:[#allocation2 + $0x28] sm:$0xf]  ;;  %v1694_v55 = vld [vmem:[%s2193_s2 + $0x150] sm:$0xff]   ;;  %v1698_v62 = vld [vmem:[%s2193_s2 + $0x1a0] sm:$0xff]  }
  0xa6   : > { %v2003_v3 = vcombine.low %v1997_v1, %v1992_v63  ;;  %1496 = vmatpush3.bf16.msra.mxu1 %v1665_v56  ;;  %v1324_v6 = vcombine.low %v416_v2, %v417_v0  ;;  %v1345_v16 = vcombine.low %v415_v57, %v416_v2  ;;  %v1344_v49 = vcombine.low %v1977_v52, %v1997_v1  ;;  %v1696_v52 = vld [vmem:[%s2193_s2 + $0x198] sm:$0xff]  }
  0xa7   : > { %1497 = vmatprep.subr.bf16.mxu1 %v1668_v59  ;;  %v1695_v57 = vld [vmem:[%s2193_s2 + $0x118] sm:$0xff]  }
  0xa8   : > { %v2011_v8 = vpop.permute.xlu1 %396  ;;  %v373_v9 = vpop.permute.xlu0 %372  ;;  %v452_v10 = vpack.c.bf16 %v1324_v6, %v1322_v5  ;;  %v451_v11 = vpack.c.bf16 %v2003_v3, %v1321_v60  ;;  %v1697_v59 = vld [vmem:[%s2193_s2 + $0x158] sm:$0xff]   ;;  %v691_v60 = vcombine.low %v1962_v42, %v1958_v39  ;;  %v1699_v39 = vld [vmem:[%s2193_s2 + $0x1a8] sm:$0xff]  }
  0xa9   : > { %v418_v13 = vsel %vm413_vm4, %v373_v9, %v2011_v8  ;;  %v411_v40 = vsel %vm406_vm2, %v344_v35, %v373_v9  ;;  %v694_v58 = vcombine.low %v1960_v41, %v2011_v8 }
  0xaa   : > { %v1347_v17 = vcombine.low %v417_v0, %v418_v13  ;;  %1498 = vmatpush3.bf16.msra.mxu1 %v1669_v4  ;;  %634 = vmatprep.mubr.bf16.mxu0 %v452_v10  ;;  %v1346_v47 = vcombine.low %v1992_v63, %v411_v40 }
  0xab   : > { %635 = vmatmul.mubr.bf16.vlgmr.msra.gmra.mrb[0].mxu0 %v451_v11  ;;  %1499 = vmatprep.subr.bf16.mxu1 %v1672_v7  ;;  %v703_v63 = vpack.c.bf16 %v694_v58, %v691_v60  ;;  %v1320_v7 = vld [vmem:[%s2194_s3] ss:$0 sm:$0xff] }
  0xac   : > { %1519 = vmatpush3.bf16.msra.mxu0 %v1671_v12  ;;  %v2028_v20 = vpop.permute.xlu1 %398  ;;  %v375_v21 = vpop.permute.xlu0 %374  ;;  %v702_v22 = vpack.c.bf16 %v1347_v17, %v1345_v16  ;;  %v701_v53 = vpack.c.bf16 %v1346_v47, %v1344_v49 }
  0xad   : > { %v419_v24 = vsel %vm413_vm4, %v375_v21, %v2028_v20  ;;  %1520 = vmatprep.subr.bf16.mxu0 %v1674_v15  ;;  %v412_v56 = vsel %vm406_vm2, %v345_v54, %v375_v21  ;;  %v941_v42 = vcombine.low %v2011_v8, %v2028_v20 }
  0xae   : > { %v1404_v26 = vcombine.low %v418_v13, %v419_v24  ;;  %1500 = vmatpush3.bf16.msra.mxu1 %v1673_v18  ;;  %884 = vmatprep.mubr.bf16.mxu1 %v702_v22  ;;  %v1403_v61 = vcombine.low %v411_v40, %v412_v56 }
  0xaf   : > { %1501 = vmatprep.subr.bf16.mxu1 %v1676_v19  ;;  %v947_v0 = vpack.c.bf16 %v941_v42, %v1966_v43 }
  0xb0   : > { %1521 = vmatpush3.bf16.msra.mxu0 %v1675_v23  ;;  %v946_v29 = vpack.c.bf16 %v1404_v26, %v1324_v6  ;;  %v945_v41 = vpack.c.bf16 %v1403_v61, %v2003_v3  ;;  %v1183_v26 = vstv %s1180_s28 }
  0xb1   : > { %1522 = vmatprep.subr.bf16.mxu0 %v1678_v25 }
  0xb2   : > { %1502 = vmatpush3.bf16.msra.mxu1 %v1677_v27  ;;  %1128 = vmatprep.mubr.bf16.mxu0 %v946_v29 }
  0xb3   : > { %1503 = vmatprep.subr.bf16.mxu1 %v1680_v28 }
  0xb4   : > { %1523 = vmatpush3.bf16.msra.mxu0 %v1679_v30 }
  0xb5   : > { %1524 = vmatprep.subr.bf16.mxu0 %v1682_v31 }
  0xb6   : > { %1504 = vmatpush3.bf16.msra.mxu1 %v1681_v32 }
  0xb7   : > { %1505 = vmatprep.subr.bf16.mxu1 %v1684_v33 }
  0xb8   : > { %1525 = vmatpush3.bf16.msra.mxu0 %v1683_v34 }
  0xb9   : > { %1526 = vmatprep.subr.bf16.mxu0 %v1686_v36 }
  0xba   : > { %1506 = vmatpush3.bf16.msra.mxu1 %v1685_v37 }
  0xbb   : > { %1507 = vmatprep.subr.bf16.mxu1 %v1688_v38 }
  0xbc   : > { %1527 = vmatpush3.bf16.msra.mxu0 %v1687_v44 }
  0xbd   : > { %1528 = vmatprep.subr.bf16.mxu0 %v1690_v45 }
  0xbe   : > { %1508 = vmatpush3.bf16.msra.mxu1 %v1689_v46 }
  0xbf   : > { %1551 = vmatprep.subr.bf16.mxu1 %v1780_v14 }
  0xc0   : > { %1529 = vmatpush3.bf16.msra.mxu0 %v1691_v48 }
  0xc1   : > { %885 = vmatmul.mubr.bf16.vlgmr.msra.gmra.mrb[4].mxu1 %v701_v53  ;;  %1530 = vmatprep.subr.bf16.mxu0 %v1693_v50 }
  0xc2   : > { %1552 = vmatpush3.bf16.msra.mxu1 %v1692_v51  ;;  %1555 = vmatprep.mubr.msk.bf16.mxu1 %vm1781_vm1, %v1780_v14 }
  0xc3   : > { %1553 = vmatprep.subr.bf16.mxu1 %v1780_v14 }
  0xc4   : > { %1531 = vmatpush3.bf16.msra.mxu0 %v1694_v55 }
  0xc5   : > { %1532 = vmatprep.subr.bf16.mxu0 %v1696_v52 }
  0xc6   : > { %1554 = vmatpush3.bf16.msra.mxu1 %v1695_v57 }
  0xc7   : > { %1559 = vmatprep.subr.bf16.mxu1 %v1780_v14 }
  0xc8   : > { %1533 = vmatpush3.bf16.msra.mxu0 %v1697_v59 }
  0xc9   : > { %1556 = vmatmul.mubr.msk.bf16.vlgmr.msra.gmra.mrb[0].mxu1 %vm598_vm3, %v703_v63 }
  0xca   : > { %1560 = vmatpush3.bf16.msra.mxu1 %v1698_v62  ;;  %1563 = vmatprep.mubr.msk.bf16.mxu1 %vm1781_vm1, %v1780_v14 }
  0xcb   : > { %1129 = vmatmul.mubr.bf16.vlgmr.msra.gmra.mrb[4].mxu0 %v945_v41  ;;  %1561 = vmatprep.subr.bf16.mxu1 %v1780_v14 }
  0xce   : > { %1562 = vmatpush3.bf16.msra.mxu1 %v1699_v39 }
  0xd5   : > { %1564 = vmatmul.mubr.msk.bf16.vlgmr.msra.gmra.mrb[0].mxu1 %vm598_vm3, %v947_v0 }
 0x17e   : > { %v1484_v1 = vpop.f32.mrb[0].mxu0 }
 0x17f   : > { %v1485_v2 = vpop.f32.mrb[1].mxu0 }
 0x180   : > { %v1486_v3 = vadd.f32 %v1485_v2, %v1484_v1  ;;  %v1487_v4 = vpop.f32.mrb[2].mxu0 }
 0x181   : > { %v1488_v5 = vpop.f32.mrb[3].mxu0 }
 0x182   : > { %v1489_v6 = vadd.f32 %v1488_v5, %v1487_v4  ;;  %v1567_v10 = vadd.f32 %v1486_v3, %v1320_v7 }
 0x184   : > { %v1571_v43 = vadd.f32 %v1489_v6, %v1320_v7 }
 0x194   : > { %v1509_v9 = vpop.f32.mrb[4].mxu1 }
 0x195   : > { %v1510_v14 = vpop.f32.mrb[5].mxu1 }
 0x196   : > { %v1511_v11 = vadd.f32 %v1510_v14, %v1509_v9  ;;  %v1512_v8 = vpop.f32.mrb[6].mxu1 }
 0x197   : > { %v1513_v12 = vpop.f32.mrb[7].mxu1 }
 0x198   : > { %v1568_v13 = vadd.f32 %v1567_v10, %v1511_v11  ;;  %v1514_v15 = vadd.f32 %v1513_v12, %v1512_v8 }
 0x19a   : > { %v1572_v16 = vadd.f32 %v1571_v43, %v1514_v15 }
 0x19e   : > { %v1534_v17 = vpop.f32.mrb[4].mxu0 }
 0x19f   : > { %v1535_v18 = vpop.f32.mrb[5].mxu0 }
 0x1a0   : > { %v1536_v19 = vadd.f32 %v1535_v18, %v1534_v17  ;;  %v1537_v20 = vpop.f32.mrb[6].mxu0 }
 0x1a1   : > { %v1538_v21 = vpop.f32.mrb[7].mxu0 }
 0x1a2   : > { %v1539_v22 = vadd.f32 %v1538_v21, %v1537_v20  ;;  %v1569_v23 = vadd.f32 %v1568_v13, %v1536_v19 }
 0x1a4   : > { %v1573_v24 = vadd.f32 %v1572_v16, %v1539_v22 }
 0x1a8   : > { %v1171_v25 = vpop.f32.mrb[0].mxu1 }
 0x1a9   : > { %v1570_v27 = vadd.f32 %v1569_v23, %v1171_v25  ;;  %v1565_v28 = vpop.f32.mrb[1].mxu1 }
 0x1aa   : > { %v1174_v29 = vpop.f32.mrb[2].mxu1 }
 0x1ab   : > { %vm1181_vm5 = vcmp.gt.f32.partialorder %v1570_v27, 0.0  ;;  %v1184_v30 = vmul.f32 %v1570_v27, %v1183_v26  ;;  %v1574_v31 = vadd.f32 %v1573_v24, %v1174_v29  ;;  %v1566_v32 = vpop.f32.mrb[3].mxu1 }
 0x1ad   : > { %v1186_v33 = vsel %vm1181_vm5, %v1570_v27, %v1184_v30  ;;  %vm1182_vm7 = vcmp.gt.f32.partialorder %v1574_v31, 0.0  ;;  %v1185_v34 = vmul.f32 %v1574_v31, %v1183_v26 }
 0x1ae   : > { %v1190_v35 = vcombine.high %v1186_v33, %v1186_v33  ;;  %1195 = vst.msk [vmem:[%s291_s11] sm:$0xf] %vm1194_vm6, %v1186_v33 }
 0x1af   : > { %v1187_v36 = vsel %vm1182_vm7, %v1574_v31, %v1185_v34 }
 0x1b0   : > { %1196 = vst.msk [vmem:[%s291_s11 + $0x4] sm:$0xf] %vm1194_vm6, %v1190_v35  ;;  %v1191_v37 = vcombine.high %v1187_v36, %v1187_v36  ;;  %1197 = vst.msk [vmem:[%s291_s11 + $0x8] sm:$0xf] %vm1194_vm6, %v1187_v36 }
 0x1b2   : > { %1198 = vst.msk [vmem:[%s291_s11 + $0xc] sm:$0xf] %vm1194_vm6, %v1191_v37 }
 0x1b3   : > { %1713 = shalt.err (!%p1710_p5)
}
 0x1b4   : > { %s1714_s4 = scalar_lea.hbm %s2136_s15, 256  ;;  %s1718_s30 = scalar_lea.hbm %s2196_s5, 512 }
 0x1b5   : > { %p1715_p6 = scmp.ne.s32.totalorder %s2136_s15, %s1714_s4  ;;  %p1719_p10 = scmp.lt.u32.totalorder %s2136_s15, %s2196_s5 }
 0x1b6   : > { %p1720_p11 = scmp.lt.u32.totalorder %s1718_s30, %s1714_s4  ;;  %p1722_p13 = scmp.lt.u32.totalorder %s1714_s4, %s2136_s15 }
 0x1b7   : > { %p1716_p7 = pnand %p1715_p6, %p1859_p4 }
 0x1b8   : > { %p1721_p12 = por %p1720_p11, %p1719_p10 }
 0x1b9   : > { %p1717_p9 = pneg %p1716_p7 }
 0x1ba   : > { %p1723_p0 = por %p1722_p13, %p1721_p12 }
 0x1bc   : > { %p1724_p1 = pnand %p1723_p0, %p1717_p9 }
 0x1be   : > { %1727 = shalt.err (!%p1724_p1)
}
 0x1bf   : > { %s1785_s11 = smov 4  }
 0x1c0   : > { %1585 = dma.vmem_to_hbm [thread:$0]  (%p1859_p4), %s2140_s12, 256, %s2136_s15, %s2143_s23, %s1782_s9, %s1782_s9, %s1785_s11  }
 0x1c1 PF: > { %p1592_p2 = scmp.ge.s32.totalorder %s1778_s25, 2  ;;  %s1230_s13 = sand.u32 1, %s1758_s20  }
 0x1c2   : > { %s1231_s14 = scalar_lea.sflag [#allocation5], %s1230_s13 }
 0x1c3   : > { %p1588_p3 = pnand %p1592_p2, %p1866_p8 }
 0x1c5   : > { %1753 = dma.done.wait (!%p1588_p3), %s1231_s14, 256  }
 0x1c6   : > { %1755 = vsyncadd (!%p1588_p3), %s1231_s14, 4294967040  ;;  %s19_s25 = sadd.s32 1, %s1778_s25   ;;  %s2199_s20 = smov %s1762_s21 }
 0x1c7   : > { %p16_p5 = scmp.ge.s32.totalorder %s19_s25, 4   ;;  %s2200_s21 = smov %s1766_s22 }
 0x1c8   : > { %s2201_s22 = smov %s1872_s7  ;;  %s2202_s23 = smov %s1774_s24 }
 0x1c9   : > { %s2203_s24 = smov %s2205_s27  ;;  %18 = sbr.rel (!%p16_p5) target bundleno = 6 (0x6), region = 81 }
 0x1d0   :  { %1236 = vsyncpa [#allocation5], 1 }
 0x1d1   :  { %1238 = vsyncpa [#allocation5 + $0x1], 1 }

</bundles_post_ra>
